<compile_context>
chip_gen: v7x
topology: tpu7x:2x2x1
jax: 0.10.0
libtpu: 0.0.40
codegen_flags: <defaults>
</compile_context>

<pallas_src>
import functools

import jax
import jax.numpy as jnp
from jax.experimental import pallas as pl
from jax.experimental.pallas import tpu as pltpu

CHANNELS = 32                 # fixed by the WaveNet module
KERNEL_SIZE = 2
N_BLOCKS = 3
N_LAYERS = 8
FC_HIDDEN = 64
POOL_OUT = 4
DILATIONS = tuple(2 ** i for i in range(N_LAYERS)) * N_BLOCKS
# >= max causal pad ((K-1)*max_dilation = 128); multiple of 128 keeps the
# "current" activation region lane-aligned.
MAX_PAD = 128


def _wavenet_kernel(x_ref, causal_ref, wdil_ref, bdil_ref, w1x1_ref, b1x1_ref,
                    wfin_ref, bfin_ref, wfc1_ref, bfc1_ref, wfc2_ref, bfc2_ref,
                    out_ref, hpad_ref, skip_ref, *, channels, seq_len,
                    dilations, pad_width):
    """One batch element per grid step.

    x_ref    : (1, 1, L+1)   input, left-padded by one zero (causal conv k=2)
    causal_ref: (3, C, 1)    rows: [w_tap0, w_tap1, bias] of the 1->C conv
    wdil_ref : (NL, 2C, 2C)  bf16, per-layer stacked dilated-conv weights
    bdil_ref : (NL, 2C, 1)   f32
    w1x1_ref : (NL, C, C)    bf16
    b1x1_ref : (NL, C, 1)    f32
    wfin_ref : (C, C) bf16 ; bfin_ref : (C, 1) f32
    wfc1_ref : (4, 64, C) f32 ; bfc1_ref : (64, 1) f32
    wfc2_ref : (OUT, 64) f32 ; bfc2_ref : (OUT, 1) f32
    out_ref  : (1, OUT, 1)
    hpad_ref : (C, MAX_PAD + L) f32 scratch, left MAX_PAD region kept zero
    skip_ref : (C, L) f32 scratch (skip-connection accumulator)
    """
    C = channels
    L = seq_len
    P = pad_width
    f32 = jnp.float32
    bf16 = jnp.bfloat16

    # --- zero the causal halo region once per batch element -----------------
    hpad_ref[:, 0:P] = jnp.zeros((C, P), f32)

    # --- initial causal conv: 1 -> C channels, kernel_size=2, dilation=1 ----
    xrow = x_ref[0].astype(f32)                 # (1, L+1)
    x_prev = xrow[:, 0:L]                       # x[t-1] (zero for t=0)
    x_cur = xrow[:, 1:L + 1]                    # x[t]
    h0 = causal_ref[0] * x_prev + causal_ref[1] * x_cur + causal_ref[2]  # (C, L)
    hpad_ref[:, P:P + L] = h0
    skip_ref[...] = jnp.zeros((C, L), f32)

    # --- residual blocks (statically unrolled; activations stay in VMEM) ----
    for layer, d in enumerate(dilations):
        shifted = hpad_ref[:, P - d:P - d + L]  # x[:, t-d] (zeros for t < d)
        current = hpad_ref[:, P:P + L]          # x[:, t]   (lane-aligned)

        # Fused 2-tap dilated conv: one (2C, 2C) x (2C, L) bf16 MXU matmul
        # with f32 accumulation.
        stacked = jnp.concatenate([shifted, current], axis=0).astype(bf16)
        z = jnp.dot(wdil_ref[layer], stacked,
                    preferred_element_type=f32) + bdil_ref[layer]    # (2C, L)

        # Gated activation (f32 elementwise / EUP).
        gated = jnp.tanh(z[:C, :]) * jax.nn.sigmoid(z[C:, :])        # (C, L)

        # 1x1 conv (channel mixing).
        y = jnp.dot(w1x1_ref[layer], gated.astype(bf16),
                    preferred_element_type=f32) + b1x1_ref[layer]    # (C, L)

        # TODO(synk): nn.Dropout is stochastic in train mode; identity here.
        skip_ref[...] = skip_ref[...] + y
        hpad_ref[:, P:P + L] = current + y      # residual connection

    # --- head: relu -> final 1x1 conv -> relu -> adaptive max pool(4) -> FC -
    s = jnp.maximum(skip_ref[...], 0.0)                              # (C, L)
    f = jnp.dot(wfin_ref[...], s.astype(bf16),
                preferred_element_type=f32) + bfin_ref[...]
    f = jnp.maximum(f, 0.0)                                          # (C, L)

    # AdaptiveMaxPool1d(4) + flatten + fc1, fused: out1 += W1[:, c*4+j]*pool[c,j]
    out1 = bfc1_ref[...]                                             # (64, 1)
    for j in range(POOL_OUT):
        start = (j * L) // POOL_OUT
        end = -(-((j + 1) * L) // POOL_OUT)
        col = jnp.max(f[:, start:end], axis=1, keepdims=True)        # (C, 1)
        out1 = out1 + jnp.dot(wfc1_ref[j], col, preferred_element_type=f32)
    out1 = jnp.maximum(out1, 0.0)
    # TODO(synk): fc dropout is identity (eval mode).
    out2 = jnp.dot(wfc2_ref[...], out1,
                   preferred_element_type=f32) + bfc2_ref[...]       # (OUT, 1)
    out_ref[0] = out2.astype(out_ref.dtype)


def _pack_params(params):
    """Pre-pack weights in final dtype / layout (done once in glue)."""
    C = CHANNELS
    bf16, f32 = jnp.bfloat16, jnp.float32
    causal = jnp.stack(
        [params["cw"][:, 0, 0], params["cw"][:, 0, 1], params["cb"]],
        axis=0)[:, :, None].astype(f32)                               # (3, C, 1)
    # Stack the two conv taps along the contraction dim: (NL, 2C, 2C).
    w_dil = jnp.concatenate(
        [params["wd"][..., 0], params["wd"][..., 1]], axis=-1).astype(bf16)
    b_dil = params["bd"][:, :, None].astype(f32)                      # (NL, 2C, 1)
    w_1x1 = params["w1"][..., 0].astype(bf16)                         # (NL, C, C)
    b_1x1 = params["b1"][:, :, None].astype(f32)                      # (NL, C, 1)
    w_fin = params["wf"][..., 0].astype(bf16)                         # (C, C)
    b_fin = params["bf"][:, None].astype(f32)                         # (C, 1)
    # fc1 weight reshaped so w_fc1[j, o, c] == W1[o, c*4 + j] (matches flatten).
    w_fc1 = params["fc1_w"].reshape(FC_HIDDEN, C, POOL_OUT)\
        .transpose(2, 0, 1).astype(f32)                               # (4, 64, C)
    b_fc1 = params["fc1_b"][:, None].astype(f32)                      # (64, 1)
    w_fc2 = params["fc2_w"].astype(f32)                               # (OUT, 64)
    b_fc2 = params["fc2_b"][:, None].astype(f32)                      # (OUT, 1)
    return (causal, w_dil, b_dil, w_1x1, b_1x1, w_fin, b_fin,
            w_fc1, b_fc1, w_fc2, b_fc2)


def wavenet_forward(x, params):
    """x: (B, L) float32  ->  logits (B, output_dim) float32."""
    B, L = x.shape
    C = CHANNELS
    NL = len(DILATIONS)
    out_dim = params["fc2_w"].shape[0]

    x_pad = jnp.pad(x.astype(jnp.float32), ((0, 0), (1, 0)))[:, None, :]
    packed = _pack_params(params)

    kernel = functools.partial(
        _wavenet_kernel, channels=C, seq_len=L, dilations=DILATIONS,
        pad_width=MAX_PAD)

    in_specs = [
        pl.BlockSpec((1, 1, L + 1), lambda b: (b, 0, 0)),              # x
        pl.BlockSpec((3, C, 1), lambda b: (0, 0, 0)),                  # causal conv
        pl.BlockSpec((NL, 2 * C, 2 * C), lambda b: (0, 0, 0)),         # dilated W
        pl.BlockSpec((NL, 2 * C, 1), lambda b: (0, 0, 0)),             # dilated b
        pl.BlockSpec((NL, C, C), lambda b: (0, 0, 0)),                 # 1x1 W
        pl.BlockSpec((NL, C, 1), lambda b: (0, 0, 0)),                 # 1x1 b
        pl.BlockSpec((C, C), lambda b: (0, 0)),                        # final W
        pl.BlockSpec((C, 1), lambda b: (0, 0)),                        # final b
        pl.BlockSpec((POOL_OUT, FC_HIDDEN, C), lambda b: (0, 0, 0)),   # fc1 W
        pl.BlockSpec((FC_HIDDEN, 1), lambda b: (0, 0)),                # fc1 b
        pl.BlockSpec((out_dim, FC_HIDDEN), lambda b: (0, 0)),          # fc2 W
        pl.BlockSpec((out_dim, 1), lambda b: (0, 0)),                  # fc2 b
    ]

    out = pl.pallas_call(
        kernel,
        out_shape=jax.ShapeDtypeStruct((B, out_dim, 1), jnp.float32),
        grid_spec=pltpu.PrefetchScalarGridSpec(
            num_scalar_prefetch=0,
            grid=(B,),
            in_specs=in_specs,
            out_specs=pl.BlockSpec((1, out_dim, 1), lambda b: (b, 0, 0)),
            scratch_shapes=[
                pltpu.VMEM((C, MAX_PAD + L), jnp.float32),  # padded activation
                pltpu.VMEM((C, L), jnp.float32),            # skip-sum accum
            ]),
        compiler_params=pltpu.CompilerParams(
            dimension_semantics=("parallel",),
            vmem_limit_bytes=48 * 1024 * 1024),
    )(x_pad, *packed)
    return out[:, :, 0]


def _reference(x, params):
    """Pure-JAX reference (same bf16-operand / f32-accumulate matmul policy)."""
    f32, bf16 = jnp.float32, jnp.bfloat16
    B, L = x.shape
    C = CHANNELS

    def mm(w, a):  # w: (O, Cin), a: (B, Cin, L)
        return jnp.einsum("oc,bcl->bol", w.astype(bf16), a.astype(bf16),
                          preferred_element_type=f32)

    xp = jnp.pad(x.astype(f32), ((0, 0), (1, 0)))                  # (B, L+1)
    w_prev = params["cw"][:, 0, 0][None, :, None]
    w_cur = params["cw"][:, 0, 1][None, :, None]
    h = w_prev * xp[:, None, :L] + w_cur * xp[:, None, 1:] \
        + params["cb"][None, :, None]                              # (B, C, L)

    skip_sum = jnp.zeros((B, C, L), f32)
    for l, d in enumerate(DILATIONS):
        wd, bd = params["wd"][l], params["bd"][l]
        w1, b1 = params["w1"][l], params["b1"][l]
        hp = jnp.pad(h, ((0, 0), (0, 0), (d, 0)))
        z = (mm(wd[:, :, 0], hp[:, :, :L]) + mm(wd[:, :, 1], hp[:, :, d:d + L])
             + bd[None, :, None])
        g = jnp.tanh(z[:, :C]) * jax.nn.sigmoid(z[:, C:])
        y = mm(w1[:, :, 0], g) + b1[None, :, None]
        skip_sum = skip_sum + y
        h = h + y

    s = jnp.maximum(skip_sum, 0.0)
    f = jnp.maximum(mm(params["wf"][:, :, 0], s)
                    + params["bf"][None, :, None], 0.0)
    cols = []
    for j in range(POOL_OUT):
        a = (j * L) // POOL_OUT
        b = -(-((j + 1) * L) // POOL_OUT)
        cols.append(jnp.max(f[:, :, a:b], axis=-1))
    pooled = jnp.stack(cols, axis=-1)                              # (B, C, 4)
    flat = pooled.reshape(B, C * POOL_OUT)
    o1 = jnp.maximum(flat @ params["fc1_w"].T + params["fc1_b"], 0.0)
    return o1 @ params["fc2_w"].T + params["fc2_b"]


if __name__ == "__main__":
    B, L, OUT = 2, 64, 8
    C, K, NL = CHANNELS, KERNEL_SIZE, len(DILATIONS)

    key = jax.random.PRNGKey(0)
    ks = jax.random.split(key, 13)
    u = lambda k, shape, bound: jax.random.uniform(
        k, shape, jnp.float32, -bound, bound)

    params = {
        "cw": u(ks[0], (C, 1, K), (1.0 / (1 * K)) ** 0.5),
        "cb": u(ks[1], (C,), (1.0 / (1 * K)) ** 0.5),
        "wd": u(ks[2], (NL, 2 * C, C, K), (1.0 / (C * K)) ** 0.5),
        "bd": u(ks[3], (NL, 2 * C), (1.0 / (C * K)) ** 0.5),
        "w1": u(ks[4], (NL, C, C, 1), (1.0 / C) ** 0.5),
        "b1": u(ks[5], (NL, C), (1.0 / C) ** 0.5),
        "wf": u(ks[6], (C, C, 1), (1.0 / C) ** 0.5),
        "bf": u(ks[7], (C,), (1.0 / C) ** 0.5),
        "fc1_w": u(ks[8], (FC_HIDDEN, POOL_OUT * C), (1.0 / (POOL_OUT * C)) ** 0.5),
        "fc1_b": u(ks[9], (FC_HIDDEN,), (1.0 / (POOL_OUT * C)) ** 0.5),
        "fc2_w": u(ks[10], (OUT, FC_HIDDEN), (1.0 / FC_HIDDEN) ** 0.5),
        "fc2_b": u(ks[11], (OUT,), (1.0 / FC_HIDDEN) ** 0.5),
    }
    x = jax.random.normal(ks[12], (B, L), dtype=jnp.float32)

    out = wavenet_forward(x, params)
    jax.block_until_ready(out)

    ref = _reference(x, params)
    assert out.shape == (B, OUT)
    max_err = float(jnp.max(jnp.abs(out - ref)))
    assert jnp.allclose(out, ref, atol=3e-2, rtol=3e-2), max_err

    print("KERNEL_OK")
</pallas_src>

<mosaic_0001>
module attributes {stable_mosaic.version = 11 : i64} {
  func.func @_wavenet_kernel(%arg0: i32, %arg1: memref<1x1x65xf32, #tpu.memory_space<vmem>>, %arg2: memref<3x32x1xf32, #tpu.memory_space<vmem>>, %arg3: memref<24x64x64xbf16, #tpu.memory_space<vmem>>, %arg4: memref<24x64x1xf32, #tpu.memory_space<vmem>>, %arg5: memref<24x32x32xbf16, #tpu.memory_space<vmem>>, %arg6: memref<24x32x1xf32, #tpu.memory_space<vmem>>, %arg7: memref<32x32xbf16, #tpu.memory_space<vmem>>, %arg8: memref<32x1xf32, #tpu.memory_space<vmem>>, %arg9: memref<4x64x32xf32, #tpu.memory_space<vmem>>, %arg10: memref<64x1xf32, #tpu.memory_space<vmem>>, %arg11: memref<8x64xf32, #tpu.memory_space<vmem>>, %arg12: memref<8x1xf32, #tpu.memory_space<vmem>>, %arg13: memref<1x8x1xf32, #tpu.memory_space<vmem>>, %arg14: memref<32x192xf32, #tpu.memory_space<vmem>>, %arg15: memref<32x64xf32, #tpu.memory_space<vmem>>) attributes {dimension_semantics = [#tpu.dimension_semantics<parallel>], iteration_bounds = array<i64: 2>, scalar_prefetch = 0 : i64, scratch_operands = 2 : i64, tpu.core_type = #tpu.core_type<tc>, window_params = [{transform_indices = @transform_0, window_bounds = array<i64: 1, 1, 65>}, {pipeline_mode = #tpu.pipeline_mode<synchronous>, transform_indices = @transform_1, window_bounds = array<i64: 3, 32, 1>}, {pipeline_mode = #tpu.pipeline_mode<synchronous>, transform_indices = @transform_2, window_bounds = array<i64: 24, 64, 64>}, {pipeline_mode = #tpu.pipeline_mode<synchronous>, transform_indices = @transform_3, window_bounds = array<i64: 24, 64, 1>}, {pipeline_mode = #tpu.pipeline_mode<synchronous>, transform_indices = @transform_4, window_bounds = array<i64: 24, 32, 32>}, {pipeline_mode = #tpu.pipeline_mode<synchronous>, transform_indices = @transform_5, window_bounds = array<i64: 24, 32, 1>}, {pipeline_mode = #tpu.pipeline_mode<synchronous>, transform_indices = @transform_6, window_bounds = array<i64: 32, 32>}, {pipeline_mode = #tpu.pipeline_mode<synchronous>, transform_indices = @transform_7, window_bounds = array<i64: 32, 1>}, {pipeline_mode = #tpu.pipeline_mode<synchronous>, transform_indices = @transform_8, window_bounds = array<i64: 4, 64, 32>}, {pipeline_mode = #tpu.pipeline_mode<synchronous>, transform_indices = @transform_9, window_bounds = array<i64: 64, 1>}, {pipeline_mode = #tpu.pipeline_mode<synchronous>, transform_indices = @transform_10, window_bounds = array<i64: 8, 64>}, {pipeline_mode = #tpu.pipeline_mode<synchronous>, transform_indices = @transform_11, window_bounds = array<i64: 8, 1>}, {transform_indices = @transform_12, window_bounds = array<i64: 1, 8, 1>}]} {
    %cst = arith.constant 0.000000e+00 : f32
    %0 = vector.broadcast %cst : f32 to vector<32x128xf32>
    %c0 = arith.constant 0 : index
    %c0_0 = arith.constant 0 : index
    %1 = vector.load %arg14[%c0, %c0_0] : memref<32x192xf32, #tpu.memory_space<vmem>>, vector<32x128xf32>
    tpu.vector_store %arg14[%c0, %c0_0], %0 {strides = array<i32>} : memref<32x192xf32, #tpu.memory_space<vmem>>, vector<32x128xf32>,
    %c0_1 = arith.constant 0 : index
    %c0_2 = arith.constant 0 : index
    %c0_3 = arith.constant 0 : index
    %2 = vector.load %arg1[%c0_1, %c0_2, %c0_3] : memref<1x1x65xf32, #tpu.memory_space<vmem>>, vector<1x1x65xf32>
    %3 = vector.shape_cast %2 : vector<1x1x65xf32> to vector<1x65xf32>
    %4 = vector.extract_strided_slice %3 {offsets = [0, 0], sizes = [1, 64], strides = [1, 1]} : vector<1x65xf32> to vector<1x64xf32>
    %5 = vector.extract_strided_slice %3 {offsets = [0, 1], sizes = [1, 64], strides = [1, 1]} : vector<1x65xf32> to vector<1x64xf32>
    %c0_4 = arith.constant 0 : index
    %c0_5 = arith.constant 0 : index
    %c0_6 = arith.constant 0 : index
    %6 = vector.load %arg2[%c0_4, %c0_5, %c0_6] : memref<3x32x1xf32, #tpu.memory_space<vmem>>, vector<1x32x1xf32>
    %7 = vector.shape_cast %6 : vector<1x32x1xf32> to vector<32x1xf32>
    %8 = vector.broadcast %7 : vector<32x1xf32> to vector<32x64xf32>
    %9 = vector.broadcast %4 : vector<1x64xf32> to vector<32x64xf32>
    %10 = arith.mulf %8, %9 : vector<32x64xf32>
    %c1 = arith.constant 1 : index
    %c0_7 = arith.constant 0 : index
    %c0_8 = arith.constant 0 : index
    %11 = vector.load %arg2[%c1, %c0_7, %c0_8] : memref<3x32x1xf32, #tpu.memory_space<vmem>>, vector<1x32x1xf32>
    %12 = vector.shape_cast %11 : vector<1x32x1xf32> to vector<32x1xf32>
    %13 = vector.broadcast %12 : vector<32x1xf32> to vector<32x64xf32>
    %14 = vector.broadcast %5 : vector<1x64xf32> to vector<32x64xf32>
    %15 = arith.mulf %13, %14 : vector<32x64xf32>
    %16 = arith.addf %10, %15 : vector<32x64xf32>
    %c2 = arith.constant 2 : index
    %c0_9 = arith.constant 0 : index
    %c0_10 = arith.constant 0 : index
    %17 = vector.load %arg2[%c2, %c0_9, %c0_10] : memref<3x32x1xf32, #tpu.memory_space<vmem>>, vector<1x32x1xf32>
    %18 = vector.shape_cast %17 : vector<1x32x1xf32> to vector<32x1xf32>
    %19 = vector.broadcast %18 : vector<32x1xf32> to vector<32x64xf32>
    %20 = arith.addf %16, %19 : vector<32x64xf32>
    %c0_11 = arith.constant 0 : index
    %c128 = arith.constant 128 : index
    %21 = vector.load %arg14[%c0_11, %c128] : memref<32x192xf32, #tpu.memory_space<vmem>>, vector<32x64xf32>
    tpu.vector_store %arg14[%c0_11, %c128], %20 {strides = array<i32>} : memref<32x192xf32, #tpu.memory_space<vmem>>, vector<32x64xf32>,
    %cst_12 = arith.constant 0.000000e+00 : f32
    %22 = vector.broadcast %cst_12 : f32 to vector<32x64xf32>
    %c0_13 = arith.constant 0 : index
    %c0_14 = arith.constant 0 : index
    %23 = vector.load %arg15[%c0_13, %c0_14] : memref<32x64xf32, #tpu.memory_space<vmem>>, vector<32x64xf32>
    tpu.vector_store %arg15[%c0_13, %c0_14], %22 {strides = array<i32>} : memref<32x64xf32, #tpu.memory_space<vmem>>, vector<32x64xf32>,
    %c0_15 = arith.constant 0 : index
    %c127 = arith.constant 127 : index
    %24 = vector.load %arg14[%c0_15, %c127] : memref<32x192xf32, #tpu.memory_space<vmem>>, vector<32x64xf32>
    %c0_16 = arith.constant 0 : index
    %c128_17 = arith.constant 128 : index
    %25 = vector.load %arg14[%c0_16, %c128_17] : memref<32x192xf32, #tpu.memory_space<vmem>>, vector<32x64xf32>
    %26 = tpu.concatenate %24, %25 in 0 : vector<32x64xf32>, vector<32x64xf32> -> vector<64x64xf32>
    %27 = arith.truncf %26 : vector<64x64xf32> to vector<64x64xbf16>
    %c0_18 = arith.constant 0 : index
    %c0_19 = arith.constant 0 : index
    %c0_20 = arith.constant 0 : index
    %28 = vector.load %arg3[%c0_18, %c0_19, %c0_20] : memref<24x64x64xbf16, #tpu.memory_space<vmem>>, vector<1x64x64xbf16>
    %29 = vector.shape_cast %28 : vector<1x64x64xbf16> to vector<64x64xbf16>
    %cst_21 = arith.constant dense<0.000000e+00> : vector<64x64xf32>
    %30 = tpu.matmul %29, %27, %cst_21 {dimension_numbers = #tpu.dot_dimension_numbers<[1], [0], [0], [1], [0, 0, 1, 1], [], []>} : vector<64x64xbf16>, vector<64x64xbf16>, vector<64x64xf32> -> vector<64x64xf32>
    %c0_22 = arith.constant 0 : index
    %c0_23 = arith.constant 0 : index
    %c0_24 = arith.constant 0 : index
    %31 = vector.load %arg4[%c0_22, %c0_23, %c0_24] : memref<24x64x1xf32, #tpu.memory_space<vmem>>, vector<1x64x1xf32>
    %32 = vector.shape_cast %31 : vector<1x64x1xf32> to vector<64x1xf32>
    %33 = vector.broadcast %32 : vector<64x1xf32> to vector<64x64xf32>
    %34 = arith.addf %30, %33 : vector<64x64xf32>
    %35 = vector.extract_strided_slice %34 {offsets = [0, 0], sizes = [32, 64], strides = [1, 1]} : vector<64x64xf32> to vector<32x64xf32>
    %36 = math.tanh %35 : vector<32x64xf32>
    %37 = vector.extract_strided_slice %34 {offsets = [32, 0], sizes = [32, 64], strides = [1, 1]} : vector<64x64xf32> to vector<32x64xf32>
    %38 = arith.negf %37 : vector<32x64xf32>
    %39 = math.exp %38 : vector<32x64xf32>
    %cst_25 = arith.constant 1.000000e+00 : f32
    %40 = vector.broadcast %cst_25 : f32 to vector<32x64xf32>
    %41 = arith.addf %40, %39 : vector<32x64xf32>
    %42 = arith.divf %40, %41 : vector<32x64xf32>
    %43 = arith.mulf %36, %42 : vector<32x64xf32>
    %c0_26 = arith.constant 0 : index
    %c0_27 = arith.constant 0 : index
    %c0_28 = arith.constant 0 : index
    %44 = vector.load %arg5[%c0_26, %c0_27, %c0_28] : memref<24x32x32xbf16, #tpu.memory_space<vmem>>, vector<1x32x32xbf16>
    %45 = vector.shape_cast %44 : vector<1x32x32xbf16> to vector<32x32xbf16>
    %46 = arith.truncf %43 : vector<32x64xf32> to vector<32x64xbf16>
    %cst_29 = arith.constant dense<0.000000e+00> : vector<32x64xf32>
    %47 = tpu.matmul %45, %46, %cst_29 {dimension_numbers = #tpu.dot_dimension_numbers<[1], [0], [0], [1], [0, 0, 1, 1], [], []>} : vector<32x32xbf16>, vector<32x64xbf16>, vector<32x64xf32> -> vector<32x64xf32>
    %c0_30 = arith.constant 0 : index
    %c0_31 = arith.constant 0 : index
    %c0_32 = arith.constant 0 : index
    %48 = vector.load %arg6[%c0_30, %c0_31, %c0_32] : memref<24x32x1xf32, #tpu.memory_space<vmem>>, vector<1x32x1xf32>
    %49 = vector.shape_cast %48 : vector<1x32x1xf32> to vector<32x1xf32>
    %50 = vector.broadcast %49 : vector<32x1xf32> to vector<32x64xf32>
    %51 = arith.addf %47, %50 : vector<32x64xf32>
    %c0_33 = arith.constant 0 : index
    %c0_34 = arith.constant 0 : index
    %52 = vector.load %arg15[%c0_33, %c0_34] : memref<32x64xf32, #tpu.memory_space<vmem>>, vector<32x64xf32>
    %53 = arith.addf %52, %51 : vector<32x64xf32>
    %c0_35 = arith.constant 0 : index
    %c0_36 = arith.constant 0 : index
    %54 = vector.load %arg15[%c0_35, %c0_36] : memref<32x64xf32, #tpu.memory_space<vmem>>, vector<32x64xf32>
    tpu.vector_store %arg15[%c0_35, %c0_36], %53 {strides = array<i32>} : memref<32x64xf32, #tpu.memory_space<vmem>>, vector<32x64xf32>,
    %55 = arith.addf %25, %51 : vector<32x64xf32>
    %c0_37 = arith.constant 0 : index
    %c128_38 = arith.constant 128 : index
    %56 = vector.load %arg14[%c0_37, %c128_38] : memref<32x192xf32, #tpu.memory_space<vmem>>, vector<32x64xf32>
    tpu.vector_store %arg14[%c0_37, %c128_38], %55 {strides = array<i32>} : memref<32x192xf32, #tpu.memory_space<vmem>>, vector<32x64xf32>,
    %c0_39 = arith.constant 0 : index
    %c126 = arith.constant 126 : index
    %57 = vector.load %arg14[%c0_39, %c126] : memref<32x192xf32, #tpu.memory_space<vmem>>, vector<32x64xf32>
    %c0_40 = arith.constant 0 : index
    %c128_41 = arith.constant 128 : index
    %58 = vector.load %arg14[%c0_40, %c128_41] : memref<32x192xf32, #tpu.memory_space<vmem>>, vector<32x64xf32>
    %59 = tpu.concatenate %57, %58 in 0 : vector<32x64xf32>, vector<32x64xf32> -> vector<64x64xf32>
    %60 = arith.truncf %59 : vector<64x64xf32> to vector<64x64xbf16>
    %c1_42 = arith.constant 1 : index
    %c0_43 = arith.constant 0 : index
    %c0_44 = arith.constant 0 : index
    %61 = vector.load %arg3[%c1_42, %c0_43, %c0_44] : memref<24x64x64xbf16, #tpu.memory_space<vmem>>, vector<1x64x64xbf16>
    %62 = vector.shape_cast %61 : vector<1x64x64xbf16> to vector<64x64xbf16>
    %cst_45 = arith.constant dense<0.000000e+00> : vector<64x64xf32>
    %63 = tpu.matmul %62, %60, %cst_45 {dimension_numbers = #tpu.dot_dimension_numbers<[1], [0], [0], [1], [0, 0, 1, 1], [], []>} : vector<64x64xbf16>, vector<64x64xbf16>, vector<64x64xf32> -> vector<64x64xf32>
    %c1_46 = arith.constant 1 : index
    %c0_47 = arith.constant 0 : index
    %c0_48 = arith.constant 0 : index
    %64 = vector.load %arg4[%c1_46, %c0_47, %c0_48] : memref<24x64x1xf32, #tpu.memory_space<vmem>>, vector<1x64x1xf32>
    %65 = vector.shape_cast %64 : vector<1x64x1xf32> to vector<64x1xf32>
    %66 = vector.broadcast %65 : vector<64x1xf32> to vector<64x64xf32>
    %67 = arith.addf %63, %66 : vector<64x64xf32>
    %68 = vector.extract_strided_slice %67 {offsets = [0, 0], sizes = [32, 64], strides = [1, 1]} : vector<64x64xf32> to vector<32x64xf32>
    %69 = math.tanh %68 : vector<32x64xf32>
    %70 = vector.extract_strided_slice %67 {offsets = [32, 0], sizes = [32, 64], strides = [1, 1]} : vector<64x64xf32> to vector<32x64xf32>
    %71 = arith.negf %70 : vector<32x64xf32>
    %72 = math.exp %71 : vector<32x64xf32>
    %cst_49 = arith.constant 1.000000e+00 : f32
    %73 = vector.broadcast %cst_49 : f32 to vector<32x64xf32>
    %74 = arith.addf %73, %72 : vector<32x64xf32>
    %75 = arith.divf %73, %74 : vector<32x64xf32>
    %76 = arith.mulf %69, %75 : vector<32x64xf32>
    %c1_50 = arith.constant 1 : index
    %c0_51 = arith.constant 0 : index
    %c0_52 = arith.constant 0 : index
    %77 = vector.load %arg5[%c1_50, %c0_51, %c0_52] : memref<24x32x32xbf16, #tpu.memory_space<vmem>>, vector<1x32x32xbf16>
    %78 = vector.shape_cast %77 : vector<1x32x32xbf16> to vector<32x32xbf16>
    %79 = arith.truncf %76 : vector<32x64xf32> to vector<32x64xbf16>
    %cst_53 = arith.constant dense<0.000000e+00> : vector<32x64xf32>
    %80 = tpu.matmul %78, %79, %cst_53 {dimension_numbers = #tpu.dot_dimension_numbers<[1], [0], [0], [1], [0, 0, 1, 1], [], []>} : vector<32x32xbf16>, vector<32x64xbf16>, vector<32x64xf32> -> vector<32x64xf32>
    %c1_54 = arith.constant 1 : index
    %c0_55 = arith.constant 0 : index
    %c0_56 = arith.constant 0 : index
    %81 = vector.load %arg6[%c1_54, %c0_55, %c0_56] : memref<24x32x1xf32, #tpu.memory_space<vmem>>, vector<1x32x1xf32>
    %82 = vector.shape_cast %81 : vector<1x32x1xf32> to vector<32x1xf32>
    %83 = vector.broadcast %82 : vector<32x1xf32> to vector<32x64xf32>
    %84 = arith.addf %80, %83 : vector<32x64xf32>
    %c0_57 = arith.constant 0 : index
    %c0_58 = arith.constant 0 : index
    %85 = vector.load %arg15[%c0_57, %c0_58] : memref<32x64xf32, #tpu.memory_space<vmem>>, vector<32x64xf32>
    %86 = arith.addf %85, %84 : vector<32x64xf32>
    %c0_59 = arith.constant 0 : index
    %c0_60 = arith.constant 0 : index
    %87 = vector.load %arg15[%c0_59, %c0_60] : memref<32x64xf32, #tpu.memory_space<vmem>>, vector<32x64xf32>
    tpu.vector_store %arg15[%c0_59, %c0_60], %86 {strides = array<i32>} : memref<32x64xf32, #tpu.memory_space<vmem>>, vector<32x64xf32>,
    %88 = arith.addf %58, %84 : vector<32x64xf32>
    %c0_61 = arith.constant 0 : index
    %c128_62 = arith.constant 128 : index
    %89 = vector.load %arg14[%c0_61, %c128_62] : memref<32x192xf32, #tpu.memory_space<vmem>>, vector<32x64xf32>
    tpu.vector_store %arg14[%c0_61, %c128_62], %88 {strides = array<i32>} : memref<32x192xf32, #tpu.memory_space<vmem>>, vector<32x64xf32>,
    %c0_63 = arith.constant 0 : index
    %c124 = arith.constant 124 : index
    %90 = vector.load %arg14[%c0_63, %c124] : memref<32x192xf32, #tpu.memory_space<vmem>>, vector<32x64xf32>
    %c0_64 = arith.constant 0 : index
    %c128_65 = arith.constant 128 : index
    %91 = vector.load %arg14[%c0_64, %c128_65] : memref<32x192xf32, #tpu.memory_space<vmem>>, vector<32x64xf32>
    %92 = tpu.concatenate %90, %91 in 0 : vector<32x64xf32>, vector<32x64xf32> -> vector<64x64xf32>
    %93 = arith.truncf %92 : vector<64x64xf32> to vector<64x64xbf16>
    %c2_66 = arith.constant 2 : index
    %c0_67 = arith.constant 0 : index
    %c0_68 = arith.constant 0 : index
    %94 = vector.load %arg3[%c2_66, %c0_67, %c0_68] : memref<24x64x64xbf16, #tpu.memory_space<vmem>>, vector<1x64x64xbf16>
    %95 = vector.shape_cast %94 : vector<1x64x64xbf16> to vector<64x64xbf16>
    %cst_69 = arith.constant dense<0.000000e+00> : vector<64x64xf32>
    %96 = tpu.matmul %95, %93, %cst_69 {dimension_numbers = #tpu.dot_dimension_numbers<[1], [0], [0], [1], [0, 0, 1, 1], [], []>} : vector<64x64xbf16>, vector<64x64xbf16>, vector<64x64xf32> -> vector<64x64xf32>
    %c2_70 = arith.constant 2 : index
    %c0_71 = arith.constant 0 : index
    %c0_72 = arith.constant 0 : index
    %97 = vector.load %arg4[%c2_70, %c0_71, %c0_72] : memref<24x64x1xf32, #tpu.memory_space<vmem>>, vector<1x64x1xf32>
    %98 = vector.shape_cast %97 : vector<1x64x1xf32> to vector<64x1xf32>
    %99 = vector.broadcast %98 : vector<64x1xf32> to vector<64x64xf32>
    %100 = arith.addf %96, %99 : vector<64x64xf32>
    %101 = vector.extract_strided_slice %100 {offsets = [0, 0], sizes = [32, 64], strides = [1, 1]} : vector<64x64xf32> to vector<32x64xf32>
    %102 = math.tanh %101 : vector<32x64xf32>
    %103 = vector.extract_strided_slice %100 {offsets = [32, 0], sizes = [32, 64], strides = [1, 1]} : vector<64x64xf32> to vector<32x64xf32>
    %104 = arith.negf %103 : vector<32x64xf32>
    %105 = math.exp %104 : vector<32x64xf32>
    %cst_73 = arith.constant 1.000000e+00 : f32
    %106 = vector.broadcast %cst_73 : f32 to vector<32x64xf32>
    %107 = arith.addf %106, %105 : vector<32x64xf32>
    %108 = arith.divf %106, %107 : vector<32x64xf32>
    %109 = arith.mulf %102, %108 : vector<32x64xf32>
    %c2_74 = arith.constant 2 : index
    %c0_75 = arith.constant 0 : index
    %c0_76 = arith.constant 0 : index
    %110 = vector.load %arg5[%c2_74, %c0_75, %c0_76] : memref<24x32x32xbf16, #tpu.memory_space<vmem>>, vector<1x32x32xbf16>
    %111 = vector.shape_cast %110 : vector<1x32x32xbf16> to vector<32x32xbf16>
    %112 = arith.truncf %109 : vector<32x64xf32> to vector<32x64xbf16>
    %cst_77 = arith.constant dense<0.000000e+00> : vector<32x64xf32>
    %113 = tpu.matmul %111, %112, %cst_77 {dimension_numbers = #tpu.dot_dimension_numbers<[1], [0], [0], [1], [0, 0, 1, 1], [], []>} : vector<32x32xbf16>, vector<32x64xbf16>, vector<32x64xf32> -> vector<32x64xf32>
    %c2_78 = arith.constant 2 : index
    %c0_79 = arith.constant 0 : index
    %c0_80 = arith.constant 0 : index
    %114 = vector.load %arg6[%c2_78, %c0_79, %c0_80] : memref<24x32x1xf32, #tpu.memory_space<vmem>>, vector<1x32x1xf32>
    %115 = vector.shape_cast %114 : vector<1x32x1xf32> to vector<32x1xf32>
    %116 = vector.broadcast %115 : vector<32x1xf32> to vector<32x64xf32>
    %117 = arith.addf %113, %116 : vector<32x64xf32>
    %c0_81 = arith.constant 0 : index
    %c0_82 = arith.constant 0 : index
    %118 = vector.load %arg15[%c0_81, %c0_82] : memref<32x64xf32, #tpu.memory_space<vmem>>, vector<32x64xf32>
    %119 = arith.addf %118, %117 : vector<32x64xf32>
    %c0_83 = arith.constant 0 : index
    %c0_84 = arith.constant 0 : index
    %120 = vector.load %arg15[%c0_83, %c0_84] : memref<32x64xf32, #tpu.memory_space<vmem>>, vector<32x64xf32>
    tpu.vector_store %arg15[%c0_83, %c0_84], %119 {strides = array<i32>} : memref<32x64xf32, #tpu.memory_space<vmem>>, vector<32x64xf32>,
    %121 = arith.addf %91, %117 : vector<32x64xf32>
    %c0_85 = arith.constant 0 : index
    %c128_86 = arith.constant 128 : index
    %122 = vector.load %arg14[%c0_85, %c128_86] : memref<32x192xf32, #tpu.memory_space<vmem>>, vector<32x64xf32>
    tpu.vector_store %arg14[%c0_85, %c128_86], %121 {strides = array<i32>} : memref<32x192xf32, #tpu.memory_space<vmem>>, vector<32x64xf32>,
    %c0_87 = arith.constant 0 : index
    %c120 = arith.constant 120 : index
    %123 = vector.load %arg14[%c0_87, %c120] : memref<32x192xf32, #tpu.memory_space<vmem>>, vector<32x64xf32>
    %c0_88 = arith.constant 0 : index
    %c128_89 = arith.constant 128 : index
    %124 = vector.load %arg14[%c0_88, %c128_89] : memref<32x192xf32, #tpu.memory_space<vmem>>, vector<32x64xf32>
    %125 = tpu.concatenate %123, %124 in 0 : vector<32x64xf32>, vector<32x64xf32> -> vector<64x64xf32>
    %126 = arith.truncf %125 : vector<64x64xf32> to vector<64x64xbf16>
    %c3 = arith.constant 3 : index
    %c0_90 = arith.constant 0 : index
    %c0_91 = arith.constant 0 : index
    %127 = vector.load %arg3[%c3, %c0_90, %c0_91] : memref<24x64x64xbf16, #tpu.memory_space<vmem>>, vector<1x64x64xbf16>
    %128 = vector.shape_cast %127 : vector<1x64x64xbf16> to vector<64x64xbf16>
    %cst_92 = arith.constant dense<0.000000e+00> : vector<64x64xf32>
    %129 = tpu.matmul %128, %126, %cst_92 {dimension_numbers = #tpu.dot_dimension_numbers<[1], [0], [0], [1], [0, 0, 1, 1], [], []>} : vector<64x64xbf16>, vector<64x64xbf16>, vector<64x64xf32> -> vector<64x64xf32>
    %c3_93 = arith.constant 3 : index
    %c0_94 = arith.constant 0 : index
    %c0_95 = arith.constant 0 : index
    %130 = vector.load %arg4[%c3_93, %c0_94, %c0_95] : memref<24x64x1xf32, #tpu.memory_space<vmem>>, vector<1x64x1xf32>
    %131 = vector.shape_cast %130 : vector<1x64x1xf32> to vector<64x1xf32>
    %132 = vector.broadcast %131 : vector<64x1xf32> to vector<64x64xf32>
    %133 = arith.addf %129, %132 : vector<64x64xf32>
    %134 = vector.extract_strided_slice %133 {offsets = [0, 0], sizes = [32, 64], strides = [1, 1]} : vector<64x64xf32> to vector<32x64xf32>
    %135 = math.tanh %134 : vector<32x64xf32>
    %136 = vector.extract_strided_slice %133 {offsets = [32, 0], sizes = [32, 64], strides = [1, 1]} : vector<64x64xf32> to vector<32x64xf32>
    %137 = arith.negf %136 : vector<32x64xf32>
    %138 = math.exp %137 : vector<32x64xf32>
    %cst_96 = arith.constant 1.000000e+00 : f32
    %139 = vector.broadcast %cst_96 : f32 to vector<32x64xf32>
    %140 = arith.addf %139, %138 : vector<32x64xf32>
    %141 = arith.divf %139, %140 : vector<32x64xf32>
    %142 = arith.mulf %135, %141 : vector<32x64xf32>
    %c3_97 = arith.constant 3 : index
    %c0_98 = arith.constant 0 : index
    %c0_99 = arith.constant 0 : index
    %143 = vector.load %arg5[%c3_97, %c0_98, %c0_99] : memref<24x32x32xbf16, #tpu.memory_space<vmem>>, vector<1x32x32xbf16>
    %144 = vector.shape_cast %143 : vector<1x32x32xbf16> to vector<32x32xbf16>
    %145 = arith.truncf %142 : vector<32x64xf32> to vector<32x64xbf16>
    %cst_100 = arith.constant dense<0.000000e+00> : vector<32x64xf32>
    %146 = tpu.matmul %144, %145, %cst_100 {dimension_numbers = #tpu.dot_dimension_numbers<[1], [0], [0], [1], [0, 0, 1, 1], [], []>} : vector<32x32xbf16>, vector<32x64xbf16>, vector<32x64xf32> -> vector<32x64xf32>
    %c3_101 = arith.constant 3 : index
    %c0_102 = arith.constant 0 : index
    %c0_103 = arith.constant 0 : index
    %147 = vector.load %arg6[%c3_101, %c0_102, %c0_103] : memref<24x32x1xf32, #tpu.memory_space<vmem>>, vector<1x32x1xf32>
    %148 = vector.shape_cast %147 : vector<1x32x1xf32> to vector<32x1xf32>
    %149 = vector.broadcast %148 : vector<32x1xf32> to vector<32x64xf32>
    %150 = arith.addf %146, %149 : vector<32x64xf32>
    %c0_104 = arith.constant 0 : index
    %c0_105 = arith.constant 0 : index
    %151 = vector.load %arg15[%c0_104, %c0_105] : memref<32x64xf32, #tpu.memory_space<vmem>>, vector<32x64xf32>
    %152 = arith.addf %151, %150 : vector<32x64xf32>
    %c0_106 = arith.constant 0 : index
    %c0_107 = arith.constant 0 : index
    %153 = vector.load %arg15[%c0_106, %c0_107] : memref<32x64xf32, #tpu.memory_space<vmem>>, vector<32x64xf32>
    tpu.vector_store %arg15[%c0_106, %c0_107], %152 {strides = array<i32>} : memref<32x64xf32, #tpu.memory_space<vmem>>, vector<32x64xf32>,
    %154 = arith.addf %124, %150 : vector<32x64xf32>
    %c0_108 = arith.constant 0 : index
    %c128_109 = arith.constant 128 : index
    %155 = vector.load %arg14[%c0_108, %c128_109] : memref<32x192xf32, #tpu.memory_space<vmem>>, vector<32x64xf32>
    tpu.vector_store %arg14[%c0_108, %c128_109], %154 {strides = array<i32>} : memref<32x192xf32, #tpu.memory_space<vmem>>, vector<32x64xf32>,
    %c0_110 = arith.constant 0 : index
    %c112 = arith.constant 112 : index
    %156 = vector.load %arg14[%c0_110, %c112] : memref<32x192xf32, #tpu.memory_space<vmem>>, vector<32x64xf32>
    %c0_111 = arith.constant 0 : index
    %c128_112 = arith.constant 128 : index
    %157 = vector.load %arg14[%c0_111, %c128_112] : memref<32x192xf32, #tpu.memory_space<vmem>>, vector<32x64xf32>
    %158 = tpu.concatenate %156, %157 in 0 : vector<32x64xf32>, vector<32x64xf32> -> vector<64x64xf32>
    %159 = arith.truncf %158 : vector<64x64xf32> to vector<64x64xbf16>
    %c4 = arith.constant 4 : index
    %c0_113 = arith.constant 0 : index
    %c0_114 = arith.constant 0 : index
    %160 = vector.load %arg3[%c4, %c0_113, %c0_114] : memref<24x64x64xbf16, #tpu.memory_space<vmem>>, vector<1x64x64xbf16>
    %161 = vector.shape_cast %160 : vector<1x64x64xbf16> to vector<64x64xbf16>
    %cst_115 = arith.constant dense<0.000000e+00> : vector<64x64xf32>
    %162 = tpu.matmul %161, %159, %cst_115 {dimension_numbers = #tpu.dot_dimension_numbers<[1], [0], [0], [1], [0, 0, 1, 1], [], []>} : vector<64x64xbf16>, vector<64x64xbf16>, vector<64x64xf32> -> vector<64x64xf32>
    %c4_116 = arith.constant 4 : index
    %c0_117 = arith.constant 0 : index
    %c0_118 = arith.constant 0 : index
    %163 = vector.load %arg4[%c4_116, %c0_117, %c0_118] : memref<24x64x1xf32, #tpu.memory_space<vmem>>, vector<1x64x1xf32>
    %164 = vector.shape_cast %163 : vector<1x64x1xf32> to vector<64x1xf32>
    %165 = vector.broadcast %164 : vector<64x1xf32> to vector<64x64xf32>
    %166 = arith.addf %162, %165 : vector<64x64xf32>
    %167 = vector.extract_strided_slice %166 {offsets = [0, 0], sizes = [32, 64], strides = [1, 1]} : vector<64x64xf32> to vector<32x64xf32>
    %168 = math.tanh %167 : vector<32x64xf32>
    %169 = vector.extract_strided_slice %166 {offsets = [32, 0], sizes = [32, 64], strides = [1, 1]} : vector<64x64xf32> to vector<32x64xf32>
    %170 = arith.negf %169 : vector<32x64xf32>
    %171 = math.exp %170 : vector<32x64xf32>
    %cst_119 = arith.constant 1.000000e+00 : f32
    %172 = vector.broadcast %cst_119 : f32 to vector<32x64xf32>
    %173 = arith.addf %172, %171 : vector<32x64xf32>
    %174 = arith.divf %172, %173 : vector<32x64xf32>
    %175 = arith.mulf %168, %174 : vector<32x64xf32>
    %c4_120 = arith.constant 4 : index
    %c0_121 = arith.constant 0 : index
    %c0_122 = arith.constant 0 : index
    %176 = vector.load %arg5[%c4_120, %c0_121, %c0_122] : memref<24x32x32xbf16, #tpu.memory_space<vmem>>, vector<1x32x32xbf16>
    %177 = vector.shape_cast %176 : vector<1x32x32xbf16> to vector<32x32xbf16>
    %178 = arith.truncf %175 : vector<32x64xf32> to vector<32x64xbf16>
    %cst_123 = arith.constant dense<0.000000e+00> : vector<32x64xf32>
    %179 = tpu.matmul %177, %178, %cst_123 {dimension_numbers = #tpu.dot_dimension_numbers<[1], [0], [0], [1], [0, 0, 1, 1], [], []>} : vector<32x32xbf16>, vector<32x64xbf16>, vector<32x64xf32> -> vector<32x64xf32>
    %c4_124 = arith.constant 4 : index
    %c0_125 = arith.constant 0 : index
    %c0_126 = arith.constant 0 : index
    %180 = vector.load %arg6[%c4_124, %c0_125, %c0_126] : memref<24x32x1xf32, #tpu.memory_space<vmem>>, vector<1x32x1xf32>
    %181 = vector.shape_cast %180 : vector<1x32x1xf32> to vector<32x1xf32>
    %182 = vector.broadcast %181 : vector<32x1xf32> to vector<32x64xf32>
    %183 = arith.addf %179, %182 : vector<32x64xf32>
    %c0_127 = arith.constant 0 : index
    %c0_128 = arith.constant 0 : index
    %184 = vector.load %arg15[%c0_127, %c0_128] : memref<32x64xf32, #tpu.memory_space<vmem>>, vector<32x64xf32>
    %185 = arith.addf %184, %183 : vector<32x64xf32>
    %c0_129 = arith.constant 0 : index
    %c0_130 = arith.constant 0 : index
    %186 = vector.load %arg15[%c0_129, %c0_130] : memref<32x64xf32, #tpu.memory_space<vmem>>, vector<32x64xf32>
    tpu.vector_store %arg15[%c0_129, %c0_130], %185 {strides = array<i32>} : memref<32x64xf32, #tpu.memory_space<vmem>>, vector<32x64xf32>,
    %187 = arith.addf %157, %183 : vector<32x64xf32>
    %c0_131 = arith.constant 0 : index
    %c128_132 = arith.constant 128 : index
    %188 = vector.load %arg14[%c0_131, %c128_132] : memref<32x192xf32, #tpu.memory_space<vmem>>, vector<32x64xf32>
    tpu.vector_store %arg14[%c0_131, %c128_132], %187 {strides = array<i32>} : memref<32x192xf32, #tpu.memory_space<vmem>>, vector<32x64xf32>,
    %c0_133 = arith.constant 0 : index
    %c96 = arith.constant 96 : index
    %189 = vector.load %arg14[%c0_133, %c96] : memref<32x192xf32, #tpu.memory_space<vmem>>, vector<32x64xf32>
    %c0_134 = arith.constant 0 : index
    %c128_135 = arith.constant 128 : index
    %190 = vector.load %arg14[%c0_134, %c128_135] : memref<32x192xf32, #tpu.memory_space<vmem>>, vector<32x64xf32>
    %191 = tpu.concatenate %189, %190 in 0 : vector<32x64xf32>, vector<32x64xf32> -> vector<64x64xf32>
    %192 = arith.truncf %191 : vector<64x64xf32> to vector<64x64xbf16>
    %c5 = arith.constant 5 : index
    %c0_136 = arith.constant 0 : index
    %c0_137 = arith.constant 0 : index
    %193 = vector.load %arg3[%c5, %c0_136, %c0_137] : memref<24x64x64xbf16, #tpu.memory_space<vmem>>, vector<1x64x64xbf16>
    %194 = vector.shape_cast %193 : vector<1x64x64xbf16> to vector<64x64xbf16>
    %cst_138 = arith.constant dense<0.000000e+00> : vector<64x64xf32>
    %195 = tpu.matmul %194, %192, %cst_138 {dimension_numbers = #tpu.dot_dimension_numbers<[1], [0], [0], [1], [0, 0, 1, 1], [], []>} : vector<64x64xbf16>, vector<64x64xbf16>, vector<64x64xf32> -> vector<64x64xf32>
    %c5_139 = arith.constant 5 : index
    %c0_140 = arith.constant 0 : index
    %c0_141 = arith.constant 0 : index
    %196 = vector.load %arg4[%c5_139, %c0_140, %c0_141] : memref<24x64x1xf32, #tpu.memory_space<vmem>>, vector<1x64x1xf32>
    %197 = vector.shape_cast %196 : vector<1x64x1xf32> to vector<64x1xf32>
    %198 = vector.broadcast %197 : vector<64x1xf32> to vector<64x64xf32>
    %199 = arith.addf %195, %198 : vector<64x64xf32>
    %200 = vector.extract_strided_slice %199 {offsets = [0, 0], sizes = [32, 64], strides = [1, 1]} : vector<64x64xf32> to vector<32x64xf32>
    %201 = math.tanh %200 : vector<32x64xf32>
    %202 = vector.extract_strided_slice %199 {offsets = [32, 0], sizes = [32, 64], strides = [1, 1]} : vector<64x64xf32> to vector<32x64xf32>
    %203 = arith.negf %202 : vector<32x64xf32>
    %204 = math.exp %203 : vector<32x64xf32>
    %cst_142 = arith.constant 1.000000e+00 : f32
    %205 = vector.broadcast %cst_142 : f32 to vector<32x64xf32>
    %206 = arith.addf %205, %204 : vector<32x64xf32>
    %207 = arith.divf %205, %206 : vector<32x64xf32>
    %208 = arith.mulf %201, %207 : vector<32x64xf32>
    %c5_143 = arith.constant 5 : index
    %c0_144 = arith.constant 0 : index
    %c0_145 = arith.constant 0 : index
    %209 = vector.load %arg5[%c5_143, %c0_144, %c0_145] : memref<24x32x32xbf16, #tpu.memory_space<vmem>>, vector<1x32x32xbf16>
    %210 = vector.shape_cast %209 : vector<1x32x32xbf16> to vector<32x32xbf16>
    %211 = arith.truncf %208 : vector<32x64xf32> to vector<32x64xbf16>
    %cst_146 = arith.constant dense<0.000000e+00> : vector<32x64xf32>
    %212 = tpu.matmul %210, %211, %cst_146 {dimension_numbers = #tpu.dot_dimension_numbers<[1], [0], [0], [1], [0, 0, 1, 1], [], []>} : vector<32x32xbf16>, vector<32x64xbf16>, vector<32x64xf32> -> vector<32x64xf32>
    %c5_147 = arith.constant 5 : index
    %c0_148 = arith.constant 0 : index
    %c0_149 = arith.constant 0 : index
    %213 = vector.load %arg6[%c5_147, %c0_148, %c0_149] : memref<24x32x1xf32, #tpu.memory_space<vmem>>, vector<1x32x1xf32>
    %214 = vector.shape_cast %213 : vector<1x32x1xf32> to vector<32x1xf32>
    %215 = vector.broadcast %214 : vector<32x1xf32> to vector<32x64xf32>
    %216 = arith.addf %212, %215 : vector<32x64xf32>
    %c0_150 = arith.constant 0 : index
    %c0_151 = arith.constant 0 : index
    %217 = vector.load %arg15[%c0_150, %c0_151] : memref<32x64xf32, #tpu.memory_space<vmem>>, vector<32x64xf32>
    %218 = arith.addf %217, %216 : vector<32x64xf32>
    %c0_152 = arith.constant 0 : index
    %c0_153 = arith.constant 0 : index
    %219 = vector.load %arg15[%c0_152, %c0_153] : memref<32x64xf32, #tpu.memory_space<vmem>>, vector<32x64xf32>
    tpu.vector_store %arg15[%c0_152, %c0_153], %218 {strides = array<i32>} : memref<32x64xf32, #tpu.memory_space<vmem>>, vector<32x64xf32>,
    %220 = arith.addf %190, %216 : vector<32x64xf32>
    %c0_154 = arith.constant 0 : index
    %c128_155 = arith.constant 128 : index
    %221 = vector.load %arg14[%c0_154, %c128_155] : memref<32x192xf32, #tpu.memory_space<vmem>>, vector<32x64xf32>
    tpu.vector_store %arg14[%c0_154, %c128_155], %220 {strides = array<i32>} : memref<32x192xf32, #tpu.memory_space<vmem>>, vector<32x64xf32>,
    %c0_156 = arith.constant 0 : index
    %c64 = arith.constant 64 : index
    %222 = vector.load %arg14[%c0_156, %c64] : memref<32x192xf32, #tpu.memory_space<vmem>>, vector<32x64xf32>
    %c0_157 = arith.constant 0 : index
    %c128_158 = arith.constant 128 : index
    %223 = vector.load %arg14[%c0_157, %c128_158] : memref<32x192xf32, #tpu.memory_space<vmem>>, vector<32x64xf32>
    %224 = tpu.concatenate %222, %223 in 0 : vector<32x64xf32>, vector<32x64xf32> -> vector<64x64xf32>
    %225 = arith.truncf %224 : vector<64x64xf32> to vector<64x64xbf16>
    %c6 = arith.constant 6 : index
    %c0_159 = arith.constant 0 : index
    %c0_160 = arith.constant 0 : index
    %226 = vector.load %arg3[%c6, %c0_159, %c0_160] : memref<24x64x64xbf16, #tpu.memory_space<vmem>>, vector<1x64x64xbf16>
    %227 = vector.shape_cast %226 : vector<1x64x64xbf16> to vector<64x64xbf16>
    %cst_161 = arith.constant dense<0.000000e+00> : vector<64x64xf32>
    %228 = tpu.matmul %227, %225, %cst_161 {dimension_numbers = #tpu.dot_dimension_numbers<[1], [0], [0], [1], [0, 0, 1, 1], [], []>} : vector<64x64xbf16>, vector<64x64xbf16>, vector<64x64xf32> -> vector<64x64xf32>
    %c6_162 = arith.constant 6 : index
    %c0_163 = arith.constant 0 : index
    %c0_164 = arith.constant 0 : index
    %229 = vector.load %arg4[%c6_162, %c0_163, %c0_164] : memref<24x64x1xf32, #tpu.memory_space<vmem>>, vector<1x64x1xf32>
    %230 = vector.shape_cast %229 : vector<1x64x1xf32> to vector<64x1xf32>
    %231 = vector.broadcast %230 : vector<64x1xf32> to vector<64x64xf32>
    %232 = arith.addf %228, %231 : vector<64x64xf32>
    %233 = vector.extract_strided_slice %232 {offsets = [0, 0], sizes = [32, 64], strides = [1, 1]} : vector<64x64xf32> to vector<32x64xf32>
    %234 = math.tanh %233 : vector<32x64xf32>
    %235 = vector.extract_strided_slice %232 {offsets = [32, 0], sizes = [32, 64], strides = [1, 1]} : vector<64x64xf32> to vector<32x64xf32>
    %236 = arith.negf %235 : vector<32x64xf32>
    %237 = math.exp %236 : vector<32x64xf32>
    %cst_165 = arith.constant 1.000000e+00 : f32
    %238 = vector.broadcast %cst_165 : f32 to vector<32x64xf32>
    %239 = arith.addf %238, %237 : vector<32x64xf32>
    %240 = arith.divf %238, %239 : vector<32x64xf32>
    %241 = arith.mulf %234, %240 : vector<32x64xf32>
    %c6_166 = arith.constant 6 : index
    %c0_167 = arith.constant 0 : index
    %c0_168 = arith.constant 0 : index
    %242 = vector.load %arg5[%c6_166, %c0_167, %c0_168] : memref<24x32x32xbf16, #tpu.memory_space<vmem>>, vector<1x32x32xbf16>
    %243 = vector.shape_cast %242 : vector<1x32x32xbf16> to vector<32x32xbf16>
    %244 = arith.truncf %241 : vector<32x64xf32> to vector<32x64xbf16>
    %cst_169 = arith.constant dense<0.000000e+00> : vector<32x64xf32>
    %245 = tpu.matmul %243, %244, %cst_169 {dimension_numbers = #tpu.dot_dimension_numbers<[1], [0], [0], [1], [0, 0, 1, 1], [], []>} : vector<32x32xbf16>, vector<32x64xbf16>, vector<32x64xf32> -> vector<32x64xf32>
    %c6_170 = arith.constant 6 : index
    %c0_171 = arith.constant 0 : index
    %c0_172 = arith.constant 0 : index
    %246 = vector.load %arg6[%c6_170, %c0_171, %c0_172] : memref<24x32x1xf32, #tpu.memory_space<vmem>>, vector<1x32x1xf32>
    %247 = vector.shape_cast %246 : vector<1x32x1xf32> to vector<32x1xf32>
    %248 = vector.broadcast %247 : vector<32x1xf32> to vector<32x64xf32>
    %249 = arith.addf %245, %248 : vector<32x64xf32>
    %c0_173 = arith.constant 0 : index
    %c0_174 = arith.constant 0 : index
    %250 = vector.load %arg15[%c0_173, %c0_174] : memref<32x64xf32, #tpu.memory_space<vmem>>, vector<32x64xf32>
    %251 = arith.addf %250, %249 : vector<32x64xf32>
    %c0_175 = arith.constant 0 : index
    %c0_176 = arith.constant 0 : index
    %252 = vector.load %arg15[%c0_175, %c0_176] : memref<32x64xf32, #tpu.memory_space<vmem>>, vector<32x64xf32>
    tpu.vector_store %arg15[%c0_175, %c0_176], %251 {strides = array<i32>} : memref<32x64xf32, #tpu.memory_space<vmem>>, vector<32x64xf32>,
    %253 = arith.addf %223, %249 : vector<32x64xf32>
    %c0_177 = arith.constant 0 : index
    %c128_178 = arith.constant 128 : index
    %254 = vector.load %arg14[%c0_177, %c128_178] : memref<32x192xf32, #tpu.memory_space<vmem>>, vector<32x64xf32>
    tpu.vector_store %arg14[%c0_177, %c128_178], %253 {strides = array<i32>} : memref<32x192xf32, #tpu.memory_space<vmem>>, vector<32x64xf32>,
    %c0_179 = arith.constant 0 : index
    %c0_180 = arith.constant 0 : index
    %255 = vector.load %arg14[%c0_179, %c0_180] : memref<32x192xf32, #tpu.memory_space<vmem>>, vector<32x64xf32>
    %c0_181 = arith.constant 0 : index
    %c128_182 = arith.constant 128 : index
    %256 = vector.load %arg14[%c0_181, %c128_182] : memref<32x192xf32, #tpu.memory_space<vmem>>, vector<32x64xf32>
    %257 = tpu.concatenate %255, %256 in 0 : vector<32x64xf32>, vector<32x64xf32> -> vector<64x64xf32>
    %258 = arith.truncf %257 : vector<64x64xf32> to vector<64x64xbf16>
    %c7 = arith.constant 7 : index
    %c0_183 = arith.constant 0 : index
    %c0_184 = arith.constant 0 : index
    %259 = vector.load %arg3[%c7, %c0_183, %c0_184] : memref<24x64x64xbf16, #tpu.memory_space<vmem>>, vector<1x64x64xbf16>
    %260 = vector.shape_cast %259 : vector<1x64x64xbf16> to vector<64x64xbf16>
    %cst_185 = arith.constant dense<0.000000e+00> : vector<64x64xf32>
    %261 = tpu.matmul %260, %258, %cst_185 {dimension_numbers = #tpu.dot_dimension_numbers<[1], [0], [0], [1], [0, 0, 1, 1], [], []>} : vector<64x64xbf16>, vector<64x64xbf16>, vector<64x64xf32> -> vector<64x64xf32>
    %c7_186 = arith.constant 7 : index
    %c0_187 = arith.constant 0 : index
    %c0_188 = arith.constant 0 : index
    %262 = vector.load %arg4[%c7_186, %c0_187, %c0_188] : memref<24x64x1xf32, #tpu.memory_space<vmem>>, vector<1x64x1xf32>
    %263 = vector.shape_cast %262 : vector<1x64x1xf32> to vector<64x1xf32>
    %264 = vector.broadcast %263 : vector<64x1xf32> to vector<64x64xf32>
    %265 = arith.addf %261, %264 : vector<64x64xf32>
    %266 = vector.extract_strided_slice %265 {offsets = [0, 0], sizes = [32, 64], strides = [1, 1]} : vector<64x64xf32> to vector<32x64xf32>
    %267 = math.tanh %266 : vector<32x64xf32>
    %268 = vector.extract_strided_slice %265 {offsets = [32, 0], sizes = [32, 64], strides = [1, 1]} : vector<64x64xf32> to vector<32x64xf32>
    %269 = arith.negf %268 : vector<32x64xf32>
    %270 = math.exp %269 : vector<32x64xf32>
    %cst_189 = arith.constant 1.000000e+00 : f32
    %271 = vector.broadcast %cst_189 : f32 to vector<32x64xf32>
    %272 = arith.addf %271, %270 : vector<32x64xf32>
    %273 = arith.divf %271, %272 : vector<32x64xf32>
    %274 = arith.mulf %267, %273 : vector<32x64xf32>
    %c7_190 = arith.constant 7 : index
    %c0_191 = arith.constant 0 : index
    %c0_192 = arith.constant 0 : index
    %275 = vector.load %arg5[%c7_190, %c0_191, %c0_192] : memref<24x32x32xbf16, #tpu.memory_space<vmem>>, vector<1x32x32xbf16>
    %276 = vector.shape_cast %275 : vector<1x32x32xbf16> to vector<32x32xbf16>
    %277 = arith.truncf %274 : vector<32x64xf32> to vector<32x64xbf16>
    %cst_193 = arith.constant dense<0.000000e+00> : vector<32x64xf32>
    %278 = tpu.matmul %276, %277, %cst_193 {dimension_numbers = #tpu.dot_dimension_numbers<[1], [0], [0], [1], [0, 0, 1, 1], [], []>} : vector<32x32xbf16>, vector<32x64xbf16>, vector<32x64xf32> -> vector<32x64xf32>
    %c7_194 = arith.constant 7 : index
    %c0_195 = arith.constant 0 : index
    %c0_196 = arith.constant 0 : index
    %279 = vector.load %arg6[%c7_194, %c0_195, %c0_196] : memref<24x32x1xf32, #tpu.memory_space<vmem>>, vector<1x32x1xf32>
    %280 = vector.shape_cast %279 : vector<1x32x1xf32> to vector<32x1xf32>
    %281 = vector.broadcast %280 : vector<32x1xf32> to vector<32x64xf32>
    %282 = arith.addf %278, %281 : vector<32x64xf32>
    %c0_197 = arith.constant 0 : index
    %c0_198 = arith.constant 0 : index
    %283 = vector.load %arg15[%c0_197, %c0_198] : memref<32x64xf32, #tpu.memory_space<vmem>>, vector<32x64xf32>
    %284 = arith.addf %283, %282 : vector<32x64xf32>
    %c0_199 = arith.constant 0 : index
    %c0_200 = arith.constant 0 : index
    %285 = vector.load %arg15[%c0_199, %c0_200] : memref<32x64xf32, #tpu.memory_space<vmem>>, vector<32x64xf32>
    tpu.vector_store %arg15[%c0_199, %c0_200], %284 {strides = array<i32>} : memref<32x64xf32, #tpu.memory_space<vmem>>, vector<32x64xf32>,
    %286 = arith.addf %256, %282 : vector<32x64xf32>
    %c0_201 = arith.constant 0 : index
    %c128_202 = arith.constant 128 : index
    %287 = vector.load %arg14[%c0_201, %c128_202] : memref<32x192xf32, #tpu.memory_space<vmem>>, vector<32x64xf32>
    tpu.vector_store %arg14[%c0_201, %c128_202], %286 {strides = array<i32>} : memref<32x192xf32, #tpu.memory_space<vmem>>, vector<32x64xf32>,
    %c0_203 = arith.constant 0 : index
    %c127_204 = arith.constant 127 : index
    %288 = vector.load %arg14[%c0_203, %c127_204] : memref<32x192xf32, #tpu.memory_space<vmem>>, vector<32x64xf32>
    %c0_205 = arith.constant 0 : index
    %c128_206 = arith.constant 128 : index
    %289 = vector.load %arg14[%c0_205, %c128_206] : memref<32x192xf32, #tpu.memory_space<vmem>>, vector<32x64xf32>
    %290 = tpu.concatenate %288, %289 in 0 : vector<32x64xf32>, vector<32x64xf32> -> vector<64x64xf32>
    %291 = arith.truncf %290 : vector<64x64xf32> to vector<64x64xbf16>
    %c8 = arith.constant 8 : index
    %c0_207 = arith.constant 0 : index
    %c0_208 = arith.constant 0 : index
    %292 = vector.load %arg3[%c8, %c0_207, %c0_208] : memref<24x64x64xbf16, #tpu.memory_space<vmem>>, vector<1x64x64xbf16>
    %293 = vector.shape_cast %292 : vector<1x64x64xbf16> to vector<64x64xbf16>
    %cst_209 = arith.constant dense<0.000000e+00> : vector<64x64xf32>
    %294 = tpu.matmul %293, %291, %cst_209 {dimension_numbers = #tpu.dot_dimension_numbers<[1], [0], [0], [1], [0, 0, 1, 1], [], []>} : vector<64x64xbf16>, vector<64x64xbf16>, vector<64x64xf32> -> vector<64x64xf32>
    %c8_210 = arith.constant 8 : index
    %c0_211 = arith.constant 0 : index
    %c0_212 = arith.constant 0 : index
    %295 = vector.load %arg4[%c8_210, %c0_211, %c0_212] : memref<24x64x1xf32, #tpu.memory_space<vmem>>, vector<1x64x1xf32>
    %296 = vector.shape_cast %295 : vector<1x64x1xf32> to vector<64x1xf32>
    %297 = vector.broadcast %296 : vector<64x1xf32> to vector<64x64xf32>
    %298 = arith.addf %294, %297 : vector<64x64xf32>
    %299 = vector.extract_strided_slice %298 {offsets = [0, 0], sizes = [32, 64], strides = [1, 1]} : vector<64x64xf32> to vector<32x64xf32>
    %300 = math.tanh %299 : vector<32x64xf32>
    %301 = vector.extract_strided_slice %298 {offsets = [32, 0], sizes = [32, 64], strides = [1, 1]} : vector<64x64xf32> to vector<32x64xf32>
    %302 = arith.negf %301 : vector<32x64xf32>
    %303 = math.exp %302 : vector<32x64xf32>
    %cst_213 = arith.constant 1.000000e+00 : f32
    %304 = vector.broadcast %cst_213 : f32 to vector<32x64xf32>
    %305 = arith.addf %304, %303 : vector<32x64xf32>
    %306 = arith.divf %304, %305 : vector<32x64xf32>
    %307 = arith.mulf %300, %306 : vector<32x64xf32>
    %c8_214 = arith.constant 8 : index
    %c0_215 = arith.constant 0 : index
    %c0_216 = arith.constant 0 : index
    %308 = vector.load %arg5[%c8_214, %c0_215, %c0_216] : memref<24x32x32xbf16, #tpu.memory_space<vmem>>, vector<1x32x32xbf16>
    %309 = vector.shape_cast %308 : vector<1x32x32xbf16> to vector<32x32xbf16>
    %310 = arith.truncf %307 : vector<32x64xf32> to vector<32x64xbf16>
    %cst_217 = arith.constant dense<0.000000e+00> : vector<32x64xf32>
    %311 = tpu.matmul %309, %310, %cst_217 {dimension_numbers = #tpu.dot_dimension_numbers<[1], [0], [0], [1], [0, 0, 1, 1], [], []>} : vector<32x32xbf16>, vector<32x64xbf16>, vector<32x64xf32> -> vector<32x64xf32>
    %c8_218 = arith.constant 8 : index
    %c0_219 = arith.constant 0 : index
    %c0_220 = arith.constant 0 : index
    %312 = vector.load %arg6[%c8_218, %c0_219, %c0_220] : memref<24x32x1xf32, #tpu.memory_space<vmem>>, vector<1x32x1xf32>
    %313 = vector.shape_cast %312 : vector<1x32x1xf32> to vector<32x1xf32>
    %314 = vector.broadcast %313 : vector<32x1xf32> to vector<32x64xf32>
    %315 = arith.addf %311, %314 : vector<32x64xf32>
    %c0_221 = arith.constant 0 : index
    %c0_222 = arith.constant 0 : index
    %316 = vector.load %arg15[%c0_221, %c0_222] : memref<32x64xf32, #tpu.memory_space<vmem>>, vector<32x64xf32>
    %317 = arith.addf %316, %315 : vector<32x64xf32>
    %c0_223 = arith.constant 0 : index
    %c0_224 = arith.constant 0 : index
    %318 = vector.load %arg15[%c0_223, %c0_224] : memref<32x64xf32, #tpu.memory_space<vmem>>, vector<32x64xf32>
    tpu.vector_store %arg15[%c0_223, %c0_224], %317 {strides = array<i32>} : memref<32x64xf32, #tpu.memory_space<vmem>>, vector<32x64xf32>,
    %319 = arith.addf %289, %315 : vector<32x64xf32>
    %c0_225 = arith.constant 0 : index
    %c128_226 = arith.constant 128 : index
    %320 = vector.load %arg14[%c0_225, %c128_226] : memref<32x192xf32, #tpu.memory_space<vmem>>, vector<32x64xf32>
    tpu.vector_store %arg14[%c0_225, %c128_226], %319 {strides = array<i32>} : memref<32x192xf32, #tpu.memory_space<vmem>>, vector<32x64xf32>,
    %c0_227 = arith.constant 0 : index
    %c126_228 = arith.constant 126 : index
    %321 = vector.load %arg14[%c0_227, %c126_228] : memref<32x192xf32, #tpu.memory_space<vmem>>, vector<32x64xf32>
    %c0_229 = arith.constant 0 : index
    %c128_230 = arith.constant 128 : index
    %322 = vector.load %arg14[%c0_229, %c128_230] : memref<32x192xf32, #tpu.memory_space<vmem>>, vector<32x64xf32>
    %323 = tpu.concatenate %321, %322 in 0 : vector<32x64xf32>, vector<32x64xf32> -> vector<64x64xf32>
    %324 = arith.truncf %323 : vector<64x64xf32> to vector<64x64xbf16>
    %c9 = arith.constant 9 : index
    %c0_231 = arith.constant 0 : index
    %c0_232 = arith.constant 0 : index
    %325 = vector.load %arg3[%c9, %c0_231, %c0_232] : memref<24x64x64xbf16, #tpu.memory_space<vmem>>, vector<1x64x64xbf16>
    %326 = vector.shape_cast %325 : vector<1x64x64xbf16> to vector<64x64xbf16>
    %cst_233 = arith.constant dense<0.000000e+00> : vector<64x64xf32>
    %327 = tpu.matmul %326, %324, %cst_233 {dimension_numbers = #tpu.dot_dimension_numbers<[1], [0], [0], [1], [0, 0, 1, 1], [], []>} : vector<64x64xbf16>, vector<64x64xbf16>, vector<64x64xf32> -> vector<64x64xf32>
    %c9_234 = arith.constant 9 : index
    %c0_235 = arith.constant 0 : index
    %c0_236 = arith.constant 0 : index
    %328 = vector.load %arg4[%c9_234, %c0_235, %c0_236] : memref<24x64x1xf32, #tpu.memory_space<vmem>>, vector<1x64x1xf32>
    %329 = vector.shape_cast %328 : vector<1x64x1xf32> to vector<64x1xf32>
    %330 = vector.broadcast %329 : vector<64x1xf32> to vector<64x64xf32>
    %331 = arith.addf %327, %330 : vector<64x64xf32>
    %332 = vector.extract_strided_slice %331 {offsets = [0, 0], sizes = [32, 64], strides = [1, 1]} : vector<64x64xf32> to vector<32x64xf32>
    %333 = math.tanh %332 : vector<32x64xf32>
    %334 = vector.extract_strided_slice %331 {offsets = [32, 0], sizes = [32, 64], strides = [1, 1]} : vector<64x64xf32> to vector<32x64xf32>
    %335 = arith.negf %334 : vector<32x64xf32>
    %336 = math.exp %335 : vector<32x64xf32>
    %cst_237 = arith.constant 1.000000e+00 : f32
    %337 = vector.broadcast %cst_237 : f32 to vector<32x64xf32>
    %338 = arith.addf %337, %336 : vector<32x64xf32>
    %339 = arith.divf %337, %338 : vector<32x64xf32>
    %340 = arith.mulf %333, %339 : vector<32x64xf32>
    %c9_238 = arith.constant 9 : index
    %c0_239 = arith.constant 0 : index
    %c0_240 = arith.constant 0 : index
    %341 = vector.load %arg5[%c9_238, %c0_239, %c0_240] : memref<24x32x32xbf16, #tpu.memory_space<vmem>>, vector<1x32x32xbf16>
    %342 = vector.shape_cast %341 : vector<1x32x32xbf16> to vector<32x32xbf16>
    %343 = arith.truncf %340 : vector<32x64xf32> to vector<32x64xbf16>
    %cst_241 = arith.constant dense<0.000000e+00> : vector<32x64xf32>
    %344 = tpu.matmul %342, %343, %cst_241 {dimension_numbers = #tpu.dot_dimension_numbers<[1], [0], [0], [1], [0, 0, 1, 1], [], []>} : vector<32x32xbf16>, vector<32x64xbf16>, vector<32x64xf32> -> vector<32x64xf32>
    %c9_242 = arith.constant 9 : index
    %c0_243 = arith.constant 0 : index
    %c0_244 = arith.constant 0 : index
    %345 = vector.load %arg6[%c9_242, %c0_243, %c0_244] : memref<24x32x1xf32, #tpu.memory_space<vmem>>, vector<1x32x1xf32>
    %346 = vector.shape_cast %345 : vector<1x32x1xf32> to vector<32x1xf32>
    %347 = vector.broadcast %346 : vector<32x1xf32> to vector<32x64xf32>
    %348 = arith.addf %344, %347 : vector<32x64xf32>
    %c0_245 = arith.constant 0 : index
    %c0_246 = arith.constant 0 : index
    %349 = vector.load %arg15[%c0_245, %c0_246] : memref<32x64xf32, #tpu.memory_space<vmem>>, vector<32x64xf32>
    %350 = arith.addf %349, %348 : vector<32x64xf32>
    %c0_247 = arith.constant 0 : index
    %c0_248 = arith.constant 0 : index
    %351 = vector.load %arg15[%c0_247, %c0_248] : memref<32x64xf32, #tpu.memory_space<vmem>>, vector<32x64xf32>
    tpu.vector_store %arg15[%c0_247, %c0_248], %350 {strides = array<i32>} : memref<32x64xf32, #tpu.memory_space<vmem>>, vector<32x64xf32>,
    %352 = arith.addf %322, %348 : vector<32x64xf32>
    %c0_249 = arith.constant 0 : index
    %c128_250 = arith.constant 128 : index
    %353 = vector.load %arg14[%c0_249, %c128_250] : memref<32x192xf32, #tpu.memory_space<vmem>>, vector<32x64xf32>
    tpu.vector_store %arg14[%c0_249, %c128_250], %352 {strides = array<i32>} : memref<32x192xf32, #tpu.memory_space<vmem>>, vector<32x64xf32>,
    %c0_251 = arith.constant 0 : index
    %c124_252 = arith.constant 124 : index
    %354 = vector.load %arg14[%c0_251, %c124_252] : memref<32x192xf32, #tpu.memory_space<vmem>>, vector<32x64xf32>
    %c0_253 = arith.constant 0 : index
    %c128_254 = arith.constant 128 : index
    %355 = vector.load %arg14[%c0_253, %c128_254] : memref<32x192xf32, #tpu.memory_space<vmem>>, vector<32x64xf32>
    %356 = tpu.concatenate %354, %355 in 0 : vector<32x64xf32>, vector<32x64xf32> -> vector<64x64xf32>
    %357 = arith.truncf %356 : vector<64x64xf32> to vector<64x64xbf16>
    %c10 = arith.constant 10 : index
    %c0_255 = arith.constant 0 : index
    %c0_256 = arith.constant 0 : index
    %358 = vector.load %arg3[%c10, %c0_255, %c0_256] : memref<24x64x64xbf16, #tpu.memory_space<vmem>>, vector<1x64x64xbf16>
    %359 = vector.shape_cast %358 : vector<1x64x64xbf16> to vector<64x64xbf16>
    %cst_257 = arith.constant dense<0.000000e+00> : vector<64x64xf32>
    %360 = tpu.matmul %359, %357, %cst_257 {dimension_numbers = #tpu.dot_dimension_numbers<[1], [0], [0], [1], [0, 0, 1, 1], [], []>} : vector<64x64xbf16>, vector<64x64xbf16>, vector<64x64xf32> -> vector<64x64xf32>
    %c10_258 = arith.constant 10 : index
    %c0_259 = arith.constant 0 : index
    %c0_260 = arith.constant 0 : index
    %361 = vector.load %arg4[%c10_258, %c0_259, %c0_260] : memref<24x64x1xf32, #tpu.memory_space<vmem>>, vector<1x64x1xf32>
    %362 = vector.shape_cast %361 : vector<1x64x1xf32> to vector<64x1xf32>
    %363 = vector.broadcast %362 : vector<64x1xf32> to vector<64x64xf32>
    %364 = arith.addf %360, %363 : vector<64x64xf32>
    %365 = vector.extract_strided_slice %364 {offsets = [0, 0], sizes = [32, 64], strides = [1, 1]} : vector<64x64xf32> to vector<32x64xf32>
    %366 = math.tanh %365 : vector<32x64xf32>
    %367 = vector.extract_strided_slice %364 {offsets = [32, 0], sizes = [32, 64], strides = [1, 1]} : vector<64x64xf32> to vector<32x64xf32>
    %368 = arith.negf %367 : vector<32x64xf32>
    %369 = math.exp %368 : vector<32x64xf32>
    %cst_261 = arith.constant 1.000000e+00 : f32
    %370 = vector.broadcast %cst_261 : f32 to vector<32x64xf32>
    %371 = arith.addf %370, %369 : vector<32x64xf32>
    %372 = arith.divf %370, %371 : vector<32x64xf32>
    %373 = arith.mulf %366, %372 : vector<32x64xf32>
    %c10_262 = arith.constant 10 : index
    %c0_263 = arith.constant 0 : index
    %c0_264 = arith.constant 0 : index
    %374 = vector.load %arg5[%c10_262, %c0_263, %c0_264] : memref<24x32x32xbf16, #tpu.memory_space<vmem>>, vector<1x32x32xbf16>
    %375 = vector.shape_cast %374 : vector<1x32x32xbf16> to vector<32x32xbf16>
    %376 = arith.truncf %373 : vector<32x64xf32> to vector<32x64xbf16>
    %cst_265 = arith.constant dense<0.000000e+00> : vector<32x64xf32>
    %377 = tpu.matmul %375, %376, %cst_265 {dimension_numbers = #tpu.dot_dimension_numbers<[1], [0], [0], [1], [0, 0, 1, 1], [], []>} : vector<32x32xbf16>, vector<32x64xbf16>, vector<32x64xf32> -> vector<32x64xf32>
    %c10_266 = arith.constant 10 : index
    %c0_267 = arith.constant 0 : index
    %c0_268 = arith.constant 0 : index
    %378 = vector.load %arg6[%c10_266, %c0_267, %c0_268] : memref<24x32x1xf32, #tpu.memory_space<vmem>>, vector<1x32x1xf32>
    %379 = vector.shape_cast %378 : vector<1x32x1xf32> to vector<32x1xf32>
    %380 = vector.broadcast %379 : vector<32x1xf32> to vector<32x64xf32>
    %381 = arith.addf %377, %380 : vector<32x64xf32>
    %c0_269 = arith.constant 0 : index
    %c0_270 = arith.constant 0 : index
    %382 = vector.load %arg15[%c0_269, %c0_270] : memref<32x64xf32, #tpu.memory_space<vmem>>, vector<32x64xf32>
    %383 = arith.addf %382, %381 : vector<32x64xf32>
    %c0_271 = arith.constant 0 : index
    %c0_272 = arith.constant 0 : index
    %384 = vector.load %arg15[%c0_271, %c0_272] : memref<32x64xf32, #tpu.memory_space<vmem>>, vector<32x64xf32>
    tpu.vector_store %arg15[%c0_271, %c0_272], %383 {strides = array<i32>} : memref<32x64xf32, #tpu.memory_space<vmem>>, vector<32x64xf32>,
    %385 = arith.addf %355, %381 : vector<32x64xf32>
    %c0_273 = arith.constant 0 : index
    %c128_274 = arith.constant 128 : index
    %386 = vector.load %arg14[%c0_273, %c128_274] : memref<32x192xf32, #tpu.memory_space<vmem>>, vector<32x64xf32>
    tpu.vector_store %arg14[%c0_273, %c128_274], %385 {strides = array<i32>} : memref<32x192xf32, #tpu.memory_space<vmem>>, vector<32x64xf32>,
    %c0_275 = arith.constant 0 : index
    %c120_276 = arith.constant 120 : index
    %387 = vector.load %arg14[%c0_275, %c120_276] : memref<32x192xf32, #tpu.memory_space<vmem>>, vector<32x64xf32>
    %c0_277 = arith.constant 0 : index
    %c128_278 = arith.constant 128 : index
    %388 = vector.load %arg14[%c0_277, %c128_278] : memref<32x192xf32, #tpu.memory_space<vmem>>, vector<32x64xf32>
    %389 = tpu.concatenate %387, %388 in 0 : vector<32x64xf32>, vector<32x64xf32> -> vector<64x64xf32>
    %390 = arith.truncf %389 : vector<64x64xf32> to vector<64x64xbf16>
    %c11 = arith.constant 11 : index
    %c0_279 = arith.constant 0 : index
    %c0_280 = arith.constant 0 : index
    %391 = vector.load %arg3[%c11, %c0_279, %c0_280] : memref<24x64x64xbf16, #tpu.memory_space<vmem>>, vector<1x64x64xbf16>
    %392 = vector.shape_cast %391 : vector<1x64x64xbf16> to vector<64x64xbf16>
    %cst_281 = arith.constant dense<0.000000e+00> : vector<64x64xf32>
    %393 = tpu.matmul %392, %390, %cst_281 {dimension_numbers = #tpu.dot_dimension_numbers<[1], [0], [0], [1], [0, 0, 1, 1], [], []>} : vector<64x64xbf16>, vector<64x64xbf16>, vector<64x64xf32> -> vector<64x64xf32>
    %c11_282 = arith.constant 11 : index
    %c0_283 = arith.constant 0 : index
    %c0_284 = arith.constant 0 : index
    %394 = vector.load %arg4[%c11_282, %c0_283, %c0_284] : memref<24x64x1xf32, #tpu.memory_space<vmem>>, vector<1x64x1xf32>
    %395 = vector.shape_cast %394 : vector<1x64x1xf32> to vector<64x1xf32>
    %396 = vector.broadcast %395 : vector<64x1xf32> to vector<64x64xf32>
    %397 = arith.addf %393, %396 : vector<64x64xf32>
    %398 = vector.extract_strided_slice %397 {offsets = [0, 0], sizes = [32, 64], strides = [1, 1]} : vector<64x64xf32> to vector<32x64xf32>
    %399 = math.tanh %398 : vector<32x64xf32>
    %400 = vector.extract_strided_slice %397 {offsets = [32, 0], sizes = [32, 64], strides = [1, 1]} : vector<64x64xf32> to vector<32x64xf32>
    %401 = arith.negf %400 : vector<32x64xf32>
    %402 = math.exp %401 : vector<32x64xf32>
    %cst_285 = arith.constant 1.000000e+00 : f32
    %403 = vector.broadcast %cst_285 : f32 to vector<32x64xf32>
    %404 = arith.addf %403, %402 : vector<32x64xf32>
    %405 = arith.divf %403, %404 : vector<32x64xf32>
    %406 = arith.mulf %399, %405 : vector<32x64xf32>
    %c11_286 = arith.constant 11 : index
    %c0_287 = arith.constant 0 : index
    %c0_288 = arith.constant 0 : index
    %407 = vector.load %arg5[%c11_286, %c0_287, %c0_288] : memref<24x32x32xbf16, #tpu.memory_space<vmem>>, vector<1x32x32xbf16>
    %408 = vector.shape_cast %407 : vector<1x32x32xbf16> to vector<32x32xbf16>
    %409 = arith.truncf %406 : vector<32x64xf32> to vector<32x64xbf16>
    %cst_289 = arith.constant dense<0.000000e+00> : vector<32x64xf32>
    %410 = tpu.matmul %408, %409, %cst_289 {dimension_numbers = #tpu.dot_dimension_numbers<[1], [0], [0], [1], [0, 0, 1, 1], [], []>} : vector<32x32xbf16>, vector<32x64xbf16>, vector<32x64xf32> -> vector<32x64xf32>
    %c11_290 = arith.constant 11 : index
    %c0_291 = arith.constant 0 : index
    %c0_292 = arith.constant 0 : index
    %411 = vector.load %arg6[%c11_290, %c0_291, %c0_292] : memref<24x32x1xf32, #tpu.memory_space<vmem>>, vector<1x32x1xf32>
    %412 = vector.shape_cast %411 : vector<1x32x1xf32> to vector<32x1xf32>
    %413 = vector.broadcast %412 : vector<32x1xf32> to vector<32x64xf32>
    %414 = arith.addf %410, %413 : vector<32x64xf32>
    %c0_293 = arith.constant 0 : index
    %c0_294 = arith.constant 0 : index
    %415 = vector.load %arg15[%c0_293, %c0_294] : memref<32x64xf32, #tpu.memory_space<vmem>>, vector<32x64xf32>
    %416 = arith.addf %415, %414 : vector<32x64xf32>
    %c0_295 = arith.constant 0 : index
    %c0_296 = arith.constant 0 : index
    %417 = vector.load %arg15[%c0_295, %c0_296] : memref<32x64xf32, #tpu.memory_space<vmem>>, vector<32x64xf32>
    tpu.vector_store %arg15[%c0_295, %c0_296], %416 {strides = array<i32>} : memref<32x64xf32, #tpu.memory_space<vmem>>, vector<32x64xf32>,
    %418 = arith.addf %388, %414 : vector<32x64xf32>
    %c0_297 = arith.constant 0 : index
    %c128_298 = arith.constant 128 : index
    %419 = vector.load %arg14[%c0_297, %c128_298] : memref<32x192xf32, #tpu.memory_space<vmem>>, vector<32x64xf32>
    tpu.vector_store %arg14[%c0_297, %c128_298], %418 {strides = array<i32>} : memref<32x192xf32, #tpu.memory_space<vmem>>, vector<32x64xf32>,
    %c0_299 = arith.constant 0 : index
    %c112_300 = arith.constant 112 : index
    %420 = vector.load %arg14[%c0_299, %c112_300] : memref<32x192xf32, #tpu.memory_space<vmem>>, vector<32x64xf32>
    %c0_301 = arith.constant 0 : index
    %c128_302 = arith.constant 128 : index
    %421 = vector.load %arg14[%c0_301, %c128_302] : memref<32x192xf32, #tpu.memory_space<vmem>>, vector<32x64xf32>
    %422 = tpu.concatenate %420, %421 in 0 : vector<32x64xf32>, vector<32x64xf32> -> vector<64x64xf32>
    %423 = arith.truncf %422 : vector<64x64xf32> to vector<64x64xbf16>
    %c12 = arith.constant 12 : index
    %c0_303 = arith.constant 0 : index
    %c0_304 = arith.constant 0 : index
    %424 = vector.load %arg3[%c12, %c0_303, %c0_304] : memref<24x64x64xbf16, #tpu.memory_space<vmem>>, vector<1x64x64xbf16>
    %425 = vector.shape_cast %424 : vector<1x64x64xbf16> to vector<64x64xbf16>
    %cst_305 = arith.constant dense<0.000000e+00> : vector<64x64xf32>
    %426 = tpu.matmul %425, %423, %cst_305 {dimension_numbers = #tpu.dot_dimension_numbers<[1], [0], [0], [1], [0, 0, 1, 1], [], []>} : vector<64x64xbf16>, vector<64x64xbf16>, vector<64x64xf32> -> vector<64x64xf32>
    %c12_306 = arith.constant 12 : index
    %c0_307 = arith.constant 0 : index
    %c0_308 = arith.constant 0 : index
    %427 = vector.load %arg4[%c12_306, %c0_307, %c0_308] : memref<24x64x1xf32, #tpu.memory_space<vmem>>, vector<1x64x1xf32>
    %428 = vector.shape_cast %427 : vector<1x64x1xf32> to vector<64x1xf32>
    %429 = vector.broadcast %428 : vector<64x1xf32> to vector<64x64xf32>
    %430 = arith.addf %426, %429 : vector<64x64xf32>
    %431 = vector.extract_strided_slice %430 {offsets = [0, 0], sizes = [32, 64], strides = [1, 1]} : vector<64x64xf32> to vector<32x64xf32>
    %432 = math.tanh %431 : vector<32x64xf32>
    %433 = vector.extract_strided_slice %430 {offsets = [32, 0], sizes = [32, 64], strides = [1, 1]} : vector<64x64xf32> to vector<32x64xf32>
    %434 = arith.negf %433 : vector<32x64xf32>
    %435 = math.exp %434 : vector<32x64xf32>
    %cst_309 = arith.constant 1.000000e+00 : f32
    %436 = vector.broadcast %cst_309 : f32 to vector<32x64xf32>
    %437 = arith.addf %436, %435 : vector<32x64xf32>
    %438 = arith.divf %436, %437 : vector<32x64xf32>
    %439 = arith.mulf %432, %438 : vector<32x64xf32>
    %c12_310 = arith.constant 12 : index
    %c0_311 = arith.constant 0 : index
    %c0_312 = arith.constant 0 : index
    %440 = vector.load %arg5[%c12_310, %c0_311, %c0_312] : memref<24x32x32xbf16, #tpu.memory_space<vmem>>, vector<1x32x32xbf16>
    %441 = vector.shape_cast %440 : vector<1x32x32xbf16> to vector<32x32xbf16>
    %442 = arith.truncf %439 : vector<32x64xf32> to vector<32x64xbf16>
    %cst_313 = arith.constant dense<0.000000e+00> : vector<32x64xf32>
    %443 = tpu.matmul %441, %442, %cst_313 {dimension_numbers = #tpu.dot_dimension_numbers<[1], [0], [0], [1], [0, 0, 1, 1], [], []>} : vector<32x32xbf16>, vector<32x64xbf16>, vector<32x64xf32> -> vector<32x64xf32>
    %c12_314 = arith.constant 12 : index
    %c0_315 = arith.constant 0 : index
    %c0_316 = arith.constant 0 : index
    %444 = vector.load %arg6[%c12_314, %c0_315, %c0_316] : memref<24x32x1xf32, #tpu.memory_space<vmem>>, vector<1x32x1xf32>
    %445 = vector.shape_cast %444 : vector<1x32x1xf32> to vector<32x1xf32>
    %446 = vector.broadcast %445 : vector<32x1xf32> to vector<32x64xf32>
    %447 = arith.addf %443, %446 : vector<32x64xf32>
    %c0_317 = arith.constant 0 : index
    %c0_318 = arith.constant 0 : index
    %448 = vector.load %arg15[%c0_317, %c0_318] : memref<32x64xf32, #tpu.memory_space<vmem>>, vector<32x64xf32>
    %449 = arith.addf %448, %447 : vector<32x64xf32>
    %c0_319 = arith.constant 0 : index
    %c0_320 = arith.constant 0 : index
    %450 = vector.load %arg15[%c0_319, %c0_320] : memref<32x64xf32, #tpu.memory_space<vmem>>, vector<32x64xf32>
    tpu.vector_store %arg15[%c0_319, %c0_320], %449 {strides = array<i32>} : memref<32x64xf32, #tpu.memory_space<vmem>>, vector<32x64xf32>,
    %451 = arith.addf %421, %447 : vector<32x64xf32>
    %c0_321 = arith.constant 0 : index
    %c128_322 = arith.constant 128 : index
    %452 = vector.load %arg14[%c0_321, %c128_322] : memref<32x192xf32, #tpu.memory_space<vmem>>, vector<32x64xf32>
    tpu.vector_store %arg14[%c0_321, %c128_322], %451 {strides = array<i32>} : memref<32x192xf32, #tpu.memory_space<vmem>>, vector<32x64xf32>,
    %c0_323 = arith.constant 0 : index
    %c96_324 = arith.constant 96 : index
    %453 = vector.load %arg14[%c0_323, %c96_324] : memref<32x192xf32, #tpu.memory_space<vmem>>, vector<32x64xf32>
    %c0_325 = arith.constant 0 : index
    %c128_326 = arith.constant 128 : index
    %454 = vector.load %arg14[%c0_325, %c128_326] : memref<32x192xf32, #tpu.memory_space<vmem>>, vector<32x64xf32>
    %455 = tpu.concatenate %453, %454 in 0 : vector<32x64xf32>, vector<32x64xf32> -> vector<64x64xf32>
    %456 = arith.truncf %455 : vector<64x64xf32> to vector<64x64xbf16>
    %c13 = arith.constant 13 : index
    %c0_327 = arith.constant 0 : index
    %c0_328 = arith.constant 0 : index
    %457 = vector.load %arg3[%c13, %c0_327, %c0_328] : memref<24x64x64xbf16, #tpu.memory_space<vmem>>, vector<1x64x64xbf16>
    %458 = vector.shape_cast %457 : vector<1x64x64xbf16> to vector<64x64xbf16>
    %cst_329 = arith.constant dense<0.000000e+00> : vector<64x64xf32>
    %459 = tpu.matmul %458, %456, %cst_329 {dimension_numbers = #tpu.dot_dimension_numbers<[1], [0], [0], [1], [0, 0, 1, 1], [], []>} : vector<64x64xbf16>, vector<64x64xbf16>, vector<64x64xf32> -> vector<64x64xf32>
    %c13_330 = arith.constant 13 : index
    %c0_331 = arith.constant 0 : index
    %c0_332 = arith.constant 0 : index
    %460 = vector.load %arg4[%c13_330, %c0_331, %c0_332] : memref<24x64x1xf32, #tpu.memory_space<vmem>>, vector<1x64x1xf32>
    %461 = vector.shape_cast %460 : vector<1x64x1xf32> to vector<64x1xf32>
    %462 = vector.broadcast %461 : vector<64x1xf32> to vector<64x64xf32>
    %463 = arith.addf %459, %462 : vector<64x64xf32>
    %464 = vector.extract_strided_slice %463 {offsets = [0, 0], sizes = [32, 64], strides = [1, 1]} : vector<64x64xf32> to vector<32x64xf32>
    %465 = math.tanh %464 : vector<32x64xf32>
    %466 = vector.extract_strided_slice %463 {offsets = [32, 0], sizes = [32, 64], strides = [1, 1]} : vector<64x64xf32> to vector<32x64xf32>
    %467 = arith.negf %466 : vector<32x64xf32>
    %468 = math.exp %467 : vector<32x64xf32>
    %cst_333 = arith.constant 1.000000e+00 : f32
    %469 = vector.broadcast %cst_333 : f32 to vector<32x64xf32>
    %470 = arith.addf %469, %468 : vector<32x64xf32>
    %471 = arith.divf %469, %470 : vector<32x64xf32>
    %472 = arith.mulf %465, %471 : vector<32x64xf32>
    %c13_334 = arith.constant 13 : index
    %c0_335 = arith.constant 0 : index
    %c0_336 = arith.constant 0 : index
    %473 = vector.load %arg5[%c13_334, %c0_335, %c0_336] : memref<24x32x32xbf16, #tpu.memory_space<vmem>>, vector<1x32x32xbf16>
    %474 = vector.shape_cast %473 : vector<1x32x32xbf16> to vector<32x32xbf16>
    %475 = arith.truncf %472 : vector<32x64xf32> to vector<32x64xbf16>
    %cst_337 = arith.constant dense<0.000000e+00> : vector<32x64xf32>
    %476 = tpu.matmul %474, %475, %cst_337 {dimension_numbers = #tpu.dot_dimension_numbers<[1], [0], [0], [1], [0, 0, 1, 1], [], []>} : vector<32x32xbf16>, vector<32x64xbf16>, vector<32x64xf32> -> vector<32x64xf32>
    %c13_338 = arith.constant 13 : index
    %c0_339 = arith.constant 0 : index
    %c0_340 = arith.constant 0 : index
    %477 = vector.load %arg6[%c13_338, %c0_339, %c0_340] : memref<24x32x1xf32, #tpu.memory_space<vmem>>, vector<1x32x1xf32>
    %478 = vector.shape_cast %477 : vector<1x32x1xf32> to vector<32x1xf32>
    %479 = vector.broadcast %478 : vector<32x1xf32> to vector<32x64xf32>
    %480 = arith.addf %476, %479 : vector<32x64xf32>
    %c0_341 = arith.constant 0 : index
    %c0_342 = arith.constant 0 : index
    %481 = vector.load %arg15[%c0_341, %c0_342] : memref<32x64xf32, #tpu.memory_space<vmem>>, vector<32x64xf32>
    %482 = arith.addf %481, %480 : vector<32x64xf32>
    %c0_343 = arith.constant 0 : index
    %c0_344 = arith.constant 0 : index
    %483 = vector.load %arg15[%c0_343, %c0_344] : memref<32x64xf32, #tpu.memory_space<vmem>>, vector<32x64xf32>
    tpu.vector_store %arg15[%c0_343, %c0_344], %482 {strides = array<i32>} : memref<32x64xf32, #tpu.memory_space<vmem>>, vector<32x64xf32>,
    %484 = arith.addf %454, %480 : vector<32x64xf32>
    %c0_345 = arith.constant 0 : index
    %c128_346 = arith.constant 128 : index
    %485 = vector.load %arg14[%c0_345, %c128_346] : memref<32x192xf32, #tpu.memory_space<vmem>>, vector<32x64xf32>
    tpu.vector_store %arg14[%c0_345, %c128_346], %484 {strides = array<i32>} : memref<32x192xf32, #tpu.memory_space<vmem>>, vector<32x64xf32>,
    %c0_347 = arith.constant 0 : index
    %c64_348 = arith.constant 64 : index
    %486 = vector.load %arg14[%c0_347, %c64_348] : memref<32x192xf32, #tpu.memory_space<vmem>>, vector<32x64xf32>
    %c0_349 = arith.constant 0 : index
    %c128_350 = arith.constant 128 : index
    %487 = vector.load %arg14[%c0_349, %c128_350] : memref<32x192xf32, #tpu.memory_space<vmem>>, vector<32x64xf32>
    %488 = tpu.concatenate %486, %487 in 0 : vector<32x64xf32>, vector<32x64xf32> -> vector<64x64xf32>
    %489 = arith.truncf %488 : vector<64x64xf32> to vector<64x64xbf16>
    %c14 = arith.constant 14 : index
    %c0_351 = arith.constant 0 : index
    %c0_352 = arith.constant 0 : index
    %490 = vector.load %arg3[%c14, %c0_351, %c0_352] : memref<24x64x64xbf16, #tpu.memory_space<vmem>>, vector<1x64x64xbf16>
    %491 = vector.shape_cast %490 : vector<1x64x64xbf16> to vector<64x64xbf16>
    %cst_353 = arith.constant dense<0.000000e+00> : vector<64x64xf32>
    %492 = tpu.matmul %491, %489, %cst_353 {dimension_numbers = #tpu.dot_dimension_numbers<[1], [0], [0], [1], [0, 0, 1, 1], [], []>} : vector<64x64xbf16>, vector<64x64xbf16>, vector<64x64xf32> -> vector<64x64xf32>
    %c14_354 = arith.constant 14 : index
    %c0_355 = arith.constant 0 : index
    %c0_356 = arith.constant 0 : index
    %493 = vector.load %arg4[%c14_354, %c0_355, %c0_356] : memref<24x64x1xf32, #tpu.memory_space<vmem>>, vector<1x64x1xf32>
    %494 = vector.shape_cast %493 : vector<1x64x1xf32> to vector<64x1xf32>
    %495 = vector.broadcast %494 : vector<64x1xf32> to vector<64x64xf32>
    %496 = arith.addf %492, %495 : vector<64x64xf32>
    %497 = vector.extract_strided_slice %496 {offsets = [0, 0], sizes = [32, 64], strides = [1, 1]} : vector<64x64xf32> to vector<32x64xf32>
    %498 = math.tanh %497 : vector<32x64xf32>
    %499 = vector.extract_strided_slice %496 {offsets = [32, 0], sizes = [32, 64], strides = [1, 1]} : vector<64x64xf32> to vector<32x64xf32>
    %500 = arith.negf %499 : vector<32x64xf32>
    %501 = math.exp %500 : vector<32x64xf32>
    %cst_357 = arith.constant 1.000000e+00 : f32
    %502 = vector.broadcast %cst_357 : f32 to vector<32x64xf32>
    %503 = arith.addf %502, %501 : vector<32x64xf32>
    %504 = arith.divf %502, %503 : vector<32x64xf32>
    %505 = arith.mulf %498, %504 : vector<32x64xf32>
    %c14_358 = arith.constant 14 : index
    %c0_359 = arith.constant 0 : index
    %c0_360 = arith.constant 0 : index
    %506 = vector.load %arg5[%c14_358, %c0_359, %c0_360] : memref<24x32x32xbf16, #tpu.memory_space<vmem>>, vector<1x32x32xbf16>
    %507 = vector.shape_cast %506 : vector<1x32x32xbf16> to vector<32x32xbf16>
    %508 = arith.truncf %505 : vector<32x64xf32> to vector<32x64xbf16>
    %cst_361 = arith.constant dense<0.000000e+00> : vector<32x64xf32>
    %509 = tpu.matmul %507, %508, %cst_361 {dimension_numbers = #tpu.dot_dimension_numbers<[1], [0], [0], [1], [0, 0, 1, 1], [], []>} : vector<32x32xbf16>, vector<32x64xbf16>, vector<32x64xf32> -> vector<32x64xf32>
    %c14_362 = arith.constant 14 : index
    %c0_363 = arith.constant 0 : index
    %c0_364 = arith.constant 0 : index
    %510 = vector.load %arg6[%c14_362, %c0_363, %c0_364] : memref<24x32x1xf32, #tpu.memory_space<vmem>>, vector<1x32x1xf32>
    %511 = vector.shape_cast %510 : vector<1x32x1xf32> to vector<32x1xf32>
    %512 = vector.broadcast %511 : vector<32x1xf32> to vector<32x64xf32>
    %513 = arith.addf %509, %512 : vector<32x64xf32>
    %c0_365 = arith.constant 0 : index
    %c0_366 = arith.constant 0 : index
    %514 = vector.load %arg15[%c0_365, %c0_366] : memref<32x64xf32, #tpu.memory_space<vmem>>, vector<32x64xf32>
    %515 = arith.addf %514, %513 : vector<32x64xf32>
    %c0_367 = arith.constant 0 : index
    %c0_368 = arith.constant 0 : index
    %516 = vector.load %arg15[%c0_367, %c0_368] : memref<32x64xf32, #tpu.memory_space<vmem>>, vector<32x64xf32>
    tpu.vector_store %arg15[%c0_367, %c0_368], %515 {strides = array<i32>} : memref<32x64xf32, #tpu.memory_space<vmem>>, vector<32x64xf32>,
    %517 = arith.addf %487, %513 : vector<32x64xf32>
    %c0_369 = arith.constant 0 : index
    %c128_370 = arith.constant 128 : index
    %518 = vector.load %arg14[%c0_369, %c128_370] : memref<32x192xf32, #tpu.memory_space<vmem>>, vector<32x64xf32>
    tpu.vector_store %arg14[%c0_369, %c128_370], %517 {strides = array<i32>} : memref<32x192xf32, #tpu.memory_space<vmem>>, vector<32x64xf32>,
    %c0_371 = arith.constant 0 : index
    %c0_372 = arith.constant 0 : index
    %519 = vector.load %arg14[%c0_371, %c0_372] : memref<32x192xf32, #tpu.memory_space<vmem>>, vector<32x64xf32>
    %c0_373 = arith.constant 0 : index
    %c128_374 = arith.constant 128 : index
    %520 = vector.load %arg14[%c0_373, %c128_374] : memref<32x192xf32, #tpu.memory_space<vmem>>, vector<32x64xf32>
    %521 = tpu.concatenate %519, %520 in 0 : vector<32x64xf32>, vector<32x64xf32> -> vector<64x64xf32>
    %522 = arith.truncf %521 : vector<64x64xf32> to vector<64x64xbf16>
    %c15 = arith.constant 15 : index
    %c0_375 = arith.constant 0 : index
    %c0_376 = arith.constant 0 : index
    %523 = vector.load %arg3[%c15, %c0_375, %c0_376] : memref<24x64x64xbf16, #tpu.memory_space<vmem>>, vector<1x64x64xbf16>
    %524 = vector.shape_cast %523 : vector<1x64x64xbf16> to vector<64x64xbf16>
    %cst_377 = arith.constant dense<0.000000e+00> : vector<64x64xf32>
    %525 = tpu.matmul %524, %522, %cst_377 {dimension_numbers = #tpu.dot_dimension_numbers<[1], [0], [0], [1], [0, 0, 1, 1], [], []>} : vector<64x64xbf16>, vector<64x64xbf16>, vector<64x64xf32> -> vector<64x64xf32>
    %c15_378 = arith.constant 15 : index
    %c0_379 = arith.constant 0 : index
    %c0_380 = arith.constant 0 : index
    %526 = vector.load %arg4[%c15_378, %c0_379, %c0_380] : memref<24x64x1xf32, #tpu.memory_space<vmem>>, vector<1x64x1xf32>
    %527 = vector.shape_cast %526 : vector<1x64x1xf32> to vector<64x1xf32>
    %528 = vector.broadcast %527 : vector<64x1xf32> to vector<64x64xf32>
    %529 = arith.addf %525, %528 : vector<64x64xf32>
    %530 = vector.extract_strided_slice %529 {offsets = [0, 0], sizes = [32, 64], strides = [1, 1]} : vector<64x64xf32> to vector<32x64xf32>
    %531 = math.tanh %530 : vector<32x64xf32>
    %532 = vector.extract_strided_slice %529 {offsets = [32, 0], sizes = [32, 64], strides = [1, 1]} : vector<64x64xf32> to vector<32x64xf32>
    %533 = arith.negf %532 : vector<32x64xf32>
    %534 = math.exp %533 : vector<32x64xf32>
    %cst_381 = arith.constant 1.000000e+00 : f32
    %535 = vector.broadcast %cst_381 : f32 to vector<32x64xf32>
    %536 = arith.addf %535, %534 : vector<32x64xf32>
    %537 = arith.divf %535, %536 : vector<32x64xf32>
    %538 = arith.mulf %531, %537 : vector<32x64xf32>
    %c15_382 = arith.constant 15 : index
    %c0_383 = arith.constant 0 : index
    %c0_384 = arith.constant 0 : index
    %539 = vector.load %arg5[%c15_382, %c0_383, %c0_384] : memref<24x32x32xbf16, #tpu.memory_space<vmem>>, vector<1x32x32xbf16>
    %540 = vector.shape_cast %539 : vector<1x32x32xbf16> to vector<32x32xbf16>
    %541 = arith.truncf %538 : vector<32x64xf32> to vector<32x64xbf16>
    %cst_385 = arith.constant dense<0.000000e+00> : vector<32x64xf32>
    %542 = tpu.matmul %540, %541, %cst_385 {dimension_numbers = #tpu.dot_dimension_numbers<[1], [0], [0], [1], [0, 0, 1, 1], [], []>} : vector<32x32xbf16>, vector<32x64xbf16>, vector<32x64xf32> -> vector<32x64xf32>
    %c15_386 = arith.constant 15 : index
    %c0_387 = arith.constant 0 : index
    %c0_388 = arith.constant 0 : index
    %543 = vector.load %arg6[%c15_386, %c0_387, %c0_388] : memref<24x32x1xf32, #tpu.memory_space<vmem>>, vector<1x32x1xf32>
    %544 = vector.shape_cast %543 : vector<1x32x1xf32> to vector<32x1xf32>
    %545 = vector.broadcast %544 : vector<32x1xf32> to vector<32x64xf32>
    %546 = arith.addf %542, %545 : vector<32x64xf32>
    %c0_389 = arith.constant 0 : index
    %c0_390 = arith.constant 0 : index
    %547 = vector.load %arg15[%c0_389, %c0_390] : memref<32x64xf32, #tpu.memory_space<vmem>>, vector<32x64xf32>
    %548 = arith.addf %547, %546 : vector<32x64xf32>
    %c0_391 = arith.constant 0 : index
    %c0_392 = arith.constant 0 : index
    %549 = vector.load %arg15[%c0_391, %c0_392] : memref<32x64xf32, #tpu.memory_space<vmem>>, vector<32x64xf32>
    tpu.vector_store %arg15[%c0_391, %c0_392], %548 {strides = array<i32>} : memref<32x64xf32, #tpu.memory_space<vmem>>, vector<32x64xf32>,
    %550 = arith.addf %520, %546 : vector<32x64xf32>
    %c0_393 = arith.constant 0 : index
    %c128_394 = arith.constant 128 : index
    %551 = vector.load %arg14[%c0_393, %c128_394] : memref<32x192xf32, #tpu.memory_space<vmem>>, vector<32x64xf32>
    tpu.vector_store %arg14[%c0_393, %c128_394], %550 {strides = array<i32>} : memref<32x192xf32, #tpu.memory_space<vmem>>, vector<32x64xf32>,
    %c0_395 = arith.constant 0 : index
    %c127_396 = arith.constant 127 : index
    %552 = vector.load %arg14[%c0_395, %c127_396] : memref<32x192xf32, #tpu.memory_space<vmem>>, vector<32x64xf32>
    %c0_397 = arith.constant 0 : index
    %c128_398 = arith.constant 128 : index
    %553 = vector.load %arg14[%c0_397, %c128_398] : memref<32x192xf32, #tpu.memory_space<vmem>>, vector<32x64xf32>
    %554 = tpu.concatenate %552, %553 in 0 : vector<32x64xf32>, vector<32x64xf32> -> vector<64x64xf32>
    %555 = arith.truncf %554 : vector<64x64xf32> to vector<64x64xbf16>
    %c16 = arith.constant 16 : index
    %c0_399 = arith.constant 0 : index
    %c0_400 = arith.constant 0 : index
    %556 = vector.load %arg3[%c16, %c0_399, %c0_400] : memref<24x64x64xbf16, #tpu.memory_space<vmem>>, vector<1x64x64xbf16>
    %557 = vector.shape_cast %556 : vector<1x64x64xbf16> to vector<64x64xbf16>
    %cst_401 = arith.constant dense<0.000000e+00> : vector<64x64xf32>
    %558 = tpu.matmul %557, %555, %cst_401 {dimension_numbers = #tpu.dot_dimension_numbers<[1], [0], [0], [1], [0, 0, 1, 1], [], []>} : vector<64x64xbf16>, vector<64x64xbf16>, vector<64x64xf32> -> vector<64x64xf32>
    %c16_402 = arith.constant 16 : index
    %c0_403 = arith.constant 0 : index
    %c0_404 = arith.constant 0 : index
    %559 = vector.load %arg4[%c16_402, %c0_403, %c0_404] : memref<24x64x1xf32, #tpu.memory_space<vmem>>, vector<1x64x1xf32>
    %560 = vector.shape_cast %559 : vector<1x64x1xf32> to vector<64x1xf32>
    %561 = vector.broadcast %560 : vector<64x1xf32> to vector<64x64xf32>
    %562 = arith.addf %558, %561 : vector<64x64xf32>
    %563 = vector.extract_strided_slice %562 {offsets = [0, 0], sizes = [32, 64], strides = [1, 1]} : vector<64x64xf32> to vector<32x64xf32>
    %564 = math.tanh %563 : vector<32x64xf32>
    %565 = vector.extract_strided_slice %562 {offsets = [32, 0], sizes = [32, 64], strides = [1, 1]} : vector<64x64xf32> to vector<32x64xf32>
    %566 = arith.negf %565 : vector<32x64xf32>
    %567 = math.exp %566 : vector<32x64xf32>
    %cst_405 = arith.constant 1.000000e+00 : f32
    %568 = vector.broadcast %cst_405 : f32 to vector<32x64xf32>
    %569 = arith.addf %568, %567 : vector<32x64xf32>
    %570 = arith.divf %568, %569 : vector<32x64xf32>
    %571 = arith.mulf %564, %570 : vector<32x64xf32>
    %c16_406 = arith.constant 16 : index
    %c0_407 = arith.constant 0 : index
    %c0_408 = arith.constant 0 : index
    %572 = vector.load %arg5[%c16_406, %c0_407, %c0_408] : memref<24x32x32xbf16, #tpu.memory_space<vmem>>, vector<1x32x32xbf16>
    %573 = vector.shape_cast %572 : vector<1x32x32xbf16> to vector<32x32xbf16>
    %574 = arith.truncf %571 : vector<32x64xf32> to vector<32x64xbf16>
    %cst_409 = arith.constant dense<0.000000e+00> : vector<32x64xf32>
    %575 = tpu.matmul %573, %574, %cst_409 {dimension_numbers = #tpu.dot_dimension_numbers<[1], [0], [0], [1], [0, 0, 1, 1], [], []>} : vector<32x32xbf16>, vector<32x64xbf16>, vector<32x64xf32> -> vector<32x64xf32>
    %c16_410 = arith.constant 16 : index
    %c0_411 = arith.constant 0 : index
    %c0_412 = arith.constant 0 : index
    %576 = vector.load %arg6[%c16_410, %c0_411, %c0_412] : memref<24x32x1xf32, #tpu.memory_space<vmem>>, vector<1x32x1xf32>
    %577 = vector.shape_cast %576 : vector<1x32x1xf32> to vector<32x1xf32>
    %578 = vector.broadcast %577 : vector<32x1xf32> to vector<32x64xf32>
    %579 = arith.addf %575, %578 : vector<32x64xf32>
    %c0_413 = arith.constant 0 : index
    %c0_414 = arith.constant 0 : index
    %580 = vector.load %arg15[%c0_413, %c0_414] : memref<32x64xf32, #tpu.memory_space<vmem>>, vector<32x64xf32>
    %581 = arith.addf %580, %579 : vector<32x64xf32>
    %c0_415 = arith.constant 0 : index
    %c0_416 = arith.constant 0 : index
    %582 = vector.load %arg15[%c0_415, %c0_416] : memref<32x64xf32, #tpu.memory_space<vmem>>, vector<32x64xf32>
    tpu.vector_store %arg15[%c0_415, %c0_416], %581 {strides = array<i32>} : memref<32x64xf32, #tpu.memory_space<vmem>>, vector<32x64xf32>,
    %583 = arith.addf %553, %579 : vector<32x64xf32>
    %c0_417 = arith.constant 0 : index
    %c128_418 = arith.constant 128 : index
    %584 = vector.load %arg14[%c0_417, %c128_418] : memref<32x192xf32, #tpu.memory_space<vmem>>, vector<32x64xf32>
    tpu.vector_store %arg14[%c0_417, %c128_418], %583 {strides = array<i32>} : memref<32x192xf32, #tpu.memory_space<vmem>>, vector<32x64xf32>,
    %c0_419 = arith.constant 0 : index
    %c126_420 = arith.constant 126 : index
    %585 = vector.load %arg14[%c0_419, %c126_420] : memref<32x192xf32, #tpu.memory_space<vmem>>, vector<32x64xf32>
    %c0_421 = arith.constant 0 : index
    %c128_422 = arith.constant 128 : index
    %586 = vector.load %arg14[%c0_421, %c128_422] : memref<32x192xf32, #tpu.memory_space<vmem>>, vector<32x64xf32>
    %587 = tpu.concatenate %585, %586 in 0 : vector<32x64xf32>, vector<32x64xf32> -> vector<64x64xf32>
    %588 = arith.truncf %587 : vector<64x64xf32> to vector<64x64xbf16>
    %c17 = arith.constant 17 : index
    %c0_423 = arith.constant 0 : index
    %c0_424 = arith.constant 0 : index
    %589 = vector.load %arg3[%c17, %c0_423, %c0_424] : memref<24x64x64xbf16, #tpu.memory_space<vmem>>, vector<1x64x64xbf16>
    %590 = vector.shape_cast %589 : vector<1x64x64xbf16> to vector<64x64xbf16>
    %cst_425 = arith.constant dense<0.000000e+00> : vector<64x64xf32>
    %591 = tpu.matmul %590, %588, %cst_425 {dimension_numbers = #tpu.dot_dimension_numbers<[1], [0], [0], [1], [0, 0, 1, 1], [], []>} : vector<64x64xbf16>, vector<64x64xbf16>, vector<64x64xf32> -> vector<64x64xf32>
    %c17_426 = arith.constant 17 : index
    %c0_427 = arith.constant 0 : index
    %c0_428 = arith.constant 0 : index
    %592 = vector.load %arg4[%c17_426, %c0_427, %c0_428] : memref<24x64x1xf32, #tpu.memory_space<vmem>>, vector<1x64x1xf32>
    %593 = vector.shape_cast %592 : vector<1x64x1xf32> to vector<64x1xf32>
    %594 = vector.broadcast %593 : vector<64x1xf32> to vector<64x64xf32>
    %595 = arith.addf %591, %594 : vector<64x64xf32>
    %596 = vector.extract_strided_slice %595 {offsets = [0, 0], sizes = [32, 64], strides = [1, 1]} : vector<64x64xf32> to vector<32x64xf32>
    %597 = math.tanh %596 : vector<32x64xf32>
    %598 = vector.extract_strided_slice %595 {offsets = [32, 0], sizes = [32, 64], strides = [1, 1]} : vector<64x64xf32> to vector<32x64xf32>
    %599 = arith.negf %598 : vector<32x64xf32>
    %600 = math.exp %599 : vector<32x64xf32>
    %cst_429 = arith.constant 1.000000e+00 : f32
    %601 = vector.broadcast %cst_429 : f32 to vector<32x64xf32>
    %602 = arith.addf %601, %600 : vector<32x64xf32>
    %603 = arith.divf %601, %602 : vector<32x64xf32>
    %604 = arith.mulf %597, %603 : vector<32x64xf32>
    %c17_430 = arith.constant 17 : index
    %c0_431 = arith.constant 0 : index
    %c0_432 = arith.constant 0 : index
    %605 = vector.load %arg5[%c17_430, %c0_431, %c0_432] : memref<24x32x32xbf16, #tpu.memory_space<vmem>>, vector<1x32x32xbf16>
    %606 = vector.shape_cast %605 : vector<1x32x32xbf16> to vector<32x32xbf16>
    %607 = arith.truncf %604 : vector<32x64xf32> to vector<32x64xbf16>
    %cst_433 = arith.constant dense<0.000000e+00> : vector<32x64xf32>
    %608 = tpu.matmul %606, %607, %cst_433 {dimension_numbers = #tpu.dot_dimension_numbers<[1], [0], [0], [1], [0, 0, 1, 1], [], []>} : vector<32x32xbf16>, vector<32x64xbf16>, vector<32x64xf32> -> vector<32x64xf32>
    %c17_434 = arith.constant 17 : index
    %c0_435 = arith.constant 0 : index
    %c0_436 = arith.constant 0 : index
    %609 = vector.load %arg6[%c17_434, %c0_435, %c0_436] : memref<24x32x1xf32, #tpu.memory_space<vmem>>, vector<1x32x1xf32>
    %610 = vector.shape_cast %609 : vector<1x32x1xf32> to vector<32x1xf32>
    %611 = vector.broadcast %610 : vector<32x1xf32> to vector<32x64xf32>
    %612 = arith.addf %608, %611 : vector<32x64xf32>
    %c0_437 = arith.constant 0 : index
    %c0_438 = arith.constant 0 : index
    %613 = vector.load %arg15[%c0_437, %c0_438] : memref<32x64xf32, #tpu.memory_space<vmem>>, vector<32x64xf32>
    %614 = arith.addf %613, %612 : vector<32x64xf32>
    %c0_439 = arith.constant 0 : index
    %c0_440 = arith.constant 0 : index
    %615 = vector.load %arg15[%c0_439, %c0_440] : memref<32x64xf32, #tpu.memory_space<vmem>>, vector<32x64xf32>
    tpu.vector_store %arg15[%c0_439, %c0_440], %614 {strides = array<i32>} : memref<32x64xf32, #tpu.memory_space<vmem>>, vector<32x64xf32>,
    %616 = arith.addf %586, %612 : vector<32x64xf32>
    %c0_441 = arith.constant 0 : index
    %c128_442 = arith.constant 128 : index
    %617 = vector.load %arg14[%c0_441, %c128_442] : memref<32x192xf32, #tpu.memory_space<vmem>>, vector<32x64xf32>
    tpu.vector_store %arg14[%c0_441, %c128_442], %616 {strides = array<i32>} : memref<32x192xf32, #tpu.memory_space<vmem>>, vector<32x64xf32>,
    %c0_443 = arith.constant 0 : index
    %c124_444 = arith.constant 124 : index
    %618 = vector.load %arg14[%c0_443, %c124_444] : memref<32x192xf32, #tpu.memory_space<vmem>>, vector<32x64xf32>
    %c0_445 = arith.constant 0 : index
    %c128_446 = arith.constant 128 : index
    %619 = vector.load %arg14[%c0_445, %c128_446] : memref<32x192xf32, #tpu.memory_space<vmem>>, vector<32x64xf32>
    %620 = tpu.concatenate %618, %619 in 0 : vector<32x64xf32>, vector<32x64xf32> -> vector<64x64xf32>
    %621 = arith.truncf %620 : vector<64x64xf32> to vector<64x64xbf16>
    %c18 = arith.constant 18 : index
    %c0_447 = arith.constant 0 : index
    %c0_448 = arith.constant 0 : index
    %622 = vector.load %arg3[%c18, %c0_447, %c0_448] : memref<24x64x64xbf16, #tpu.memory_space<vmem>>, vector<1x64x64xbf16>
    %623 = vector.shape_cast %622 : vector<1x64x64xbf16> to vector<64x64xbf16>
    %cst_449 = arith.constant dense<0.000000e+00> : vector<64x64xf32>
    %624 = tpu.matmul %623, %621, %cst_449 {dimension_numbers = #tpu.dot_dimension_numbers<[1], [0], [0], [1], [0, 0, 1, 1], [], []>} : vector<64x64xbf16>, vector<64x64xbf16>, vector<64x64xf32> -> vector<64x64xf32>
    %c18_450 = arith.constant 18 : index
    %c0_451 = arith.constant 0 : index
    %c0_452 = arith.constant 0 : index
    %625 = vector.load %arg4[%c18_450, %c0_451, %c0_452] : memref<24x64x1xf32, #tpu.memory_space<vmem>>, vector<1x64x1xf32>
    %626 = vector.shape_cast %625 : vector<1x64x1xf32> to vector<64x1xf32>
    %627 = vector.broadcast %626 : vector<64x1xf32> to vector<64x64xf32>
    %628 = arith.addf %624, %627 : vector<64x64xf32>
    %629 = vector.extract_strided_slice %628 {offsets = [0, 0], sizes = [32, 64], strides = [1, 1]} : vector<64x64xf32> to vector<32x64xf32>
    %630 = math.tanh %629 : vector<32x64xf32>
    %631 = vector.extract_strided_slice %628 {offsets = [32, 0], sizes = [32, 64], strides = [1, 1]} : vector<64x64xf32> to vector<32x64xf32>
    %632 = arith.negf %631 : vector<32x64xf32>
    %633 = math.exp %632 : vector<32x64xf32>
    %cst_453 = arith.constant 1.000000e+00 : f32
    %634 = vector.broadcast %cst_453 : f32 to vector<32x64xf32>
    %635 = arith.addf %634, %633 : vector<32x64xf32>
    %636 = arith.divf %634, %635 : vector<32x64xf32>
    %637 = arith.mulf %630, %636 : vector<32x64xf32>
    %c18_454 = arith.constant 18 : index
    %c0_455 = arith.constant 0 : index
    %c0_456 = arith.constant 0 : index
    %638 = vector.load %arg5[%c18_454, %c0_455, %c0_456] : memref<24x32x32xbf16, #tpu.memory_space<vmem>>, vector<1x32x32xbf16>
    %639 = vector.shape_cast %638 : vector<1x32x32xbf16> to vector<32x32xbf16>
    %640 = arith.truncf %637 : vector<32x64xf32> to vector<32x64xbf16>
    %cst_457 = arith.constant dense<0.000000e+00> : vector<32x64xf32>
    %641 = tpu.matmul %639, %640, %cst_457 {dimension_numbers = #tpu.dot_dimension_numbers<[1], [0], [0], [1], [0, 0, 1, 1], [], []>} : vector<32x32xbf16>, vector<32x64xbf16>, vector<32x64xf32> -> vector<32x64xf32>
    %c18_458 = arith.constant 18 : index
    %c0_459 = arith.constant 0 : index
    %c0_460 = arith.constant 0 : index
    %642 = vector.load %arg6[%c18_458, %c0_459, %c0_460] : memref<24x32x1xf32, #tpu.memory_space<vmem>>, vector<1x32x1xf32>
    %643 = vector.shape_cast %642 : vector<1x32x1xf32> to vector<32x1xf32>
    %644 = vector.broadcast %643 : vector<32x1xf32> to vector<32x64xf32>
    %645 = arith.addf %641, %644 : vector<32x64xf32>
    %c0_461 = arith.constant 0 : index
    %c0_462 = arith.constant 0 : index
    %646 = vector.load %arg15[%c0_461, %c0_462] : memref<32x64xf32, #tpu.memory_space<vmem>>, vector<32x64xf32>
    %647 = arith.addf %646, %645 : vector<32x64xf32>
    %c0_463 = arith.constant 0 : index
    %c0_464 = arith.constant 0 : index
    %648 = vector.load %arg15[%c0_463, %c0_464] : memref<32x64xf32, #tpu.memory_space<vmem>>, vector<32x64xf32>
    tpu.vector_store %arg15[%c0_463, %c0_464], %647 {strides = array<i32>} : memref<32x64xf32, #tpu.memory_space<vmem>>, vector<32x64xf32>,
    %649 = arith.addf %619, %645 : vector<32x64xf32>
    %c0_465 = arith.constant 0 : index
    %c128_466 = arith.constant 128 : index
    %650 = vector.load %arg14[%c0_465, %c128_466] : memref<32x192xf32, #tpu.memory_space<vmem>>, vector<32x64xf32>
    tpu.vector_store %arg14[%c0_465, %c128_466], %649 {strides = array<i32>} : memref<32x192xf32, #tpu.memory_space<vmem>>, vector<32x64xf32>,
    %c0_467 = arith.constant 0 : index
    %c120_468 = arith.constant 120 : index
    %651 = vector.load %arg14[%c0_467, %c120_468] : memref<32x192xf32, #tpu.memory_space<vmem>>, vector<32x64xf32>
    %c0_469 = arith.constant 0 : index
    %c128_470 = arith.constant 128 : index
    %652 = vector.load %arg14[%c0_469, %c128_470] : memref<32x192xf32, #tpu.memory_space<vmem>>, vector<32x64xf32>
    %653 = tpu.concatenate %651, %652 in 0 : vector<32x64xf32>, vector<32x64xf32> -> vector<64x64xf32>
    %654 = arith.truncf %653 : vector<64x64xf32> to vector<64x64xbf16>
    %c19 = arith.constant 19 : index
    %c0_471 = arith.constant 0 : index
    %c0_472 = arith.constant 0 : index
    %655 = vector.load %arg3[%c19, %c0_471, %c0_472] : memref<24x64x64xbf16, #tpu.memory_space<vmem>>, vector<1x64x64xbf16>
    %656 = vector.shape_cast %655 : vector<1x64x64xbf16> to vector<64x64xbf16>
    %cst_473 = arith.constant dense<0.000000e+00> : vector<64x64xf32>
    %657 = tpu.matmul %656, %654, %cst_473 {dimension_numbers = #tpu.dot_dimension_numbers<[1], [0], [0], [1], [0, 0, 1, 1], [], []>} : vector<64x64xbf16>, vector<64x64xbf16>, vector<64x64xf32> -> vector<64x64xf32>
    %c19_474 = arith.constant 19 : index
    %c0_475 = arith.constant 0 : index
    %c0_476 = arith.constant 0 : index
    %658 = vector.load %arg4[%c19_474, %c0_475, %c0_476] : memref<24x64x1xf32, #tpu.memory_space<vmem>>, vector<1x64x1xf32>
    %659 = vector.shape_cast %658 : vector<1x64x1xf32> to vector<64x1xf32>
    %660 = vector.broadcast %659 : vector<64x1xf32> to vector<64x64xf32>
    %661 = arith.addf %657, %660 : vector<64x64xf32>
    %662 = vector.extract_strided_slice %661 {offsets = [0, 0], sizes = [32, 64], strides = [1, 1]} : vector<64x64xf32> to vector<32x64xf32>
    %663 = math.tanh %662 : vector<32x64xf32>
    %664 = vector.extract_strided_slice %661 {offsets = [32, 0], sizes = [32, 64], strides = [1, 1]} : vector<64x64xf32> to vector<32x64xf32>
    %665 = arith.negf %664 : vector<32x64xf32>
    %666 = math.exp %665 : vector<32x64xf32>
    %cst_477 = arith.constant 1.000000e+00 : f32
    %667 = vector.broadcast %cst_477 : f32 to vector<32x64xf32>
    %668 = arith.addf %667, %666 : vector<32x64xf32>
    %669 = arith.divf %667, %668 : vector<32x64xf32>
    %670 = arith.mulf %663, %669 : vector<32x64xf32>
    %c19_478 = arith.constant 19 : index
    %c0_479 = arith.constant 0 : index
    %c0_480 = arith.constant 0 : index
    %671 = vector.load %arg5[%c19_478, %c0_479, %c0_480] : memref<24x32x32xbf16, #tpu.memory_space<vmem>>, vector<1x32x32xbf16>
    %672 = vector.shape_cast %671 : vector<1x32x32xbf16> to vector<32x32xbf16>
    %673 = arith.truncf %670 : vector<32x64xf32> to vector<32x64xbf16>
    %cst_481 = arith.constant dense<0.000000e+00> : vector<32x64xf32>
    %674 = tpu.matmul %672, %673, %cst_481 {dimension_numbers = #tpu.dot_dimension_numbers<[1], [0], [0], [1], [0, 0, 1, 1], [], []>} : vector<32x32xbf16>, vector<32x64xbf16>, vector<32x64xf32> -> vector<32x64xf32>
    %c19_482 = arith.constant 19 : index
    %c0_483 = arith.constant 0 : index
    %c0_484 = arith.constant 0 : index
    %675 = vector.load %arg6[%c19_482, %c0_483, %c0_484] : memref<24x32x1xf32, #tpu.memory_space<vmem>>, vector<1x32x1xf32>
    %676 = vector.shape_cast %675 : vector<1x32x1xf32> to vector<32x1xf32>
    %677 = vector.broadcast %676 : vector<32x1xf32> to vector<32x64xf32>
    %678 = arith.addf %674, %677 : vector<32x64xf32>
    %c0_485 = arith.constant 0 : index
    %c0_486 = arith.constant 0 : index
    %679 = vector.load %arg15[%c0_485, %c0_486] : memref<32x64xf32, #tpu.memory_space<vmem>>, vector<32x64xf32>
    %680 = arith.addf %679, %678 : vector<32x64xf32>
    %c0_487 = arith.constant 0 : index
    %c0_488 = arith.constant 0 : index
    %681 = vector.load %arg15[%c0_487, %c0_488] : memref<32x64xf32, #tpu.memory_space<vmem>>, vector<32x64xf32>
    tpu.vector_store %arg15[%c0_487, %c0_488], %680 {strides = array<i32>} : memref<32x64xf32, #tpu.memory_space<vmem>>, vector<32x64xf32>,
    %682 = arith.addf %652, %678 : vector<32x64xf32>
    %c0_489 = arith.constant 0 : index
    %c128_490 = arith.constant 128 : index
    %683 = vector.load %arg14[%c0_489, %c128_490] : memref<32x192xf32, #tpu.memory_space<vmem>>, vector<32x64xf32>
    tpu.vector_store %arg14[%c0_489, %c128_490], %682 {strides = array<i32>} : memref<32x192xf32, #tpu.memory_space<vmem>>, vector<32x64xf32>,
    %c0_491 = arith.constant 0 : index
    %c112_492 = arith.constant 112 : index
    %684 = vector.load %arg14[%c0_491, %c112_492] : memref<32x192xf32, #tpu.memory_space<vmem>>, vector<32x64xf32>
    %c0_493 = arith.constant 0 : index
    %c128_494 = arith.constant 128 : index
    %685 = vector.load %arg14[%c0_493, %c128_494] : memref<32x192xf32, #tpu.memory_space<vmem>>, vector<32x64xf32>
    %686 = tpu.concatenate %684, %685 in 0 : vector<32x64xf32>, vector<32x64xf32> -> vector<64x64xf32>
    %687 = arith.truncf %686 : vector<64x64xf32> to vector<64x64xbf16>
    %c20 = arith.constant 20 : index
    %c0_495 = arith.constant 0 : index
    %c0_496 = arith.constant 0 : index
    %688 = vector.load %arg3[%c20, %c0_495, %c0_496] : memref<24x64x64xbf16, #tpu.memory_space<vmem>>, vector<1x64x64xbf16>
    %689 = vector.shape_cast %688 : vector<1x64x64xbf16> to vector<64x64xbf16>
    %cst_497 = arith.constant dense<0.000000e+00> : vector<64x64xf32>
    %690 = tpu.matmul %689, %687, %cst_497 {dimension_numbers = #tpu.dot_dimension_numbers<[1], [0], [0], [1], [0, 0, 1, 1], [], []>} : vector<64x64xbf16>, vector<64x64xbf16>, vector<64x64xf32> -> vector<64x64xf32>
    %c20_498 = arith.constant 20 : index
    %c0_499 = arith.constant 0 : index
    %c0_500 = arith.constant 0 : index
    %691 = vector.load %arg4[%c20_498, %c0_499, %c0_500] : memref<24x64x1xf32, #tpu.memory_space<vmem>>, vector<1x64x1xf32>
    %692 = vector.shape_cast %691 : vector<1x64x1xf32> to vector<64x1xf32>
    %693 = vector.broadcast %692 : vector<64x1xf32> to vector<64x64xf32>
    %694 = arith.addf %690, %693 : vector<64x64xf32>
    %695 = vector.extract_strided_slice %694 {offsets = [0, 0], sizes = [32, 64], strides = [1, 1]} : vector<64x64xf32> to vector<32x64xf32>
    %696 = math.tanh %695 : vector<32x64xf32>
    %697 = vector.extract_strided_slice %694 {offsets = [32, 0], sizes = [32, 64], strides = [1, 1]} : vector<64x64xf32> to vector<32x64xf32>
    %698 = arith.negf %697 : vector<32x64xf32>
    %699 = math.exp %698 : vector<32x64xf32>
    %cst_501 = arith.constant 1.000000e+00 : f32
    %700 = vector.broadcast %cst_501 : f32 to vector<32x64xf32>
    %701 = arith.addf %700, %699 : vector<32x64xf32>
    %702 = arith.divf %700, %701 : vector<32x64xf32>
    %703 = arith.mulf %696, %702 : vector<32x64xf32>
    %c20_502 = arith.constant 20 : index
    %c0_503 = arith.constant 0 : index
    %c0_504 = arith.constant 0 : index
    %704 = vector.load %arg5[%c20_502, %c0_503, %c0_504] : memref<24x32x32xbf16, #tpu.memory_space<vmem>>, vector<1x32x32xbf16>
    %705 = vector.shape_cast %704 : vector<1x32x32xbf16> to vector<32x32xbf16>
    %706 = arith.truncf %703 : vector<32x64xf32> to vector<32x64xbf16>
    %cst_505 = arith.constant dense<0.000000e+00> : vector<32x64xf32>
    %707 = tpu.matmul %705, %706, %cst_505 {dimension_numbers = #tpu.dot_dimension_numbers<[1], [0], [0], [1], [0, 0, 1, 1], [], []>} : vector<32x32xbf16>, vector<32x64xbf16>, vector<32x64xf32> -> vector<32x64xf32>
    %c20_506 = arith.constant 20 : index
    %c0_507 = arith.constant 0 : index
    %c0_508 = arith.constant 0 : index
    %708 = vector.load %arg6[%c20_506, %c0_507, %c0_508] : memref<24x32x1xf32, #tpu.memory_space<vmem>>, vector<1x32x1xf32>
    %709 = vector.shape_cast %708 : vector<1x32x1xf32> to vector<32x1xf32>
    %710 = vector.broadcast %709 : vector<32x1xf32> to vector<32x64xf32>
    %711 = arith.addf %707, %710 : vector<32x64xf32>
    %c0_509 = arith.constant 0 : index
    %c0_510 = arith.constant 0 : index
    %712 = vector.load %arg15[%c0_509, %c0_510] : memref<32x64xf32, #tpu.memory_space<vmem>>, vector<32x64xf32>
    %713 = arith.addf %712, %711 : vector<32x64xf32>
    %c0_511 = arith.constant 0 : index
    %c0_512 = arith.constant 0 : index
    %714 = vector.load %arg15[%c0_511, %c0_512] : memref<32x64xf32, #tpu.memory_space<vmem>>, vector<32x64xf32>
    tpu.vector_store %arg15[%c0_511, %c0_512], %713 {strides = array<i32>} : memref<32x64xf32, #tpu.memory_space<vmem>>, vector<32x64xf32>,
    %715 = arith.addf %685, %711 : vector<32x64xf32>
    %c0_513 = arith.constant 0 : index
    %c128_514 = arith.constant 128 : index
    %716 = vector.load %arg14[%c0_513, %c128_514] : memref<32x192xf32, #tpu.memory_space<vmem>>, vector<32x64xf32>
    tpu.vector_store %arg14[%c0_513, %c128_514], %715 {strides = array<i32>} : memref<32x192xf32, #tpu.memory_space<vmem>>, vector<32x64xf32>,
    %c0_515 = arith.constant 0 : index
    %c96_516 = arith.constant 96 : index
    %717 = vector.load %arg14[%c0_515, %c96_516] : memref<32x192xf32, #tpu.memory_space<vmem>>, vector<32x64xf32>
    %c0_517 = arith.constant 0 : index
    %c128_518 = arith.constant 128 : index
    %718 = vector.load %arg14[%c0_517, %c128_518] : memref<32x192xf32, #tpu.memory_space<vmem>>, vector<32x64xf32>
    %719 = tpu.concatenate %717, %718 in 0 : vector<32x64xf32>, vector<32x64xf32> -> vector<64x64xf32>
    %720 = arith.truncf %719 : vector<64x64xf32> to vector<64x64xbf16>
    %c21 = arith.constant 21 : index
    %c0_519 = arith.constant 0 : index
    %c0_520 = arith.constant 0 : index
    %721 = vector.load %arg3[%c21, %c0_519, %c0_520] : memref<24x64x64xbf16, #tpu.memory_space<vmem>>, vector<1x64x64xbf16>
    %722 = vector.shape_cast %721 : vector<1x64x64xbf16> to vector<64x64xbf16>
    %cst_521 = arith.constant dense<0.000000e+00> : vector<64x64xf32>
    %723 = tpu.matmul %722, %720, %cst_521 {dimension_numbers = #tpu.dot_dimension_numbers<[1], [0], [0], [1], [0, 0, 1, 1], [], []>} : vector<64x64xbf16>, vector<64x64xbf16>, vector<64x64xf32> -> vector<64x64xf32>
    %c21_522 = arith.constant 21 : index
    %c0_523 = arith.constant 0 : index
    %c0_524 = arith.constant 0 : index
    %724 = vector.load %arg4[%c21_522, %c0_523, %c0_524] : memref<24x64x1xf32, #tpu.memory_space<vmem>>, vector<1x64x1xf32>
    %725 = vector.shape_cast %724 : vector<1x64x1xf32> to vector<64x1xf32>
    %726 = vector.broadcast %725 : vector<64x1xf32> to vector<64x64xf32>
    %727 = arith.addf %723, %726 : vector<64x64xf32>
    %728 = vector.extract_strided_slice %727 {offsets = [0, 0], sizes = [32, 64], strides = [1, 1]} : vector<64x64xf32> to vector<32x64xf32>
    %729 = math.tanh %728 : vector<32x64xf32>
    %730 = vector.extract_strided_slice %727 {offsets = [32, 0], sizes = [32, 64], strides = [1, 1]} : vector<64x64xf32> to vector<32x64xf32>
    %731 = arith.negf %730 : vector<32x64xf32>
    %732 = math.exp %731 : vector<32x64xf32>
    %cst_525 = arith.constant 1.000000e+00 : f32
    %733 = vector.broadcast %cst_525 : f32 to vector<32x64xf32>
    %734 = arith.addf %733, %732 : vector<32x64xf32>
    %735 = arith.divf %733, %734 : vector<32x64xf32>
    %736 = arith.mulf %729, %735 : vector<32x64xf32>
    %c21_526 = arith.constant 21 : index
    %c0_527 = arith.constant 0 : index
    %c0_528 = arith.constant 0 : index
    %737 = vector.load %arg5[%c21_526, %c0_527, %c0_528] : memref<24x32x32xbf16, #tpu.memory_space<vmem>>, vector<1x32x32xbf16>
    %738 = vector.shape_cast %737 : vector<1x32x32xbf16> to vector<32x32xbf16>
    %739 = arith.truncf %736 : vector<32x64xf32> to vector<32x64xbf16>
    %cst_529 = arith.constant dense<0.000000e+00> : vector<32x64xf32>
    %740 = tpu.matmul %738, %739, %cst_529 {dimension_numbers = #tpu.dot_dimension_numbers<[1], [0], [0], [1], [0, 0, 1, 1], [], []>} : vector<32x32xbf16>, vector<32x64xbf16>, vector<32x64xf32> -> vector<32x64xf32>
    %c21_530 = arith.constant 21 : index
    %c0_531 = arith.constant 0 : index
    %c0_532 = arith.constant 0 : index
    %741 = vector.load %arg6[%c21_530, %c0_531, %c0_532] : memref<24x32x1xf32, #tpu.memory_space<vmem>>, vector<1x32x1xf32>
    %742 = vector.shape_cast %741 : vector<1x32x1xf32> to vector<32x1xf32>
    %743 = vector.broadcast %742 : vector<32x1xf32> to vector<32x64xf32>
    %744 = arith.addf %740, %743 : vector<32x64xf32>
    %c0_533 = arith.constant 0 : index
    %c0_534 = arith.constant 0 : index
    %745 = vector.load %arg15[%c0_533, %c0_534] : memref<32x64xf32, #tpu.memory_space<vmem>>, vector<32x64xf32>
    %746 = arith.addf %745, %744 : vector<32x64xf32>
    %c0_535 = arith.constant 0 : index
    %c0_536 = arith.constant 0 : index
    %747 = vector.load %arg15[%c0_535, %c0_536] : memref<32x64xf32, #tpu.memory_space<vmem>>, vector<32x64xf32>
    tpu.vector_store %arg15[%c0_535, %c0_536], %746 {strides = array<i32>} : memref<32x64xf32, #tpu.memory_space<vmem>>, vector<32x64xf32>,
    %748 = arith.addf %718, %744 : vector<32x64xf32>
    %c0_537 = arith.constant 0 : index
    %c128_538 = arith.constant 128 : index
    %749 = vector.load %arg14[%c0_537, %c128_538] : memref<32x192xf32, #tpu.memory_space<vmem>>, vector<32x64xf32>
    tpu.vector_store %arg14[%c0_537, %c128_538], %748 {strides = array<i32>} : memref<32x192xf32, #tpu.memory_space<vmem>>, vector<32x64xf32>,
    %c0_539 = arith.constant 0 : index
    %c64_540 = arith.constant 64 : index
    %750 = vector.load %arg14[%c0_539, %c64_540] : memref<32x192xf32, #tpu.memory_space<vmem>>, vector<32x64xf32>
    %c0_541 = arith.constant 0 : index
    %c128_542 = arith.constant 128 : index
    %751 = vector.load %arg14[%c0_541, %c128_542] : memref<32x192xf32, #tpu.memory_space<vmem>>, vector<32x64xf32>
    %752 = tpu.concatenate %750, %751 in 0 : vector<32x64xf32>, vector<32x64xf32> -> vector<64x64xf32>
    %753 = arith.truncf %752 : vector<64x64xf32> to vector<64x64xbf16>
    %c22 = arith.constant 22 : index
    %c0_543 = arith.constant 0 : index
    %c0_544 = arith.constant 0 : index
    %754 = vector.load %arg3[%c22, %c0_543, %c0_544] : memref<24x64x64xbf16, #tpu.memory_space<vmem>>, vector<1x64x64xbf16>
    %755 = vector.shape_cast %754 : vector<1x64x64xbf16> to vector<64x64xbf16>
    %cst_545 = arith.constant dense<0.000000e+00> : vector<64x64xf32>
    %756 = tpu.matmul %755, %753, %cst_545 {dimension_numbers = #tpu.dot_dimension_numbers<[1], [0], [0], [1], [0, 0, 1, 1], [], []>} : vector<64x64xbf16>, vector<64x64xbf16>, vector<64x64xf32> -> vector<64x64xf32>
    %c22_546 = arith.constant 22 : index
    %c0_547 = arith.constant 0 : index
    %c0_548 = arith.constant 0 : index
    %757 = vector.load %arg4[%c22_546, %c0_547, %c0_548] : memref<24x64x1xf32, #tpu.memory_space<vmem>>, vector<1x64x1xf32>
    %758 = vector.shape_cast %757 : vector<1x64x1xf32> to vector<64x1xf32>
    %759 = vector.broadcast %758 : vector<64x1xf32> to vector<64x64xf32>
    %760 = arith.addf %756, %759 : vector<64x64xf32>
    %761 = vector.extract_strided_slice %760 {offsets = [0, 0], sizes = [32, 64], strides = [1, 1]} : vector<64x64xf32> to vector<32x64xf32>
    %762 = math.tanh %761 : vector<32x64xf32>
    %763 = vector.extract_strided_slice %760 {offsets = [32, 0], sizes = [32, 64], strides = [1, 1]} : vector<64x64xf32> to vector<32x64xf32>
    %764 = arith.negf %763 : vector<32x64xf32>
    %765 = math.exp %764 : vector<32x64xf32>
    %cst_549 = arith.constant 1.000000e+00 : f32
    %766 = vector.broadcast %cst_549 : f32 to vector<32x64xf32>
    %767 = arith.addf %766, %765 : vector<32x64xf32>
    %768 = arith.divf %766, %767 : vector<32x64xf32>
    %769 = arith.mulf %762, %768 : vector<32x64xf32>
    %c22_550 = arith.constant 22 : index
    %c0_551 = arith.constant 0 : index
    %c0_552 = arith.constant 0 : index
    %770 = vector.load %arg5[%c22_550, %c0_551, %c0_552] : memref<24x32x32xbf16, #tpu.memory_space<vmem>>, vector<1x32x32xbf16>
    %771 = vector.shape_cast %770 : vector<1x32x32xbf16> to vector<32x32xbf16>
    %772 = arith.truncf %769 : vector<32x64xf32> to vector<32x64xbf16>
    %cst_553 = arith.constant dense<0.000000e+00> : vector<32x64xf32>
    %773 = tpu.matmul %771, %772, %cst_553 {dimension_numbers = #tpu.dot_dimension_numbers<[1], [0], [0], [1], [0, 0, 1, 1], [], []>} : vector<32x32xbf16>, vector<32x64xbf16>, vector<32x64xf32> -> vector<32x64xf32>
    %c22_554 = arith.constant 22 : index
    %c0_555 = arith.constant 0 : index
    %c0_556 = arith.constant 0 : index
    %774 = vector.load %arg6[%c22_554, %c0_555, %c0_556] : memref<24x32x1xf32, #tpu.memory_space<vmem>>, vector<1x32x1xf32>
    %775 = vector.shape_cast %774 : vector<1x32x1xf32> to vector<32x1xf32>
    %776 = vector.broadcast %775 : vector<32x1xf32> to vector<32x64xf32>
    %777 = arith.addf %773, %776 : vector<32x64xf32>
    %c0_557 = arith.constant 0 : index
    %c0_558 = arith.constant 0 : index
    %778 = vector.load %arg15[%c0_557, %c0_558] : memref<32x64xf32, #tpu.memory_space<vmem>>, vector<32x64xf32>
    %779 = arith.addf %778, %777 : vector<32x64xf32>
    %c0_559 = arith.constant 0 : index
    %c0_560 = arith.constant 0 : index
    %780 = vector.load %arg15[%c0_559, %c0_560] : memref<32x64xf32, #tpu.memory_space<vmem>>, vector<32x64xf32>
    tpu.vector_store %arg15[%c0_559, %c0_560], %779 {strides = array<i32>} : memref<32x64xf32, #tpu.memory_space<vmem>>, vector<32x64xf32>,
    %781 = arith.addf %751, %777 : vector<32x64xf32>
    %c0_561 = arith.constant 0 : index
    %c128_562 = arith.constant 128 : index
    %782 = vector.load %arg14[%c0_561, %c128_562] : memref<32x192xf32, #tpu.memory_space<vmem>>, vector<32x64xf32>
    tpu.vector_store %arg14[%c0_561, %c128_562], %781 {strides = array<i32>} : memref<32x192xf32, #tpu.memory_space<vmem>>, vector<32x64xf32>,
    %c0_563 = arith.constant 0 : index
    %c0_564 = arith.constant 0 : index
    %783 = vector.load %arg14[%c0_563, %c0_564] : memref<32x192xf32, #tpu.memory_space<vmem>>, vector<32x64xf32>
    %c0_565 = arith.constant 0 : index
    %c128_566 = arith.constant 128 : index
    %784 = vector.load %arg14[%c0_565, %c128_566] : memref<32x192xf32, #tpu.memory_space<vmem>>, vector<32x64xf32>
    %785 = tpu.concatenate %783, %784 in 0 : vector<32x64xf32>, vector<32x64xf32> -> vector<64x64xf32>
    %786 = arith.truncf %785 : vector<64x64xf32> to vector<64x64xbf16>
    %c23 = arith.constant 23 : index
    %c0_567 = arith.constant 0 : index
    %c0_568 = arith.constant 0 : index
    %787 = vector.load %arg3[%c23, %c0_567, %c0_568] : memref<24x64x64xbf16, #tpu.memory_space<vmem>>, vector<1x64x64xbf16>
    %788 = vector.shape_cast %787 : vector<1x64x64xbf16> to vector<64x64xbf16>
    %cst_569 = arith.constant dense<0.000000e+00> : vector<64x64xf32>
    %789 = tpu.matmul %788, %786, %cst_569 {dimension_numbers = #tpu.dot_dimension_numbers<[1], [0], [0], [1], [0, 0, 1, 1], [], []>} : vector<64x64xbf16>, vector<64x64xbf16>, vector<64x64xf32> -> vector<64x64xf32>
    %c23_570 = arith.constant 23 : index
    %c0_571 = arith.constant 0 : index
    %c0_572 = arith.constant 0 : index
    %790 = vector.load %arg4[%c23_570, %c0_571, %c0_572] : memref<24x64x1xf32, #tpu.memory_space<vmem>>, vector<1x64x1xf32>
    %791 = vector.shape_cast %790 : vector<1x64x1xf32> to vector<64x1xf32>
    %792 = vector.broadcast %791 : vector<64x1xf32> to vector<64x64xf32>
    %793 = arith.addf %789, %792 : vector<64x64xf32>
    %794 = vector.extract_strided_slice %793 {offsets = [0, 0], sizes = [32, 64], strides = [1, 1]} : vector<64x64xf32> to vector<32x64xf32>
    %795 = math.tanh %794 : vector<32x64xf32>
    %796 = vector.extract_strided_slice %793 {offsets = [32, 0], sizes = [32, 64], strides = [1, 1]} : vector<64x64xf32> to vector<32x64xf32>
    %797 = arith.negf %796 : vector<32x64xf32>
    %798 = math.exp %797 : vector<32x64xf32>
    %cst_573 = arith.constant 1.000000e+00 : f32
    %799 = vector.broadcast %cst_573 : f32 to vector<32x64xf32>
    %800 = arith.addf %799, %798 : vector<32x64xf32>
    %801 = arith.divf %799, %800 : vector<32x64xf32>
    %802 = arith.mulf %795, %801 : vector<32x64xf32>
    %c23_574 = arith.constant 23 : index
    %c0_575 = arith.constant 0 : index
    %c0_576 = arith.constant 0 : index
    %803 = vector.load %arg5[%c23_574, %c0_575, %c0_576] : memref<24x32x32xbf16, #tpu.memory_space<vmem>>, vector<1x32x32xbf16>
    %804 = vector.shape_cast %803 : vector<1x32x32xbf16> to vector<32x32xbf16>
    %805 = arith.truncf %802 : vector<32x64xf32> to vector<32x64xbf16>
    %cst_577 = arith.constant dense<0.000000e+00> : vector<32x64xf32>
    %806 = tpu.matmul %804, %805, %cst_577 {dimension_numbers = #tpu.dot_dimension_numbers<[1], [0], [0], [1], [0, 0, 1, 1], [], []>} : vector<32x32xbf16>, vector<32x64xbf16>, vector<32x64xf32> -> vector<32x64xf32>
    %c23_578 = arith.constant 23 : index
    %c0_579 = arith.constant 0 : index
    %c0_580 = arith.constant 0 : index
    %807 = vector.load %arg6[%c23_578, %c0_579, %c0_580] : memref<24x32x1xf32, #tpu.memory_space<vmem>>, vector<1x32x1xf32>
    %808 = vector.shape_cast %807 : vector<1x32x1xf32> to vector<32x1xf32>
    %809 = vector.broadcast %808 : vector<32x1xf32> to vector<32x64xf32>
    %810 = arith.addf %806, %809 : vector<32x64xf32>
    %c0_581 = arith.constant 0 : index
    %c0_582 = arith.constant 0 : index
    %811 = vector.load %arg15[%c0_581, %c0_582] : memref<32x64xf32, #tpu.memory_space<vmem>>, vector<32x64xf32>
    %812 = arith.addf %811, %810 : vector<32x64xf32>
    %c0_583 = arith.constant 0 : index
    %c0_584 = arith.constant 0 : index
    %813 = vector.load %arg15[%c0_583, %c0_584] : memref<32x64xf32, #tpu.memory_space<vmem>>, vector<32x64xf32>
    tpu.vector_store %arg15[%c0_583, %c0_584], %812 {strides = array<i32>} : memref<32x64xf32, #tpu.memory_space<vmem>>, vector<32x64xf32>,
    %814 = arith.addf %784, %810 : vector<32x64xf32>
    %c0_585 = arith.constant 0 : index
    %c128_586 = arith.constant 128 : index
    %815 = vector.load %arg14[%c0_585, %c128_586] : memref<32x192xf32, #tpu.memory_space<vmem>>, vector<32x64xf32>
    tpu.vector_store %arg14[%c0_585, %c128_586], %814 {strides = array<i32>} : memref<32x192xf32, #tpu.memory_space<vmem>>, vector<32x64xf32>,
    %c0_587 = arith.constant 0 : index
    %c0_588 = arith.constant 0 : index
    %816 = vector.load %arg15[%c0_587, %c0_588] : memref<32x64xf32, #tpu.memory_space<vmem>>, vector<32x64xf32>
    %cst_589 = arith.constant 0.000000e+00 : f32
    %817 = vector.broadcast %cst_589 : f32 to vector<32x64xf32>
    %818 = arith.maximumf %816, %817 : vector<32x64xf32>
    %c0_590 = arith.constant 0 : index
    %c0_591 = arith.constant 0 : index
    %819 = vector.load %arg7[%c0_590, %c0_591] : memref<32x32xbf16, #tpu.memory_space<vmem>>, vector<32x32xbf16>
    %820 = arith.truncf %818 : vector<32x64xf32> to vector<32x64xbf16>
    %cst_592 = arith.constant dense<0.000000e+00> : vector<32x64xf32>
    %821 = tpu.matmul %819, %820, %cst_592 {dimension_numbers = #tpu.dot_dimension_numbers<[1], [0], [0], [1], [0, 0, 1, 1], [], []>} : vector<32x32xbf16>, vector<32x64xbf16>, vector<32x64xf32> -> vector<32x64xf32>
    %c0_593 = arith.constant 0 : index
    %c0_594 = arith.constant 0 : index
    %822 = vector.load %arg8[%c0_593, %c0_594] : memref<32x1xf32, #tpu.memory_space<vmem>>, vector<32x1xf32>
    %823 = vector.broadcast %822 : vector<32x1xf32> to vector<32x64xf32>
    %824 = arith.addf %821, %823 : vector<32x64xf32>
    %cst_595 = arith.constant 0.000000e+00 : f32
    %825 = vector.broadcast %cst_595 : f32 to vector<32x64xf32>
    %826 = arith.maximumf %824, %825 : vector<32x64xf32>
    %c0_596 = arith.constant 0 : index
    %c0_597 = arith.constant 0 : index
    %827 = vector.load %arg10[%c0_596, %c0_597] : memref<64x1xf32, #tpu.memory_space<vmem>>, vector<64x1xf32>
    %828 = vector.extract_strided_slice %826 {offsets = [0, 0], sizes = [32, 16], strides = [1, 1]} : vector<32x64xf32> to vector<32x16xf32>
    %cst_598 = arith.constant dense<0xFF800000> : vector<32xf32>
    %829 = vector.multi_reduction <maximumf>, %828, %cst_598 [1] : vector<32x16xf32> to vector<32xf32>
    %830 = vector.shape_cast %829 : vector<32xf32> to vector<32x1xf32>
    %c0_599 = arith.constant 0 : index
    %c0_600 = arith.constant 0 : index
    %c0_601 = arith.constant 0 : index
    %831 = vector.load %arg9[%c0_599, %c0_600, %c0_601] : memref<4x64x32xf32, #tpu.memory_space<vmem>>, vector<1x64x32xf32>
    %832 = vector.shape_cast %831 : vector<1x64x32xf32> to vector<64x32xf32>
    %cst_602 = arith.constant dense<0.000000e+00> : vector<64x1xf32>
    %833 = tpu.matmul %832, %830, %cst_602 {dimension_numbers = #tpu.dot_dimension_numbers<[1], [0], [0], [1], [0, 0, 1, 1], [], []>} : vector<64x32xf32>, vector<32x1xf32>, vector<64x1xf32> -> vector<64x1xf32>
    %834 = arith.addf %827, %833 : vector<64x1xf32>
    %835 = vector.extract_strided_slice %826 {offsets = [0, 16], sizes = [32, 16], strides = [1, 1]} : vector<32x64xf32> to vector<32x16xf32>
    %cst_603 = arith.constant dense<0xFF800000> : vector<32xf32>
    %836 = vector.multi_reduction <maximumf>, %835, %cst_603 [1] : vector<32x16xf32> to vector<32xf32>
    %837 = vector.shape_cast %836 : vector<32xf32> to vector<32x1xf32>
    %c1_604 = arith.constant 1 : index
    %c0_605 = arith.constant 0 : index
    %c0_606 = arith.constant 0 : index
    %838 = vector.load %arg9[%c1_604, %c0_605, %c0_606] : memref<4x64x32xf32, #tpu.memory_space<vmem>>, vector<1x64x32xf32>
    %839 = vector.shape_cast %838 : vector<1x64x32xf32> to vector<64x32xf32>
    %cst_607 = arith.constant dense<0.000000e+00> : vector<64x1xf32>
    %840 = tpu.matmul %839, %837, %cst_607 {dimension_numbers = #tpu.dot_dimension_numbers<[1], [0], [0], [1], [0, 0, 1, 1], [], []>} : vector<64x32xf32>, vector<32x1xf32>, vector<64x1xf32> -> vector<64x1xf32>
    %841 = arith.addf %834, %840 : vector<64x1xf32>
    %842 = vector.extract_strided_slice %826 {offsets = [0, 32], sizes = [32, 16], strides = [1, 1]} : vector<32x64xf32> to vector<32x16xf32>
    %cst_608 = arith.constant dense<0xFF800000> : vector<32xf32>
    %843 = vector.multi_reduction <maximumf>, %842, %cst_608 [1] : vector<32x16xf32> to vector<32xf32>
    %844 = vector.shape_cast %843 : vector<32xf32> to vector<32x1xf32>
    %c2_609 = arith.constant 2 : index
    %c0_610 = arith.constant 0 : index
    %c0_611 = arith.constant 0 : index
    %845 = vector.load %arg9[%c2_609, %c0_610, %c0_611] : memref<4x64x32xf32, #tpu.memory_space<vmem>>, vector<1x64x32xf32>
    %846 = vector.shape_cast %845 : vector<1x64x32xf32> to vector<64x32xf32>
    %cst_612 = arith.constant dense<0.000000e+00> : vector<64x1xf32>
    %847 = tpu.matmul %846, %844, %cst_612 {dimension_numbers = #tpu.dot_dimension_numbers<[1], [0], [0], [1], [0, 0, 1, 1], [], []>} : vector<64x32xf32>, vector<32x1xf32>, vector<64x1xf32> -> vector<64x1xf32>
    %848 = arith.addf %841, %847 : vector<64x1xf32>
    %849 = vector.extract_strided_slice %826 {offsets = [0, 48], sizes = [32, 16], strides = [1, 1]} : vector<32x64xf32> to vector<32x16xf32>
    %cst_613 = arith.constant dense<0xFF800000> : vector<32xf32>
    %850 = vector.multi_reduction <maximumf>, %849, %cst_613 [1] : vector<32x16xf32> to vector<32xf32>
    %851 = vector.shape_cast %850 : vector<32xf32> to vector<32x1xf32>
    %c3_614 = arith.constant 3 : index
    %c0_615 = arith.constant 0 : index
    %c0_616 = arith.constant 0 : index
    %852 = vector.load %arg9[%c3_614, %c0_615, %c0_616] : memref<4x64x32xf32, #tpu.memory_space<vmem>>, vector<1x64x32xf32>
    %853 = vector.shape_cast %852 : vector<1x64x32xf32> to vector<64x32xf32>
    %cst_617 = arith.constant dense<0.000000e+00> : vector<64x1xf32>
    %854 = tpu.matmul %853, %851, %cst_617 {dimension_numbers = #tpu.dot_dimension_numbers<[1], [0], [0], [1], [0, 0, 1, 1], [], []>} : vector<64x32xf32>, vector<32x1xf32>, vector<64x1xf32> -> vector<64x1xf32>
    %855 = arith.addf %848, %854 : vector<64x1xf32>
    %cst_618 = arith.constant 0.000000e+00 : f32
    %856 = vector.broadcast %cst_618 : f32 to vector<64x1xf32>
    %857 = arith.maximumf %855, %856 : vector<64x1xf32>
    %c0_619 = arith.constant 0 : index
    %c0_620 = arith.constant 0 : index
    %858 = vector.load %arg11[%c0_619, %c0_620] : memref<8x64xf32, #tpu.memory_space<vmem>>, vector<8x64xf32>
    %cst_621 = arith.constant dense<0.000000e+00> : vector<8x1xf32>
    %859 = tpu.matmul %858, %857, %cst_621 {dimension_numbers = #tpu.dot_dimension_numbers<[1], [0], [0], [1], [0, 0, 1, 1], [], []>} : vector<8x64xf32>, vector<64x1xf32>, vector<8x1xf32> -> vector<8x1xf32>
    %c0_622 = arith.constant 0 : index
    %c0_623 = arith.constant 0 : index
    %860 = vector.load %arg12[%c0_622, %c0_623] : memref<8x1xf32, #tpu.memory_space<vmem>>, vector<8x1xf32>
    %861 = arith.addf %859, %860 : vector<8x1xf32>
    %c0_624 = arith.constant 0 : index
    %c0_625 = arith.constant 0 : index
    %c0_626 = arith.constant 0 : index
    %862 = vector.load %arg13[%c0_624, %c0_625, %c0_626] : memref<1x8x1xf32, #tpu.memory_space<vmem>>, vector<1x8x1xf32>
    %863 = vector.shape_cast %862 : vector<1x8x1xf32> to vector<8x1xf32>
    %864 = vector.shape_cast %861 : vector<8x1xf32> to vector<1x8x1xf32>
    tpu.vector_store %arg13[%c0_624, %c0_625, %c0_626], %864 {strides = array<i32>} : memref<1x8x1xf32, #tpu.memory_space<vmem>>, vector<1x8x1xf32>,
    return
  }
  func.func @transform_0(%arg0: i32) -> (i32, i32, i32) {
    %c0_i32 = arith.constant 0 : i32
    %c0_i32_0 = arith.constant 0 : i32
    %c0_i32_1 = arith.constant 0 : i32
    return %arg0, %c0_i32, %c0_i32_0 : i32, i32, i32
  }
  func.func @transform_1(%arg0: i32) -> (i32, i32, i32) {
    %c0_i32 = arith.constant 0 : i32
    %c0_i32_0 = arith.constant 0 : i32
    %c0_i32_1 = arith.constant 0 : i32
    %c0_i32_2 = arith.constant 0 : i32
    return %c0_i32, %c0_i32_0, %c0_i32_1 : i32, i32, i32
  }
  func.func @transform_2(%arg0: i32) -> (i32, i32, i32) {
    %c0_i32 = arith.constant 0 : i32
    %c0_i32_0 = arith.constant 0 : i32
    %c0_i32_1 = arith.constant 0 : i32
    %c0_i32_2 = arith.constant 0 : i32
    return %c0_i32, %c0_i32_0, %c0_i32_1 : i32, i32, i32
  }
  func.func @transform_3(%arg0: i32) -> (i32, i32, i32) {
    %c0_i32 = arith.constant 0 : i32
    %c0_i32_0 = arith.constant 0 : i32
    %c0_i32_1 = arith.constant 0 : i32
    %c0_i32_2 = arith.constant 0 : i32
    return %c0_i32, %c0_i32_0, %c0_i32_1 : i32, i32, i32
  }
  func.func @transform_4(%arg0: i32) -> (i32, i32, i32) {
    %c0_i32 = arith.constant 0 : i32
    %c0_i32_0 = arith.constant 0 : i32
    %c0_i32_1 = arith.constant 0 : i32
    %c0_i32_2 = arith.constant 0 : i32
    return %c0_i32, %c0_i32_0, %c0_i32_1 : i32, i32, i32
  }
  func.func @transform_5(%arg0: i32) -> (i32, i32, i32) {
    %c0_i32 = arith.constant 0 : i32
    %c0_i32_0 = arith.constant 0 : i32
    %c0_i32_1 = arith.constant 0 : i32
    %c0_i32_2 = arith.constant 0 : i32
    return %c0_i32, %c0_i32_0, %c0_i32_1 : i32, i32, i32
  }
  func.func @transform_6(%arg0: i32) -> (i32, i32) {
    %c0_i32 = arith.constant 0 : i32
    %c0_i32_0 = arith.constant 0 : i32
    %c0_i32_1 = arith.constant 0 : i32
    return %c0_i32, %c0_i32_0 : i32, i32
  }
  func.func @transform_7(%arg0: i32) -> (i32, i32) {
    %c0_i32 = arith.constant 0 : i32
    %c0_i32_0 = arith.constant 0 : i32
    %c0_i32_1 = arith.constant 0 : i32
    return %c0_i32, %c0_i32_0 : i32, i32
  }
  func.func @transform_8(%arg0: i32) -> (i32, i32, i32) {
    %c0_i32 = arith.constant 0 : i32
    %c0_i32_0 = arith.constant 0 : i32
    %c0_i32_1 = arith.constant 0 : i32
    %c0_i32_2 = arith.constant 0 : i32
    return %c0_i32, %c0_i32_0, %c0_i32_1 : i32, i32, i32
  }
  func.func @transform_9(%arg0: i32) -> (i32, i32) {
    %c0_i32 = arith.constant 0 : i32
    %c0_i32_0 = arith.constant 0 : i32
    %c0_i32_1 = arith.constant 0 : i32
    return %c0_i32, %c0_i32_0 : i32, i32
  }
  func.func @transform_10(%arg0: i32) -> (i32, i32) {
    %c0_i32 = arith.constant 0 : i32
    %c0_i32_0 = arith.constant 0 : i32
    %c0_i32_1 = arith.constant 0 : i32
    return %c0_i32, %c0_i32_0 : i32, i32
  }
  func.func @transform_11(%arg0: i32) -> (i32, i32) {
    %c0_i32 = arith.constant 0 : i32
    %c0_i32_0 = arith.constant 0 : i32
    %c0_i32_1 = arith.constant 0 : i32
    return %c0_i32, %c0_i32_0 : i32, i32
  }
  func.func @transform_12(%arg0: i32) -> (i32, i32, i32) {
    %c0_i32 = arith.constant 0 : i32
    %c0_i32_0 = arith.constant 0 : i32
    %c0_i32_1 = arith.constant 0 : i32
    return %arg0, %c0_i32, %c0_i32_0 : i32, i32, i32
  }
}

</mosaic_0001>

<bundles_post_ra>
// kernel: tpu_custom_call.1
= control target key start
LH: loop header
LB: loop body
LE: loop exit
PB: predicated region body
PF: predicated region fallthrough
CT: control target
= control target key end

     0   :  { %s13033_s21 = smov 0   ;;  %s15649_s0 = inlined_call_operand.vmem [shape: f32[2,1,65], index: 0, kind: input, shape index: {}]   ;;  %s15650_s1 = inlined_call_operand.vmem [shape: f32[3,32,1], index: 1, kind: input, shape index: {}]   ;;  %s15651_s2 = inlined_call_operand.vmem [shape: bf16[24,64,64], index: 2, kind: input, shape index: {}]   ;;  %s15652_s3 = inlined_call_operand.vmem [shape: f32[24,64,1], index: 3, kind: input, shape index: {}]   ;;  %s15653_s4 = inlined_call_operand.vmem [shape: bf16[24,32,32], index: 4, kind: input, shape index: {}]   ;;  %s15654_s5 = inlined_call_operand.vmem [shape: f32[24,32,1], index: 5, kind: input, shape index: {}]   ;;  %s15655_s6 = inlined_call_operand.vmem [shape: bf16[32,32], index: 6, kind: input, shape index: {}]   ;;  %s15656_s7 = inlined_call_operand.vmem [shape: f32[32,1], index: 7, kind: input, shape index: {}]   ;;  %s15657_s8 = inlined_call_operand.vmem [shape: f32[4,64,32], index: 8, kind: input, shape index: {}]   ;;  %s15658_s9 = inlined_call_operand.vmem [shape: f32[64,1], index: 9, kind: input, shape index: {}]   ;;  %s15659_s10 = inlined_call_operand.vmem [shape: f32[8,64], index: 10, kind: input, shape index: {}]   ;;  %s15660_s11 = inlined_call_operand.vmem [shape: f32[8,1], index: 11, kind: input, shape index: {}]   ;;  %s15661_s12 = inlined_call_operand.vmem [shape: f32[2,8,1], index: 12, kind: output, shape index: {}]  }
   0x1   :  { %15688 = sst [smem:[#allocation4_spill]] %s15649_s0 }
   0x2 LB: > { %s9857_s22 = sadd.s32 4294967295, %s12949_s21   ;;  %p9861_p0 = scmp.ge.s32.totalorder %s12949_s21, 1  ;;  %s12949_s21 = sphi %s13033_s21, %s22_s21  }
   0x3   : > { %p360_p1 = scmp.lt.s32.totalorder %s12949_s21, 3 }
   0x5   : > { %p361_p2 = pnand %p9861_p0, %p360_p1 }
   0x6   : > { %v9866_v0 = vld [vmem:[%s15650_s1 + $0x30] sm:$0xff] (!%p361_p2)  ;;  %v9864_v1 = vld [vmem:[%s15650_s1 + $0x20] sm:$0xff] (!%p361_p2)  ;;  %v12951_v2 = vmov (!%p361_p2), 0   ;;  %v9867_v3 = vld [vmem:[%s15650_s1 + $0x38] sm:$0xff] (!%p361_p2)  ;;  %p399_p3 = scmp.lt.s32.totalorder (!%p361_p2), %s9857_s22, 1  ;;  %s15689_s0 = sld [smem:[#allocation4_spill]] (!%p361_p2) }
   0x7   : > { %364 = sbr.rel (%p361_p2) target bundleno = 18066 (0x4692), region = 68  ;;  %12005 = vset.pattern.permute.xlu1 (!%p361_p2), %v12951_v2  ;;  %12004 = vset.pattern.permute.xlu0 (!%p361_p2), %v12951_v2  ;;  %v9865_v4 = vld [vmem:[%s15650_s1 + $0x28] sm:$0xff] (!%p361_p2)  ;;  %v412_v6 = vld [vmem:[%s15650_s1] sm:$0xff] (!%p361_p2)  ;;  %v415_v7 = vld [vmem:[%s15650_s1 + $0x18] sm:$0xff] (!%p361_p2)  ;;  %s15686_s16 = smov (!%p361_p2), 127   ;;  %vm524_vm0 = vcmask (!%p361_p2), 523264  }
   0x8   : > { %463 = vperm.xlu1 (!%p361_p2), %12005, %v9866_v0   ;;  %453 = vperm.xlu0 (!%p361_p2), %12004, %v9864_v1   ;;  %v413_v5 = vld [vmem:[%s15650_s1 + $0x8] sm:$0xff] (!%p361_p2)  ;;  %v414_v8 = vld [vmem:[%s15650_s1 + $0x10] sm:$0xff] (!%p361_p2)  ;;  %v9868_v10 = vld [vmem:[%s15650_s1 + $0x40] sm:$0xff] (!%p361_p2)  ;;  %v12953_v22 = vmov (!%p361_p2), 0.0   ;;  %v12954_v53 = vmov (!%p361_p2), 0.0|0.0   ;;  %s15684_s17 = smov (!%p361_p2), 1  }
   0x9   : > { %v9869_v9 = vld [vmem:[%s15650_s1 + $0x48] sm:$0xff] (!%p361_p2)  ;;  %v9871_v11 = vld [vmem:[%s15650_s1 + $0x58] sm:$0xff] (!%p361_p2)  ;;  %v9870_v12 = vld [vmem:[%s15650_s1 + $0x50] sm:$0xff] (!%p361_p2)  ;;  %407 = vst [vmem:[#allocation2] sm:$0xff] (!%p361_p2), %v12953_v22  ;;  %vm657_vm1 = vcmask (!%p361_p2), 7168   ;;  %vm813_vm2 = vcmask (!%p361_p2), 261120  }
   0xa   : > { %529 = vst.msk [vmem:[#allocation3] sm:$0xff] (!%p361_p2), %vm524_vm0, %v12953_v22  ;;  %530 = vst.msk [vmem:[#allocation3 + $0x8] sm:$0xff] (!%p361_p2), %vm524_vm0, %v12953_v22  ;;  %v12216_v56 = vld [vmem:[%s15651_s2] sm:$0xff] (!%p361_p2)   ;;  %s15682_s28 = smov (!%p361_p2), 126   ;;  %s15680_s29 = smov (!%p361_p2), 2   ;;  %vm1015_vm3 = vcmask (!%p361_p2), 15360  }
   0xb   : > { %531 = vst.msk [vmem:[#allocation3 + $0x10] sm:$0xff] (!%p361_p2), %vm524_vm0, %v12953_v22  ;;  %532 = vst.msk [vmem:[#allocation3 + $0x18] sm:$0xff] (!%p361_p2), %vm524_vm0, %v12953_v22  ;;  %11228 = vmatprep.mubr.msk.bf16.mxu1 (!%p361_p2), %vm524_vm0, %v12216_v56  ;;  %v575_v1 = vld [vmem:[%s15652_s3 + $0x20] sm:$0xff] (!%p361_p2)  ;;  %v12218_v22 = vld [vmem:[%s15651_s2 + $0x10] sm:$0xff] (!%p361_p2)   ;;  %s15678_s30 = smov (!%p361_p2), 124   ;;  %s15676_s13 = smov (!%p361_p2), 4  }
   0xc   : > { %468 = vperm.xlu1 (!%p361_p2), %12005, %v9867_v3   ;;  %458 = vperm.xlu0 (!%p361_p2), %12004, %v9865_v4   ;;  %vm1374_vm4 = vcmask (!%p361_p2), 31744   ;;  %s15664_s24 = smov (!%p361_p2), 120   ;;  %s15662_s25 = smov (!%p361_p2), 8   ;;  %vm1733_vm5 = vcmask (!%p361_p2), 64512   ;;  %vm2092_vm6 = vcmask (!%p361_p2), 130048   ;;  %vm9245_vm7 = vcmask (!%p361_p2), 261248  }
   0xd   : > { %s15690_s26 = smov (!%p361_p2), 120   ;;  %s15691_s27 = smov (!%p361_p2), 8   ;;  %vm9404_vm8 = vcmask (!%p361_p2), 392448   ;;  %vm9563_vm9 = vcmask (!%p361_p2), 523648   ;;  %vm12967_vm10 = vmmov (!%p361_p2), 0  }
   0xe   : > { %s15704_s22 = smov (!%p399_p3, %s9857_s22), 1  ;;  %s15697_s18 = smov 127  }
   0xf   : > { %s401_s15 = scalar_lea.vmem %s15689_s0, %s15704_s22  ;;  %s15698_s19 = smov 1  }
  0x10   : > { %423 = vperm.xlu1 %12005, %v413_v5   ;;  %418 = vperm.xlu0 %12004, %v412_v6   ;;  %v9863_v13 = vld [vmem:[%s401_s15] ss:$0 sm:$0xff]  ;;  %v577_v6 = vld [vmem:[%s15652_s3 + $0x30] sm:$0xff]  ;;  %s15699_s14 = smov 126   ;;  %s15700_s15 = smov 2  }
  0x11   : > { %s15701_s0 = smov 124  }
  0x14   : > { %433 = vperm.xlu1 %12005, %v415_v7   ;;  %428 = vperm.xlu0 %12004, %v414_v8   ;;  %v576_v7 = vld [vmem:[%s15652_s3 + $0x28] sm:$0xff] }
  0x18   : > { %507 = vperm.xlu1 %12005, %v9869_v9   ;;  %502 = vperm.xlu0 %12004, %v9868_v10   ;;  %v571_v10 = vld [vmem:[%s15652_s3] sm:$0xff] }
  0x1c   : > { %517 = vperm.xlu1 %12005, %v9871_v11   ;;  %512 = vperm.xlu0 %12004, %v9870_v12   ;;  %v578_v11 = vld [vmem:[%s15652_s3 + $0x38] sm:$0xff]  ;;  %v573_v12 = vld [vmem:[%s15652_s3 + $0x10] sm:$0xff] }
  0x87   : > { %v464_v14 = vpop.permute.xlu1 %463  ;;  %v454_v15 = vpop.permute.xlu0 %453 }
  0x88   : > { %v471_v16 = vmul.f32 %v9863_v13, %v454_v15  ;;  %v473_v17 = vmul.f32 %v9863_v13, %v464_v14  ;;  %v779_v14 = vld [vmem:[%s15654_s5] sm:$0xff]  ;;  %v574_v15 = vld [vmem:[%s15652_s3 + $0x18] sm:$0xff] }
  0x8a   : > { %479 = vrot.lane.b32.xlu0 %v471_v16, %s15686_s16  ;;  %v781_v16 = vld [vmem:[%s15654_s5 + $0x10] sm:$0xff] }
  0x8b   : > { %v459_v18 = vpop.permute.xlu0 %458  ;;  %v469_v20 = vpop.permute.xlu1 %468 }
  0x8c   : > { %v472_v19 = vmul.f32 %v9863_v13, %v459_v18  ;;  %v474_v21 = vmul.f32 %v9863_v13, %v469_v20  ;;  %v782_v18 = vld [vmem:[%s15654_s5 + $0x18] sm:$0xff] }
  0x8e   : > { %481 = vrot.lane.b32.xlu1 %v472_v19, %s15686_s16  ;;  %483 = vrot.lane.b32.xlu0 %v473_v17, %s15686_s16  ;;  %v780_v17 = vld [vmem:[%s15654_s5 + $0x8] sm:$0xff] }
  0x8f   : > { %v419_v23 = vpop.permute.xlu0 %418  ;;  %v424_v24 = vpop.permute.xlu1 %423 }
  0x90   : > { %v442_v30 = vmul.f32 %v9863_v13, %v419_v23  ;;  %v443_v34 = vmul.f32 %v9863_v13, %v424_v24  ;;  %v12219_v23 = vld [vmem:[%s15651_s2 + $0x18] sm:$0xff]   ;;  %v12220_v24 = vld [vmem:[%s15653_s4] sm:$0xff]  }
  0x92   : > { %485 = vrot.lane.b32.xlu1 %v474_v21, %s15686_s16  ;;  %v12217_v21 = vld [vmem:[%s15651_s2 + $0x8] sm:$0xff]  }
  0x93   : > { %v429_v25 = vpop.permute.xlu0 %428  ;;  %v434_v26 = vpop.permute.xlu1 %433 }
  0x94   : > { %v444_v35 = vmul.f32 %v9863_v13, %v429_v25  ;;  %v445_v41 = vmul.f32 %v9863_v13, %v434_v26  ;;  %v572_v13 = vld [vmem:[%s15652_s3 + $0x8] sm:$0xff] }
  0x97   : > { %v503_v27 = vpop.permute.xlu0 %502  ;;  %v508_v28 = vpop.permute.xlu1 %507 }
  0x9b   : > { %v513_v29 = vpop.permute.xlu0 %512  ;;  %v518_v31 = vpop.permute.xlu1 %517 }
  0xfc   : > { %v480_v32 = vpop.permute.xlu0 %479 }
  0xfd   : > { %v491_v33 = vadd.f32 %v480_v32, %v442_v30 }
  0xff   : > { %v520_v36 = vadd.f32 %v503_v27, %v491_v33 }
 0x100   : > { %v482_v37 = vpop.permute.xlu1 %481  ;;  %v484_v38 = vpop.permute.xlu0 %483 }
 0x101   : > { %525 = vst.msk [vmem:[#allocation2 + $0x8] sm:$0xff] %vm524_vm0, %v520_v36  ;;  %v492_v39 = vadd.f32 %v482_v37, %v443_v34  ;;  %v493_v40 = vadd.f32 %v484_v38, %v444_v35 }
 0x103   : > { %v521_v42 = vadd.f32 %v508_v28, %v492_v39  ;;  %v522_v43 = vadd.f32 %v513_v29, %v493_v40 }
 0x104   : > { %v486_v44 = vpop.permute.xlu1 %485 }
 0x105   : > { %526 = vst.msk [vmem:[#allocation2 + $0x18] sm:$0xff] %vm524_vm0, %v521_v42  ;;  %527 = vst.msk [vmem:[#allocation2 + $0x28] sm:$0xff] %vm524_vm0, %v522_v43  ;;  %v494_v45 = vadd.f32 %v486_v44, %v445_v41 }
 0x107   : > { %v523_v46 = vadd.f32 %v518_v31, %v494_v45 }
 0x108   : > { %v13099_v47 = vld [vmem:[#allocation2 + $0x8] sm:$0xff] }
 0x109   : > { %528 = vst.msk [vmem:[#allocation2 + $0x38] sm:$0xff] %vm524_vm0, %v523_v46 }
 0x10c   : > { %v13101_v48 = vld [vmem:[#allocation2 + $0x18] sm:$0xff]  ;;  %v13106_v50 = vld [vmem:[#allocation2 + $0x28] sm:$0xff] }
 0x10d   : > { %v12006_v49 = vpack.i.bf16 %v13101_v48, %v13099_v47  ;;  %v558_v54 = vpack.c.bf16 %v13101_v48, %v13099_v47 }
 0x10f   : > { %12007 = vrot.lane.b32.xlu0 %v12006_v49, %s15686_s16 }
 0x110   : > { %v13108_v51 = vld [vmem:[#allocation2 + $0x38] sm:$0xff] }
 0x111   : > { %v12011_v52 = vpack.i.bf16 %v13108_v51, %v13106_v50  ;;  %v560_v55 = vpack.c.bf16 %v13108_v51, %v13106_v50 }
 0x113   : > { %12012 = vrot.lane.b32.xlu1 %v12011_v52, %s15686_s16  ;;  %645 = vrot.lane.b32.xlu0 %v12954_v53, %s15684_s17 }
 0x117   : > { %647 = vrot.lane.b32.xlu1 %v558_v54, %s15684_s17  ;;  %649 = vrot.lane.b32.xlu0 %v12954_v53, %s15684_s17 }
 0x11b   : > { %651 = vrot.lane.b32.xlu1 %v560_v55, %s15684_s17 }
 0x181   : > { %v12008_v57 = vpop.permute.xlu0 %12007 }
 0x182   : > { %v12010_v58 = vunpack.i.h.bf16 %v12008_v57  ;;  %v12009_v59 = vunpack.i.l.bf16 %v12008_v57 }
 0x184   : > { %v561_v60 = vpack.c.bf16 %v12010_v58, %v12009_v59 }
 0x185   : > { %v12013_v61 = vpop.permute.xlu1 %12012  ;;  %v646_v62 = vpop.permute.xlu0 %645 }
 0x186   : > { %v12015_v63 = vunpack.i.h.bf16 %v12013_v61  ;;  %v12014_v0 = vunpack.i.l.bf16 %v12013_v61  ;;  %653 = vrot.lane.b32.xlu0 %v561_v60, %s15684_s17 }
 0x188   : > { %v562_v2 = vpack.c.bf16 %v12015_v63, %v12014_v0 }
 0x189   : > { %v648_v3 = vpop.permute.xlu1 %647  ;;  %v650_v5 = vpop.permute.xlu0 %649 }
 0x18a   : > { %601 = vperm.xlu0 %12004, %v575_v1   ;;  %655 = vrot.lane.b32.xlu1 %v562_v2, %s15684_s17  ;;  %v658_v4 = vsel %vm657_vm1, %v646_v62, %v648_v3 }
 0x18b   : > { %11220 = vmatprep.subr.bf16.mxu1 %v658_v4 }
 0x18c   : > { %11221 = vmatpush3.bf16.msra.mxu1 %v658_v4 }
 0x18d   : > { %v652_v8 = vpop.permute.xlu1 %651 }
 0x18e   : > { %611 = vperm.xlu0 %12004, %v577_v6   ;;  %606 = vperm.xlu1 %12005, %v576_v7   ;;  %v659_v9 = vsel %vm657_vm1, %v650_v5, %v652_v8 }
 0x18f   : > { %11222 = vmatprep.subr.bf16.mxu1 %v659_v9 }
 0x190   : > { %11223 = vmatpush3.bf16.msra.mxu1 %v659_v9 }
 0x192   : > { %581 = vperm.xlu0 %12004, %v571_v10   ;;  %616 = vperm.xlu1 %12005, %v578_v11  }
 0x196   : > { %591 = vperm.xlu0 %12004, %v573_v12   ;;  %586 = vperm.xlu1 %12005, %v572_v13  }
 0x19a   : > { %785 = vperm.xlu0 %12004, %v779_v14   ;;  %596 = vperm.xlu1 %12005, %v574_v15  }
 0x19e   : > { %795 = vperm.xlu0 %12004, %v781_v16   ;;  %790 = vperm.xlu1 %12005, %v780_v17   ;;  %v12221_v16 = vld [vmem:[%s15653_s4 + $0x8] sm:$0xff]  }
 0x1a2   : > { %800 = vperm.xlu1 %12005, %v782_v18  }
 0x1f8   : > { %v654_v19 = vpop.permute.xlu0 %653 }
 0x1f9   : > { %11224 = vmatprep.subr.bf16.mxu1 %v654_v19 }
 0x1fa   : > { %11225 = vmatpush3.bf16.msra.mxu1 %v654_v19 }
 0x1fc   : > { %v656_v20 = vpop.permute.xlu1 %655 }
 0x1fd   : > { %11226 = vmatprep.subr.bf16.mxu1 %v656_v20 }
 0x1fe   : > { %11227 = vmatpush3.bf16.msra.mxu1 %v656_v20 }
 0x201   : > { %11229 = vmatmul.mubr.msk.bf16.vlgmr.msra.gmra.mrb[0].mxu1 %vm524_vm0, %v12217_v21  ;;  %v871_v21 = vld [vmem:[#allocation3 + $0x10] sm:$0xff] }
 0x202   : > { %11232 = vmatprep.mubr.msk.bf16.mxu1 %vm524_vm0, %v12218_v22 }
 0x209   : > { %11233 = vmatmul.mubr.msk.bf16.gmra.mrb[4].mxu1 %vm524_vm0, %v12219_v23  ;;  %v602_v25 = vpop.permute.xlu0 %601 }
 0x20a   : > { %11240 = vmatprep.mubr.msk.bf16.mxu1 %vm813_vm2, %v12220_v24  ;;  %v869_v24 = vld [vmem:[#allocation3] sm:$0xff] }
 0x20d   : > { %v607_v27 = vpop.permute.xlu1 %606  ;;  %v612_v31 = vpop.permute.xlu0 %611 }
 0x211   : > { %v617_v32 = vpop.permute.xlu1 %616  ;;  %v582_v38 = vpop.permute.xlu0 %581 }
 0x215   : > { %v587_v44 = vpop.permute.xlu1 %586  ;;  %v592_v49 = vpop.permute.xlu0 %591 }
 0x219   : > { %v597_v54 = vpop.permute.xlu1 %596  ;;  %v786_v17 = vpop.permute.xlu0 %785 }
 0x21d   : > { %v791_v18 = vpop.permute.xlu1 %790  ;;  %v796_v19 = vpop.permute.xlu0 %795 }
 0x2d4   : > { %v11230_v26 = vpop.f32.mrb[0].mxu1 }
 0x2d5   : > { %v710_v28 = vpop.f32.mrb[1].mxu1  ;;  %v719_v52 = vadd.f32 %v11230_v26, %v592_v49 }
 0x2d6   : > { %v11231_v29 = vpop.f32.mrb[2].mxu1  ;;  %v711_v55 = vadd.f32 %v710_v28, %v582_v38  ;;  %v872_v28 = vld [vmem:[#allocation3 + $0x18] sm:$0xff] }
 0x2d7   : > { %v713_v30 = vpop.f32.mrb[3].mxu1  ;;  %v722_v56 = vadd.f32 %v11231_v29, %v597_v54 }
 0x2d8   : > { %v714_v57 = vadd.f32 %v713_v30, %v587_v44 }
 0x2dc   : > { %v11234_v33 = vpop.f32.mrb[4].mxu1 }
 0x2dd   : > { %v735_v34 = vadd.f32 %v11234_v33, %v612_v31  ;;  %v726_v35 = vpop.f32.mrb[5].mxu1  ;;  %v870_v33 = vld [vmem:[#allocation3 + $0x8] sm:$0xff] }
 0x2de   : > { %v727_v36 = vadd.f32 %v726_v35, %v602_v25  ;;  %v11235_v37 = vpop.f32.mrb[6].mxu1  ;;  %v801_v25 = vpop.permute.xlu1 %800 }
 0x2df   : > { %v9882_v39 = vmul.f32 -1.442695, %v735_v34  ;;  %v738_v40 = vadd.f32 %v11235_v37, %v617_v32  ;;  %v729_v41 = vpop.f32.mrb[7].mxu1 }
 0x2e0   : > { %v9880_v42 = vmul.f32 -1.442695, %v727_v36  ;;  %v730_v43 = vadd.f32 %v729_v41, %v607_v27 }
 0x2e1   : > { %12362 = vpow2.f32 %v9882_v39  ;;  %v9883_v45 = vmul.f32 -1.442695, %v738_v40 }
 0x2e2   : > { %12364 = vpow2.f32 %v9880_v42  ;;  %v9881_v46 = vmul.f32 -1.442695, %v730_v43 }
 0x2e3   : > { %12366 = vpow2.f32 %v9883_v45  ;;  %v12222_v45 = vld [vmem:[%s15651_s2 + $0x20] sm:$0xff]  }
 0x2e4   : > { %12368 = vpow2.f32 %v9881_v46 }
 0x2e5   : > { %12370 = vtanh.f32 %v719_v52 }
 0x2e6   : > { %12372 = vtanh.f32 %v711_v55 }
 0x2e7   : > { %12374 = vtanh.f32 %v722_v56 }
 0x2e8   : > { %12376 = vtanh.f32 %v714_v57 }
 0x2eb   : > { %v12363_v58 = vpop.eup %12362 }
 0x2ec   : > { %v12365_v59 = vpop.eup %12364  ;;  %v759_v60 = vadd.f32 1.0, %v12363_v58 }
 0x2ed   : > { %v12367_v61 = vpop.eup %12366  ;;  %v757_v62 = vadd.f32 1.0, %v12365_v59 }
 0x2ee   : > { %v12369_v63 = vpop.eup %12368  ;;  %12378 = vrcp.f32 %v759_v60  ;;  %v760_v0 = vadd.f32 1.0, %v12367_v61 }
 0x2ef   : > { %12380 = vrcp.f32 %v757_v62  ;;  %v758_v1 = vadd.f32 1.0, %v12369_v63  ;;  %v12371_v2 = vpop.eup %12370  ;;  %v9901_v62 = vld [vmem:[%s15652_s3 + $0x68] sm:$0xff]  ;;  %v9900_v63 = vld [vmem:[%s15652_s3 + $0x60] sm:$0xff] }
 0x2f0   : > { %12382 = vrcp.f32 %v760_v0  ;;  %v12373_v3 = vpop.eup %12372 }
 0x2f1   : > { %12384 = vrcp.f32 %v758_v1  ;;  %v12375_v4 = vpop.eup %12374 }
 0x2f2   : > { %v12377_v5 = vpop.eup %12376 }
 0x2f8   : > { %v12379_v6 = vpop.eup %12378 }
 0x2f9   : > { %v12381_v7 = vpop.eup %12380  ;;  %v771_v8 = vmul.f32 %v12379_v6, %v12371_v2  ;;  %v9896_v6 = vld [vmem:[%s15652_s3 + $0x40] sm:$0xff] }
 0x2fa   : > { %v12383_v9 = vpop.eup %12382  ;;  %v769_v10 = vmul.f32 %v12381_v7, %v12373_v3  ;;  %v9903_v3 = vld [vmem:[%s15652_s3 + $0x78] sm:$0xff] }
 0x2fb   : > { %v12385_v11 = vpop.eup %12384  ;;  %v772_v12 = vmul.f32 %v12383_v9, %v12375_v4  ;;  %v9902_v4 = vld [vmem:[%s15652_s3 + $0x70] sm:$0xff]  ;;  %v9899_v7 = vld [vmem:[%s15652_s3 + $0x58] sm:$0xff]  ;;  %v9921_v9 = vld [vmem:[%s15654_s5 + $0x28] sm:$0xff] }
 0x2fc   : > { %v770_v13 = vmul.f32 %v12385_v11, %v12377_v5  ;;  %v9897_v5 = vld [vmem:[%s15652_s3 + $0x48] sm:$0xff]  ;;  %v9923_v11 = vld [vmem:[%s15654_s5 + $0x38] sm:$0xff] }
 0x2fd   : > { %v778_v14 = vpack.c.bf16 %v772_v12, %v771_v8  ;;  %v9898_v8 = vld [vmem:[%s15652_s3 + $0x50] sm:$0xff] }
 0x2fe   : > { %v777_v15 = vpack.c.bf16 %v770_v13, %v769_v10  ;;  %v9920_v10 = vld [vmem:[%s15654_s5 + $0x20] sm:$0xff]  ;;  %v9922_v12 = vld [vmem:[%s15654_s5 + $0x30] sm:$0xff] }
 0x300   : > { %11236 = vmatprep.subr.bf16.mxu1 %v777_v15 }
 0x301   : > { %11237 = vmatpush3.bf16.msra.mxu1 %v777_v15  ;;  %v12223_v15 = vld [vmem:[%s15651_s2 + $0x28] sm:$0xff]  }
 0x302   : > { %11238 = vmatprep.subr.bf16.mxu1 %v778_v14 }
 0x305   : > { %11239 = vmatpush3.bf16.msra.mxu1 %v778_v14 }
 0x308   : > { %11241 = vmatmul.mubr.msk.bf16.vlgmr.msra.gmra.mrb[8].mxu1 %vm813_vm2, %v12221_v16  ;;  %v12224_v16 = vld [vmem:[%s15651_s2 + $0x30] sm:$0xff]  }
 0x309   : > { %11252 = vmatprep.mubr.msk.bf16.mxu1 %vm524_vm0, %v12222_v45 }
 0x3db   : > { %v11242_v20 = vpop.f32.mrb[8].mxu1 }
 0x3dc   : > { %v863_v22 = vadd.f32 %v11242_v20, %v796_v19  ;;  %v854_v23 = vpop.f32.mrb[9].mxu1 }
 0x3dd   : > { %v855_v26 = vadd.f32 %v854_v23, %v786_v17  ;;  %v11243_v27 = vpop.f32.mrb[10].mxu1  ;;  %v12225_v17 = vld [vmem:[%s15651_s2 + $0x38] sm:$0xff]  }
 0x3de   : > { %v875_v29 = vadd.f32 %v871_v21, %v863_v22  ;;  %v883_v30 = vadd.f32 %v863_v22, %v13106_v50  ;;  %v866_v31 = vadd.f32 %v11243_v27, %v801_v25  ;;  %v857_v32 = vpop.f32.mrb[11].mxu1 }
 0x3df   : > { %v873_v34 = vadd.f32 %v869_v24, %v855_v26  ;;  %v881_v35 = vadd.f32 %v855_v26, %v13099_v47  ;;  %v858_v36 = vadd.f32 %v857_v32, %v791_v18  ;;  %v12226_v18 = vld [vmem:[%s15653_s4 + $0x10] sm:$0xff]  }
 0x3e0   : > { %879 = vst.msk [vmem:[#allocation3 + $0x10] sm:$0xff] %vm524_vm0, %v875_v29  ;;  %887 = vst.msk [vmem:[#allocation2 + $0x28] sm:$0xff] %vm524_vm0, %v883_v30  ;;  %v876_v37 = vadd.f32 %v872_v28, %v866_v31  ;;  %v884_v38 = vadd.f32 %v866_v31, %v13108_v51  ;;  %11264 = vmatprep.mubr.msk.bf16.mxu0 %vm813_vm2, %v12226_v18 }
 0x3e1   : > { %877 = vst.msk [vmem:[#allocation3] sm:$0xff] %vm524_vm0, %v873_v34  ;;  %885 = vst.msk [vmem:[#allocation2 + $0x8] sm:$0xff] %vm524_vm0, %v881_v35  ;;  %v874_v39 = vadd.f32 %v870_v33, %v858_v36  ;;  %v882_v50 = vadd.f32 %v858_v36, %v13101_v48 }
 0x3e2   : > { %880 = vst.msk [vmem:[#allocation3 + $0x18] sm:$0xff] %vm524_vm0, %v876_v37  ;;  %888 = vst.msk [vmem:[#allocation2 + $0x38] sm:$0xff] %vm524_vm0, %v884_v38 }
 0x3e3   : > { %878 = vst.msk [vmem:[#allocation3 + $0x8] sm:$0xff] %vm524_vm0, %v874_v39  ;;  %886 = vst.msk [vmem:[#allocation2 + $0x18] sm:$0xff] %vm524_vm0, %v882_v50 }
 0x3e7   : > { %v13199_v47 = vld [vmem:[#allocation2 + $0x28] sm:$0xff]  ;;  %v1230_v18 = vld [vmem:[#allocation3 + $0x10] sm:$0xff] }
 0x3e8   : > { %v13205_v41 = vld [vmem:[#allocation2 + $0x8] sm:$0xff] }
 0x3e9   : > { %v13201_v40 = vld [vmem:[#allocation2 + $0x38] sm:$0xff] }
 0x3ea   : > { %v12021_v51 = vpack.i.bf16 %v13201_v40, %v13199_v47  ;;  %v13207_v42 = vld [vmem:[#allocation2 + $0x18] sm:$0xff]  ;;  %v916_v44 = vpack.c.bf16 %v13201_v40, %v13199_v47 }
 0x3eb   : > { %v12016_v48 = vpack.i.bf16 %v13207_v42, %v13205_v41  ;;  %v914_v43 = vpack.c.bf16 %v13207_v42, %v13205_v41 }
 0x3ec   : > { %12022 = vrot.lane.b32.xlu1 %v12021_v51, %s15682_s28 }
 0x3ed   : > { %12017 = vrot.lane.b32.xlu0 %v12016_v48, %s15682_s28 }
 0x3f0   : > { %1005 = vrot.lane.b32.xlu1 %v914_v43, %s15680_s29 }
 0x3f1   : > { %1003 = vrot.lane.b32.xlu0 %v12954_v53, %s15680_s29 }
 0x3f4   : > { %1009 = vrot.lane.b32.xlu1 %v916_v44, %s15680_s29 }
 0x3f5   : > { %1007 = vrot.lane.b32.xlu0 %v12954_v53, %s15680_s29 }
 0x45e   : > { %v12023_v46 = vpop.permute.xlu1 %12022 }
 0x45f   : > { %v12025_v49 = vunpack.i.h.bf16 %v12023_v46  ;;  %v12024_v52 = vunpack.i.l.bf16 %v12023_v46  ;;  %v12018_v54 = vpop.permute.xlu0 %12017 }
 0x460   : > { %v12020_v55 = vunpack.i.h.bf16 %v12018_v54  ;;  %v12019_v56 = vunpack.i.l.bf16 %v12018_v54 }
 0x461   : > { %v918_v57 = vpack.c.bf16 %v12025_v49, %v12024_v52 }
 0x462   : > { %v1006_v58 = vpop.permute.xlu1 %1005  ;;  %v917_v59 = vpack.c.bf16 %v12020_v55, %v12019_v56 }
 0x463   : > { %v1004_v60 = vpop.permute.xlu0 %1003  ;;  %1013 = vrot.lane.b32.xlu1 %v918_v57, %s15680_s29 }
 0x464   : > { %1011 = vrot.lane.b32.xlu0 %v917_v59, %s15680_s29  ;;  %v1016_v61 = vsel %vm1015_vm3, %v1004_v60, %v1006_v58 }
 0x465   : > { %11244 = vmatprep.subr.bf16.mxu1 %v1016_v61 }
 0x466   : > { %11245 = vmatpush3.bf16.msra.mxu1 %v1016_v61  ;;  %v1010_v0 = vpop.permute.xlu1 %1009 }
 0x467   : > { %v1008_v1 = vpop.permute.xlu0 %1007  ;;  %964 = vperm.xlu1 %12005, %v9901_v62  }
 0x468   : > { %959 = vperm.xlu0 %12004, %v9900_v63   ;;  %v1017_v2 = vsel %vm1015_vm3, %v1008_v1, %v1010_v0 }
 0x469   : > { %11246 = vmatprep.subr.bf16.mxu1 %v1017_v2 }
 0x46a   : > { %11247 = vmatpush3.bf16.msra.mxu1 %v1017_v2 }
 0x46b   : > { %974 = vperm.xlu1 %12005, %v9903_v3  }
 0x46c   : > { %969 = vperm.xlu0 %12004, %v9902_v4  }
 0x46f   : > { %944 = vperm.xlu1 %12005, %v9897_v5  }
 0x470   : > { %939 = vperm.xlu0 %12004, %v9896_v6  }
 0x473   : > { %954 = vperm.xlu1 %12005, %v9899_v7  }
 0x474   : > { %949 = vperm.xlu0 %12004, %v9898_v8  }
 0x477   : > { %1150 = vperm.xlu1 %12005, %v9921_v9  }
 0x478   : > { %1145 = vperm.xlu0 %12004, %v9920_v10   ;;  %v12227_v10 = vld [vmem:[%s15653_s4 + $0x18] sm:$0xff]  }
 0x47b   : > { %1160 = vperm.xlu1 %12005, %v9923_v11  }
 0x47c   : > { %1155 = vperm.xlu0 %12004, %v9922_v12  }
 0x4d5   : > { %v1014_v14 = vpop.permute.xlu1 %1013 }
 0x4d6   : > { %v1012_v13 = vpop.permute.xlu0 %1011 }
 0x4d7   : > { %11248 = vmatprep.subr.bf16.mxu1 %v1012_v13 }
 0x4d8   : > { %11249 = vmatpush3.bf16.msra.mxu1 %v1012_v13 }
 0x4d9   : > { %11250 = vmatprep.subr.bf16.mxu1 %v1014_v14 }
 0x4dc   : > { %11251 = vmatpush3.bf16.msra.mxu1 %v1014_v14 }
 0x4df   : > { %11253 = vmatmul.mubr.msk.bf16.vlgmr.msra.gmra.mrb[12].mxu1 %vm524_vm0, %v12223_v15 }
 0x4e0   : > { %11256 = vmatprep.mubr.msk.bf16.mxu1 %vm524_vm0, %v12224_v16 }
 0x4e6   : > { %v965_v21 = vpop.permute.xlu1 %964 }
 0x4e7   : > { %11257 = vmatmul.mubr.msk.bf16.gmra.mrb[16].mxu1 %vm524_vm0, %v12225_v17  ;;  %v960_v19 = vpop.permute.xlu0 %959 }
 0x4ea   : > { %v975_v26 = vpop.permute.xlu1 %974 }
 0x4eb   : > { %v970_v25 = vpop.permute.xlu0 %969 }
 0x4ee   : > { %v945_v38 = vpop.permute.xlu1 %944 }
 0x4ef   : > { %v940_v32 = vpop.permute.xlu0 %939 }
 0x4f2   : > { %v955_v43 = vpop.permute.xlu1 %954 }
 0x4f3   : > { %v950_v51 = vpop.permute.xlu0 %949 }
 0x4f6   : > { %v1151_v12 = vpop.permute.xlu1 %1150 }
 0x4f7   : > { %v1146_v11 = vpop.permute.xlu0 %1145 }
 0x4fa   : > { %v1161_v17 = vpop.permute.xlu1 %1160 }
 0x4fb   : > { %v1156_v13 = vpop.permute.xlu0 %1155 }
 0x5b2   : > { %v11254_v20 = vpop.f32.mrb[12].mxu1 }
 0x5b3   : > { %v1068_v22 = vpop.f32.mrb[13].mxu1  ;;  %v1077_v48 = vadd.f32 %v11254_v20, %v950_v51 }
 0x5b4   : > { %v11255_v23 = vpop.f32.mrb[14].mxu1  ;;  %v1069_v44 = vadd.f32 %v1068_v22, %v940_v32  ;;  %v1229_v32 = vld [vmem:[#allocation3 + $0x8] sm:$0xff] }
 0x5b5   : > { %v1071_v24 = vpop.f32.mrb[15].mxu1  ;;  %v1080_v45 = vadd.f32 %v11255_v23, %v955_v43  ;;  %v1228_v23 = vld [vmem:[#allocation3] sm:$0xff] }
 0x5b6   : > { %v1072_v46 = vadd.f32 %v1071_v24, %v945_v38 }
 0x5ba   : > { %v11258_v27 = vpop.f32.mrb[16].mxu1 }
 0x5bb   : > { %v1093_v28 = vadd.f32 %v11258_v27, %v970_v25  ;;  %v1084_v29 = vpop.f32.mrb[17].mxu1 }
 0x5bc   : > { %v1085_v30 = vadd.f32 %v1084_v29, %v960_v19  ;;  %v11259_v31 = vpop.f32.mrb[18].mxu1 }
 0x5bd   : > { %v9914_v33 = vmul.f32 -1.442695, %v1093_v28  ;;  %v1096_v34 = vadd.f32 %v11259_v31, %v975_v26  ;;  %v1087_v35 = vpop.f32.mrb[19].mxu1  ;;  %v1231_v28 = vld [vmem:[#allocation3 + $0x18] sm:$0xff] }
 0x5be   : > { %v9912_v36 = vmul.f32 -1.442695, %v1085_v30  ;;  %v1088_v37 = vadd.f32 %v1087_v35, %v965_v21 }
 0x5bf   : > { %12386 = vpow2.f32 %v9914_v33  ;;  %v9915_v39 = vmul.f32 -1.442695, %v1096_v34 }
 0x5c0   : > { %12388 = vpow2.f32 %v9912_v36  ;;  %v9913_v50 = vmul.f32 -1.442695, %v1088_v37 }
 0x5c1   : > { %12390 = vpow2.f32 %v9915_v39  ;;  %v12228_v39 = vld [vmem:[%s15651_s2 + $0x40] sm:$0xff]  }
 0x5c2   : > { %12392 = vpow2.f32 %v9913_v50  ;;  %11276 = vmatprep.mubr.msk.bf16.mxu1 %vm524_vm0, %v12228_v39 }
 0x5c3   : > { %12394 = vtanh.f32 %v1077_v48 }
 0x5c4   : > { %12396 = vtanh.f32 %v1069_v44 }
 0x5c5   : > { %12398 = vtanh.f32 %v1080_v45 }
 0x5c6   : > { %12400 = vtanh.f32 %v1072_v46 }
 0x5c9   : > { %v12387_v49 = vpop.eup %12386 }
 0x5ca   : > { %v12389_v52 = vpop.eup %12388  ;;  %v1117_v54 = vadd.f32 1.0, %v12387_v49 }
 0x5cb   : > { %v12391_v55 = vpop.eup %12390  ;;  %v1115_v56 = vadd.f32 1.0, %v12389_v52 }
 0x5cc   : > { %v12393_v57 = vpop.eup %12392  ;;  %12402 = vrcp.f32 %v1117_v54  ;;  %v1118_v58 = vadd.f32 1.0, %v12391_v55 }
 0x5cd   : > { %12404 = vrcp.f32 %v1115_v56  ;;  %v1116_v59 = vadd.f32 1.0, %v12393_v57  ;;  %v12395_v60 = vpop.eup %12394  ;;  %v9941_v56 = vld [vmem:[%s15652_s3 + $0xa8] sm:$0xff]  ;;  %v9940_v57 = vld [vmem:[%s15652_s3 + $0xa0] sm:$0xff] }
 0x5ce   : > { %12406 = vrcp.f32 %v1118_v58  ;;  %v12397_v61 = vpop.eup %12396 }
 0x5cf   : > { %12408 = vrcp.f32 %v1116_v59  ;;  %v12399_v62 = vpop.eup %12398 }
 0x5d0   : > { %v12401_v63 = vpop.eup %12400 }
 0x5d6   : > { %v12403_v0 = vpop.eup %12402 }
 0x5d7   : > { %v12405_v1 = vpop.eup %12404  ;;  %v1129_v2 = vmul.f32 %v12403_v0, %v12395_v60  ;;  %v9936_v0 = vld [vmem:[%s15652_s3 + $0x80] sm:$0xff] }
 0x5d8   : > { %v12407_v3 = vpop.eup %12406  ;;  %v1127_v4 = vmul.f32 %v12405_v1, %v12397_v61  ;;  %v9943_v61 = vld [vmem:[%s15652_s3 + $0xb8] sm:$0xff] }
 0x5d9   : > { %v12409_v5 = vpop.eup %12408  ;;  %v1130_v6 = vmul.f32 %v12407_v3, %v12399_v62  ;;  %v9942_v62 = vld [vmem:[%s15652_s3 + $0xb0] sm:$0xff]  ;;  %v9939_v1 = vld [vmem:[%s15652_s3 + $0x98] sm:$0xff]  ;;  %v9961_v3 = vld [vmem:[%s15654_s5 + $0x48] sm:$0xff] }
 0x5da   : > { %v1128_v7 = vmul.f32 %v12409_v5, %v12401_v63  ;;  %v9937_v63 = vld [vmem:[%s15652_s3 + $0x88] sm:$0xff]  ;;  %v9963_v5 = vld [vmem:[%s15654_s5 + $0x58] sm:$0xff] }
 0x5db   : > { %v1137_v8 = vpack.c.bf16 %v1130_v6, %v1129_v2  ;;  %v9938_v2 = vld [vmem:[%s15652_s3 + $0x90] sm:$0xff] }
 0x5dc   : > { %v1136_v9 = vpack.c.bf16 %v1128_v7, %v1127_v4  ;;  %v9960_v4 = vld [vmem:[%s15654_s5 + $0x40] sm:$0xff]  ;;  %v9962_v6 = vld [vmem:[%s15654_s5 + $0x50] sm:$0xff] }
 0x5de   : > { %11260 = vmatprep.subr.bf16.mxu0 %v1136_v9 }
 0x5df   : > { %11261 = vmatpush3.bf16.msra.mxu0 %v1136_v9  ;;  %v12229_v9 = vld [vmem:[%s15651_s2 + $0x48] sm:$0xff]  }
 0x5e0   : > { %11262 = vmatprep.subr.bf16.mxu0 %v1137_v8 }
 0x5e3   : > { %11263 = vmatpush3.bf16.msra.mxu0 %v1137_v8 }
 0x5e6   : > { %11265 = vmatmul.mubr.msk.bf16.vlgmr.msra.gmra.mrb[0].mxu0 %vm813_vm2, %v12227_v10  ;;  %v12230_v10 = vld [vmem:[%s15651_s2 + $0x50] sm:$0xff]  }
 0x6b9   : > { %v11266_v14 = vpop.f32.mrb[0].mxu0 }
 0x6ba   : > { %v1222_v15 = vadd.f32 %v11266_v14, %v1156_v13  ;;  %v1213_v16 = vpop.f32.mrb[1].mxu0 }
 0x6bb   : > { %v1214_v19 = vadd.f32 %v1213_v16, %v1146_v11  ;;  %v11267_v20 = vpop.f32.mrb[2].mxu0  ;;  %v12231_v11 = vld [vmem:[%s15651_s2 + $0x58] sm:$0xff]  }
 0x6bc   : > { %v1234_v21 = vadd.f32 %v1230_v18, %v1222_v15  ;;  %v1242_v22 = vadd.f32 %v1222_v15, %v13199_v47  ;;  %v1225_v24 = vadd.f32 %v11267_v20, %v1161_v17  ;;  %v1216_v25 = vpop.f32.mrb[3].mxu0 }
 0x6bd   : > { %v1232_v26 = vadd.f32 %v1228_v23, %v1214_v19  ;;  %v1240_v27 = vadd.f32 %v1214_v19, %v13205_v41  ;;  %v1217_v29 = vadd.f32 %v1216_v25, %v1151_v12  ;;  %v12232_v12 = vld [vmem:[%s15653_s4 + $0x20] sm:$0xff]  }
 0x6be   : > { %1238 = vst.msk [vmem:[#allocation3 + $0x10] sm:$0xff] %vm524_vm0, %v1234_v21  ;;  %1246 = vst.msk [vmem:[#allocation2 + $0x28] sm:$0xff] %vm524_vm0, %v1242_v22  ;;  %v1235_v30 = vadd.f32 %v1231_v28, %v1225_v24  ;;  %v1243_v31 = vadd.f32 %v1225_v24, %v13201_v40  ;;  %11288 = vmatprep.mubr.msk.bf16.mxu0 %vm813_vm2, %v12232_v12 }
 0x6bf   : > { %1236 = vst.msk [vmem:[#allocation3] sm:$0xff] %vm524_vm0, %v1232_v26  ;;  %1244 = vst.msk [vmem:[#allocation2 + $0x8] sm:$0xff] %vm524_vm0, %v1240_v27  ;;  %v1233_v47 = vadd.f32 %v1229_v32, %v1217_v29  ;;  %v1241_v33 = vadd.f32 %v1217_v29, %v13207_v42 }
 0x6c0   : > { %1239 = vst.msk [vmem:[#allocation3 + $0x18] sm:$0xff] %vm524_vm0, %v1235_v30  ;;  %1247 = vst.msk [vmem:[#allocation2 + $0x38] sm:$0xff] %vm524_vm0, %v1243_v31 }
 0x6c1   : > { %1237 = vst.msk [vmem:[#allocation3 + $0x8] sm:$0xff] %vm524_vm0, %v1233_v47  ;;  %1245 = vst.msk [vmem:[#allocation2 + $0x18] sm:$0xff] %vm524_vm0, %v1241_v33 }
 0x6c5   : > { %v13299_v41 = vld [vmem:[#allocation2 + $0x28] sm:$0xff]  ;;  %v1589_v12 = vld [vmem:[#allocation3 + $0x10] sm:$0xff] }
 0x6c6   : > { %v13305_v35 = vld [vmem:[#allocation2 + $0x8] sm:$0xff] }
 0x6c7   : > { %v13301_v34 = vld [vmem:[#allocation2 + $0x38] sm:$0xff] }
 0x6c8   : > { %v12031_v40 = vpack.i.bf16 %v13301_v34, %v13299_v41  ;;  %v13307_v36 = vld [vmem:[#allocation2 + $0x18] sm:$0xff]  ;;  %v1275_v38 = vpack.c.bf16 %v13301_v34, %v13299_v41 }
 0x6c9   : > { %v12026_v42 = vpack.i.bf16 %v13307_v36, %v13305_v35  ;;  %v1273_v37 = vpack.c.bf16 %v13307_v36, %v13305_v35 }
 0x6ca   : > { %12032 = vrot.lane.b32.xlu1 %v12031_v40, %s15678_s30 }
 0x6cb   : > { %12027 = vrot.lane.b32.xlu0 %v12026_v42, %s15678_s30 }
 0x6ce   : > { %1364 = vrot.lane.b32.xlu1 %v1273_v37, %s15676_s13 }
 0x6cf   : > { %1362 = vrot.lane.b32.xlu0 %v12954_v53, %s15676_s13 }
 0x6d2   : > { %1368 = vrot.lane.b32.xlu1 %v1275_v38, %s15676_s13 }
 0x6d3   : > { %1366 = vrot.lane.b32.xlu0 %v12954_v53, %s15676_s13 }
 0x73c   : > { %v12033_v50 = vpop.permute.xlu1 %12032 }
 0x73d   : > { %v12035_v51 = vunpack.i.h.bf16 %v12033_v50  ;;  %v12034_v48 = vunpack.i.l.bf16 %v12033_v50  ;;  %v12028_v43 = vpop.permute.xlu0 %12027 }
 0x73e   : > { %v12030_v44 = vunpack.i.h.bf16 %v12028_v43  ;;  %v12029_v45 = vunpack.i.l.bf16 %v12028_v43 }
 0x73f   : > { %v1277_v46 = vpack.c.bf16 %v12035_v51, %v12034_v48 }
 0x740   : > { %v1365_v49 = vpop.permute.xlu1 %1364  ;;  %v1276_v52 = vpack.c.bf16 %v12030_v44, %v12029_v45 }
 0x741   : > { %v1363_v54 = vpop.permute.xlu0 %1362  ;;  %1372 = vrot.lane.b32.xlu1 %v1277_v46, %s15676_s13 }
 0x742   : > { %1370 = vrot.lane.b32.xlu0 %v1276_v52, %s15676_s13  ;;  %v1375_v55 = vsel %vm1374_vm4, %v1363_v54, %v1365_v49 }
 0x743   : > { %11268 = vmatprep.subr.bf16.mxu1 %v1375_v55 }
 0x744   : > { %11269 = vmatpush3.bf16.msra.mxu1 %v1375_v55  ;;  %v1369_v58 = vpop.permute.xlu1 %1368 }
 0x745   : > { %v1367_v59 = vpop.permute.xlu0 %1366  ;;  %1323 = vperm.xlu1 %12005, %v9941_v56  }
 0x746   : > { %1318 = vperm.xlu0 %12004, %v9940_v57   ;;  %v1376_v60 = vsel %vm1374_vm4, %v1367_v59, %v1369_v58 }
 0x747   : > { %11270 = vmatprep.subr.bf16.mxu1 %v1376_v60 }
 0x748   : > { %11271 = vmatpush3.bf16.msra.mxu1 %v1376_v60 }
 0x749   : > { %1333 = vperm.xlu1 %12005, %v9943_v61  }
 0x74a   : > { %1328 = vperm.xlu0 %12004, %v9942_v62  }
 0x74d   : > { %1303 = vperm.xlu1 %12005, %v9937_v63  }
 0x74e   : > { %1298 = vperm.xlu0 %12004, %v9936_v0  }
 0x751   : > { %1313 = vperm.xlu1 %12005, %v9939_v1  }
 0x752   : > { %1308 = vperm.xlu0 %12004, %v9938_v2  }
 0x755   : > { %1509 = vperm.xlu1 %12005, %v9961_v3  }
 0x756   : > { %1504 = vperm.xlu0 %12004, %v9960_v4   ;;  %v12233_v4 = vld [vmem:[%s15653_s4 + $0x28] sm:$0xff]  }
 0x759   : > { %1519 = vperm.xlu1 %12005, %v9963_v5  }
 0x75a   : > { %1514 = vperm.xlu0 %12004, %v9962_v6  }
 0x7b3   : > { %v1373_v8 = vpop.permute.xlu1 %1372 }
 0x7b4   : > { %v1371_v7 = vpop.permute.xlu0 %1370 }
 0x7b5   : > { %11272 = vmatprep.subr.bf16.mxu1 %v1371_v7 }
 0x7b6   : > { %11273 = vmatpush3.bf16.msra.mxu1 %v1371_v7 }
 0x7b7   : > { %11274 = vmatprep.subr.bf16.mxu1 %v1373_v8 }
 0x7ba   : > { %11275 = vmatpush3.bf16.msra.mxu1 %v1373_v8 }
 0x7bd   : > { %11277 = vmatmul.mubr.msk.bf16.vlgmr.msra.gmra.mrb[20].mxu1 %vm524_vm0, %v12229_v9 }
 0x7be   : > { %11280 = vmatprep.mubr.msk.bf16.mxu1 %vm524_vm0, %v12230_v10 }
 0x7c4   : > { %v1324_v15 = vpop.permute.xlu1 %1323 }
 0x7c5   : > { %11281 = vmatmul.mubr.msk.bf16.gmra.mrb[24].mxu1 %vm524_vm0, %v12231_v11  ;;  %v1319_v13 = vpop.permute.xlu0 %1318 }
 0x7c8   : > { %v1334_v20 = vpop.permute.xlu1 %1333 }
 0x7c9   : > { %v1329_v19 = vpop.permute.xlu0 %1328 }
 0x7cc   : > { %v1304_v32 = vpop.permute.xlu1 %1303 }
 0x7cd   : > { %v1299_v26 = vpop.permute.xlu0 %1298 }
 0x7d0   : > { %v1314_v37 = vpop.permute.xlu1 %1313 }
 0x7d1   : > { %v1309_v40 = vpop.permute.xlu0 %1308 }
 0x7d4   : > { %v1510_v6 = vpop.permute.xlu1 %1509 }
 0x7d5   : > { %v1505_v5 = vpop.permute.xlu0 %1504 }
 0x7d8   : > { %v1520_v11 = vpop.permute.xlu1 %1519 }
 0x7d9   : > { %v1515_v7 = vpop.permute.xlu0 %1514 }
 0x890   : > { %v11278_v14 = vpop.f32.mrb[20].mxu1 }
 0x891   : > { %v1427_v16 = vpop.f32.mrb[21].mxu1  ;;  %v1436_v42 = vadd.f32 %v11278_v14, %v1309_v40  ;;  %v12234_v40 = vld [vmem:[%s15651_s2 + $0x60] sm:$0xff]  }
 0x892   : > { %v11279_v17 = vpop.f32.mrb[22].mxu1  ;;  %v1428_v38 = vadd.f32 %v1427_v16, %v1299_v26  ;;  %v1588_v26 = vld [vmem:[#allocation3 + $0x8] sm:$0xff] }
 0x893   : > { %v1430_v18 = vpop.f32.mrb[23].mxu1  ;;  %v1439_v39 = vadd.f32 %v11279_v17, %v1314_v37  ;;  %v1587_v17 = vld [vmem:[#allocation3] sm:$0xff] }
 0x894   : > { %v1431_v50 = vadd.f32 %v1430_v18, %v1304_v32 }
 0x898   : > { %v11282_v21 = vpop.f32.mrb[24].mxu1 }
 0x899   : > { %v1452_v22 = vadd.f32 %v11282_v21, %v1329_v19  ;;  %v1443_v23 = vpop.f32.mrb[25].mxu1 }
 0x89a   : > { %v1444_v24 = vadd.f32 %v1443_v23, %v1319_v13  ;;  %v11283_v25 = vpop.f32.mrb[26].mxu1 }
 0x89b   : > { %v9954_v27 = vmul.f32 -1.442695, %v1452_v22  ;;  %v1455_v28 = vadd.f32 %v11283_v25, %v1334_v20  ;;  %v1446_v29 = vpop.f32.mrb[27].mxu1  ;;  %v1590_v22 = vld [vmem:[#allocation3 + $0x18] sm:$0xff] }
 0x89c   : > { %v9952_v30 = vmul.f32 -1.442695, %v1444_v24  ;;  %v1447_v31 = vadd.f32 %v1446_v29, %v1324_v15 }
 0x89d   : > { %12410 = vpow2.f32 %v9954_v27  ;;  %v9955_v47 = vmul.f32 -1.442695, %v1455_v28 }
 0x89e   : > { %12412 = vpow2.f32 %v9952_v30  ;;  %v9953_v33 = vmul.f32 -1.442695, %v1447_v31  ;;  %v12938_v31 = vld [vmem:[#allocation2] sm:$0xff] }
 0x89f   : > { %12414 = vpow2.f32 %v9955_v47  ;;  %v13413_v32 = vpack.c.bf16 %v12938_v31, %v12938_v31 }
 0x8a0   : > { %12416 = vpow2.f32 %v9953_v33 }
 0x8a1   : > { %12418 = vtanh.f32 %v1436_v42 }
 0x8a2   : > { %12420 = vtanh.f32 %v1428_v38 }
 0x8a3   : > { %12422 = vtanh.f32 %v1439_v39 }
 0x8a4   : > { %12424 = vtanh.f32 %v1431_v50 }
 0x8a7   : > { %v12411_v51 = vpop.eup %12410 }
 0x8a8   : > { %v12413_v48 = vpop.eup %12412  ;;  %v1476_v43 = vadd.f32 1.0, %v12411_v51 }
 0x8a9   : > { %v12415_v44 = vpop.eup %12414  ;;  %v1474_v45 = vadd.f32 1.0, %v12413_v48 }
 0x8aa   : > { %v12417_v46 = vpop.eup %12416  ;;  %12426 = vrcp.f32 %v1476_v43  ;;  %v1477_v49 = vadd.f32 1.0, %v12415_v44 }
 0x8ab   : > { %12428 = vrcp.f32 %v1474_v45  ;;  %v1475_v52 = vadd.f32 1.0, %v12417_v46  ;;  %v12419_v54 = vpop.eup %12418 }
 0x8ac   : > { %12430 = vrcp.f32 %v1477_v49  ;;  %v12421_v55 = vpop.eup %12420  ;;  %v9981_v49 = vld [vmem:[%s15652_s3 + $0xe8] sm:$0xff] }
 0x8ad   : > { %12432 = vrcp.f32 %v1475_v52  ;;  %v12423_v56 = vpop.eup %12422  ;;  %v9980_v52 = vld [vmem:[%s15652_s3 + $0xe0] sm:$0xff] }
 0x8ae   : > { %v12425_v57 = vpop.eup %12424 }
 0x8b4   : > { %v12427_v58 = vpop.eup %12426 }
 0x8b5   : > { %v12429_v59 = vpop.eup %12428  ;;  %v1488_v60 = vmul.f32 %v12427_v58, %v12419_v54  ;;  %v9982_v58 = vld [vmem:[%s15652_s3 + $0xf0] sm:$0xff] }
 0x8b6   : > { %v12431_v61 = vpop.eup %12430  ;;  %v1486_v62 = vmul.f32 %v12429_v59, %v12421_v55  ;;  %v9977_v59 = vld [vmem:[%s15652_s3 + $0xc8] sm:$0xff] }
 0x8b7   : > { %v12433_v63 = vpop.eup %12432  ;;  %v1489_v0 = vmul.f32 %v12431_v61, %v12423_v56  ;;  %v9979_v61 = vld [vmem:[%s15652_s3 + $0xd8] sm:$0xff] }
 0x8b8   : > { %v1487_v1 = vmul.f32 %v12433_v63, %v12425_v57  ;;  %v9983_v57 = vld [vmem:[%s15652_s3 + $0xf8] sm:$0xff]  ;;  %v10001_v63 = vld [vmem:[%s15654_s5 + $0x68] sm:$0xff] }
 0x8b9   : > { %v1496_v2 = vpack.c.bf16 %v1489_v0, %v1488_v60  ;;  %v9976_v60 = vld [vmem:[%s15652_s3 + $0xc0] sm:$0xff] }
 0x8ba   : > { %v1495_v3 = vpack.c.bf16 %v1487_v1, %v1486_v62  ;;  %v9978_v62 = vld [vmem:[%s15652_s3 + $0xd0] sm:$0xff]  ;;  %v10000_v0 = vld [vmem:[%s15654_s5 + $0x60] sm:$0xff]  ;;  %v10003_v1 = vld [vmem:[%s15654_s5 + $0x78] sm:$0xff] }
 0x8bc   : > { %11284 = vmatprep.subr.bf16.mxu0 %v1495_v3 }
 0x8bd   : > { %11285 = vmatpush3.bf16.msra.mxu0 %v1495_v3 }
 0x8be   : > { %11286 = vmatprep.subr.bf16.mxu0 %v1496_v2 }
 0x8c1   : > { %11287 = vmatpush3.bf16.msra.mxu0 %v1496_v2  ;;  %v10002_v2 = vld [vmem:[%s15654_s5 + $0x70] sm:$0xff] }
 0x8c4   : > { %11289 = vmatmul.mubr.msk.bf16.vlgmr.msra.gmra.mrb[4].mxu0 %vm813_vm2, %v12233_v4 }
 0x8c5   : > { %11300 = vmatprep.mubr.msk.bf16.mxu0 %vm524_vm0, %v12234_v40 }
 0x997   : > { %v11290_v8 = vpop.f32.mrb[4].mxu0 }
 0x998   : > { %v1581_v9 = vadd.f32 %v11290_v8, %v1515_v7  ;;  %v1572_v10 = vpop.f32.mrb[5].mxu0  ;;  %v12237_v7 = vld [vmem:[%s15651_s2 + $0x78] sm:$0xff]   ;;  %v12238_v8 = vld [vmem:[%s15653_s4 + $0x30] sm:$0xff]  }
 0x999   : > { %v1573_v13 = vadd.f32 %v1572_v10, %v1505_v5  ;;  %v11291_v14 = vpop.f32.mrb[6].mxu0  ;;  %v12235_v5 = vld [vmem:[%s15651_s2 + $0x68] sm:$0xff]   ;;  %11312 = vmatprep.mubr.msk.bf16.mxu1 %vm813_vm2, %v12238_v8 }
 0x99a   : > { %v1593_v15 = vadd.f32 %v1589_v12, %v1581_v9  ;;  %v1601_v16 = vadd.f32 %v1581_v9, %v13299_v41  ;;  %v1584_v18 = vadd.f32 %v11291_v14, %v1520_v11  ;;  %v1575_v19 = vpop.f32.mrb[7].mxu0 }
 0x99b   : > { %v1591_v20 = vadd.f32 %v1587_v17, %v1573_v13  ;;  %v1599_v21 = vadd.f32 %v1573_v13, %v13305_v35  ;;  %v1576_v23 = vadd.f32 %v1575_v19, %v1510_v6  ;;  %v12236_v6 = vld [vmem:[%s15651_s2 + $0x70] sm:$0xff]  }
 0x99c   : > { %1597 = vst.msk [vmem:[#allocation3 + $0x10] sm:$0xff] %vm524_vm0, %v1593_v15  ;;  %1605 = vst.msk [vmem:[#allocation2 + $0x28] sm:$0xff] %vm524_vm0, %v1601_v16  ;;  %v1594_v24 = vadd.f32 %v1590_v22, %v1584_v18  ;;  %v1602_v25 = vadd.f32 %v1584_v18, %v13301_v34 }
 0x99d   : > { %1595 = vst.msk [vmem:[#allocation3] sm:$0xff] %vm524_vm0, %v1591_v20  ;;  %1603 = vst.msk [vmem:[#allocation2 + $0x8] sm:$0xff] %vm524_vm0, %v1599_v21  ;;  %v1592_v41 = vadd.f32 %v1588_v26, %v1576_v23  ;;  %v1600_v27 = vadd.f32 %v1576_v23, %v13307_v36 }
 0x99e   : > { %1598 = vst.msk [vmem:[#allocation3 + $0x18] sm:$0xff] %vm524_vm0, %v1594_v24  ;;  %1606 = vst.msk [vmem:[#allocation2 + $0x38] sm:$0xff] %vm524_vm0, %v1602_v25 }
 0x99f   : > { %1596 = vst.msk [vmem:[#allocation3 + $0x8] sm:$0xff] %vm524_vm0, %v1592_v41  ;;  %1604 = vst.msk [vmem:[#allocation2 + $0x18] sm:$0xff] %vm524_vm0, %v1600_v27 }
 0x9a3   : > { %v13399_v35 = vld [vmem:[#allocation2 + $0x28] sm:$0xff] }
 0x9a4   : > { %v13405_v29 = vld [vmem:[#allocation2 + $0x8] sm:$0xff] }
 0x9a5   : > { %v13401_v28 = vld [vmem:[#allocation2 + $0x38] sm:$0xff] }
 0x9a6   : > { %v12041_v34 = vpack.i.bf16 %v13401_v28, %v13399_v35  ;;  %v13407_v30 = vld [vmem:[#allocation2 + $0x18] sm:$0xff]  ;;  %v1634_v33 = vpack.c.bf16 %v13401_v28, %v13399_v35 }
 0x9a7   : > { %v12036_v36 = vpack.i.bf16 %v13407_v30, %v13405_v29  ;;  %v1632_v47 = vpack.c.bf16 %v13407_v30, %v13405_v29 }
 0x9a8   : > { %12042 = vrot.lane.b32.xlu1 %v12041_v34, %s15664_s24 }
 0x9a9   : > { %12037 = vrot.lane.b32.xlu0 %v12036_v36, %s15664_s24  ;;  %s15668_s24 = smov 112  }
 0x9ac   : > { %1723 = vrot.lane.b32.xlu1 %v1632_v47, %s15662_s25 }
 0x9ad   : > { %1721 = vrot.lane.b32.xlu0 %v13413_v32, %s15662_s25 }
 0x9b0   : > { %1727 = vrot.lane.b32.xlu1 %v1634_v33, %s15662_s25 }
 0x9b1   : > { %1725 = vrot.lane.b32.xlu0 %v13413_v32, %s15662_s25 }
 0xa1a   : > { %v12043_v42 = vpop.permute.xlu1 %12042 }
 0xa1b   : > { %v12045_v37 = vunpack.i.h.bf16 %v12043_v42  ;;  %v12044_v38 = vunpack.i.l.bf16 %v12043_v42  ;;  %v12038_v39 = vpop.permute.xlu0 %12037 }
 0xa1c   : > { %v12040_v50 = vunpack.i.h.bf16 %v12038_v39  ;;  %v12039_v51 = vunpack.i.l.bf16 %v12038_v39 }
 0xa1d   : > { %v1636_v48 = vpack.c.bf16 %v12045_v37, %v12044_v38 }
 0xa1e   : > { %v1724_v43 = vpop.permute.xlu1 %1723  ;;  %v1635_v44 = vpack.c.bf16 %v12040_v50, %v12039_v51 }
 0xa1f   : > { %v1722_v45 = vpop.permute.xlu0 %1721  ;;  %1731 = vrot.lane.b32.xlu1 %v1636_v48, %s15662_s25 }
 0xa20   : > { %1729 = vrot.lane.b32.xlu0 %v1635_v44, %s15662_s25  ;;  %v1734_v46 = vsel %vm1733_vm5, %v1722_v45, %v1724_v43  ;;  %s15666_s25 = smov 16  }
 0xa21   : > { %11292 = vmatprep.subr.bf16.mxu0 %v1734_v46 }
 0xa22   : > { %11293 = vmatpush3.bf16.msra.mxu0 %v1734_v46  ;;  %v1728_v54 = vpop.permute.xlu1 %1727 }
 0xa23   : > { %v1726_v55 = vpop.permute.xlu0 %1725  ;;  %1682 = vperm.xlu1 %12005, %v9981_v49  }
 0xa24   : > { %1677 = vperm.xlu0 %12004, %v9980_v52   ;;  %v1735_v56 = vsel %vm1733_vm5, %v1726_v55, %v1728_v54 }
 0xa25   : > { %11294 = vmatprep.subr.bf16.mxu0 %v1735_v56 }
 0xa26   : > { %11295 = vmatpush3.bf16.msra.mxu0 %v1735_v56 }
 0xa27   : > { %1692 = vperm.xlu1 %12005, %v9983_v57  }
 0xa28   : > { %1687 = vperm.xlu0 %12004, %v9982_v58  }
 0xa2b   : > { %1662 = vperm.xlu1 %12005, %v9977_v59  }
 0xa2c   : > { %1657 = vperm.xlu0 %12004, %v9976_v60  }
 0xa2f   : > { %1672 = vperm.xlu1 %12005, %v9979_v61  }
 0xa30   : > { %1667 = vperm.xlu0 %12004, %v9978_v62  }
 0xa33   : > { %1868 = vperm.xlu1 %12005, %v10001_v63  }
 0xa34   : > { %1863 = vperm.xlu0 %12004, %v10000_v0  }
 0xa37   : > { %1878 = vperm.xlu1 %12005, %v10003_v1   ;;  %v12239_v1 = vld [vmem:[%s15653_s4 + $0x38] sm:$0xff]  }
 0xa38   : > { %1873 = vperm.xlu0 %12004, %v10002_v2  }
 0xa91   : > { %v1732_v4 = vpop.permute.xlu1 %1731 }
 0xa92   : > { %v1730_v3 = vpop.permute.xlu0 %1729 }
 0xa93   : > { %11296 = vmatprep.subr.bf16.mxu0 %v1730_v3 }
 0xa94   : > { %11297 = vmatpush3.bf16.msra.mxu0 %v1730_v3 }
 0xa95   : > { %11298 = vmatprep.subr.bf16.mxu0 %v1732_v4 }
 0xa98   : > { %11299 = vmatpush3.bf16.msra.mxu0 %v1732_v4 }
 0xa9b   : > { %11301 = vmatmul.mubr.msk.bf16.vlgmr.msra.gmra.mrb[8].mxu0 %vm524_vm0, %v12235_v5 }
 0xa9c   : > { %11304 = vmatprep.mubr.msk.bf16.mxu0 %vm524_vm0, %v12236_v6 }
 0xaa2   : > { %v1683_v11 = vpop.permute.xlu1 %1682 }
 0xaa3   : > { %11305 = vmatmul.mubr.msk.bf16.gmra.mrb[12].mxu0 %vm524_vm0, %v12237_v7  ;;  %v1678_v9 = vpop.permute.xlu0 %1677 }
 0xaa6   : > { %v1693_v16 = vpop.permute.xlu1 %1692 }
 0xaa7   : > { %v1688_v15 = vpop.permute.xlu0 %1687 }
 0xaaa   : > { %v1663_v27 = vpop.permute.xlu1 %1662 }
 0xaab   : > { %v1658_v22 = vpop.permute.xlu0 %1657 }
 0xaae   : > { %v1673_v33 = vpop.permute.xlu1 %1672 }
 0xaaf   : > { %v1668_v31 = vpop.permute.xlu0 %1667 }
 0xab2   : > { %v1869_v3 = vpop.permute.xlu1 %1868 }
 0xab3   : > { %v1864_v2 = vpop.permute.xlu0 %1863 }
 0xab6   : > { %v1879_v8 = vpop.permute.xlu1 %1878 }
 0xab7   : > { %v1874_v4 = vpop.permute.xlu0 %1873 }
 0xb6e   : > { %v11302_v10 = vpop.f32.mrb[8].mxu0 }
 0xb6f   : > { %v1786_v12 = vpop.f32.mrb[9].mxu0  ;;  %v1795_v47 = vadd.f32 %v11302_v10, %v1668_v31 }
 0xb70   : > { %v11303_v13 = vpop.f32.mrb[10].mxu0  ;;  %v1787_v40 = vadd.f32 %v1786_v12, %v1658_v22 }
 0xb71   : > { %v1789_v14 = vpop.f32.mrb[11].mxu0  ;;  %v1798_v42 = vadd.f32 %v11303_v13, %v1673_v33 }
 0xb72   : > { %v1790_v37 = vadd.f32 %v1789_v14, %v1663_v27  ;;  %v1946_v14 = vld [vmem:[#allocation3] sm:$0xff] }
 0xb76   : > { %v11306_v17 = vpop.f32.mrb[12].mxu0 }
 0xb77   : > { %v1811_v18 = vadd.f32 %v11306_v17, %v1688_v15  ;;  %v1802_v19 = vpop.f32.mrb[13].mxu0 }
 0xb78   : > { %v1803_v20 = vadd.f32 %v1802_v19, %v1678_v9  ;;  %v11307_v21 = vpop.f32.mrb[14].mxu0  ;;  %v1948_v9 = vld [vmem:[#allocation3 + $0x10] sm:$0xff]  ;;  %v1949_v19 = vld [vmem:[#allocation3 + $0x18] sm:$0xff] }
 0xb79   : > { %v9994_v23 = vmul.f32 -1.442695, %v1811_v18  ;;  %v1814_v24 = vadd.f32 %v11307_v21, %v1693_v16  ;;  %v1805_v25 = vpop.f32.mrb[15].mxu0 }
 0xb7a   : > { %v9992_v26 = vmul.f32 -1.442695, %v1803_v20  ;;  %v1806_v41 = vadd.f32 %v1805_v25, %v1683_v11 }
 0xb7b   : > { %12434 = vpow2.f32 %v9994_v23  ;;  %v9995_v34 = vmul.f32 -1.442695, %v1814_v24  ;;  %v1947_v23 = vld [vmem:[#allocation3 + $0x8] sm:$0xff] }
 0xb7c   : > { %12436 = vpow2.f32 %v9992_v26  ;;  %v9993_v36 = vmul.f32 -1.442695, %v1806_v41 }
 0xb7d   : > { %12438 = vpow2.f32 %v9995_v34 }
 0xb7e   : > { %12440 = vpow2.f32 %v9993_v36  ;;  %v12240_v36 = vld [vmem:[%s15651_s2 + $0x80] sm:$0xff]  }
 0xb7f   : > { %12442 = vtanh.f32 %v1795_v47  ;;  %11324 = vmatprep.mubr.msk.bf16.mxu0 %vm524_vm0, %v12240_v36 }
 0xb80   : > { %12444 = vtanh.f32 %v1787_v40 }
 0xb81   : > { %12446 = vtanh.f32 %v1798_v42 }
 0xb82   : > { %12448 = vtanh.f32 %v1790_v37 }
 0xb85   : > { %v12435_v38 = vpop.eup %12434 }
 0xb86   : > { %v12437_v39 = vpop.eup %12436  ;;  %v1835_v50 = vadd.f32 1.0, %v12435_v38 }
 0xb87   : > { %v12439_v51 = vpop.eup %12438  ;;  %v1833_v48 = vadd.f32 1.0, %v12437_v39 }
 0xb88   : > { %v12441_v43 = vpop.eup %12440  ;;  %12450 = vrcp.f32 %v1835_v50  ;;  %v1836_v44 = vadd.f32 1.0, %v12439_v51 }
 0xb89   : > { %12452 = vrcp.f32 %v1833_v48  ;;  %v1834_v45 = vadd.f32 1.0, %v12441_v43  ;;  %v12443_v46 = vpop.eup %12442  ;;  %v10021_v43 = vld [vmem:[%s15652_s3 + $0x128] sm:$0xff] }
 0xb8a   : > { %12454 = vrcp.f32 %v1836_v44  ;;  %v12445_v49 = vpop.eup %12444  ;;  %v10020_v44 = vld [vmem:[%s15652_s3 + $0x120] sm:$0xff] }
 0xb8b   : > { %12456 = vrcp.f32 %v1834_v45  ;;  %v12447_v52 = vpop.eup %12446 }
 0xb8c   : > { %v12449_v54 = vpop.eup %12448 }
 0xb92   : > { %v12451_v55 = vpop.eup %12450 }
 0xb93   : > { %v12453_v56 = vpop.eup %12452  ;;  %v1847_v57 = vmul.f32 %v12451_v55, %v12443_v46  ;;  %v10017_v55 = vld [vmem:[%s15652_s3 + $0x108] sm:$0xff] }
 0xb94   : > { %v12455_v58 = vpop.eup %12454  ;;  %v1845_v59 = vmul.f32 %v12453_v56, %v12445_v49  ;;  %v10016_v56 = vld [vmem:[%s15652_s3 + $0x100] sm:$0xff] }
 0xb95   : > { %v12457_v60 = vpop.eup %12456  ;;  %v1848_v61 = vmul.f32 %v12455_v58, %v12447_v52  ;;  %v10023_v52 = vld [vmem:[%s15652_s3 + $0x138] sm:$0xff]  ;;  %v10018_v58 = vld [vmem:[%s15652_s3 + $0x110] sm:$0xff] }
 0xb96   : > { %v1846_v62 = vmul.f32 %v12457_v60, %v12449_v54  ;;  %v10022_v54 = vld [vmem:[%s15652_s3 + $0x130] sm:$0xff]  ;;  %v10040_v60 = vld [vmem:[%s15654_s5 + $0x80] sm:$0xff] }
 0xb97   : > { %v1855_v63 = vpack.c.bf16 %v1848_v61, %v1847_v57  ;;  %v10019_v57 = vld [vmem:[%s15652_s3 + $0x118] sm:$0xff] }
 0xb98   : > { %v1854_v0 = vpack.c.bf16 %v1846_v62, %v1845_v59  ;;  %v10041_v59 = vld [vmem:[%s15654_s5 + $0x88] sm:$0xff]  ;;  %v10043_v61 = vld [vmem:[%s15654_s5 + $0x98] sm:$0xff]  ;;  %v10042_v62 = vld [vmem:[%s15654_s5 + $0x90] sm:$0xff] }
 0xb9a   : > { %11308 = vmatprep.subr.bf16.mxu1 %v1854_v0 }
 0xb9b   : > { %11309 = vmatpush3.bf16.msra.mxu1 %v1854_v0 }
 0xb9c   : > { %11310 = vmatprep.subr.bf16.mxu1 %v1855_v63 }
 0xb9f   : > { %11311 = vmatpush3.bf16.msra.mxu1 %v1855_v63 }
 0xba2   : > { %11313 = vmatmul.mubr.msk.bf16.vlgmr.msra.gmra.mrb[28].mxu1 %vm813_vm2, %v12239_v1  ;;  %v12241_v1 = vld [vmem:[%s15651_s2 + $0x88] sm:$0xff]  }
 0xc75   : > { %v11314_v5 = vpop.f32.mrb[28].mxu1 }
 0xc76   : > { %v1940_v6 = vadd.f32 %v11314_v5, %v1874_v4  ;;  %v1931_v7 = vpop.f32.mrb[29].mxu1  ;;  %v12244_v4 = vld [vmem:[%s15653_s4 + $0x40] sm:$0xff]  }
 0xc77   : > { %v1932_v10 = vadd.f32 %v1931_v7, %v1864_v2  ;;  %v11315_v11 = vpop.f32.mrb[30].mxu1  ;;  %v12242_v2 = vld [vmem:[%s15651_s2 + $0x90] sm:$0xff]   ;;  %11336 = vmatprep.mubr.msk.bf16.mxu1 %vm813_vm2, %v12244_v4 }
 0xc78   : > { %v1952_v12 = vadd.f32 %v1948_v9, %v1940_v6  ;;  %v1960_v13 = vadd.f32 %v1940_v6, %v13399_v35  ;;  %v1943_v15 = vadd.f32 %v11315_v11, %v1879_v8  ;;  %v1934_v16 = vpop.f32.mrb[31].mxu1 }
 0xc79   : > { %v1950_v17 = vadd.f32 %v1946_v14, %v1932_v10  ;;  %v1958_v18 = vadd.f32 %v1932_v10, %v13405_v29  ;;  %v1935_v20 = vadd.f32 %v1934_v16, %v1869_v3  ;;  %v12243_v3 = vld [vmem:[%s15651_s2 + $0x98] sm:$0xff]  }
 0xc7a   : > { %1956 = vst.msk [vmem:[#allocation3 + $0x10] sm:$0xff] %vm524_vm0, %v1952_v12  ;;  %1964 = vst.msk [vmem:[#allocation2 + $0x28] sm:$0xff] %vm524_vm0, %v1960_v13  ;;  %v1953_v21 = vadd.f32 %v1949_v19, %v1943_v15  ;;  %v1961_v22 = vadd.f32 %v1943_v15, %v13401_v28 }
 0xc7b   : > { %1954 = vst.msk [vmem:[#allocation3] sm:$0xff] %vm524_vm0, %v1950_v17  ;;  %1962 = vst.msk [vmem:[#allocation2 + $0x8] sm:$0xff] %vm524_vm0, %v1958_v18  ;;  %v1951_v35 = vadd.f32 %v1947_v23, %v1935_v20  ;;  %v1959_v24 = vadd.f32 %v1935_v20, %v13407_v30 }
 0xc7c   : > { %1957 = vst.msk [vmem:[#allocation3 + $0x18] sm:$0xff] %vm524_vm0, %v1953_v21  ;;  %1965 = vst.msk [vmem:[#allocation2 + $0x38] sm:$0xff] %vm524_vm0, %v1961_v22 }
 0xc7d   : > { %1955 = vst.msk [vmem:[#allocation3 + $0x8] sm:$0xff] %vm524_vm0, %v1951_v35  ;;  %1963 = vst.msk [vmem:[#allocation2 + $0x18] sm:$0xff] %vm524_vm0, %v1959_v24 }
 0xc81   : > { %v13501_v29 = vld [vmem:[#allocation2 + $0x28] sm:$0xff] }
 0xc82   : > { %v13507_v26 = vld [vmem:[#allocation2 + $0x8] sm:$0xff] }
 0xc83   : > { %v13503_v25 = vld [vmem:[#allocation2 + $0x38] sm:$0xff] }
 0xc84   : > { %v12051_v28 = vpack.i.bf16 %v13503_v25, %v13501_v29  ;;  %v13509_v41 = vld [vmem:[#allocation2 + $0x18] sm:$0xff]  ;;  %v1993_v34 = vpack.c.bf16 %v13503_v25, %v13501_v29 }
 0xc85   : > { %v12046_v30 = vpack.i.bf16 %v13509_v41, %v13507_v26  ;;  %v1991_v27 = vpack.c.bf16 %v13509_v41, %v13507_v26 }
 0xc86   : > { %12052 = vrot.lane.b32.xlu1 %v12051_v28, %s15668_s24 }
 0xc87   : > { %12047 = vrot.lane.b32.xlu0 %v12046_v30, %s15668_s24  ;;  %s15672_s24 = smov 96  }
 0xc8a   : > { %2082 = vrot.lane.b32.xlu1 %v1991_v27, %s15666_s25 }
 0xc8b   : > { %2080 = vrot.lane.b32.xlu0 %v13413_v32, %s15666_s25 }
 0xc8e   : > { %2086 = vrot.lane.b32.xlu1 %v1993_v34, %s15666_s25 }
 0xc8f   : > { %2084 = vrot.lane.b32.xlu0 %v13413_v32, %s15666_s25 }
 0xcf8   : > { %v12053_v31 = vpop.permute.xlu1 %12052 }
 0xcf9   : > { %v12055_v47 = vunpack.i.h.bf16 %v12053_v31  ;;  %v12054_v33 = vunpack.i.l.bf16 %v12053_v31  ;;  %v12048_v40 = vpop.permute.xlu0 %12047 }
 0xcfa   : > { %v12050_v42 = vunpack.i.h.bf16 %v12048_v40  ;;  %v12049_v37 = vunpack.i.l.bf16 %v12048_v40 }
 0xcfb   : > { %v1995_v38 = vpack.c.bf16 %v12055_v47, %v12054_v33 }
 0xcfc   : > { %v1994_v39 = vpack.c.bf16 %v12050_v42, %v12049_v37  ;;  %v2083_v50 = vpop.permute.xlu1 %2082 }
 0xcfd   : > { %v2081_v51 = vpop.permute.xlu0 %2080  ;;  %2090 = vrot.lane.b32.xlu1 %v1995_v38, %s15666_s25 }
 0xcfe   : > { %2088 = vrot.lane.b32.xlu0 %v1994_v39, %s15666_s25  ;;  %v2093_v48 = vsel %vm2092_vm6, %v2081_v51, %v2083_v50  ;;  %s15670_s25 = smov 32  }
 0xcff   : > { %11316 = vmatprep.subr.bf16.mxu0 %v2093_v48 }
 0xd00   : > { %11317 = vmatpush3.bf16.msra.mxu0 %v2093_v48  ;;  %v2087_v45 = vpop.permute.xlu1 %2086 }
 0xd01   : > { %v2085_v46 = vpop.permute.xlu0 %2084  ;;  %2041 = vperm.xlu1 %12005, %v10021_v43  }
 0xd02   : > { %2036 = vperm.xlu0 %12004, %v10020_v44   ;;  %v2094_v49 = vsel %vm2092_vm6, %v2085_v46, %v2087_v45 }
 0xd03   : > { %11318 = vmatprep.subr.bf16.mxu0 %v2094_v49 }
 0xd04   : > { %11319 = vmatpush3.bf16.msra.mxu0 %v2094_v49 }
 0xd05   : > { %2051 = vperm.xlu1 %12005, %v10023_v52  }
 0xd06   : > { %2046 = vperm.xlu0 %12004, %v10022_v54  }
 0xd09   : > { %2021 = vperm.xlu1 %12005, %v10017_v55  }
 0xd0a   : > { %2016 = vperm.xlu0 %12004, %v10016_v56  }
 0xd0d   : > { %2031 = vperm.xlu1 %12005, %v10019_v57  }
 0xd0e   : > { %2026 = vperm.xlu0 %12004, %v10018_v58  }
 0xd11   : > { %2227 = vperm.xlu1 %12005, %v10041_v59  }
 0xd12   : > { %2222 = vperm.xlu0 %12004, %v10040_v60  }
 0xd15   : > { %2237 = vperm.xlu1 %12005, %v10043_v61   ;;  %v12245_v61 = vld [vmem:[%s15653_s4 + $0x48] sm:$0xff]  }
 0xd16   : > { %2232 = vperm.xlu0 %12004, %v10042_v62  }
 0xd6f   : > { %v2091_v0 = vpop.permute.xlu1 %2090 }
 0xd70   : > { %v2089_v63 = vpop.permute.xlu0 %2088 }
 0xd71   : > { %11320 = vmatprep.subr.bf16.mxu0 %v2089_v63 }
 0xd72   : > { %11321 = vmatpush3.bf16.msra.mxu0 %v2089_v63 }
 0xd73   : > { %11322 = vmatprep.subr.bf16.mxu0 %v2091_v0 }
 0xd76   : > { %11323 = vmatpush3.bf16.msra.mxu0 %v2091_v0 }
 0xd79   : > { %11325 = vmatmul.mubr.msk.bf16.vlgmr.msra.gmra.mrb[16].mxu0 %vm524_vm0, %v12241_v1 }
 0xd7a   : > { %11328 = vmatprep.mubr.msk.bf16.mxu0 %vm524_vm0, %v12242_v2 }
 0xd80   : > { %v2042_v7 = vpop.permute.xlu1 %2041 }
 0xd81   : > { %11329 = vmatmul.mubr.msk.bf16.gmra.mrb[20].mxu0 %vm524_vm0, %v12243_v3  ;;  %v2037_v5 = vpop.permute.xlu0 %2036 }
 0xd84   : > { %v2052_v12 = vpop.permute.xlu1 %2051 }
 0xd85   : > { %v2047_v11 = vpop.permute.xlu0 %2046 }
 0xd88   : > { %v2022_v35 = vpop.permute.xlu1 %2021 }
 0xd89   : > { %v2017_v18 = vpop.permute.xlu0 %2016 }
 0xd8c   : > { %v2032_v34 = vpop.permute.xlu1 %2031 }
 0xd8d   : > { %v2027_v30 = vpop.permute.xlu0 %2026 }
 0xd90   : > { %v2228_v63 = vpop.permute.xlu1 %2227 }
 0xd91   : > { %v2223_v62 = vpop.permute.xlu0 %2222 }
 0xd94   : > { %v2238_v4 = vpop.permute.xlu1 %2237 }
 0xd95   : > { %v2233_v0 = vpop.permute.xlu0 %2232 }
 0xe4c   : > { %v11326_v6 = vpop.f32.mrb[16].mxu0 }
 0xe4d   : > { %v2145_v8 = vpop.f32.mrb[17].mxu0  ;;  %v2154_v27 = vadd.f32 %v11326_v6, %v2027_v30 }
 0xe4e   : > { %v11327_v9 = vpop.f32.mrb[18].mxu0  ;;  %v2146_v36 = vadd.f32 %v2145_v8, %v2017_v18 }
 0xe4f   : > { %v2148_v10 = vpop.f32.mrb[19].mxu0  ;;  %v2157_v31 = vadd.f32 %v11327_v9, %v2032_v34 }
 0xe50   : > { %v2149_v47 = vadd.f32 %v2148_v10, %v2022_v35  ;;  %v2305_v10 = vld [vmem:[#allocation3] sm:$0xff] }
 0xe54   : > { %v11330_v13 = vpop.f32.mrb[20].mxu0 }
 0xe55   : > { %v2170_v14 = vadd.f32 %v11330_v13, %v2047_v11  ;;  %v2161_v15 = vpop.f32.mrb[21].mxu0 }
 0xe56   : > { %v2162_v16 = vadd.f32 %v2161_v15, %v2037_v5  ;;  %v11331_v17 = vpop.f32.mrb[22].mxu0  ;;  %v2307_v5 = vld [vmem:[#allocation3 + $0x10] sm:$0xff]  ;;  %v2308_v15 = vld [vmem:[#allocation3 + $0x18] sm:$0xff] }
 0xe57   : > { %v10034_v19 = vmul.f32 -1.442695, %v2170_v14  ;;  %v2173_v20 = vadd.f32 %v11331_v17, %v2052_v12  ;;  %v2164_v21 = vpop.f32.mrb[23].mxu0 }
 0xe58   : > { %v10032_v22 = vmul.f32 -1.442695, %v2162_v16  ;;  %v2165_v23 = vadd.f32 %v2164_v21, %v2042_v7 }
 0xe59   : > { %12458 = vpow2.f32 %v10034_v19  ;;  %v10035_v24 = vmul.f32 -1.442695, %v2173_v20  ;;  %v2306_v19 = vld [vmem:[#allocation3 + $0x8] sm:$0xff] }
 0xe5a   : > { %12460 = vpow2.f32 %v10032_v22  ;;  %v10033_v28 = vmul.f32 -1.442695, %v2165_v23 }
 0xe5b   : > { %12462 = vpow2.f32 %v10035_v24 }
 0xe5c   : > { %12464 = vpow2.f32 %v10033_v28  ;;  %v12246_v28 = vld [vmem:[%s15651_s2 + $0xa0] sm:$0xff]  }
 0xe5d   : > { %12466 = vtanh.f32 %v2154_v27 }
 0xe5e   : > { %12468 = vtanh.f32 %v2146_v36 }
 0xe5f   : > { %12470 = vtanh.f32 %v2157_v31 }
 0xe60   : > { %12472 = vtanh.f32 %v2149_v47 }
 0xe63   : > { %v12459_v33 = vpop.eup %12458 }
 0xe64   : > { %v12461_v40 = vpop.eup %12460  ;;  %v2194_v42 = vadd.f32 1.0, %v12459_v33 }
 0xe65   : > { %v12463_v37 = vpop.eup %12462  ;;  %v2192_v38 = vadd.f32 1.0, %v12461_v40 }
 0xe66   : > { %v12465_v39 = vpop.eup %12464  ;;  %12474 = vrcp.f32 %v2194_v42  ;;  %v2195_v50 = vadd.f32 1.0, %v12463_v37 }
 0xe67   : > { %12476 = vrcp.f32 %v2192_v38  ;;  %v2193_v51 = vadd.f32 1.0, %v12465_v39  ;;  %v12467_v48 = vpop.eup %12466  ;;  %v10061_v38 = vld [vmem:[%s15652_s3 + $0x168] sm:$0xff]  ;;  %v10060_v39 = vld [vmem:[%s15652_s3 + $0x160] sm:$0xff] }
 0xe68   : > { %12478 = vrcp.f32 %v2195_v50  ;;  %v12469_v43 = vpop.eup %12468 }
 0xe69   : > { %12480 = vrcp.f32 %v2193_v51  ;;  %v12471_v44 = vpop.eup %12470 }
 0xe6a   : > { %v12473_v45 = vpop.eup %12472 }
 0xe70   : > { %v12475_v46 = vpop.eup %12474 }
 0xe71   : > { %v12477_v49 = vpop.eup %12476  ;;  %v2206_v52 = vmul.f32 %v12475_v46, %v12467_v48  ;;  %v10056_v46 = vld [vmem:[%s15652_s3 + $0x140] sm:$0xff] }
 0xe72   : > { %v12479_v54 = vpop.eup %12478  ;;  %v2204_v55 = vmul.f32 %v12477_v49, %v12469_v43  ;;  %v10063_v43 = vld [vmem:[%s15652_s3 + $0x178] sm:$0xff] }
 0xe73   : > { %v12481_v56 = vpop.eup %12480  ;;  %v2207_v57 = vmul.f32 %v12479_v54, %v12471_v44  ;;  %v10062_v44 = vld [vmem:[%s15652_s3 + $0x170] sm:$0xff]  ;;  %v10059_v49 = vld [vmem:[%s15652_s3 + $0x158] sm:$0xff]  ;;  %v10081_v54 = vld [vmem:[%s15654_s5 + $0xa8] sm:$0xff] }
 0xe74   : > { %v2205_v58 = vmul.f32 %v12481_v56, %v12473_v45  ;;  %v10057_v45 = vld [vmem:[%s15652_s3 + $0x148] sm:$0xff]  ;;  %v10083_v56 = vld [vmem:[%s15654_s5 + $0xb8] sm:$0xff] }
 0xe75   : > { %v2214_v59 = vpack.c.bf16 %v2207_v57, %v2206_v52  ;;  %v10058_v52 = vld [vmem:[%s15652_s3 + $0x150] sm:$0xff] }
 0xe76   : > { %v2213_v60 = vpack.c.bf16 %v2205_v58, %v2204_v55  ;;  %v10080_v55 = vld [vmem:[%s15654_s5 + $0xa0] sm:$0xff]  ;;  %v10082_v57 = vld [vmem:[%s15654_s5 + $0xb0] sm:$0xff] }
 0xe78   : > { %11332 = vmatprep.subr.bf16.mxu1 %v2213_v60 }
 0xe79   : > { %11333 = vmatpush3.bf16.msra.mxu1 %v2213_v60  ;;  %v12247_v60 = vld [vmem:[%s15651_s2 + $0xa8] sm:$0xff]  }
 0xe7a   : > { %11334 = vmatprep.subr.bf16.mxu1 %v2214_v59 }
 0xe7d   : > { %11335 = vmatpush3.bf16.msra.mxu1 %v2214_v59 }
 0xe80   : > { %11337 = vmatmul.mubr.msk.bf16.vlgmr.msra.gmra.mrb[32].mxu1 %vm813_vm2, %v12245_v61  ;;  %v12248_v61 = vld [vmem:[%s15651_s2 + $0xb0] sm:$0xff]  }
 0xe81   : > { %11348 = vmatprep.mubr.msk.bf16.mxu1 %vm524_vm0, %v12246_v28 }
 0xf53   : > { %v11338_v1 = vpop.f32.mrb[32].mxu1 }
 0xf54   : > { %v2299_v2 = vadd.f32 %v11338_v1, %v2233_v0  ;;  %v2290_v3 = vpop.f32.mrb[33].mxu1 }
 0xf55   : > { %v2291_v6 = vadd.f32 %v2290_v3, %v2223_v62  ;;  %v11339_v7 = vpop.f32.mrb[34].mxu1  ;;  %v12249_v62 = vld [vmem:[%s15651_s2 + $0xb8] sm:$0xff]  }
 0xf56   : > { %v2311_v8 = vadd.f32 %v2307_v5, %v2299_v2  ;;  %v2319_v9 = vadd.f32 %v2299_v2, %v13501_v29  ;;  %v2302_v11 = vadd.f32 %v11339_v7, %v2238_v4  ;;  %v2293_v12 = vpop.f32.mrb[35].mxu1 }
 0xf57   : > { %v2309_v13 = vadd.f32 %v2305_v10, %v2291_v6  ;;  %v2317_v14 = vadd.f32 %v2291_v6, %v13507_v26  ;;  %v2294_v16 = vadd.f32 %v2293_v12, %v2228_v63  ;;  %v12250_v63 = vld [vmem:[%s15653_s4 + $0x50] sm:$0xff]  }
 0xf58   : > { %2315 = vst.msk [vmem:[#allocation3 + $0x10] sm:$0xff] %vm524_vm0, %v2311_v8  ;;  %2323 = vst.msk [vmem:[#allocation2 + $0x28] sm:$0xff] %vm524_vm0, %v2319_v9  ;;  %v2312_v17 = vadd.f32 %v2308_v15, %v2302_v11  ;;  %v2320_v18 = vadd.f32 %v2302_v11, %v13503_v25  ;;  %11360 = vmatprep.mubr.msk.bf16.mxu0 %vm813_vm2, %v12250_v63 }
 0xf59   : > { %2313 = vst.msk [vmem:[#allocation3] sm:$0xff] %vm524_vm0, %v2309_v13  ;;  %2321 = vst.msk [vmem:[#allocation2 + $0x8] sm:$0xff] %vm524_vm0, %v2317_v14  ;;  %v2310_v29 = vadd.f32 %v2306_v19, %v2294_v16  ;;  %v2318_v20 = vadd.f32 %v2294_v16, %v13509_v41 }
 0xf5a   : > { %2316 = vst.msk [vmem:[#allocation3 + $0x18] sm:$0xff] %vm524_vm0, %v2312_v17  ;;  %2324 = vst.msk [vmem:[#allocation2 + $0x38] sm:$0xff] %vm524_vm0, %v2320_v18 }
 0xf5b   : > { %2314 = vst.msk [vmem:[#allocation3 + $0x8] sm:$0xff] %vm524_vm0, %v2310_v29  ;;  %2322 = vst.msk [vmem:[#allocation2 + $0x18] sm:$0xff] %vm524_vm0, %v2318_v20 }
 0xf5f   : > { %v13601_v26 = vld [vmem:[#allocation2 + $0x28] sm:$0xff]  ;;  %v2666_v63 = vld [vmem:[#allocation3 + $0x10] sm:$0xff] }
 0xf60   : > { %v13607_v22 = vld [vmem:[#allocation2 + $0x8] sm:$0xff] }
 0xf61   : > { %v13603_v21 = vld [vmem:[#allocation2 + $0x38] sm:$0xff] }
 0xf62   : > { %v12061_v25 = vpack.i.bf16 %v13603_v21, %v13601_v26  ;;  %v13609_v23 = vld [vmem:[#allocation2 + $0x18] sm:$0xff]  ;;  %v2352_v24 = vpack.c.bf16 %v13603_v21, %v13601_v26 }
 0xf63   : > { %v12056_v41 = vpack.i.bf16 %v13609_v23, %v13607_v22  ;;  %v2350_v35 = vpack.c.bf16 %v13609_v23, %v13607_v22 }
 0xf64   : > { %12062 = vrot.lane.b32.xlu1 %v12061_v25, %s15672_s24 }
 0xf65   : > { %12057 = vrot.lane.b32.xlu0 %v12056_v41, %s15672_s24  ;;  %s15674_s24 = smov 64  }
 0xf68   : > { %2441 = vrot.lane.b32.xlu1 %v2350_v35, %s15670_s25 }
 0xf69   : > { %2439 = vrot.lane.b32.xlu0 %v13413_v32, %s15670_s25 }
 0xf6c   : > { %2445 = vrot.lane.b32.xlu1 %v2352_v24, %s15670_s25 }
 0xf6d   : > { %2443 = vrot.lane.b32.xlu0 %v13413_v32, %s15670_s25 }
 0xfd6   : > { %v12063_v30 = vpop.permute.xlu1 %12062 }
 0xfd7   : > { %v12065_v27 = vunpack.i.h.bf16 %v12063_v30  ;;  %v12064_v34 = vunpack.i.l.bf16 %v12063_v30  ;;  %v12058_v36 = vpop.permute.xlu0 %12057 }
 0xfd8   : > { %v12060_v31 = vunpack.i.h.bf16 %v12058_v36  ;;  %v12059_v47 = vunpack.i.l.bf16 %v12058_v36 }
 0xfd9   : > { %v2354_v33 = vpack.c.bf16 %v12065_v27, %v12064_v34 }
 0xfda   : > { %v2353_v40 = vpack.c.bf16 %v12060_v31, %v12059_v47  ;;  %v2442_v42 = vpop.permute.xlu1 %2441 }
 0xfdb   : > { %v2440_v37 = vpop.permute.xlu0 %2439  ;;  %2449 = vrot.lane.b32.xlu1 %v2354_v33, %s15670_s25 }
 0xfdc   : > { %2447 = vrot.lane.b32.xlu0 %v2353_v40, %s15670_s25  ;;  %v2452_v32 = vsel %vm813_vm2, %v2440_v37, %v2442_v42 }
 0xfdd   : > { %11340 = vmatprep.subr.bf16.mxu1 %v2452_v32 }
 0xfde   : > { %11341 = vmatpush3.bf16.msra.mxu1 %v2452_v32  ;;  %v2446_v50 = vpop.permute.xlu1 %2445 }
 0xfdf   : > { %v2444_v51 = vpop.permute.xlu0 %2443  ;;  %2400 = vperm.xlu1 %12005, %v10061_v38  }
 0xfe0   : > { %2395 = vperm.xlu0 %12004, %v10060_v39   ;;  %v2453_v48 = vsel %vm813_vm2, %v2444_v51, %v2446_v50 }
 0xfe1   : > { %11342 = vmatprep.subr.bf16.mxu1 %v2453_v48 }
 0xfe2   : > { %11343 = vmatpush3.bf16.msra.mxu1 %v2453_v48 }
 0xfe3   : > { %2410 = vperm.xlu1 %12005, %v10063_v43  }
 0xfe4   : > { %2405 = vperm.xlu0 %12004, %v10062_v44  }
 0xfe7   : > { %2380 = vperm.xlu1 %12005, %v10057_v45  }
 0xfe8   : > { %2375 = vperm.xlu0 %12004, %v10056_v46  }
 0xfeb   : > { %2390 = vperm.xlu1 %12005, %v10059_v49  }
 0xfec   : > { %2385 = vperm.xlu0 %12004, %v10058_v52  }
 0xfef   : > { %2586 = vperm.xlu1 %12005, %v10081_v54  }
 0xff0   : > { %2581 = vperm.xlu0 %12004, %v10080_v55   ;;  %v12251_v55 = vld [vmem:[%s15653_s4 + $0x58] sm:$0xff]  }
 0xff3   : > { %2596 = vperm.xlu1 %12005, %v10083_v56  }
 0xff4   : > { %2591 = vperm.xlu0 %12004, %v10082_v57  }
0x104d   : > { %v2450_v59 = vpop.permute.xlu1 %2449 }
0x104e   : > { %v2448_v58 = vpop.permute.xlu0 %2447 }
0x104f   : > { %11344 = vmatprep.subr.bf16.mxu1 %v2448_v58 }
0x1050   : > { %11345 = vmatpush3.bf16.msra.mxu1 %v2448_v58 }
0x1051   : > { %11346 = vmatprep.subr.bf16.mxu1 %v2450_v59 }
0x1054   : > { %11347 = vmatpush3.bf16.msra.mxu1 %v2450_v59 }
0x1057   : > { %11349 = vmatmul.mubr.msk.bf16.vlgmr.msra.gmra.mrb[36].mxu1 %vm524_vm0, %v12247_v60 }
0x1058   : > { %11352 = vmatprep.mubr.msk.bf16.mxu1 %vm524_vm0, %v12248_v61 }
0x105e   : > { %v2401_v2 = vpop.permute.xlu1 %2400 }
0x105f   : > { %11353 = vmatmul.mubr.msk.bf16.gmra.mrb[40].mxu1 %vm524_vm0, %v12249_v62  ;;  %v2396_v0 = vpop.permute.xlu0 %2395 }
0x1062   : > { %v2411_v7 = vpop.permute.xlu1 %2410 }
0x1063   : > { %v2406_v6 = vpop.permute.xlu0 %2405 }
0x1066   : > { %v2381_v19 = vpop.permute.xlu1 %2380 }
0x1067   : > { %v2376_v13 = vpop.permute.xlu0 %2375 }
0x106a   : > { %v2391_v35 = vpop.permute.xlu1 %2390 }
0x106b   : > { %v2386_v25 = vpop.permute.xlu0 %2385 }
0x106e   : > { %v2587_v57 = vpop.permute.xlu1 %2586 }
0x106f   : > { %v2582_v56 = vpop.permute.xlu0 %2581 }
0x1072   : > { %v2597_v62 = vpop.permute.xlu1 %2596 }
0x1073   : > { %v2592_v58 = vpop.permute.xlu0 %2591 }
0x112a   : > { %v11350_v1 = vpop.f32.mrb[36].mxu1 }
0x112b   : > { %v2504_v3 = vpop.f32.mrb[37].mxu1  ;;  %v2513_v41 = vadd.f32 %v11350_v1, %v2386_v25 }
0x112c   : > { %v11351_v4 = vpop.f32.mrb[38].mxu1  ;;  %v2505_v24 = vadd.f32 %v2504_v3, %v2376_v13  ;;  %v2665_v13 = vld [vmem:[#allocation3 + $0x8] sm:$0xff] }
0x112d   : > { %v2507_v5 = vpop.f32.mrb[39].mxu1  ;;  %v2516_v28 = vadd.f32 %v11351_v4, %v2391_v35  ;;  %v2664_v4 = vld [vmem:[#allocation3] sm:$0xff] }
0x112e   : > { %v2508_v30 = vadd.f32 %v2507_v5, %v2381_v19 }
0x1132   : > { %v11354_v8 = vpop.f32.mrb[40].mxu1 }
0x1133   : > { %v2529_v9 = vadd.f32 %v11354_v8, %v2406_v6  ;;  %v2520_v10 = vpop.f32.mrb[41].mxu1 }
0x1134   : > { %v2521_v11 = vadd.f32 %v2520_v10, %v2396_v0  ;;  %v11355_v12 = vpop.f32.mrb[42].mxu1 }
0x1135   : > { %v10074_v14 = vmul.f32 -1.442695, %v2529_v9  ;;  %v2532_v15 = vadd.f32 %v11355_v12, %v2411_v7  ;;  %v2523_v16 = vpop.f32.mrb[43].mxu1  ;;  %v2667_v9 = vld [vmem:[#allocation3 + $0x18] sm:$0xff] }
0x1136   : > { %v10072_v17 = vmul.f32 -1.442695, %v2521_v11  ;;  %v2524_v18 = vadd.f32 %v2523_v16, %v2401_v2 }
0x1137   : > { %12482 = vpow2.f32 %v10074_v14  ;;  %v10075_v29 = vmul.f32 -1.442695, %v2532_v15 }
0x1138   : > { %12484 = vpow2.f32 %v10072_v17  ;;  %v10073_v20 = vmul.f32 -1.442695, %v2524_v18  ;;  %v12939_v18 = vld [vmem:[#allocation2] sm:$0xff] }
0x1139   : > { %12486 = vpow2.f32 %v10075_v29  ;;  %v13715_v19 = vpack.c.bf16 %v12939_v18, %v12939_v18  ;;  %v12252_v29 = vld [vmem:[%s15651_s2 + $0xc0] sm:$0xff]  }
0x113a   : > { %12488 = vpow2.f32 %v10073_v20  ;;  %11372 = vmatprep.mubr.msk.bf16.mxu1 %vm524_vm0, %v12252_v29 }
0x113b   : > { %12490 = vtanh.f32 %v2513_v41 }
0x113c   : > { %12492 = vtanh.f32 %v2505_v24 }
0x113d   : > { %12494 = vtanh.f32 %v2516_v28 }
0x113e   : > { %12496 = vtanh.f32 %v2508_v30 }
0x1141   : > { %v12483_v27 = vpop.eup %12482 }
0x1142   : > { %v12485_v34 = vpop.eup %12484  ;;  %v2553_v36 = vadd.f32 1.0, %v12483_v27 }
0x1143   : > { %v12487_v31 = vpop.eup %12486  ;;  %v2551_v47 = vadd.f32 1.0, %v12485_v34 }
0x1144   : > { %v12489_v33 = vpop.eup %12488  ;;  %12498 = vrcp.f32 %v2553_v36  ;;  %v2554_v40 = vadd.f32 1.0, %v12487_v31  ;;  %v10101_v31 = vld [vmem:[%s15652_s3 + $0x1a8] sm:$0xff] }
0x1145   : > { %12500 = vrcp.f32 %v2551_v47  ;;  %v2552_v42 = vadd.f32 1.0, %v12489_v33  ;;  %v12491_v37 = vpop.eup %12490  ;;  %v10100_v47 = vld [vmem:[%s15652_s3 + $0x1a0] sm:$0xff]  ;;  %v10103_v33 = vld [vmem:[%s15652_s3 + $0x1b8] sm:$0xff] }
0x1146   : > { %12502 = vrcp.f32 %v2554_v40  ;;  %v12493_v32 = vpop.eup %12492  ;;  %v10102_v40 = vld [vmem:[%s15652_s3 + $0x1b0] sm:$0xff] }
0x1147   : > { %12504 = vrcp.f32 %v2552_v42  ;;  %v12495_v38 = vpop.eup %12494  ;;  %v10097_v42 = vld [vmem:[%s15652_s3 + $0x188] sm:$0xff] }
0x1148   : > { %v12497_v39 = vpop.eup %12496 }
0x114e   : > { %v12499_v50 = vpop.eup %12498 }
0x114f   : > { %v12501_v51 = vpop.eup %12500  ;;  %v2565_v48 = vmul.f32 %v12499_v50, %v12491_v37  ;;  %v10096_v37 = vld [vmem:[%s15652_s3 + $0x180] sm:$0xff] }
0x1150   : > { %v12503_v43 = vpop.eup %12502  ;;  %v2563_v44 = vmul.f32 %v12501_v51, %v12493_v32  ;;  %v10099_v32 = vld [vmem:[%s15652_s3 + $0x198] sm:$0xff]  ;;  %v10120_v50 = vld [vmem:[%s15654_s5 + $0xc0] sm:$0xff] }
0x1151   : > { %v12505_v45 = vpop.eup %12504  ;;  %v2566_v46 = vmul.f32 %v12503_v43, %v12495_v38  ;;  %v10098_v38 = vld [vmem:[%s15652_s3 + $0x190] sm:$0xff]  ;;  %v10123_v51 = vld [vmem:[%s15654_s5 + $0xd8] sm:$0xff]  ;;  %v10141_v43 = vld [vmem:[%s15652_s3 + $0x1e8] sm:$0xff] }
0x1152   : > { %v2564_v49 = vmul.f32 %v12505_v45, %v12497_v39  ;;  %v10121_v39 = vld [vmem:[%s15654_s5 + $0xc8] sm:$0xff]  ;;  %v10143_v45 = vld [vmem:[%s15652_s3 + $0x1f8] sm:$0xff] }
0x1153   : > { %v2573_v52 = vpack.c.bf16 %v2566_v46, %v2565_v48  ;;  %v10122_v48 = vld [vmem:[%s15654_s5 + $0xd0] sm:$0xff] }
0x1154   : > { %v2572_v54 = vpack.c.bf16 %v2564_v49, %v2563_v44  ;;  %v10140_v44 = vld [vmem:[%s15652_s3 + $0x1e0] sm:$0xff]  ;;  %v10142_v46 = vld [vmem:[%s15652_s3 + $0x1f0] sm:$0xff]  ;;  %v10137_v49 = vld [vmem:[%s15652_s3 + $0x1c8] sm:$0xff] }
0x1156   : > { %11356 = vmatprep.subr.bf16.mxu0 %v2572_v54 }
0x1157   : > { %11357 = vmatpush3.bf16.msra.mxu0 %v2572_v54  ;;  %v10139_v54 = vld [vmem:[%s15652_s3 + $0x1d8] sm:$0xff] }
0x1158   : > { %11358 = vmatprep.subr.bf16.mxu0 %v2573_v52 }
0x115b   : > { %11359 = vmatpush3.bf16.msra.mxu0 %v2573_v52  ;;  %v10136_v52 = vld [vmem:[%s15652_s3 + $0x1c0] sm:$0xff] }
0x115e   : > { %11361 = vmatmul.mubr.msk.bf16.vlgmr.msra.gmra.mrb[24].mxu0 %vm813_vm2, %v12251_v55  ;;  %v10138_v55 = vld [vmem:[%s15652_s3 + $0x1d0] sm:$0xff] }
0x1231   : > { %v11362_v59 = vpop.f32.mrb[24].mxu0 }
0x1232   : > { %v2658_v60 = vadd.f32 %v11362_v59, %v2592_v58  ;;  %v2649_v61 = vpop.f32.mrb[25].mxu0  ;;  %v10163_v58 = vld [vmem:[%s15654_s5 + $0xf8] sm:$0xff]  ;;  %v10162_v59 = vld [vmem:[%s15654_s5 + $0xf0] sm:$0xff] }
0x1233   : > { %v2650_v0 = vadd.f32 %v2649_v61, %v2582_v56  ;;  %v11363_v1 = vpop.f32.mrb[26].mxu0  ;;  %v10161_v56 = vld [vmem:[%s15654_s5 + $0xe8] sm:$0xff] }
0x1234   : > { %v2670_v2 = vadd.f32 %v2666_v63, %v2658_v60  ;;  %v2678_v3 = vadd.f32 %v2658_v60, %v13601_v26  ;;  %v2661_v5 = vadd.f32 %v11363_v1, %v2597_v62  ;;  %v2652_v6 = vpop.f32.mrb[27].mxu0  ;;  %v12253_v62 = vld [vmem:[%s15651_s2 + $0xc8] sm:$0xff]   ;;  %v12254_v63 = vld [vmem:[%s15651_s2 + $0xd0] sm:$0xff]   ;;  %v12256_v1 = vld [vmem:[%s15653_s4 + $0x60] sm:$0xff]  }
0x1235   : > { %v2668_v7 = vadd.f32 %v2664_v4, %v2650_v0  ;;  %v2676_v8 = vadd.f32 %v2650_v0, %v13607_v22  ;;  %v2653_v10 = vadd.f32 %v2652_v6, %v2587_v57  ;;  %v10160_v57 = vld [vmem:[%s15654_s5 + $0xe0] sm:$0xff]  ;;  %v12255_v0 = vld [vmem:[%s15651_s2 + $0xd8] sm:$0xff]   ;;  %11384 = vmatprep.mubr.msk.bf16.mxu0 %vm813_vm2, %v12256_v1 }
0x1236   : > { %2674 = vst.msk [vmem:[#allocation3 + $0x10] sm:$0xff] %vm524_vm0, %v2670_v2  ;;  %2682 = vst.msk [vmem:[#allocation2 + $0x28] sm:$0xff] %vm524_vm0, %v2678_v3  ;;  %v2671_v11 = vadd.f32 %v2667_v9, %v2661_v5  ;;  %v2679_v12 = vadd.f32 %v2661_v5, %v13603_v21 }
0x1237   : > { %2672 = vst.msk [vmem:[#allocation3] sm:$0xff] %vm524_vm0, %v2668_v7  ;;  %2680 = vst.msk [vmem:[#allocation2 + $0x8] sm:$0xff] %vm524_vm0, %v2676_v8  ;;  %v2669_v26 = vadd.f32 %v2665_v13, %v2653_v10  ;;  %v2677_v14 = vadd.f32 %v2653_v10, %v13609_v23 }
0x1238   : > { %2675 = vst.msk [vmem:[#allocation3 + $0x18] sm:$0xff] %vm524_vm0, %v2671_v11  ;;  %2683 = vst.msk [vmem:[#allocation2 + $0x38] sm:$0xff] %vm524_vm0, %v2679_v12 }
0x1239   : > { %2673 = vst.msk [vmem:[#allocation3 + $0x8] sm:$0xff] %vm524_vm0, %v2669_v26  ;;  %2681 = vst.msk [vmem:[#allocation2 + $0x18] sm:$0xff] %vm524_vm0, %v2677_v14 }
0x123d   : > { %v13701_v22 = vld [vmem:[#allocation2 + $0x28] sm:$0xff] }
0x123e   : > { %v13707_v16 = vld [vmem:[#allocation2 + $0x8] sm:$0xff] }
0x123f   : > { %v13703_v15 = vld [vmem:[#allocation2 + $0x38] sm:$0xff] }
0x1240   : > { %v12071_v21 = vpack.i.bf16 %v13703_v15, %v13701_v22  ;;  %v13709_v17 = vld [vmem:[#allocation2 + $0x18] sm:$0xff] }
0x1241   : > { %v12066_v23 = vpack.i.bf16 %v13709_v17, %v13707_v16 }
0x1242   : > { %12072 = vrot.lane.b32.xlu1 %v12071_v21, %s15674_s24 }
0x1243   : > { %12067 = vrot.lane.b32.xlu0 %v12066_v23, %s15674_s24 }
0x1246   : > { %2796 = vrot.lane.b32.xlu1 %v13715_v19, %s15674_s24 }
0x1247   : > { %2794 = vrot.lane.b32.xlu0 %v13715_v19, %s15674_s24 }
0x12b4   : > { %v12073_v20 = vpop.permute.xlu1 %12072 }
0x12b5   : > { %v12075_v25 = vunpack.i.h.bf16 %v12073_v20  ;;  %v12074_v41 = vunpack.i.l.bf16 %v12073_v20  ;;  %v12068_v35 = vpop.permute.xlu0 %12067 }
0x12b6   : > { %v12070_v24 = vunpack.i.h.bf16 %v12068_v35  ;;  %v12069_v28 = vunpack.i.l.bf16 %v12068_v35 }
0x12b7   : > { %v2711_v30 = vpack.c.bf16 %v12075_v25, %v12074_v41 }
0x12b8   : > { %v2710_v27 = vpack.c.bf16 %v12070_v24, %v12069_v28  ;;  %v2797_v36 = vpop.permute.xlu1 %2796 }
0x12b9   : > { %2800 = vrot.lane.b32.xlu1 %v2711_v30, %s15674_s24  ;;  %v2795_v34 = vpop.permute.xlu0 %2794 }
0x12ba   : > { %2798 = vrot.lane.b32.xlu0 %v2710_v27, %s15674_s24  ;;  %11364 = vmatprep.subr.bf16.mxu1 %v2795_v34 }
0x12bb   : > { %11365 = vmatpush3.bf16.msra.mxu1 %v2795_v34 }
0x12bc   : > { %11366 = vmatprep.subr.bf16.mxu1 %v2797_v36 }
0x12bd   : > { %2757 = vperm.xlu1 %12005, %v10101_v31  }
0x12be   : > { %2752 = vperm.xlu0 %12004, %v10100_v47  }
0x12bf   : > { %11367 = vmatpush3.bf16.msra.mxu1 %v2797_v36 }
0x12c1   : > { %2767 = vperm.xlu1 %12005, %v10103_v33  }
0x12c2   : > { %2762 = vperm.xlu0 %12004, %v10102_v40  }
0x12c5   : > { %2737 = vperm.xlu1 %12005, %v10097_v42  }
0x12c6   : > { %2732 = vperm.xlu0 %12004, %v10096_v37  }
0x12c9   : > { %2747 = vperm.xlu1 %12005, %v10099_v32  }
0x12ca   : > { %2742 = vperm.xlu0 %12004, %v10098_v38  }
0x12cd   : > { %2934 = vperm.xlu1 %12005, %v10121_v39  }
0x12ce   : > { %2929 = vperm.xlu0 %12004, %v10120_v50  }
0x12d1   : > { %2944 = vperm.xlu1 %12005, %v10123_v51  }
0x12d2   : > { %2939 = vperm.xlu0 %12004, %v10122_v48  }
0x12d5   : > { %3089 = vperm.xlu1 %12005, %v10141_v43  }
0x12d6   : > { %3084 = vperm.xlu0 %12004, %v10140_v44  }
0x12d9   : > { %3099 = vperm.xlu1 %12005, %v10143_v45  }
0x12da   : > { %3094 = vperm.xlu0 %12004, %v10142_v46  }
0x12dd   : > { %3069 = vperm.xlu1 %12005, %v10137_v49  }
0x12de   : > { %3064 = vperm.xlu0 %12004, %v10136_v52  }
0x12e1   : > { %3079 = vperm.xlu1 %12005, %v10139_v54  }
0x12e2   : > { %3074 = vperm.xlu0 %12004, %v10138_v55  }
0x12e5   : > { %3250 = vperm.xlu1 %12005, %v10161_v56  }
0x12e6   : > { %3245 = vperm.xlu0 %12004, %v10160_v57  }
0x12e9   : > { %3260 = vperm.xlu1 %12005, %v10163_v58   ;;  %v12257_v58 = vld [vmem:[%s15653_s4 + $0x68] sm:$0xff]  }
0x12ea   : > { %3255 = vperm.xlu0 %12004, %v10162_v59   ;;  %v12258_v59 = vld [vmem:[%s15651_s2 + $0xe0] sm:$0xff]  }
0x132b   : > { %v2801_v61 = vpop.permute.xlu1 %2800 }
0x132c   : > { %v2799_v60 = vpop.permute.xlu0 %2798 }
0x132d   : > { %11368 = vmatprep.subr.bf16.mxu1 %v2799_v60 }
0x132e   : > { %11369 = vmatpush3.bf16.msra.mxu1 %v2799_v60 }
0x132f   : > { %11370 = vmatprep.subr.bf16.mxu1 %v2801_v61 }
0x1332   : > { %11371 = vmatpush3.bf16.msra.mxu1 %v2801_v61 }
0x1335   : > { %11373 = vmatmul.mubr.msk.bf16.vlgmr.msra.gmra.mrb[44].mxu1 %vm524_vm0, %v12253_v62 }
0x1336   : > { %11376 = vmatprep.mubr.msk.bf16.mxu1 %vm524_vm0, %v12254_v63 }
0x133c   : > { %v2758_v4 = vpop.permute.xlu1 %2757 }
0x133d   : > { %11377 = vmatmul.mubr.msk.bf16.gmra.mrb[48].mxu1 %vm524_vm0, %v12255_v0  ;;  %v2753_v2 = vpop.permute.xlu0 %2752 }
0x1340   : > { %v2768_v9 = vpop.permute.xlu1 %2767 }
0x1341   : > { %v2763_v8 = vpop.permute.xlu0 %2762 }
0x1344   : > { %v2738_v25 = vpop.permute.xlu1 %2737 }
0x1345   : > { %v2733_v14 = vpop.permute.xlu0 %2732 }
0x1348   : > { %v2748_v30 = vpop.permute.xlu1 %2747 }
0x1349   : > { %v2743_v24 = vpop.permute.xlu0 %2742 }
0x134c   : > { %v2935_v61 = vpop.permute.xlu1 %2934 }
0x134d   : > { %v2930_v60 = vpop.permute.xlu0 %2929 }
0x1351   : > { %v2940_v62 = vpop.permute.xlu0 %2939 }
0x1408   : > { %v11374_v3 = vpop.f32.mrb[44].mxu1 }
0x1409   : > { %v2852_v5 = vpop.f32.mrb[45].mxu1  ;;  %v2861_v28 = vadd.f32 %v11374_v3, %v2743_v24  ;;  %v3014_v3 = vld [vmem:[#allocation3 + $0x10] sm:$0xff]  ;;  %v12261_v24 = vld [vmem:[%s15651_s2 + $0xf8] sm:$0xff]  }
0x140a   : > { %v11375_v6 = vpop.f32.mrb[46].mxu1  ;;  %v2853_v27 = vadd.f32 %v2852_v5, %v2733_v14 }
0x140b   : > { %v2855_v7 = vpop.f32.mrb[47].mxu1  ;;  %v2864_v34 = vadd.f32 %v11375_v6, %v2748_v30  ;;  %v3085_v30 = vpop.permute.xlu0 %3084 }
0x140c   : > { %v2856_v36 = vadd.f32 %v2855_v7, %v2738_v25 }
0x1410   : > { %v11378_v10 = vpop.f32.mrb[48].mxu1 }
0x1411   : > { %v2877_v11 = vadd.f32 %v11378_v10, %v2763_v8  ;;  %v2868_v12 = vpop.f32.mrb[49].mxu1  ;;  %v3012_v8 = vld [vmem:[#allocation3] sm:$0xff] }
0x1412   : > { %v2869_v13 = vadd.f32 %v2868_v12, %v2753_v2  ;;  %v11379_v26 = vpop.f32.mrb[50].mxu1  ;;  %v2945_v2 = vpop.permute.xlu1 %2944 }
0x1413   : > { %v10114_v21 = vmul.f32 -1.442695, %v2877_v11  ;;  %v2880_v23 = vadd.f32 %v11379_v26, %v2768_v9  ;;  %v2871_v18 = vpop.f32.mrb[51].mxu1 }
0x1414   : > { %v10112_v29 = vmul.f32 -1.442695, %v2869_v13  ;;  %v2872_v20 = vadd.f32 %v2871_v18, %v2758_v4  ;;  %v3015_v13 = vld [vmem:[#allocation3 + $0x18] sm:$0xff] }
0x1415   : > { %12506 = vpow2.f32 %v10114_v21  ;;  %v10115_v41 = vmul.f32 -1.442695, %v2880_v23  ;;  %v3013_v23 = vld [vmem:[#allocation3 + $0x8] sm:$0xff] }
0x1416   : > { %12508 = vpow2.f32 %v10112_v29  ;;  %v10113_v35 = vmul.f32 -1.442695, %v2872_v20 }
0x1417   : > { %12510 = vpow2.f32 %v10115_v41  ;;  %v12259_v41 = vld [vmem:[%s15651_s2 + $0xe8] sm:$0xff]  }
0x1418   : > { %12512 = vpow2.f32 %v10113_v35  ;;  %v12260_v35 = vld [vmem:[%s15651_s2 + $0xf0] sm:$0xff]  }
0x1419   : > { %12514 = vtanh.f32 %v2861_v28  ;;  %v12262_v28 = vld [vmem:[%s15653_s4 + $0x70] sm:$0xff]  }
0x141a   : > { %12516 = vtanh.f32 %v2853_v27  ;;  %11408 = vmatprep.mubr.msk.bf16.mxu1 %vm813_vm2, %v12262_v28 }
0x141b   : > { %12518 = vtanh.f32 %v2864_v34  ;;  %v3090_v34 = vpop.permute.xlu1 %3089 }
0x141c   : > { %12520 = vtanh.f32 %v2856_v36 }
0x141f   : > { %v12507_v31 = vpop.eup %12506 }
0x1420   : > { %v12509_v47 = vpop.eup %12508  ;;  %v2901_v33 = vadd.f32 1.0, %v12507_v31 }
0x1421   : > { %v12511_v40 = vpop.eup %12510  ;;  %v2899_v42 = vadd.f32 1.0, %v12509_v47 }
0x1422   : > { %v12513_v37 = vpop.eup %12512  ;;  %12522 = vrcp.f32 %v2901_v33  ;;  %v2902_v32 = vadd.f32 1.0, %v12511_v40  ;;  %v3095_v33 = vpop.permute.xlu0 %3094 }
0x1423   : > { %12524 = vrcp.f32 %v2899_v42  ;;  %v2900_v38 = vadd.f32 1.0, %v12513_v37  ;;  %v12515_v39 = vpop.eup %12514  ;;  %v3100_v40 = vpop.permute.xlu1 %3099 }
0x1424   : > { %12526 = vrcp.f32 %v2902_v32  ;;  %v12517_v50 = vpop.eup %12516 }
0x1425   : > { %12528 = vrcp.f32 %v2900_v38  ;;  %v12519_v51 = vpop.eup %12518 }
0x1426   : > { %v12521_v48 = vpop.eup %12520 }
0x142c   : > { %v12523_v43 = vpop.eup %12522 }
0x142d   : > { %v12525_v44 = vpop.eup %12524  ;;  %v2913_v45 = vmul.f32 %v12523_v43, %v12515_v39 }
0x142e   : > { %v12527_v46 = vpop.eup %12526  ;;  %v2911_v49 = vmul.f32 %v12525_v44, %v12517_v50  ;;  %v3065_v50 = vpop.permute.xlu0 %3064 }
0x142f   : > { %v12529_v52 = vpop.eup %12528  ;;  %v2914_v54 = vmul.f32 %v12527_v46, %v12519_v51  ;;  %v3070_v46 = vpop.permute.xlu1 %3069 }
0x1430   : > { %v2912_v55 = vmul.f32 %v12529_v52, %v12521_v48 }
0x1431   : > { %v2921_v56 = vpack.c.bf16 %v2914_v54, %v2913_v45 }
0x1432   : > { %v2920_v57 = vpack.c.bf16 %v2912_v55, %v2911_v49  ;;  %v3075_v54 = vpop.permute.xlu0 %3074 }
0x1434   : > { %11380 = vmatprep.subr.bf16.mxu0 %v2920_v57 }
0x1435   : > { %11381 = vmatpush3.bf16.msra.mxu0 %v2920_v57 }
0x1436   : > { %11382 = vmatprep.subr.bf16.mxu0 %v2921_v56 }
0x1439   : > { %11383 = vmatpush3.bf16.msra.mxu0 %v2921_v56  ;;  %v3080_v56 = vpop.permute.xlu1 %3079 }
0x143a   : > { %11388 = vmatprep.subr.bf16.mxu0 %v13715_v19 }
0x143c   : > { %11385 = vmatmul.mubr.msk.bf16.vlgmr.msra.gmra.mrb[28].mxu0 %vm813_vm2, %v12257_v58 }
0x143d   : > { %11389 = vmatpush3.bf16.msra.mxu0 %v13715_v19  ;;  %11396 = vmatprep.mubr.msk.bf16.mxu0 %vm524_vm0, %v12258_v59 }
0x143e   : > { %11390 = vmatprep.subr.bf16.mxu0 %v13715_v19 }
0x1441   : > { %11391 = vmatpush3.bf16.msra.mxu0 %v13715_v19 }
0x150f   : > { %v11386_v63 = vpop.f32.mrb[28].mxu0 }
0x1510   : > { %v3006_v0 = vadd.f32 %v11386_v63, %v2940_v62  ;;  %v2997_v1 = vpop.f32.mrb[29].mxu0 }
0x1511   : > { %v2998_v4 = vadd.f32 %v2997_v1, %v2930_v60  ;;  %v11387_v5 = vpop.f32.mrb[30].mxu0 }
0x1512   : > { %v3018_v6 = vadd.f32 %v3014_v3, %v3006_v0  ;;  %v3026_v7 = vadd.f32 %v3006_v0, %v13701_v22  ;;  %v3009_v9 = vadd.f32 %v11387_v5, %v2945_v2  ;;  %v3000_v10 = vpop.f32.mrb[31].mxu0 }
0x1513   : > { %v3016_v11 = vadd.f32 %v3012_v8, %v2998_v4  ;;  %v3024_v12 = vadd.f32 %v2998_v4, %v13707_v16  ;;  %v3001_v26 = vadd.f32 %v3000_v10, %v2935_v61 }
0x1514   : > { %3022 = vst.msk [vmem:[#allocation3 + $0x10] sm:$0xff] %vm524_vm0, %v3018_v6  ;;  %3030 = vst.msk [vmem:[#allocation2 + $0x28] sm:$0xff] %vm524_vm0, %v3026_v7  ;;  %v3019_v14 = vadd.f32 %v3015_v13, %v3009_v9  ;;  %v3027_v21 = vadd.f32 %v3009_v9, %v13703_v15 }
0x1515   : > { %3020 = vst.msk [vmem:[#allocation3] sm:$0xff] %vm524_vm0, %v3016_v11  ;;  %3028 = vst.msk [vmem:[#allocation2 + $0x8] sm:$0xff] %vm524_vm0, %v3024_v12  ;;  %v3017_v22 = vadd.f32 %v3013_v23, %v3001_v26  ;;  %v3025_v18 = vadd.f32 %v3001_v26, %v13709_v17 }
0x1516   : > { %3023 = vst.msk [vmem:[#allocation3 + $0x18] sm:$0xff] %vm524_vm0, %v3019_v14  ;;  %3031 = vst.msk [vmem:[#allocation2 + $0x38] sm:$0xff] %vm524_vm0, %v3027_v21 }
0x1517   : > { %3021 = vst.msk [vmem:[#allocation3 + $0x8] sm:$0xff] %vm524_vm0, %v3017_v22  ;;  %3029 = vst.msk [vmem:[#allocation2 + $0x18] sm:$0xff] %vm524_vm0, %v3025_v18  ;;  %v12263_v22 = vld [vmem:[%s15653_s4 + $0x78] sm:$0xff]   ;;  %v3246_v18 = vpop.permute.xlu0 %3245 }
0x151b   : > { %v13847_v25 = vld [vmem:[#allocation2 + $0x28] sm:$0xff] }
0x151c   : > { %v13839_v16 = vld [vmem:[#allocation2 + $0x8] sm:$0xff] }
0x151d   : > { %v13843_v15 = vld [vmem:[#allocation2 + $0x38] sm:$0xff] }
0x151e   : > { %v13841_v29 = vld [vmem:[#allocation2 + $0x18] sm:$0xff]  ;;  %v3043_v17 = vpack.c.bf16 %v13843_v15, %v13847_v25 }
0x151f   : > { %v3042_v20 = vpack.c.bf16 %v13841_v29, %v13839_v16 }
0x1521   : > { %11392 = vmatprep.subr.bf16.mxu0 %v3042_v20 }
0x1522   : > { %11393 = vmatpush3.bf16.msra.mxu0 %v3042_v20  ;;  %v3251_v20 = vpop.permute.xlu1 %3250 }
0x1523   : > { %11394 = vmatprep.subr.bf16.mxu0 %v3043_v17 }
0x1526   : > { %11395 = vmatpush3.bf16.msra.mxu0 %v3043_v17  ;;  %v3256_v17 = vpop.permute.xlu0 %3255  ;;  %v3261_v28 = vpop.permute.xlu1 %3260 }
0x1529   : > { %11397 = vmatmul.mubr.msk.bf16.vlgmr.msra.gmra.mrb[32].mxu0 %vm524_vm0, %v12259_v41 }
0x152a   : > { %11400 = vmatprep.mubr.msk.bf16.mxu0 %vm524_vm0, %v12260_v35 }
0x1531   : > { %11401 = vmatmul.mubr.msk.bf16.gmra.mrb[36].mxu0 %vm524_vm0, %v12261_v24 }
0x15fc   : > { %v11398_v27 = vpop.f32.mrb[32].mxu0 }
0x15fd   : > { %v3168_v36 = vpop.f32.mrb[33].mxu0  ;;  %v3177_v55 = vadd.f32 %v11398_v27, %v3075_v54 }
0x15fe   : > { %v11399_v31 = vpop.f32.mrb[34].mxu0  ;;  %v3169_v57 = vadd.f32 %v3168_v36, %v3065_v50 }
0x15ff   : > { %v3171_v47 = vpop.f32.mrb[35].mxu0  ;;  %v3180_v58 = vadd.f32 %v11399_v31, %v3080_v56 }
0x1600   : > { %v3172_v59 = vadd.f32 %v3171_v47, %v3070_v46  ;;  %v3328_v47 = vld [vmem:[#allocation3] sm:$0xff] }
0x1604   : > { %v11402_v42 = vpop.f32.mrb[36].mxu0 }
0x1605   : > { %v3193_v37 = vadd.f32 %v11402_v42, %v3095_v33  ;;  %v3184_v32 = vpop.f32.mrb[37].mxu0 }
0x1606   : > { %v3185_v38 = vadd.f32 %v3184_v32, %v3085_v30  ;;  %v11403_v39 = vpop.f32.mrb[38].mxu0  ;;  %v3330_v30 = vld [vmem:[#allocation3 + $0x10] sm:$0xff]  ;;  %v3331_v32 = vld [vmem:[#allocation3 + $0x18] sm:$0xff] }
0x1607   : > { %v10154_v51 = vmul.f32 -1.442695, %v3193_v37  ;;  %v3196_v48 = vadd.f32 %v11403_v39, %v3100_v40  ;;  %v3187_v43 = vpop.f32.mrb[39].mxu0 }
0x1608   : > { %v10152_v44 = vmul.f32 -1.442695, %v3185_v38  ;;  %v3188_v45 = vadd.f32 %v3187_v43, %v3090_v34 }
0x1609   : > { %12530 = vpow2.f32 %v10154_v51  ;;  %v10155_v49 = vmul.f32 -1.442695, %v3196_v48  ;;  %v3329_v51 = vld [vmem:[#allocation3 + $0x8] sm:$0xff] }
0x160a   : > { %12532 = vpow2.f32 %v10152_v44  ;;  %v10153_v52 = vmul.f32 -1.442695, %v3188_v45 }
0x160b   : > { %12534 = vpow2.f32 %v10155_v49 }
0x160c   : > { %12536 = vpow2.f32 %v10153_v52  ;;  %v12264_v52 = vld [vmem:[%s15651_s2 + $0x100] sm:$0xff]  }
0x160d   : > { %12538 = vtanh.f32 %v3177_v55  ;;  %11420 = vmatprep.mubr.msk.bf16.mxu0 %vm524_vm0, %v12264_v52 }
0x160e   : > { %12540 = vtanh.f32 %v3169_v57 }
0x160f   : > { %12542 = vtanh.f32 %v3180_v58 }
0x1610   : > { %12544 = vtanh.f32 %v3172_v59 }
0x1613   : > { %v12531_v60 = vpop.eup %12530 }
0x1614   : > { %v12533_v61 = vpop.eup %12532  ;;  %v3217_v62 = vadd.f32 1.0, %v12531_v60 }
0x1615   : > { %v12535_v63 = vpop.eup %12534  ;;  %v3215_v0 = vadd.f32 1.0, %v12533_v61 }
0x1616   : > { %v12537_v1 = vpop.eup %12536  ;;  %12546 = vrcp.f32 %v3217_v62  ;;  %v3218_v2 = vadd.f32 1.0, %v12535_v63 }
0x1617   : > { %12548 = vrcp.f32 %v3215_v0  ;;  %v3216_v3 = vadd.f32 1.0, %v12537_v1  ;;  %v12539_v4 = vpop.eup %12538  ;;  %v10181_v1 = vld [vmem:[%s15652_s3 + $0x228] sm:$0xff] }
0x1618   : > { %12550 = vrcp.f32 %v3218_v2  ;;  %v12541_v5 = vpop.eup %12540  ;;  %v10180_v2 = vld [vmem:[%s15652_s3 + $0x220] sm:$0xff] }
0x1619   : > { %12552 = vrcp.f32 %v3216_v3  ;;  %v12543_v6 = vpop.eup %12542 }
0x161a   : > { %v12545_v7 = vpop.eup %12544 }
0x1620   : > { %v12547_v8 = vpop.eup %12546 }
0x1621   : > { %v12549_v9 = vpop.eup %12548  ;;  %v3229_v10 = vmul.f32 %v12547_v8, %v12539_v4  ;;  %v10177_v8 = vld [vmem:[%s15652_s3 + $0x208] sm:$0xff] }
0x1622   : > { %v12551_v11 = vpop.eup %12550  ;;  %v3227_v12 = vmul.f32 %v12549_v9, %v12541_v5  ;;  %v10176_v9 = vld [vmem:[%s15652_s3 + $0x200] sm:$0xff] }
0x1623   : > { %v12553_v13 = vpop.eup %12552  ;;  %v3230_v26 = vmul.f32 %v12551_v11, %v12543_v6  ;;  %v10183_v6 = vld [vmem:[%s15652_s3 + $0x238] sm:$0xff]  ;;  %v10178_v11 = vld [vmem:[%s15652_s3 + $0x210] sm:$0xff] }
0x1624   : > { %v3228_v14 = vmul.f32 %v12553_v13, %v12545_v7  ;;  %v10182_v7 = vld [vmem:[%s15652_s3 + $0x230] sm:$0xff]  ;;  %v10200_v13 = vld [vmem:[%s15654_s5 + $0x100] sm:$0xff] }
0x1625   : > { %v3237_v21 = vpack.c.bf16 %v3230_v26, %v3229_v10  ;;  %v10179_v10 = vld [vmem:[%s15652_s3 + $0x218] sm:$0xff] }
0x1626   : > { %v3236_v23 = vpack.c.bf16 %v3228_v14, %v3227_v12  ;;  %v10201_v12 = vld [vmem:[%s15654_s5 + $0x108] sm:$0xff]  ;;  %v10203_v26 = vld [vmem:[%s15654_s5 + $0x118] sm:$0xff]  ;;  %v10202_v14 = vld [vmem:[%s15654_s5 + $0x110] sm:$0xff] }
0x1628   : > { %11404 = vmatprep.subr.bf16.mxu1 %v3236_v23 }
0x1629   : > { %11405 = vmatpush3.bf16.msra.mxu1 %v3236_v23 }
0x162a   : > { %11406 = vmatprep.subr.bf16.mxu1 %v3237_v21 }
0x162d   : > { %11407 = vmatpush3.bf16.msra.mxu1 %v3237_v21 }
0x1630   : > { %11409 = vmatmul.mubr.msk.bf16.vlgmr.msra.gmra.mrb[52].mxu1 %vm813_vm2, %v12263_v22  ;;  %v12265_v22 = vld [vmem:[%s15651_s2 + $0x108] sm:$0xff]  }
0x1703   : > { %v11410_v41 = vpop.f32.mrb[52].mxu1 }
0x1704   : > { %v3322_v35 = vadd.f32 %v11410_v41, %v3256_v17  ;;  %v3313_v24 = vpop.f32.mrb[53].mxu1  ;;  %v12268_v17 = vld [vmem:[%s15653_s4 + $0x80] sm:$0xff]  }
0x1705   : > { %v3314_v27 = vadd.f32 %v3313_v24, %v3246_v18  ;;  %v11411_v34 = vpop.f32.mrb[54].mxu1  ;;  %v12266_v18 = vld [vmem:[%s15651_s2 + $0x110] sm:$0xff]   ;;  %11432 = vmatprep.mubr.msk.bf16.mxu1 %vm813_vm2, %v12268_v17 }
0x1706   : > { %v3334_v36 = vadd.f32 %v3330_v30, %v3322_v35  ;;  %v3342_v31 = vadd.f32 %v3322_v35, %v13847_v25  ;;  %v3325_v33 = vadd.f32 %v11411_v34, %v3261_v28  ;;  %v3316_v40 = vpop.f32.mrb[55].mxu1 }
0x1707   : > { %v3332_v42 = vadd.f32 %v3328_v47, %v3314_v27  ;;  %v3340_v37 = vadd.f32 %v3314_v27, %v13839_v16  ;;  %v3317_v38 = vadd.f32 %v3316_v40, %v3251_v20  ;;  %v12267_v20 = vld [vmem:[%s15651_s2 + $0x118] sm:$0xff]  }
0x1708   : > { %3338 = vst.msk [vmem:[#allocation3 + $0x10] sm:$0xff] %vm524_vm0, %v3334_v36  ;;  %3346 = vst.msk [vmem:[#allocation2 + $0x28] sm:$0xff] %vm524_vm0, %v3342_v31  ;;  %v3335_v39 = vadd.f32 %v3331_v32, %v3325_v33  ;;  %v3343_v50 = vadd.f32 %v3325_v33, %v13843_v15 }
0x1709   : > { %3336 = vst.msk [vmem:[#allocation3] sm:$0xff] %vm524_vm0, %v3332_v42  ;;  %3344 = vst.msk [vmem:[#allocation2 + $0x8] sm:$0xff] %vm524_vm0, %v3340_v37  ;;  %v3333_v25 = vadd.f32 %v3329_v51, %v3317_v38  ;;  %v3341_v48 = vadd.f32 %v3317_v38, %v13841_v29 }
0x170a   : > { %3339 = vst.msk [vmem:[#allocation3 + $0x18] sm:$0xff] %vm524_vm0, %v3335_v39  ;;  %3347 = vst.msk [vmem:[#allocation2 + $0x38] sm:$0xff] %vm524_vm0, %v3343_v50 }
0x170b   : > { %3337 = vst.msk [vmem:[#allocation3 + $0x8] sm:$0xff] %vm524_vm0, %v3333_v25  ;;  %3345 = vst.msk [vmem:[#allocation2 + $0x18] sm:$0xff] %vm524_vm0, %v3341_v48 }
0x170f   : > { %v13883_v16 = vld [vmem:[#allocation2 + $0x28] sm:$0xff] }
0x1710   : > { %v13889_v44 = vld [vmem:[#allocation2 + $0x8] sm:$0xff] }
0x1711   : > { %v13885_v43 = vld [vmem:[#allocation2 + $0x38] sm:$0xff] }
0x1712   : > { %v12081_v15 = vpack.i.bf16 %v13885_v43, %v13883_v16  ;;  %v13891_v45 = vld [vmem:[#allocation2 + $0x18] sm:$0xff]  ;;  %v3375_v49 = vpack.c.bf16 %v13885_v43, %v13883_v16 }
0x1713   : > { %v12076_v29 = vpack.i.bf16 %v13891_v45, %v13889_v44  ;;  %v3373_v46 = vpack.c.bf16 %v13891_v45, %v13889_v44 }
0x1714   : > { %12082 = vrot.lane.b32.xlu1 %v12081_v15, %s15686_s16 }
0x1715   : > { %12077 = vrot.lane.b32.xlu0 %v12076_v29, %s15686_s16  ;;  %s15696_s16 = smov 64  }
0x1718   : > { %3464 = vrot.lane.b32.xlu1 %v3373_v46, %s15684_s17 }
0x1719   : > { %3462 = vrot.lane.b32.xlu0 %v13715_v19, %s15684_s17 }
0x171c   : > { %3468 = vrot.lane.b32.xlu1 %v3375_v49, %s15684_s17 }
0x171d   : > { %3466 = vrot.lane.b32.xlu0 %v13715_v19, %s15684_s17 }
0x1786   : > { %v12083_v54 = vpop.permute.xlu1 %12082 }
0x1787   : > { %v12085_v55 = vunpack.i.h.bf16 %v12083_v54  ;;  %v12084_v56 = vunpack.i.l.bf16 %v12083_v54  ;;  %v12078_v57 = vpop.permute.xlu0 %12077 }
0x1788   : > { %v12080_v58 = vunpack.i.h.bf16 %v12078_v57  ;;  %v12079_v59 = vunpack.i.l.bf16 %v12078_v57 }
0x1789   : > { %v3377_v60 = vpack.c.bf16 %v12085_v55, %v12084_v56 }
0x178a   : > { %v3376_v61 = vpack.c.bf16 %v12080_v58, %v12079_v59  ;;  %v3465_v62 = vpop.permute.xlu1 %3464 }
0x178b   : > { %v3463_v63 = vpop.permute.xlu0 %3462  ;;  %3472 = vrot.lane.b32.xlu1 %v3377_v60, %s15684_s17 }
0x178c   : > { %3470 = vrot.lane.b32.xlu0 %v3376_v61, %s15684_s17  ;;  %v3474_v0 = vsel %vm657_vm1, %v3463_v63, %v3465_v62  ;;  %s15702_s17 = smov 4  }
0x178d   : > { %11412 = vmatprep.subr.bf16.mxu0 %v3474_v0 }
0x178e   : > { %11413 = vmatpush3.bf16.msra.mxu0 %v3474_v0  ;;  %v3469_v3 = vpop.permute.xlu1 %3468 }
0x178f   : > { %v3467_v4 = vpop.permute.xlu0 %3466  ;;  %3423 = vperm.xlu1 %12005, %v10181_v1  }
0x1790   : > { %3418 = vperm.xlu0 %12004, %v10180_v2   ;;  %v3475_v5 = vsel %vm657_vm1, %v3467_v4, %v3469_v3 }
0x1791   : > { %11414 = vmatprep.subr.bf16.mxu0 %v3475_v5 }
0x1792   : > { %11415 = vmatpush3.bf16.msra.mxu0 %v3475_v5 }
0x1793   : > { %3433 = vperm.xlu1 %12005, %v10183_v6  }
0x1794   : > { %3428 = vperm.xlu0 %12004, %v10182_v7  }
0x1797   : > { %3403 = vperm.xlu1 %12005, %v10177_v8  }
0x1798   : > { %3398 = vperm.xlu0 %12004, %v10176_v9  }
0x179b   : > { %3413 = vperm.xlu1 %12005, %v10179_v10  }
0x179c   : > { %3408 = vperm.xlu0 %12004, %v10178_v11  }
0x179f   : > { %3608 = vperm.xlu1 %12005, %v10201_v12  }
0x17a0   : > { %3603 = vperm.xlu0 %12004, %v10200_v13  }
0x17a3   : > { %3618 = vperm.xlu1 %12005, %v10203_v26   ;;  %v12269_v26 = vld [vmem:[%s15653_s4 + $0x88] sm:$0xff]  }
0x17a4   : > { %3613 = vperm.xlu0 %12004, %v10202_v14  }
0x17fd   : > { %v3473_v23 = vpop.permute.xlu1 %3472 }
0x17fe   : > { %v3471_v21 = vpop.permute.xlu0 %3470 }
0x17ff   : > { %11416 = vmatprep.subr.bf16.mxu0 %v3471_v21 }
0x1800   : > { %11417 = vmatpush3.bf16.msra.mxu0 %v3471_v21 }
0x1801   : > { %11418 = vmatprep.subr.bf16.mxu0 %v3473_v23 }
0x1804   : > { %11419 = vmatpush3.bf16.msra.mxu0 %v3473_v23 }
0x1807   : > { %11421 = vmatmul.mubr.msk.bf16.vlgmr.msra.gmra.mrb[40].mxu0 %vm524_vm0, %v12265_v22 }
0x1808   : > { %11424 = vmatprep.mubr.msk.bf16.mxu0 %vm524_vm0, %v12266_v18 }
0x180e   : > { %v3424_v24 = vpop.permute.xlu1 %3423 }
0x180f   : > { %11425 = vmatmul.mubr.msk.bf16.gmra.mrb[44].mxu0 %vm524_vm0, %v12267_v20  ;;  %v3419_v41 = vpop.permute.xlu0 %3418 }
0x1812   : > { %v3434_v36 = vpop.permute.xlu1 %3433 }
0x1813   : > { %v3429_v34 = vpop.permute.xlu0 %3428 }
0x1816   : > { %v3404_v25 = vpop.permute.xlu1 %3403 }
0x1817   : > { %v3399_v37 = vpop.permute.xlu0 %3398 }
0x181a   : > { %v3414_v49 = vpop.permute.xlu1 %3413 }
0x181b   : > { %v3409_v29 = vpop.permute.xlu0 %3408 }
0x181e   : > { %v3609_v21 = vpop.permute.xlu1 %3608 }
0x181f   : > { %v3604_v14 = vpop.permute.xlu0 %3603 }
0x1822   : > { %v3619_v17 = vpop.permute.xlu1 %3618 }
0x1823   : > { %v3614_v23 = vpop.permute.xlu0 %3613 }
0x18da   : > { %v11422_v35 = vpop.f32.mrb[40].mxu0 }
0x18db   : > { %v3526_v28 = vpop.f32.mrb[41].mxu0  ;;  %v3535_v46 = vadd.f32 %v11422_v35, %v3409_v29 }
0x18dc   : > { %v11423_v30 = vpop.f32.mrb[42].mxu0  ;;  %v3527_v52 = vadd.f32 %v3526_v28, %v3399_v37 }
0x18dd   : > { %v3529_v27 = vpop.f32.mrb[43].mxu0  ;;  %v3538_v54 = vadd.f32 %v11423_v30, %v3414_v49 }
0x18de   : > { %v3530_v55 = vadd.f32 %v3529_v27, %v3404_v25  ;;  %v3686_v27 = vld [vmem:[#allocation3] sm:$0xff] }
0x18e2   : > { %v11426_v31 = vpop.f32.mrb[44].mxu0 }
0x18e3   : > { %v3551_v47 = vadd.f32 %v11426_v31, %v3429_v34  ;;  %v3542_v33 = vpop.f32.mrb[45].mxu0 }
0x18e4   : > { %v3543_v40 = vadd.f32 %v3542_v33, %v3419_v41  ;;  %v11427_v42 = vpop.f32.mrb[46].mxu0  ;;  %v3688_v41 = vld [vmem:[#allocation3 + $0x10] sm:$0xff]  ;;  %v3689_v33 = vld [vmem:[#allocation3 + $0x18] sm:$0xff] }
0x18e5   : > { %v10194_v32 = vmul.f32 -1.442695, %v3551_v47  ;;  %v3554_v38 = vadd.f32 %v11427_v42, %v3434_v36  ;;  %v3545_v39 = vpop.f32.mrb[47].mxu0 }
0x18e6   : > { %v10192_v50 = vmul.f32 -1.442695, %v3543_v40  ;;  %v3546_v51 = vadd.f32 %v3545_v39, %v3424_v24 }
0x18e7   : > { %12554 = vpow2.f32 %v10194_v32  ;;  %v10195_v48 = vmul.f32 -1.442695, %v3554_v38  ;;  %v3687_v32 = vld [vmem:[#allocation3 + $0x8] sm:$0xff] }
0x18e8   : > { %12556 = vpow2.f32 %v10192_v50  ;;  %v10193_v15 = vmul.f32 -1.442695, %v3546_v51 }
0x18e9   : > { %12558 = vpow2.f32 %v10195_v48 }
0x18ea   : > { %12560 = vpow2.f32 %v10193_v15  ;;  %v12270_v15 = vld [vmem:[%s15651_s2 + $0x120] sm:$0xff]  }
0x18eb   : > { %12562 = vtanh.f32 %v3535_v46 }
0x18ec   : > { %12564 = vtanh.f32 %v3527_v52 }
0x18ed   : > { %12566 = vtanh.f32 %v3538_v54 }
0x18ee   : > { %12568 = vtanh.f32 %v3530_v55 }
0x18f1   : > { %v12555_v56 = vpop.eup %12554 }
0x18f2   : > { %v12557_v57 = vpop.eup %12556  ;;  %v3575_v58 = vadd.f32 1.0, %v12555_v56 }
0x18f3   : > { %v12559_v59 = vpop.eup %12558  ;;  %v3573_v60 = vadd.f32 1.0, %v12557_v57 }
0x18f4   : > { %v12561_v61 = vpop.eup %12560  ;;  %12570 = vrcp.f32 %v3575_v58  ;;  %v3576_v62 = vadd.f32 1.0, %v12559_v59 }
0x18f5   : > { %12572 = vrcp.f32 %v3573_v60  ;;  %v3574_v63 = vadd.f32 1.0, %v12561_v61  ;;  %v12563_v0 = vpop.eup %12562  ;;  %v10221_v61 = vld [vmem:[%s15652_s3 + $0x268] sm:$0xff] }
0x18f6   : > { %12574 = vrcp.f32 %v3576_v62  ;;  %v12565_v1 = vpop.eup %12564  ;;  %v10220_v62 = vld [vmem:[%s15652_s3 + $0x260] sm:$0xff] }
0x18f7   : > { %12576 = vrcp.f32 %v3574_v63  ;;  %v12567_v2 = vpop.eup %12566 }
0x18f8   : > { %v12569_v3 = vpop.eup %12568 }
0x18fe   : > { %v12571_v4 = vpop.eup %12570 }
0x18ff   : > { %v12573_v5 = vpop.eup %12572  ;;  %v3587_v6 = vmul.f32 %v12571_v4, %v12563_v0  ;;  %v10217_v4 = vld [vmem:[%s15652_s3 + $0x248] sm:$0xff] }
0x1900   : > { %v12575_v7 = vpop.eup %12574  ;;  %v3585_v8 = vmul.f32 %v12573_v5, %v12565_v1  ;;  %v10216_v5 = vld [vmem:[%s15652_s3 + $0x240] sm:$0xff] }
0x1901   : > { %v12577_v9 = vpop.eup %12576  ;;  %v3588_v10 = vmul.f32 %v12575_v7, %v12567_v2  ;;  %v10223_v2 = vld [vmem:[%s15652_s3 + $0x278] sm:$0xff]  ;;  %v10218_v7 = vld [vmem:[%s15652_s3 + $0x250] sm:$0xff] }
0x1902   : > { %v3586_v11 = vmul.f32 %v12577_v9, %v12569_v3  ;;  %v10222_v3 = vld [vmem:[%s15652_s3 + $0x270] sm:$0xff]  ;;  %v10240_v9 = vld [vmem:[%s15654_s5 + $0x120] sm:$0xff] }
0x1903   : > { %v3595_v12 = vpack.c.bf16 %v3588_v10, %v3587_v6  ;;  %v10219_v6 = vld [vmem:[%s15652_s3 + $0x258] sm:$0xff] }
0x1904   : > { %v3594_v13 = vpack.c.bf16 %v3586_v11, %v3585_v8  ;;  %v10241_v8 = vld [vmem:[%s15654_s5 + $0x128] sm:$0xff]  ;;  %v10243_v10 = vld [vmem:[%s15654_s5 + $0x138] sm:$0xff]  ;;  %v10242_v11 = vld [vmem:[%s15654_s5 + $0x130] sm:$0xff] }
0x1906   : > { %11428 = vmatprep.subr.bf16.mxu1 %v3594_v13 }
0x1907   : > { %11429 = vmatpush3.bf16.msra.mxu1 %v3594_v13 }
0x1908   : > { %11430 = vmatprep.subr.bf16.mxu1 %v3595_v12 }
0x190b   : > { %11431 = vmatpush3.bf16.msra.mxu1 %v3595_v12 }
0x190e   : > { %11433 = vmatmul.mubr.msk.bf16.vlgmr.msra.gmra.mrb[56].mxu1 %vm813_vm2, %v12269_v26  ;;  %v12271_v26 = vld [vmem:[%s15651_s2 + $0x128] sm:$0xff]  }
0x190f   : > { %11444 = vmatprep.mubr.msk.bf16.mxu1 %vm524_vm0, %v12270_v15 }
0x19e1   : > { %v11434_v22 = vpop.f32.mrb[56].mxu1 }
0x19e2   : > { %v3680_v18 = vadd.f32 %v11434_v22, %v3614_v23  ;;  %v3671_v20 = vpop.f32.mrb[57].mxu1  ;;  %v12274_v23 = vld [vmem:[%s15653_s4 + $0x90] sm:$0xff]  }
0x19e3   : > { %v3672_v35 = vadd.f32 %v3671_v20, %v3604_v14  ;;  %v11435_v24 = vpop.f32.mrb[58].mxu1  ;;  %v12272_v14 = vld [vmem:[%s15651_s2 + $0x130] sm:$0xff]   ;;  %11456 = vmatprep.mubr.msk.bf16.mxu0 %vm813_vm2, %v12274_v23 }
0x19e4   : > { %v3692_v28 = vadd.f32 %v3688_v41, %v3680_v18  ;;  %v3700_v30 = vadd.f32 %v3680_v18, %v13883_v16  ;;  %v3683_v34 = vadd.f32 %v11435_v24, %v3619_v17  ;;  %v3674_v36 = vpop.f32.mrb[59].mxu1 }
0x19e5   : > { %v3690_v31 = vadd.f32 %v3686_v27, %v3672_v35  ;;  %v3698_v47 = vadd.f32 %v3672_v35, %v13889_v44  ;;  %v3675_v40 = vadd.f32 %v3674_v36, %v3609_v21  ;;  %v12273_v21 = vld [vmem:[%s15651_s2 + $0x138] sm:$0xff]  }
0x19e6   : > { %3696 = vst.msk [vmem:[#allocation3 + $0x10] sm:$0xff] %vm524_vm0, %v3692_v28  ;;  %3704 = vst.msk [vmem:[#allocation2 + $0x28] sm:$0xff] %vm524_vm0, %v3700_v30  ;;  %v3693_v42 = vadd.f32 %v3689_v33, %v3683_v34  ;;  %v3701_v37 = vadd.f32 %v3683_v34, %v13885_v43 }
0x19e7   : > { %3694 = vst.msk [vmem:[#allocation3] sm:$0xff] %vm524_vm0, %v3690_v31  ;;  %3702 = vst.msk [vmem:[#allocation2 + $0x8] sm:$0xff] %vm524_vm0, %v3698_v47  ;;  %v3691_v16 = vadd.f32 %v3687_v32, %v3675_v40  ;;  %v3699_v38 = vadd.f32 %v3675_v40, %v13891_v45 }
0x19e8   : > { %3697 = vst.msk [vmem:[#allocation3 + $0x18] sm:$0xff] %vm524_vm0, %v3693_v42  ;;  %3705 = vst.msk [vmem:[#allocation2 + $0x38] sm:$0xff] %vm524_vm0, %v3701_v37 }
0x19e9   : > { %3695 = vst.msk [vmem:[#allocation3 + $0x8] sm:$0xff] %vm524_vm0, %v3691_v16  ;;  %3703 = vst.msk [vmem:[#allocation2 + $0x18] sm:$0xff] %vm524_vm0, %v3699_v38 }
0x19ed   : > { %v13983_v44 = vld [vmem:[#allocation2 + $0x28] sm:$0xff] }
0x19ee   : > { %v13989_v50 = vld [vmem:[#allocation2 + $0x8] sm:$0xff] }
0x19ef   : > { %v13985_v39 = vld [vmem:[#allocation2 + $0x38] sm:$0xff] }
0x19f0   : > { %v12091_v43 = vpack.i.bf16 %v13985_v39, %v13983_v44  ;;  %v13991_v51 = vld [vmem:[#allocation2 + $0x18] sm:$0xff]  ;;  %v3733_v48 = vpack.c.bf16 %v13985_v39, %v13983_v44 }
0x19f1   : > { %v12086_v45 = vpack.i.bf16 %v13991_v51, %v13989_v50  ;;  %v3731_v25 = vpack.c.bf16 %v13991_v51, %v13989_v50 }
0x19f2   : > { %12092 = vrot.lane.b32.xlu1 %v12091_v43, %s15682_s28 }
0x19f3   : > { %12087 = vrot.lane.b32.xlu0 %v12086_v45, %s15682_s28  ;;  %s15694_s28 = smov 96  }
0x19f6   : > { %3822 = vrot.lane.b32.xlu1 %v3731_v25, %s15680_s29 }
0x19f7   : > { %3820 = vrot.lane.b32.xlu0 %v13715_v19, %s15680_s29 }
0x19fa   : > { %3826 = vrot.lane.b32.xlu1 %v3733_v48, %s15680_s29 }
0x19fb   : > { %3824 = vrot.lane.b32.xlu0 %v13715_v19, %s15680_s29 }
0x1a64   : > { %v12093_v29 = vpop.permute.xlu1 %12092 }
0x1a65   : > { %v12095_v46 = vunpack.i.h.bf16 %v12093_v29  ;;  %v12094_v49 = vunpack.i.l.bf16 %v12093_v29  ;;  %v12088_v52 = vpop.permute.xlu0 %12087 }
0x1a66   : > { %v12090_v54 = vunpack.i.h.bf16 %v12088_v52  ;;  %v12089_v55 = vunpack.i.l.bf16 %v12088_v52 }
0x1a67   : > { %v3735_v56 = vpack.c.bf16 %v12095_v46, %v12094_v49 }
0x1a68   : > { %v3734_v57 = vpack.c.bf16 %v12090_v54, %v12089_v55  ;;  %v3823_v58 = vpop.permute.xlu1 %3822 }
0x1a69   : > { %v3821_v59 = vpop.permute.xlu0 %3820  ;;  %3830 = vrot.lane.b32.xlu1 %v3735_v56, %s15680_s29 }
0x1a6a   : > { %3828 = vrot.lane.b32.xlu0 %v3734_v57, %s15680_s29  ;;  %v3832_v60 = vsel %vm1015_vm3, %v3821_v59, %v3823_v58  ;;  %s15695_s29 = smov 32  }
0x1a6b   : > { %11436 = vmatprep.subr.bf16.mxu1 %v3832_v60 }
0x1a6c   : > { %11437 = vmatpush3.bf16.msra.mxu1 %v3832_v60  ;;  %v3827_v63 = vpop.permute.xlu1 %3826 }
0x1a6d   : > { %v3825_v0 = vpop.permute.xlu0 %3824  ;;  %3781 = vperm.xlu1 %12005, %v10221_v61  }
0x1a6e   : > { %3776 = vperm.xlu0 %12004, %v10220_v62   ;;  %v3833_v1 = vsel %vm1015_vm3, %v3825_v0, %v3827_v63 }
0x1a6f   : > { %11438 = vmatprep.subr.bf16.mxu1 %v3833_v1 }
0x1a70   : > { %11439 = vmatpush3.bf16.msra.mxu1 %v3833_v1 }
0x1a71   : > { %3791 = vperm.xlu1 %12005, %v10223_v2  }
0x1a72   : > { %3786 = vperm.xlu0 %12004, %v10222_v3  }
0x1a75   : > { %3761 = vperm.xlu1 %12005, %v10217_v4  }
0x1a76   : > { %3756 = vperm.xlu0 %12004, %v10216_v5  }
0x1a79   : > { %3771 = vperm.xlu1 %12005, %v10219_v6  }
0x1a7a   : > { %3766 = vperm.xlu0 %12004, %v10218_v7  }
0x1a7d   : > { %3966 = vperm.xlu1 %12005, %v10241_v8  }
0x1a7e   : > { %3961 = vperm.xlu0 %12004, %v10240_v9  }
0x1a81   : > { %3976 = vperm.xlu1 %12005, %v10243_v10   ;;  %v12275_v10 = vld [vmem:[%s15653_s4 + $0x98] sm:$0xff]  }
0x1a82   : > { %3971 = vperm.xlu0 %12004, %v10242_v11  }
0x1adb   : > { %v3831_v13 = vpop.permute.xlu1 %3830 }
0x1adc   : > { %v3829_v12 = vpop.permute.xlu0 %3828 }
0x1add   : > { %11440 = vmatprep.subr.bf16.mxu1 %v3829_v12 }
0x1ade   : > { %11441 = vmatpush3.bf16.msra.mxu1 %v3829_v12 }
0x1adf   : > { %11442 = vmatprep.subr.bf16.mxu1 %v3831_v13 }
0x1ae2   : > { %11443 = vmatpush3.bf16.msra.mxu1 %v3831_v13 }
0x1ae5   : > { %11445 = vmatmul.mubr.msk.bf16.vlgmr.msra.gmra.mrb[60].mxu1 %vm524_vm0, %v12271_v26 }
0x1ae6   : > { %11448 = vmatprep.mubr.msk.bf16.mxu1 %vm524_vm0, %v12272_v14 }
0x1aec   : > { %v3782_v20 = vpop.permute.xlu1 %3781 }
0x1aed   : > { %11449 = vmatmul.mubr.msk.bf16.gmra.mrb[64].mxu1 %vm524_vm0, %v12273_v21  ;;  %v3777_v22 = vpop.permute.xlu0 %3776 }
0x1af0   : > { %v3792_v28 = vpop.permute.xlu1 %3791 }
0x1af1   : > { %v3787_v24 = vpop.permute.xlu0 %3786 }
0x1af4   : > { %v3762_v16 = vpop.permute.xlu1 %3761 }
0x1af5   : > { %v3757_v47 = vpop.permute.xlu0 %3756 }
0x1af8   : > { %v3772_v48 = vpop.permute.xlu1 %3771 }
0x1af9   : > { %v3767_v45 = vpop.permute.xlu0 %3766 }
0x1afc   : > { %v3967_v12 = vpop.permute.xlu1 %3966 }
0x1afd   : > { %v3962_v11 = vpop.permute.xlu0 %3961 }
0x1b00   : > { %v3977_v23 = vpop.permute.xlu1 %3976 }
0x1b01   : > { %v3972_v13 = vpop.permute.xlu0 %3971 }
0x1bb8   : > { %v11446_v18 = vpop.f32.mrb[60].mxu1 }
0x1bb9   : > { %v3884_v17 = vpop.f32.mrb[61].mxu1  ;;  %v3893_v25 = vadd.f32 %v11446_v18, %v3767_v45 }
0x1bba   : > { %v11447_v41 = vpop.f32.mrb[62].mxu1  ;;  %v3885_v15 = vadd.f32 %v3884_v17, %v3757_v47 }
0x1bbb   : > { %v3887_v35 = vpop.f32.mrb[63].mxu1  ;;  %v3896_v29 = vadd.f32 %v11447_v41, %v3772_v48 }
0x1bbc   : > { %v3888_v46 = vadd.f32 %v3887_v35, %v3762_v16  ;;  %v4044_v35 = vld [vmem:[#allocation3] sm:$0xff] }
0x1bc0   : > { %v11450_v30 = vpop.f32.mrb[64].mxu1 }
0x1bc1   : > { %v3909_v27 = vadd.f32 %v11450_v30, %v3787_v24  ;;  %v3900_v34 = vpop.f32.mrb[65].mxu1 }
0x1bc2   : > { %v3901_v36 = vadd.f32 %v3900_v34, %v3777_v22  ;;  %v11451_v31 = vpop.f32.mrb[66].mxu1  ;;  %v4046_v22 = vld [vmem:[#allocation3 + $0x10] sm:$0xff]  ;;  %v4047_v34 = vld [vmem:[#allocation3 + $0x18] sm:$0xff] }
0x1bc3   : > { %v10234_v33 = vmul.f32 -1.442695, %v3909_v27  ;;  %v3912_v40 = vadd.f32 %v11451_v31, %v3792_v28  ;;  %v3903_v42 = vpop.f32.mrb[67].mxu1 }
0x1bc4   : > { %v10232_v37 = vmul.f32 -1.442695, %v3901_v36  ;;  %v3904_v32 = vadd.f32 %v3903_v42, %v3782_v20 }
0x1bc5   : > { %12578 = vpow2.f32 %v10234_v33  ;;  %v10235_v38 = vmul.f32 -1.442695, %v3912_v40  ;;  %v4045_v33 = vld [vmem:[#allocation3 + $0x8] sm:$0xff] }
0x1bc6   : > { %12580 = vpow2.f32 %v10232_v37  ;;  %v10233_v43 = vmul.f32 -1.442695, %v3904_v32 }
0x1bc7   : > { %12582 = vpow2.f32 %v10235_v38 }
0x1bc8   : > { %12584 = vpow2.f32 %v10233_v43  ;;  %v12276_v43 = vld [vmem:[%s15651_s2 + $0x140] sm:$0xff]  }
0x1bc9   : > { %12586 = vtanh.f32 %v3893_v25  ;;  %11468 = vmatprep.mubr.msk.bf16.mxu1 %vm524_vm0, %v12276_v43 }
0x1bca   : > { %12588 = vtanh.f32 %v3885_v15 }
0x1bcb   : > { %12590 = vtanh.f32 %v3896_v29 }
0x1bcc   : > { %12592 = vtanh.f32 %v3888_v46 }
0x1bcf   : > { %v12579_v49 = vpop.eup %12578 }
0x1bd0   : > { %v12581_v52 = vpop.eup %12580  ;;  %v3933_v54 = vadd.f32 1.0, %v12579_v49 }
0x1bd1   : > { %v12583_v55 = vpop.eup %12582  ;;  %v3931_v56 = vadd.f32 1.0, %v12581_v52 }
0x1bd2   : > { %v12585_v57 = vpop.eup %12584  ;;  %12594 = vrcp.f32 %v3933_v54  ;;  %v3934_v58 = vadd.f32 1.0, %v12583_v55 }
0x1bd3   : > { %12596 = vrcp.f32 %v3931_v56  ;;  %v3932_v59 = vadd.f32 1.0, %v12585_v57  ;;  %v12587_v60 = vpop.eup %12586  ;;  %v10261_v57 = vld [vmem:[%s15652_s3 + $0x2a8] sm:$0xff] }
0x1bd4   : > { %12598 = vrcp.f32 %v3934_v58  ;;  %v12589_v61 = vpop.eup %12588  ;;  %v10260_v58 = vld [vmem:[%s15652_s3 + $0x2a0] sm:$0xff] }
0x1bd5   : > { %12600 = vrcp.f32 %v3932_v59  ;;  %v12591_v62 = vpop.eup %12590 }
0x1bd6   : > { %v12593_v63 = vpop.eup %12592 }
0x1bdc   : > { %v12595_v0 = vpop.eup %12594 }
0x1bdd   : > { %v12597_v1 = vpop.eup %12596  ;;  %v3945_v2 = vmul.f32 %v12595_v0, %v12587_v60  ;;  %v10257_v0 = vld [vmem:[%s15652_s3 + $0x288] sm:$0xff] }
0x1bde   : > { %v12599_v3 = vpop.eup %12598  ;;  %v3943_v4 = vmul.f32 %v12597_v1, %v12589_v61  ;;  %v10256_v1 = vld [vmem:[%s15652_s3 + $0x280] sm:$0xff] }
0x1bdf   : > { %v12601_v5 = vpop.eup %12600  ;;  %v3946_v6 = vmul.f32 %v12599_v3, %v12591_v62  ;;  %v10263_v62 = vld [vmem:[%s15652_s3 + $0x2b8] sm:$0xff]  ;;  %v10258_v3 = vld [vmem:[%s15652_s3 + $0x290] sm:$0xff] }
0x1be0   : > { %v3944_v7 = vmul.f32 %v12601_v5, %v12593_v63  ;;  %v10262_v63 = vld [vmem:[%s15652_s3 + $0x2b0] sm:$0xff]  ;;  %v10280_v5 = vld [vmem:[%s15654_s5 + $0x140] sm:$0xff] }
0x1be1   : > { %v3953_v8 = vpack.c.bf16 %v3946_v6, %v3945_v2  ;;  %v10259_v2 = vld [vmem:[%s15652_s3 + $0x298] sm:$0xff] }
0x1be2   : > { %v3952_v9 = vpack.c.bf16 %v3944_v7, %v3943_v4  ;;  %v10281_v4 = vld [vmem:[%s15654_s5 + $0x148] sm:$0xff]  ;;  %v10283_v6 = vld [vmem:[%s15654_s5 + $0x158] sm:$0xff]  ;;  %v10282_v7 = vld [vmem:[%s15654_s5 + $0x150] sm:$0xff] }
0x1be4   : > { %11452 = vmatprep.subr.bf16.mxu0 %v3952_v9 }
0x1be5   : > { %11453 = vmatpush3.bf16.msra.mxu0 %v3952_v9 }
0x1be6   : > { %11454 = vmatprep.subr.bf16.mxu0 %v3953_v8 }
0x1be9   : > { %11455 = vmatpush3.bf16.msra.mxu0 %v3953_v8 }
0x1bec   : > { %11457 = vmatmul.mubr.msk.bf16.vlgmr.msra.gmra.mrb[48].mxu0 %vm813_vm2, %v12275_v10  ;;  %v12277_v10 = vld [vmem:[%s15651_s2 + $0x148] sm:$0xff]  }
0x1cbf   : > { %v11458_v26 = vpop.f32.mrb[48].mxu0 }
0x1cc0   : > { %v4038_v14 = vadd.f32 %v11458_v26, %v3972_v13  ;;  %v4029_v21 = vpop.f32.mrb[49].mxu0  ;;  %v12280_v13 = vld [vmem:[%s15653_s4 + $0xa0] sm:$0xff]  }
0x1cc1   : > { %v4030_v18 = vadd.f32 %v4029_v21, %v3962_v11  ;;  %v11459_v20 = vpop.f32.mrb[50].mxu0  ;;  %v12278_v11 = vld [vmem:[%s15651_s2 + $0x150] sm:$0xff]   ;;  %11480 = vmatprep.mubr.msk.bf16.mxu0 %vm813_vm2, %v12280_v13 }
0x1cc2   : > { %v4050_v17 = vadd.f32 %v4046_v22, %v4038_v14  ;;  %v4058_v41 = vadd.f32 %v4038_v14, %v13983_v44  ;;  %v4041_v24 = vadd.f32 %v11459_v20, %v3977_v23  ;;  %v4032_v28 = vpop.f32.mrb[51].mxu0 }
0x1cc3   : > { %v4048_v30 = vadd.f32 %v4044_v35, %v4030_v18  ;;  %v4056_v27 = vadd.f32 %v4030_v18, %v13989_v50  ;;  %v4033_v36 = vadd.f32 %v4032_v28, %v3967_v12  ;;  %v12279_v12 = vld [vmem:[%s15651_s2 + $0x158] sm:$0xff]  }
0x1cc4   : > { %4054 = vst.msk [vmem:[#allocation3 + $0x10] sm:$0xff] %vm524_vm0, %v4050_v17  ;;  %4062 = vst.msk [vmem:[#allocation2 + $0x28] sm:$0xff] %vm524_vm0, %v4058_v41  ;;  %v4051_v31 = vadd.f32 %v4047_v34, %v4041_v24  ;;  %v4059_v47 = vadd.f32 %v4041_v24, %v13985_v39 }
0x1cc5   : > { %4052 = vst.msk [vmem:[#allocation3] sm:$0xff] %vm524_vm0, %v4048_v30  ;;  %4060 = vst.msk [vmem:[#allocation2 + $0x8] sm:$0xff] %vm524_vm0, %v4056_v27  ;;  %v4049_v44 = vadd.f32 %v4045_v33, %v4033_v36  ;;  %v4057_v40 = vadd.f32 %v4033_v36, %v13991_v51 }
0x1cc6   : > { %4055 = vst.msk [vmem:[#allocation3 + $0x18] sm:$0xff] %vm524_vm0, %v4051_v31  ;;  %4063 = vst.msk [vmem:[#allocation2 + $0x38] sm:$0xff] %vm524_vm0, %v4059_v47 }
0x1cc7   : > { %4053 = vst.msk [vmem:[#allocation3 + $0x8] sm:$0xff] %vm524_vm0, %v4049_v44  ;;  %4061 = vst.msk [vmem:[#allocation2 + $0x18] sm:$0xff] %vm524_vm0, %v4057_v40 }
0x1ccb   : > { %v14083_v50 = vld [vmem:[#allocation2 + $0x28] sm:$0xff] }
0x1ccc   : > { %v14089_v37 = vld [vmem:[#allocation2 + $0x8] sm:$0xff] }
0x1ccd   : > { %v14085_v42 = vld [vmem:[#allocation2 + $0x38] sm:$0xff] }
0x1cce   : > { %v12101_v39 = vpack.i.bf16 %v14085_v42, %v14083_v50  ;;  %v14091_v32 = vld [vmem:[#allocation2 + $0x18] sm:$0xff]  ;;  %v4091_v38 = vpack.c.bf16 %v14085_v42, %v14083_v50 }
0x1ccf   : > { %v12096_v51 = vpack.i.bf16 %v14091_v32, %v14089_v37  ;;  %v4089_v16 = vpack.c.bf16 %v14091_v32, %v14089_v37 }
0x1cd0   : > { %12102 = vrot.lane.b32.xlu1 %v12101_v39, %s15678_s30 }
0x1cd1   : > { %12097 = vrot.lane.b32.xlu0 %v12096_v51, %s15678_s30  ;;  %s15692_s30 = smov 112  }
0x1cd4   : > { %4180 = vrot.lane.b32.xlu1 %v4089_v16, %s15676_s13 }
0x1cd5   : > { %4178 = vrot.lane.b32.xlu0 %v13715_v19, %s15676_s13 }
0x1cd8   : > { %4184 = vrot.lane.b32.xlu1 %v4091_v38, %s15676_s13 }
0x1cd9   : > { %4182 = vrot.lane.b32.xlu0 %v13715_v19, %s15676_s13 }
0x1d42   : > { %v12103_v45 = vpop.permute.xlu1 %12102 }
0x1d43   : > { %v12105_v25 = vunpack.i.h.bf16 %v12103_v45  ;;  %v12104_v48 = vunpack.i.l.bf16 %v12103_v45  ;;  %v12098_v15 = vpop.permute.xlu0 %12097 }
0x1d44   : > { %v12100_v29 = vunpack.i.h.bf16 %v12098_v15  ;;  %v12099_v46 = vunpack.i.l.bf16 %v12098_v15 }
0x1d45   : > { %v4093_v49 = vpack.c.bf16 %v12105_v25, %v12104_v48 }
0x1d46   : > { %v4092_v52 = vpack.c.bf16 %v12100_v29, %v12099_v46  ;;  %v4181_v54 = vpop.permute.xlu1 %4180 }
0x1d47   : > { %v4179_v55 = vpop.permute.xlu0 %4178  ;;  %4188 = vrot.lane.b32.xlu1 %v4093_v49, %s15676_s13 }
0x1d48   : > { %4186 = vrot.lane.b32.xlu0 %v4092_v52, %s15676_s13  ;;  %v4190_v56 = vsel %vm1374_vm4, %v4179_v55, %v4181_v54  ;;  %s15693_s13 = smov 16  }
0x1d49   : > { %11460 = vmatprep.subr.bf16.mxu1 %v4190_v56 }
0x1d4a   : > { %11461 = vmatpush3.bf16.msra.mxu1 %v4190_v56  ;;  %v4185_v59 = vpop.permute.xlu1 %4184 }
0x1d4b   : > { %v4183_v60 = vpop.permute.xlu0 %4182  ;;  %4139 = vperm.xlu1 %12005, %v10261_v57  }
0x1d4c   : > { %4134 = vperm.xlu0 %12004, %v10260_v58   ;;  %v4191_v61 = vsel %vm1374_vm4, %v4183_v60, %v4185_v59 }
0x1d4d   : > { %11462 = vmatprep.subr.bf16.mxu1 %v4191_v61 }
0x1d4e   : > { %11463 = vmatpush3.bf16.msra.mxu1 %v4191_v61 }
0x1d4f   : > { %4149 = vperm.xlu1 %12005, %v10263_v62  }
0x1d50   : > { %4144 = vperm.xlu0 %12004, %v10262_v63  }
0x1d53   : > { %4119 = vperm.xlu1 %12005, %v10257_v0  }
0x1d54   : > { %4114 = vperm.xlu0 %12004, %v10256_v1  }
0x1d57   : > { %4129 = vperm.xlu1 %12005, %v10259_v2  }
0x1d58   : > { %4124 = vperm.xlu0 %12004, %v10258_v3  }
0x1d5b   : > { %4324 = vperm.xlu1 %12005, %v10281_v4  }
0x1d5c   : > { %4319 = vperm.xlu0 %12004, %v10280_v5  }
0x1d5f   : > { %4334 = vperm.xlu1 %12005, %v10283_v6   ;;  %v12281_v6 = vld [vmem:[%s15653_s4 + $0xa8] sm:$0xff]  }
0x1d60   : > { %4329 = vperm.xlu0 %12004, %v10282_v7  }
0x1db9   : > { %v4189_v9 = vpop.permute.xlu1 %4188 }
0x1dba   : > { %v4187_v8 = vpop.permute.xlu0 %4186 }
0x1dbb   : > { %11464 = vmatprep.subr.bf16.mxu1 %v4187_v8 }
0x1dbc   : > { %11465 = vmatpush3.bf16.msra.mxu1 %v4187_v8 }
0x1dbd   : > { %11466 = vmatprep.subr.bf16.mxu1 %v4189_v9 }
0x1dc0   : > { %11467 = vmatpush3.bf16.msra.mxu1 %v4189_v9 }
0x1dc3   : > { %11469 = vmatmul.mubr.msk.bf16.vlgmr.msra.gmra.mrb[68].mxu1 %vm524_vm0, %v12277_v10 }
0x1dc4   : > { %11472 = vmatprep.mubr.msk.bf16.mxu1 %vm524_vm0, %v12278_v11 }
0x1dca   : > { %v4140_v21 = vpop.permute.xlu1 %4139 }
0x1dcb   : > { %11473 = vmatmul.mubr.msk.bf16.gmra.mrb[72].mxu1 %vm524_vm0, %v12279_v12  ;;  %v4135_v26 = vpop.permute.xlu0 %4134 }
0x1dce   : > { %v4150_v17 = vpop.permute.xlu1 %4149 }
0x1dcf   : > { %v4145_v20 = vpop.permute.xlu0 %4144 }
0x1dd2   : > { %v4120_v44 = vpop.permute.xlu1 %4119 }
0x1dd3   : > { %v4115_v27 = vpop.permute.xlu0 %4114 }
0x1dd6   : > { %v4130_v38 = vpop.permute.xlu1 %4129 }
0x1dd7   : > { %v4125_v51 = vpop.permute.xlu0 %4124 }
0x1dda   : > { %v4325_v8 = vpop.permute.xlu1 %4324 }
0x1ddb   : > { %v4320_v7 = vpop.permute.xlu0 %4319 }
0x1dde   : > { %v4335_v13 = vpop.permute.xlu1 %4334 }
0x1ddf   : > { %v4330_v9 = vpop.permute.xlu0 %4329 }
0x1e96   : > { %v11470_v14 = vpop.f32.mrb[68].mxu1 }
0x1e97   : > { %v4242_v23 = vpop.f32.mrb[69].mxu1  ;;  %v4251_v16 = vadd.f32 %v11470_v14, %v4125_v51 }
0x1e98   : > { %v11471_v22 = vpop.f32.mrb[70].mxu1  ;;  %v4243_v43 = vadd.f32 %v4242_v23, %v4115_v27 }
0x1e99   : > { %v4245_v18 = vpop.f32.mrb[71].mxu1  ;;  %v4254_v45 = vadd.f32 %v11471_v22, %v4130_v38 }
0x1e9a   : > { %v4246_v25 = vadd.f32 %v4245_v18, %v4120_v44  ;;  %v4402_v18 = vld [vmem:[#allocation3] sm:$0xff] }
0x1e9e   : > { %v11474_v41 = vpop.f32.mrb[72].mxu1 }
0x1e9f   : > { %v4267_v35 = vadd.f32 %v11474_v41, %v4145_v20  ;;  %v4258_v24 = vpop.f32.mrb[73].mxu1 }
0x1ea0   : > { %v4259_v28 = vadd.f32 %v4258_v24, %v4135_v26  ;;  %v11475_v30 = vpop.f32.mrb[74].mxu1  ;;  %v4404_v26 = vld [vmem:[#allocation3 + $0x10] sm:$0xff]  ;;  %v4405_v24 = vld [vmem:[#allocation3 + $0x18] sm:$0xff] }
0x1ea1   : > { %v10274_v34 = vmul.f32 -1.442695, %v4267_v35  ;;  %v4270_v36 = vadd.f32 %v11475_v30, %v4150_v17  ;;  %v4261_v31 = vpop.f32.mrb[75].mxu1 }
0x1ea2   : > { %v10272_v47 = vmul.f32 -1.442695, %v4259_v28  ;;  %v4262_v33 = vadd.f32 %v4261_v31, %v4140_v21 }
0x1ea3   : > { %12602 = vpow2.f32 %v10274_v34  ;;  %v10275_v40 = vmul.f32 -1.442695, %v4270_v36  ;;  %v4403_v34 = vld [vmem:[#allocation3 + $0x8] sm:$0xff] }
0x1ea4   : > { %12604 = vpow2.f32 %v10272_v47  ;;  %v10273_v39 = vmul.f32 -1.442695, %v4262_v33 }
0x1ea5   : > { %12606 = vpow2.f32 %v10275_v40 }
0x1ea6   : > { %12608 = vpow2.f32 %v10273_v39  ;;  %v12282_v39 = vld [vmem:[%s15651_s2 + $0x160] sm:$0xff]  }
0x1ea7   : > { %12610 = vtanh.f32 %v4251_v16 }
0x1ea8   : > { %12612 = vtanh.f32 %v4243_v43 }
0x1ea9   : > { %12614 = vtanh.f32 %v4254_v45 }
0x1eaa   : > { %12616 = vtanh.f32 %v4246_v25 }
0x1ead   : > { %v12603_v48 = vpop.eup %12602 }
0x1eae   : > { %v12605_v15 = vpop.eup %12604  ;;  %v4291_v29 = vadd.f32 1.0, %v12603_v48 }
0x1eaf   : > { %v12607_v46 = vpop.eup %12606  ;;  %v4289_v49 = vadd.f32 1.0, %v12605_v15 }
0x1eb0   : > { %v12609_v52 = vpop.eup %12608  ;;  %12618 = vrcp.f32 %v4291_v29  ;;  %v4292_v54 = vadd.f32 1.0, %v12607_v46 }
0x1eb1   : > { %12620 = vrcp.f32 %v4289_v49  ;;  %v4290_v55 = vadd.f32 1.0, %v12609_v52  ;;  %v12611_v56 = vpop.eup %12610  ;;  %v10301_v49 = vld [vmem:[%s15652_s3 + $0x2e8] sm:$0xff]  ;;  %v10300_v52 = vld [vmem:[%s15652_s3 + $0x2e0] sm:$0xff] }
0x1eb2   : > { %12622 = vrcp.f32 %v4292_v54  ;;  %v12613_v57 = vpop.eup %12612 }
0x1eb3   : > { %12624 = vrcp.f32 %v4290_v55  ;;  %v12615_v58 = vpop.eup %12614 }
0x1eb4   : > { %v12617_v59 = vpop.eup %12616 }
0x1eba   : > { %v12619_v60 = vpop.eup %12618 }
0x1ebb   : > { %v12621_v61 = vpop.eup %12620  ;;  %v4303_v62 = vmul.f32 %v12619_v60, %v12611_v56  ;;  %v10296_v60 = vld [vmem:[%s15652_s3 + $0x2c0] sm:$0xff] }
0x1ebc   : > { %v12623_v63 = vpop.eup %12622  ;;  %v4301_v0 = vmul.f32 %v12621_v61, %v12613_v57  ;;  %v10303_v57 = vld [vmem:[%s15652_s3 + $0x2f8] sm:$0xff] }
0x1ebd   : > { %v12625_v1 = vpop.eup %12624  ;;  %v4304_v2 = vmul.f32 %v12623_v63, %v12615_v58  ;;  %v10302_v58 = vld [vmem:[%s15652_s3 + $0x2f0] sm:$0xff]  ;;  %v10299_v61 = vld [vmem:[%s15652_s3 + $0x2d8] sm:$0xff]  ;;  %v10321_v63 = vld [vmem:[%s15654_s5 + $0x168] sm:$0xff] }
0x1ebe   : > { %v4302_v3 = vmul.f32 %v12625_v1, %v12617_v59  ;;  %v10297_v59 = vld [vmem:[%s15652_s3 + $0x2c8] sm:$0xff]  ;;  %v10323_v1 = vld [vmem:[%s15654_s5 + $0x178] sm:$0xff] }
0x1ebf   : > { %v4311_v4 = vpack.c.bf16 %v4304_v2, %v4303_v62  ;;  %v10298_v62 = vld [vmem:[%s15652_s3 + $0x2d0] sm:$0xff] }
0x1ec0   : > { %v4310_v5 = vpack.c.bf16 %v4302_v3, %v4301_v0  ;;  %v10320_v0 = vld [vmem:[%s15654_s5 + $0x160] sm:$0xff]  ;;  %v10322_v2 = vld [vmem:[%s15654_s5 + $0x170] sm:$0xff] }
0x1ec2   : > { %11476 = vmatprep.subr.bf16.mxu0 %v4310_v5 }
0x1ec3   : > { %11477 = vmatpush3.bf16.msra.mxu0 %v4310_v5  ;;  %v12283_v5 = vld [vmem:[%s15651_s2 + $0x168] sm:$0xff]  }
0x1ec4   : > { %11478 = vmatprep.subr.bf16.mxu0 %v4311_v4 }
0x1ec7   : > { %11479 = vmatpush3.bf16.msra.mxu0 %v4311_v4 }
0x1eca   : > { %11481 = vmatmul.mubr.msk.bf16.vlgmr.msra.gmra.mrb[52].mxu0 %vm813_vm2, %v12281_v6  ;;  %v12284_v6 = vld [vmem:[%s15651_s2 + $0x170] sm:$0xff]  }
0x1ecb   : > { %11492 = vmatprep.mubr.msk.bf16.mxu0 %vm524_vm0, %v12282_v39 }
0x1f9d   : > { %v11482_v10 = vpop.f32.mrb[52].mxu0 }
0x1f9e   : > { %v4396_v11 = vadd.f32 %v11482_v10, %v4330_v9  ;;  %v4387_v12 = vpop.f32.mrb[53].mxu0 }
0x1f9f   : > { %v4388_v14 = vadd.f32 %v4387_v12, %v4320_v7  ;;  %v11483_v21 = vpop.f32.mrb[54].mxu0  ;;  %v12285_v7 = vld [vmem:[%s15651_s2 + $0x178] sm:$0xff]  }
0x1fa0   : > { %v4408_v23 = vadd.f32 %v4404_v26, %v4396_v11  ;;  %v4416_v22 = vadd.f32 %v4396_v11, %v14083_v50  ;;  %v4399_v20 = vadd.f32 %v11483_v21, %v4335_v13  ;;  %v4390_v17 = vpop.f32.mrb[55].mxu0 }
0x1fa1   : > { %v4406_v41 = vadd.f32 %v4402_v18, %v4388_v14  ;;  %v4414_v35 = vadd.f32 %v4388_v14, %v14089_v37  ;;  %v4391_v28 = vadd.f32 %v4390_v17, %v4325_v8  ;;  %v12286_v8 = vld [vmem:[%s15653_s4 + $0xb0] sm:$0xff]  }
0x1fa2   : > { %4412 = vst.msk [vmem:[#allocation3 + $0x10] sm:$0xff] %vm524_vm0, %v4408_v23  ;;  %4420 = vst.msk [vmem:[#allocation2 + $0x28] sm:$0xff] %vm524_vm0, %v4416_v22  ;;  %v4409_v30 = vadd.f32 %v4405_v24, %v4399_v20  ;;  %v4417_v27 = vadd.f32 %v4399_v20, %v14085_v42  ;;  %11504 = vmatprep.mubr.msk.bf16.mxu1 %vm813_vm2, %v12286_v8 }
0x1fa3   : > { %4410 = vst.msk [vmem:[#allocation3] sm:$0xff] %vm524_vm0, %v4406_v41  ;;  %4418 = vst.msk [vmem:[#allocation2 + $0x8] sm:$0xff] %vm524_vm0, %v4414_v35  ;;  %v4407_v50 = vadd.f32 %v4403_v34, %v4391_v28  ;;  %v4415_v36 = vadd.f32 %v4391_v28, %v14091_v32 }
0x1fa4   : > { %4413 = vst.msk [vmem:[#allocation3 + $0x18] sm:$0xff] %vm524_vm0, %v4409_v30  ;;  %4421 = vst.msk [vmem:[#allocation2 + $0x38] sm:$0xff] %vm524_vm0, %v4417_v27 }
0x1fa5   : > { %4411 = vst.msk [vmem:[#allocation3 + $0x8] sm:$0xff] %vm524_vm0, %v4407_v50  ;;  %4419 = vst.msk [vmem:[#allocation2 + $0x18] sm:$0xff] %vm524_vm0, %v4415_v36 }
0x1fa9   : > { %v14183_v37 = vld [vmem:[#allocation2 + $0x28] sm:$0xff]  ;;  %v4762_v8 = vld [vmem:[#allocation3 + $0x10] sm:$0xff] }
0x1faa   : > { %v14189_v47 = vld [vmem:[#allocation2 + $0x8] sm:$0xff] }
0x1fab   : > { %v14185_v31 = vld [vmem:[#allocation2 + $0x38] sm:$0xff] }
0x1fac   : > { %v12111_v42 = vpack.i.bf16 %v14185_v31, %v14183_v37  ;;  %v14191_v33 = vld [vmem:[#allocation2 + $0x18] sm:$0xff]  ;;  %v4449_v40 = vpack.c.bf16 %v14185_v31, %v14183_v37 }
0x1fad   : > { %v12106_v32 = vpack.i.bf16 %v14191_v33, %v14189_v47  ;;  %v4447_v44 = vpack.c.bf16 %v14191_v33, %v14189_v47 }
0x1fae   : > { %12112 = vrot.lane.b32.xlu1 %v12111_v42, %s15690_s26 }
0x1faf   : > { %12107 = vrot.lane.b32.xlu0 %v12106_v32, %s15690_s26 }
0x1fb2   : > { %4538 = vrot.lane.b32.xlu1 %v4447_v44, %s15691_s27 }
0x1fb3   : > { %4536 = vrot.lane.b32.xlu0 %v13715_v19, %s15691_s27 }
0x1fb6   : > { %4542 = vrot.lane.b32.xlu1 %v4449_v40, %s15691_s27 }
0x1fb7   : > { %4540 = vrot.lane.b32.xlu0 %v13715_v19, %s15691_s27 }
0x2020   : > { %v12113_v51 = vpop.permute.xlu1 %12112 }
0x2021   : > { %v12115_v16 = vunpack.i.h.bf16 %v12113_v51  ;;  %v12114_v38 = vunpack.i.l.bf16 %v12113_v51  ;;  %v12108_v43 = vpop.permute.xlu0 %12107 }
0x2022   : > { %v12110_v45 = vunpack.i.h.bf16 %v12108_v43  ;;  %v12109_v25 = vunpack.i.l.bf16 %v12108_v43 }
0x2023   : > { %v4451_v48 = vpack.c.bf16 %v12115_v16, %v12114_v38 }
0x2024   : > { %v4450_v15 = vpack.c.bf16 %v12110_v45, %v12109_v25  ;;  %v4539_v29 = vpop.permute.xlu1 %4538 }
0x2025   : > { %v4537_v46 = vpop.permute.xlu0 %4536  ;;  %4546 = vrot.lane.b32.xlu1 %v4451_v48, %s15691_s27 }
0x2026   : > { %4544 = vrot.lane.b32.xlu0 %v4450_v15, %s15691_s27  ;;  %v4548_v19 = vsel %vm1733_vm5, %v4537_v46, %v4539_v29 }
0x2027   : > { %11484 = vmatprep.subr.bf16.mxu0 %v4548_v19 }
0x2028   : > { %11485 = vmatpush3.bf16.msra.mxu0 %v4548_v19  ;;  %v4543_v54 = vpop.permute.xlu1 %4542 }
0x2029   : > { %v4541_v55 = vpop.permute.xlu0 %4540  ;;  %4497 = vperm.xlu1 %12005, %v10301_v49  }
0x202a   : > { %4492 = vperm.xlu0 %12004, %v10300_v52   ;;  %v4549_v56 = vsel %vm1733_vm5, %v4541_v55, %v4543_v54 }
0x202b   : > { %11486 = vmatprep.subr.bf16.mxu0 %v4549_v56 }
0x202c   : > { %11487 = vmatpush3.bf16.msra.mxu0 %v4549_v56 }
0x202d   : > { %4507 = vperm.xlu1 %12005, %v10303_v57  }
0x202e   : > { %4502 = vperm.xlu0 %12004, %v10302_v58  }
0x2031   : > { %4477 = vperm.xlu1 %12005, %v10297_v59  }
0x2032   : > { %4472 = vperm.xlu0 %12004, %v10296_v60  }
0x2035   : > { %4487 = vperm.xlu1 %12005, %v10299_v61  }
0x2036   : > { %4482 = vperm.xlu0 %12004, %v10298_v62  }
0x2039   : > { %4682 = vperm.xlu1 %12005, %v10321_v63  }
0x203a   : > { %4677 = vperm.xlu0 %12004, %v10320_v0   ;;  %v12287_v0 = vld [vmem:[%s15653_s4 + $0xb8] sm:$0xff]  }
0x203d   : > { %4692 = vperm.xlu1 %12005, %v10323_v1  }
0x203e   : > { %4687 = vperm.xlu0 %12004, %v10322_v2  }
0x2097   : > { %v4547_v4 = vpop.permute.xlu1 %4546 }
0x2098   : > { %v4545_v3 = vpop.permute.xlu0 %4544 }
0x2099   : > { %11488 = vmatprep.subr.bf16.mxu0 %v4545_v3 }
0x209a   : > { %11489 = vmatpush3.bf16.msra.mxu0 %v4545_v3 }
0x209b   : > { %11490 = vmatprep.subr.bf16.mxu0 %v4547_v4 }
0x209e   : > { %11491 = vmatpush3.bf16.msra.mxu0 %v4547_v4 }
0x20a1   : > { %11493 = vmatmul.mubr.msk.bf16.vlgmr.msra.gmra.mrb[56].mxu0 %vm524_vm0, %v12283_v5 }
0x20a2   : > { %11496 = vmatprep.mubr.msk.bf16.mxu0 %vm524_vm0, %v12284_v6 }
0x20a8   : > { %v4498_v11 = vpop.permute.xlu1 %4497 }
0x20a9   : > { %11497 = vmatmul.mubr.msk.bf16.gmra.mrb[60].mxu0 %vm524_vm0, %v12285_v7  ;;  %v4493_v9 = vpop.permute.xlu0 %4492 }
0x20ac   : > { %v4508_v21 = vpop.permute.xlu1 %4507 }
0x20ad   : > { %v4503_v14 = vpop.permute.xlu0 %4502 }
0x20b0   : > { %v4478_v34 = vpop.permute.xlu1 %4477 }
0x20b1   : > { %v4473_v41 = vpop.permute.xlu0 %4472 }
0x20b4   : > { %v4488_v44 = vpop.permute.xlu1 %4487 }
0x20b5   : > { %v4483_v42 = vpop.permute.xlu0 %4482 }
0x20b8   : > { %v4683_v2 = vpop.permute.xlu1 %4682 }
0x20b9   : > { %v4678_v1 = vpop.permute.xlu0 %4677 }
0x20bc   : > { %v4693_v7 = vpop.permute.xlu1 %4692 }
0x20bd   : > { %v4688_v3 = vpop.permute.xlu0 %4687 }
0x2174   : > { %v11494_v10 = vpop.f32.mrb[56].mxu0 }
0x2175   : > { %v4600_v12 = vpop.f32.mrb[57].mxu0  ;;  %v4609_v32 = vadd.f32 %v11494_v10, %v4483_v42  ;;  %v12288_v42 = vld [vmem:[%s15651_s2 + $0x180] sm:$0xff]  }
0x2176   : > { %v11495_v13 = vpop.f32.mrb[58].mxu0  ;;  %v4601_v40 = vadd.f32 %v4600_v12, %v4473_v41  ;;  %v4761_v41 = vld [vmem:[#allocation3 + $0x8] sm:$0xff]  ;;  %11516 = vmatprep.mubr.msk.bf16.mxu0 %vm524_vm0, %v12288_v42 }
0x2177   : > { %v4603_v26 = vpop.f32.mrb[59].mxu0  ;;  %v4612_v39 = vadd.f32 %v11495_v13, %v4488_v44  ;;  %v4760_v13 = vld [vmem:[#allocation3] sm:$0xff] }
0x2178   : > { %v4604_v51 = vadd.f32 %v4603_v26, %v4478_v34 }
0x217c   : > { %v11498_v23 = vpop.f32.mrb[60].mxu0 }
0x217d   : > { %v4625_v22 = vadd.f32 %v11498_v23, %v4503_v14  ;;  %v4616_v18 = vpop.f32.mrb[61].mxu0 }
0x217e   : > { %v4617_v20 = vadd.f32 %v4616_v18, %v4493_v9  ;;  %v11499_v17 = vpop.f32.mrb[62].mxu0 }
0x217f   : > { %v10314_v35 = vmul.f32 -1.442695, %v4625_v22  ;;  %v4628_v24 = vadd.f32 %v11499_v17, %v4508_v21  ;;  %v4619_v28 = vpop.f32.mrb[63].mxu0  ;;  %v4763_v22 = vld [vmem:[#allocation3 + $0x18] sm:$0xff] }
0x2180   : > { %v10312_v30 = vmul.f32 -1.442695, %v4617_v20  ;;  %v4620_v27 = vadd.f32 %v4619_v28, %v4498_v11 }
0x2181   : > { %12626 = vpow2.f32 %v10314_v35  ;;  %v10315_v50 = vmul.f32 -1.442695, %v4628_v24 }
0x2182   : > { %12628 = vpow2.f32 %v10312_v30  ;;  %v10313_v36 = vmul.f32 -1.442695, %v4620_v27  ;;  %v12940_v27 = vld [vmem:[#allocation2] sm:$0xff] }
0x2183   : > { %12630 = vpow2.f32 %v10315_v50  ;;  %v14297_v34 = vpack.c.bf16 %v12940_v27, %v12940_v27 }
0x2184   : > { %12632 = vpow2.f32 %v10313_v36 }
0x2185   : > { %12634 = vtanh.f32 %v4609_v32 }
0x2186   : > { %12636 = vtanh.f32 %v4601_v40 }
0x2187   : > { %12638 = vtanh.f32 %v4612_v39 }
0x2188   : > { %12640 = vtanh.f32 %v4604_v51 }
0x218b   : > { %v12627_v16 = vpop.eup %12626 }
0x218c   : > { %v12629_v38 = vpop.eup %12628  ;;  %v4649_v43 = vadd.f32 1.0, %v12627_v16 }
0x218d   : > { %v12631_v45 = vpop.eup %12630  ;;  %v4647_v25 = vadd.f32 1.0, %v12629_v38 }
0x218e   : > { %v12633_v48 = vpop.eup %12632  ;;  %12642 = vrcp.f32 %v4649_v43  ;;  %v4650_v15 = vadd.f32 1.0, %v12631_v45 }
0x218f   : > { %12644 = vrcp.f32 %v4647_v25  ;;  %v4648_v29 = vadd.f32 1.0, %v12633_v48  ;;  %v12635_v46 = vpop.eup %12634 }
0x2190   : > { %12646 = vrcp.f32 %v4650_v15  ;;  %v12637_v19 = vpop.eup %12636  ;;  %v10341_v15 = vld [vmem:[%s15652_s3 + $0x328] sm:$0xff] }
0x2191   : > { %12648 = vrcp.f32 %v4648_v29  ;;  %v12639_v49 = vpop.eup %12638  ;;  %v10340_v29 = vld [vmem:[%s15652_s3 + $0x320] sm:$0xff] }
0x2192   : > { %v12641_v52 = vpop.eup %12640 }
0x2198   : > { %v12643_v54 = vpop.eup %12642 }
0x2199   : > { %v12645_v55 = vpop.eup %12644  ;;  %v4661_v56 = vmul.f32 %v12643_v54, %v12635_v46  ;;  %v10342_v54 = vld [vmem:[%s15652_s3 + $0x330] sm:$0xff] }
0x219a   : > { %v12647_v57 = vpop.eup %12646  ;;  %v4659_v58 = vmul.f32 %v12645_v55, %v12637_v19  ;;  %v10337_v55 = vld [vmem:[%s15652_s3 + $0x308] sm:$0xff] }
0x219b   : > { %v12649_v59 = vpop.eup %12648  ;;  %v4662_v60 = vmul.f32 %v12647_v57, %v12639_v49  ;;  %v10339_v57 = vld [vmem:[%s15652_s3 + $0x318] sm:$0xff] }
0x219c   : > { %v4660_v61 = vmul.f32 %v12649_v59, %v12641_v52  ;;  %v10343_v52 = vld [vmem:[%s15652_s3 + $0x338] sm:$0xff]  ;;  %v10361_v59 = vld [vmem:[%s15654_s5 + $0x188] sm:$0xff] }
0x219d   : > { %v4669_v62 = vpack.c.bf16 %v4662_v60, %v4661_v56  ;;  %v10336_v56 = vld [vmem:[%s15652_s3 + $0x300] sm:$0xff] }
0x219e   : > { %v4668_v63 = vpack.c.bf16 %v4660_v61, %v4659_v58  ;;  %v10338_v58 = vld [vmem:[%s15652_s3 + $0x310] sm:$0xff]  ;;  %v10360_v60 = vld [vmem:[%s15654_s5 + $0x180] sm:$0xff]  ;;  %v10363_v61 = vld [vmem:[%s15654_s5 + $0x198] sm:$0xff] }
0x21a0   : > { %11500 = vmatprep.subr.bf16.mxu1 %v4668_v63 }
0x21a1   : > { %11501 = vmatpush3.bf16.msra.mxu1 %v4668_v63 }
0x21a2   : > { %11502 = vmatprep.subr.bf16.mxu1 %v4669_v62 }
0x21a5   : > { %11503 = vmatpush3.bf16.msra.mxu1 %v4669_v62  ;;  %v10362_v62 = vld [vmem:[%s15654_s5 + $0x190] sm:$0xff] }
0x21a8   : > { %11505 = vmatmul.mubr.msk.bf16.vlgmr.msra.gmra.mrb[76].mxu1 %vm813_vm2, %v12287_v0 }
0x227b   : > { %v11506_v4 = vpop.f32.mrb[76].mxu1 }
0x227c   : > { %v4754_v5 = vadd.f32 %v11506_v4, %v4688_v3  ;;  %v4745_v6 = vpop.f32.mrb[77].mxu1  ;;  %v12291_v3 = vld [vmem:[%s15651_s2 + $0x198] sm:$0xff]   ;;  %v12292_v4 = vld [vmem:[%s15653_s4 + $0xc0] sm:$0xff]  }
0x227d   : > { %v4746_v9 = vadd.f32 %v4745_v6, %v4678_v1  ;;  %v11507_v10 = vpop.f32.mrb[78].mxu1  ;;  %v12289_v1 = vld [vmem:[%s15651_s2 + $0x188] sm:$0xff]   ;;  %11528 = vmatprep.mubr.msk.bf16.mxu1 %vm813_vm2, %v12292_v4 }
0x227e   : > { %v4766_v11 = vadd.f32 %v4762_v8, %v4754_v5  ;;  %v4774_v12 = vadd.f32 %v4754_v5, %v14183_v37  ;;  %v4757_v26 = vadd.f32 %v11507_v10, %v4693_v7  ;;  %v4748_v14 = vpop.f32.mrb[79].mxu1 }
0x227f   : > { %v4764_v21 = vadd.f32 %v4760_v13, %v4746_v9  ;;  %v4772_v23 = vadd.f32 %v4746_v9, %v14189_v47  ;;  %v4749_v18 = vadd.f32 %v4748_v14, %v4683_v2  ;;  %v12290_v2 = vld [vmem:[%s15651_s2 + $0x190] sm:$0xff]  }
0x2280   : > { %4770 = vst.msk [vmem:[#allocation3 + $0x10] sm:$0xff] %vm524_vm0, %v4766_v11  ;;  %4778 = vst.msk [vmem:[#allocation2 + $0x28] sm:$0xff] %vm524_vm0, %v4774_v12  ;;  %v4767_v20 = vadd.f32 %v4763_v22, %v4757_v26  ;;  %v4775_v17 = vadd.f32 %v4757_v26, %v14185_v31 }
0x2281   : > { %4768 = vst.msk [vmem:[#allocation3] sm:$0xff] %vm524_vm0, %v4764_v21  ;;  %4776 = vst.msk [vmem:[#allocation2 + $0x8] sm:$0xff] %vm524_vm0, %v4772_v23  ;;  %v4765_v37 = vadd.f32 %v4761_v41, %v4749_v18  ;;  %v4773_v35 = vadd.f32 %v4749_v18, %v14191_v33 }
0x2282   : > { %4771 = vst.msk [vmem:[#allocation3 + $0x18] sm:$0xff] %vm524_vm0, %v4767_v20  ;;  %4779 = vst.msk [vmem:[#allocation2 + $0x38] sm:$0xff] %vm524_vm0, %v4775_v17 }
0x2283   : > { %4769 = vst.msk [vmem:[#allocation3 + $0x8] sm:$0xff] %vm524_vm0, %v4765_v37  ;;  %4777 = vst.msk [vmem:[#allocation2 + $0x18] sm:$0xff] %vm524_vm0, %v4773_v35 }
0x2287   : > { %v14283_v47 = vld [vmem:[#allocation2 + $0x28] sm:$0xff] }
0x2288   : > { %v14289_v28 = vld [vmem:[#allocation2 + $0x8] sm:$0xff] }
0x2289   : > { %v14285_v24 = vld [vmem:[#allocation2 + $0x38] sm:$0xff] }
0x228a   : > { %v12121_v31 = vpack.i.bf16 %v14285_v24, %v14283_v47  ;;  %v14291_v30 = vld [vmem:[#allocation2 + $0x18] sm:$0xff]  ;;  %v4807_v36 = vpack.c.bf16 %v14285_v24, %v14283_v47 }
0x228b   : > { %v12116_v33 = vpack.i.bf16 %v14291_v30, %v14289_v28  ;;  %v4805_v50 = vpack.c.bf16 %v14291_v30, %v14289_v28 }
0x228c   : > { %12122 = vrot.lane.b32.xlu1 %v12121_v31, %s15692_s30 }
0x228d   : > { %12117 = vrot.lane.b32.xlu0 %v12116_v33, %s15692_s30 }
0x2290   : > { %4896 = vrot.lane.b32.xlu1 %v4805_v50, %s15693_s13 }
0x2291   : > { %4894 = vrot.lane.b32.xlu0 %v14297_v34, %s15693_s13 }
0x2294   : > { %4900 = vrot.lane.b32.xlu1 %v4807_v36, %s15693_s13 }
0x2295   : > { %4898 = vrot.lane.b32.xlu0 %v14297_v34, %s15693_s13 }
0x22fe   : > { %v12123_v32 = vpop.permute.xlu1 %12122 }
0x22ff   : > { %v12125_v44 = vunpack.i.h.bf16 %v12123_v32  ;;  %v12124_v40 = vunpack.i.l.bf16 %v12123_v32  ;;  %v12118_v39 = vpop.permute.xlu0 %12117 }
0x2300   : > { %v12120_v51 = vunpack.i.h.bf16 %v12118_v39  ;;  %v12119_v16 = vunpack.i.l.bf16 %v12118_v39 }
0x2301   : > { %v4809_v38 = vpack.c.bf16 %v12125_v44, %v12124_v40 }
0x2302   : > { %v4808_v43 = vpack.c.bf16 %v12120_v51, %v12119_v16  ;;  %v4897_v45 = vpop.permute.xlu1 %4896 }
0x2303   : > { %v4895_v25 = vpop.permute.xlu0 %4894  ;;  %4904 = vrot.lane.b32.xlu1 %v4809_v38, %s15693_s13 }
0x2304   : > { %4902 = vrot.lane.b32.xlu0 %v4808_v43, %s15693_s13  ;;  %v4906_v48 = vsel %vm2092_vm6, %v4895_v25, %v4897_v45 }
0x2305   : > { %11508 = vmatprep.subr.bf16.mxu0 %v4906_v48 }
0x2306   : > { %11509 = vmatpush3.bf16.msra.mxu0 %v4906_v48  ;;  %v4901_v46 = vpop.permute.xlu1 %4900 }
0x2307   : > { %v4899_v19 = vpop.permute.xlu0 %4898  ;;  %4855 = vperm.xlu1 %12005, %v10341_v15  }
0x2308   : > { %4850 = vperm.xlu0 %12004, %v10340_v29   ;;  %v4907_v49 = vsel %vm2092_vm6, %v4899_v19, %v4901_v46 }
0x2309   : > { %11510 = vmatprep.subr.bf16.mxu0 %v4907_v49 }
0x230a   : > { %11511 = vmatpush3.bf16.msra.mxu0 %v4907_v49 }
0x230b   : > { %4865 = vperm.xlu1 %12005, %v10343_v52  }
0x230c   : > { %4860 = vperm.xlu0 %12004, %v10342_v54  }
0x230f   : > { %4835 = vperm.xlu1 %12005, %v10337_v55  }
0x2310   : > { %4830 = vperm.xlu0 %12004, %v10336_v56  }
0x2313   : > { %4845 = vperm.xlu1 %12005, %v10339_v57  }
0x2314   : > { %4840 = vperm.xlu0 %12004, %v10338_v58  }
0x2317   : > { %5040 = vperm.xlu1 %12005, %v10361_v59  }
0x2318   : > { %5035 = vperm.xlu0 %12004, %v10360_v60  }
0x231b   : > { %5050 = vperm.xlu1 %12005, %v10363_v61   ;;  %v12293_v61 = vld [vmem:[%s15653_s4 + $0xc8] sm:$0xff]  }
0x231c   : > { %5045 = vperm.xlu0 %12004, %v10362_v62  }
0x2375   : > { %v4905_v0 = vpop.permute.xlu1 %4904 }
0x2376   : > { %v4903_v63 = vpop.permute.xlu0 %4902 }
0x2377   : > { %11512 = vmatprep.subr.bf16.mxu0 %v4903_v63 }
0x2378   : > { %11513 = vmatpush3.bf16.msra.mxu0 %v4903_v63 }
0x2379   : > { %11514 = vmatprep.subr.bf16.mxu0 %v4905_v0 }
0x237c   : > { %11515 = vmatpush3.bf16.msra.mxu0 %v4905_v0 }
0x237f   : > { %11517 = vmatmul.mubr.msk.bf16.vlgmr.msra.gmra.mrb[64].mxu0 %vm524_vm0, %v12289_v1 }
0x2380   : > { %11520 = vmatprep.mubr.msk.bf16.mxu0 %vm524_vm0, %v12290_v2 }
0x2386   : > { %v4856_v7 = vpop.permute.xlu1 %4855 }
0x2387   : > { %11521 = vmatmul.mubr.msk.bf16.gmra.mrb[68].mxu0 %vm524_vm0, %v12291_v3  ;;  %v4851_v5 = vpop.permute.xlu0 %4850 }
0x238a   : > { %v4866_v12 = vpop.permute.xlu1 %4865 }
0x238b   : > { %v4861_v11 = vpop.permute.xlu0 %4860 }
0x238e   : > { %v4836_v35 = vpop.permute.xlu1 %4835 }
0x238f   : > { %v4831_v22 = vpop.permute.xlu0 %4830 }
0x2392   : > { %v4846_v36 = vpop.permute.xlu1 %4845 }
0x2393   : > { %v4841_v27 = vpop.permute.xlu0 %4840 }
0x2396   : > { %v5041_v63 = vpop.permute.xlu1 %5040 }
0x2397   : > { %v5036_v62 = vpop.permute.xlu0 %5035 }
0x239a   : > { %v5051_v4 = vpop.permute.xlu1 %5050 }
0x239b   : > { %v5046_v0 = vpop.permute.xlu0 %5045 }
0x2452   : > { %v11518_v6 = vpop.f32.mrb[64].mxu0 }
0x2453   : > { %v4958_v8 = vpop.f32.mrb[65].mxu0  ;;  %v4967_v50 = vadd.f32 %v11518_v6, %v4841_v27 }
0x2454   : > { %v11519_v9 = vpop.f32.mrb[66].mxu0  ;;  %v4959_v42 = vadd.f32 %v4958_v8, %v4831_v22 }
0x2455   : > { %v4961_v10 = vpop.f32.mrb[67].mxu0  ;;  %v4970_v32 = vadd.f32 %v11519_v9, %v4846_v36 }
0x2456   : > { %v4962_v44 = vadd.f32 %v4961_v10, %v4836_v35  ;;  %v5118_v10 = vld [vmem:[#allocation3] sm:$0xff] }
0x245a   : > { %v11522_v13 = vpop.f32.mrb[68].mxu0 }
0x245b   : > { %v4983_v26 = vadd.f32 %v11522_v13, %v4861_v11  ;;  %v4974_v14 = vpop.f32.mrb[69].mxu0 }
0x245c   : > { %v4975_v21 = vadd.f32 %v4974_v14, %v4851_v5  ;;  %v11523_v23 = vpop.f32.mrb[70].mxu0  ;;  %v5120_v5 = vld [vmem:[#allocation3 + $0x10] sm:$0xff]  ;;  %v5121_v14 = vld [vmem:[#allocation3 + $0x18] sm:$0xff] }
0x245d   : > { %v10354_v18 = vmul.f32 -1.442695, %v4983_v26  ;;  %v4986_v20 = vadd.f32 %v11523_v23, %v4866_v12  ;;  %v4977_v17 = vpop.f32.mrb[71].mxu0 }
0x245e   : > { %v10352_v41 = vmul.f32 -1.442695, %v4975_v21  ;;  %v4978_v37 = vadd.f32 %v4977_v17, %v4856_v7 }
0x245f   : > { %12650 = vpow2.f32 %v10354_v18  ;;  %v10355_v31 = vmul.f32 -1.442695, %v4986_v20  ;;  %v5119_v18 = vld [vmem:[#allocation3 + $0x8] sm:$0xff] }
0x2460   : > { %12652 = vpow2.f32 %v10352_v41  ;;  %v10353_v33 = vmul.f32 -1.442695, %v4978_v37 }
0x2461   : > { %12654 = vpow2.f32 %v10355_v31 }
0x2462   : > { %12656 = vpow2.f32 %v10353_v33  ;;  %v12294_v33 = vld [vmem:[%s15651_s2 + $0x1a0] sm:$0xff]  }
0x2463   : > { %12658 = vtanh.f32 %v4967_v50 }
0x2464   : > { %12660 = vtanh.f32 %v4959_v42 }
0x2465   : > { %12662 = vtanh.f32 %v4970_v32 }
0x2466   : > { %12664 = vtanh.f32 %v4962_v44 }
0x2469   : > { %v12651_v40 = vpop.eup %12650 }
0x246a   : > { %v12653_v39 = vpop.eup %12652  ;;  %v5007_v51 = vadd.f32 1.0, %v12651_v40 }
0x246b   : > { %v12655_v16 = vpop.eup %12654  ;;  %v5005_v38 = vadd.f32 1.0, %v12653_v39 }
0x246c   : > { %v12657_v43 = vpop.eup %12656  ;;  %12666 = vrcp.f32 %v5007_v51  ;;  %v5008_v45 = vadd.f32 1.0, %v12655_v16 }
0x246d   : > { %12668 = vrcp.f32 %v5005_v38  ;;  %v5006_v25 = vadd.f32 1.0, %v12657_v43  ;;  %v12659_v48 = vpop.eup %12658  ;;  %v10381_v43 = vld [vmem:[%s15652_s3 + $0x368] sm:$0xff] }
0x246e   : > { %12670 = vrcp.f32 %v5008_v45  ;;  %v12661_v15 = vpop.eup %12660  ;;  %v10380_v45 = vld [vmem:[%s15652_s3 + $0x360] sm:$0xff] }
0x246f   : > { %12672 = vrcp.f32 %v5006_v25  ;;  %v12663_v29 = vpop.eup %12662 }
0x2470   : > { %v12665_v46 = vpop.eup %12664 }
0x2476   : > { %v12667_v19 = vpop.eup %12666 }
0x2477   : > { %v12669_v49 = vpop.eup %12668  ;;  %v5019_v52 = vmul.f32 %v12667_v19, %v12659_v48  ;;  %v10377_v19 = vld [vmem:[%s15652_s3 + $0x348] sm:$0xff] }
0x2478   : > { %v12671_v54 = vpop.eup %12670  ;;  %v5017_v55 = vmul.f32 %v12669_v49, %v12661_v15  ;;  %v10376_v49 = vld [vmem:[%s15652_s3 + $0x340] sm:$0xff] }
0x2479   : > { %v12673_v56 = vpop.eup %12672  ;;  %v5020_v57 = vmul.f32 %v12671_v54, %v12663_v29  ;;  %v10383_v29 = vld [vmem:[%s15652_s3 + $0x378] sm:$0xff]  ;;  %v10378_v54 = vld [vmem:[%s15652_s3 + $0x350] sm:$0xff] }
0x247a   : > { %v5018_v58 = vmul.f32 %v12673_v56, %v12665_v46  ;;  %v10382_v46 = vld [vmem:[%s15652_s3 + $0x370] sm:$0xff]  ;;  %v10400_v56 = vld [vmem:[%s15654_s5 + $0x1a0] sm:$0xff] }
0x247b   : > { %v5027_v59 = vpack.c.bf16 %v5020_v57, %v5019_v52  ;;  %v10379_v52 = vld [vmem:[%s15652_s3 + $0x358] sm:$0xff] }
0x247c   : > { %v5026_v60 = vpack.c.bf16 %v5018_v58, %v5017_v55  ;;  %v10401_v55 = vld [vmem:[%s15654_s5 + $0x1a8] sm:$0xff]  ;;  %v10403_v57 = vld [vmem:[%s15654_s5 + $0x1b8] sm:$0xff]  ;;  %v10402_v58 = vld [vmem:[%s15654_s5 + $0x1b0] sm:$0xff] }
0x247e   : > { %11524 = vmatprep.subr.bf16.mxu1 %v5026_v60 }
0x247f   : > { %11525 = vmatpush3.bf16.msra.mxu1 %v5026_v60 }
0x2480   : > { %11526 = vmatprep.subr.bf16.mxu1 %v5027_v59 }
0x2483   : > { %11527 = vmatpush3.bf16.msra.mxu1 %v5027_v59 }
0x2486   : > { %11529 = vmatmul.mubr.msk.bf16.vlgmr.msra.gmra.mrb[80].mxu1 %vm813_vm2, %v12293_v61  ;;  %v12295_v61 = vld [vmem:[%s15651_s2 + $0x1a8] sm:$0xff]  }
0x2487   : > { %11540 = vmatprep.mubr.msk.bf16.mxu1 %vm524_vm0, %v12294_v33 }
0x2559   : > { %v11530_v1 = vpop.f32.mrb[80].mxu1 }
0x255a   : > { %v5112_v2 = vadd.f32 %v11530_v1, %v5046_v0  ;;  %v5103_v3 = vpop.f32.mrb[81].mxu1  ;;  %v12298_v0 = vld [vmem:[%s15653_s4 + $0xd0] sm:$0xff]  }
0x255b   : > { %v5104_v6 = vadd.f32 %v5103_v3, %v5036_v62  ;;  %v11531_v7 = vpop.f32.mrb[82].mxu1  ;;  %v12296_v62 = vld [vmem:[%s15651_s2 + $0x1b0] sm:$0xff]   ;;  %11552 = vmatprep.mubr.msk.bf16.mxu0 %vm813_vm2, %v12298_v0 }
0x255c   : > { %v5124_v8 = vadd.f32 %v5120_v5, %v5112_v2  ;;  %v5132_v9 = vadd.f32 %v5112_v2, %v14283_v47  ;;  %v5115_v11 = vadd.f32 %v11531_v7, %v5051_v4  ;;  %v5106_v12 = vpop.f32.mrb[83].mxu1 }
0x255d   : > { %v5122_v13 = vadd.f32 %v5118_v10, %v5104_v6  ;;  %v5130_v26 = vadd.f32 %v5104_v6, %v14289_v28  ;;  %v5107_v21 = vadd.f32 %v5106_v12, %v5041_v63  ;;  %v12297_v63 = vld [vmem:[%s15651_s2 + $0x1b8] sm:$0xff]  }
0x255e   : > { %5128 = vst.msk [vmem:[#allocation3 + $0x10] sm:$0xff] %vm524_vm0, %v5124_v8  ;;  %5136 = vst.msk [vmem:[#allocation2 + $0x28] sm:$0xff] %vm524_vm0, %v5132_v9  ;;  %v5125_v23 = vadd.f32 %v5121_v14, %v5115_v11  ;;  %v5133_v22 = vadd.f32 %v5115_v11, %v14285_v24 }
0x255f   : > { %5126 = vst.msk [vmem:[#allocation3] sm:$0xff] %vm524_vm0, %v5122_v13  ;;  %5134 = vst.msk [vmem:[#allocation2 + $0x8] sm:$0xff] %vm524_vm0, %v5130_v26  ;;  %v5123_v47 = vadd.f32 %v5119_v18, %v5107_v21  ;;  %v5131_v20 = vadd.f32 %v5107_v21, %v14291_v30 }
0x2560   : > { %5129 = vst.msk [vmem:[#allocation3 + $0x18] sm:$0xff] %vm524_vm0, %v5125_v23  ;;  %5137 = vst.msk [vmem:[#allocation2 + $0x38] sm:$0xff] %vm524_vm0, %v5133_v22 }
0x2561   : > { %5127 = vst.msk [vmem:[#allocation3 + $0x8] sm:$0xff] %vm524_vm0, %v5123_v47  ;;  %5135 = vst.msk [vmem:[#allocation2 + $0x18] sm:$0xff] %vm524_vm0, %v5131_v20 }
0x2565   : > { %v14385_v28 = vld [vmem:[#allocation2 + $0x28] sm:$0xff] }
0x2566   : > { %v14391_v41 = vld [vmem:[#allocation2 + $0x8] sm:$0xff] }
0x2567   : > { %v14387_v17 = vld [vmem:[#allocation2 + $0x38] sm:$0xff] }
0x2568   : > { %v12131_v24 = vpack.i.bf16 %v14387_v17, %v14385_v28  ;;  %v14393_v37 = vld [vmem:[#allocation2 + $0x18] sm:$0xff]  ;;  %v5165_v31 = vpack.c.bf16 %v14387_v17, %v14385_v28 }
0x2569   : > { %v12126_v30 = vpack.i.bf16 %v14393_v37, %v14391_v41  ;;  %v5163_v35 = vpack.c.bf16 %v14393_v37, %v14391_v41 }
0x256a   : > { %12132 = vrot.lane.b32.xlu1 %v12131_v24, %s15694_s28 }
0x256b   : > { %12127 = vrot.lane.b32.xlu0 %v12126_v30, %s15694_s28 }
0x256e   : > { %5254 = vrot.lane.b32.xlu1 %v5163_v35, %s15695_s29 }
0x256f   : > { %5252 = vrot.lane.b32.xlu0 %v14297_v34, %s15695_s29 }
0x2572   : > { %5258 = vrot.lane.b32.xlu1 %v5165_v31, %s15695_s29 }
0x2573   : > { %5256 = vrot.lane.b32.xlu0 %v14297_v34, %s15695_s29 }
0x25dc   : > { %v12133_v27 = vpop.permute.xlu1 %12132 }
0x25dd   : > { %v12135_v50 = vunpack.i.h.bf16 %v12133_v27  ;;  %v12134_v36 = vunpack.i.l.bf16 %v12133_v27  ;;  %v12128_v42 = vpop.permute.xlu0 %12127 }
0x25de   : > { %v12130_v32 = vunpack.i.h.bf16 %v12128_v42  ;;  %v12129_v44 = vunpack.i.l.bf16 %v12128_v42 }
0x25df   : > { %v5167_v40 = vpack.c.bf16 %v12135_v50, %v12134_v36 }
0x25e0   : > { %v5166_v39 = vpack.c.bf16 %v12130_v32, %v12129_v44  ;;  %v5255_v51 = vpop.permute.xlu1 %5254 }
0x25e1   : > { %v5253_v16 = vpop.permute.xlu0 %5252  ;;  %5262 = vrot.lane.b32.xlu1 %v5167_v40, %s15695_s29 }
0x25e2   : > { %5260 = vrot.lane.b32.xlu0 %v5166_v39, %s15695_s29  ;;  %v5264_v38 = vsel %vm813_vm2, %v5253_v16, %v5255_v51 }
0x25e3   : > { %11532 = vmatprep.subr.bf16.mxu1 %v5264_v38 }
0x25e4   : > { %11533 = vmatpush3.bf16.msra.mxu1 %v5264_v38  ;;  %v5259_v25 = vpop.permute.xlu1 %5258 }
0x25e5   : > { %v5257_v48 = vpop.permute.xlu0 %5256  ;;  %5213 = vperm.xlu1 %12005, %v10381_v43  }
0x25e6   : > { %5208 = vperm.xlu0 %12004, %v10380_v45   ;;  %v5265_v15 = vsel %vm813_vm2, %v5257_v48, %v5259_v25 }
0x25e7   : > { %11534 = vmatprep.subr.bf16.mxu1 %v5265_v15 }
0x25e8   : > { %11535 = vmatpush3.bf16.msra.mxu1 %v5265_v15 }
0x25e9   : > { %5223 = vperm.xlu1 %12005, %v10383_v29  }
0x25ea   : > { %5218 = vperm.xlu0 %12004, %v10382_v46  }
0x25ed   : > { %5193 = vperm.xlu1 %12005, %v10377_v19  }
0x25ee   : > { %5188 = vperm.xlu0 %12004, %v10376_v49  }
0x25f1   : > { %5203 = vperm.xlu1 %12005, %v10379_v52  }
0x25f2   : > { %5198 = vperm.xlu0 %12004, %v10378_v54  }
0x25f5   : > { %5398 = vperm.xlu1 %12005, %v10401_v55  }
0x25f6   : > { %5393 = vperm.xlu0 %12004, %v10400_v56  }
0x25f9   : > { %5408 = vperm.xlu1 %12005, %v10403_v57   ;;  %v12299_v57 = vld [vmem:[%s15653_s4 + $0xd8] sm:$0xff]  }
0x25fa   : > { %5403 = vperm.xlu0 %12004, %v10402_v58  }
0x2653   : > { %v5263_v60 = vpop.permute.xlu1 %5262 }
0x2654   : > { %v5261_v59 = vpop.permute.xlu0 %5260 }
0x2655   : > { %11536 = vmatprep.subr.bf16.mxu1 %v5261_v59 }
0x2656   : > { %11537 = vmatpush3.bf16.msra.mxu1 %v5261_v59 }
0x2657   : > { %11538 = vmatprep.subr.bf16.mxu1 %v5263_v60 }
0x265a   : > { %11539 = vmatpush3.bf16.msra.mxu1 %v5263_v60 }
0x265d   : > { %11541 = vmatmul.mubr.msk.bf16.vlgmr.msra.gmra.mrb[84].mxu1 %vm524_vm0, %v12295_v61 }
0x265e   : > { %11544 = vmatprep.mubr.msk.bf16.mxu1 %vm524_vm0, %v12296_v62 }
0x2664   : > { %v5214_v3 = vpop.permute.xlu1 %5213 }
0x2665   : > { %11545 = vmatmul.mubr.msk.bf16.gmra.mrb[88].mxu1 %vm524_vm0, %v12297_v63  ;;  %v5209_v1 = vpop.permute.xlu0 %5208 }
0x2668   : > { %v5224_v8 = vpop.permute.xlu1 %5223 }
0x2669   : > { %v5219_v7 = vpop.permute.xlu0 %5218 }
0x266c   : > { %v5194_v47 = vpop.permute.xlu1 %5193 }
0x266d   : > { %v5189_v26 = vpop.permute.xlu0 %5188 }
0x2670   : > { %v5204_v31 = vpop.permute.xlu1 %5203 }
0x2671   : > { %v5199_v30 = vpop.permute.xlu0 %5198 }
0x2674   : > { %v5399_v59 = vpop.permute.xlu1 %5398 }
0x2675   : > { %v5394_v58 = vpop.permute.xlu0 %5393 }
0x2678   : > { %v5409_v0 = vpop.permute.xlu1 %5408 }
0x2679   : > { %v5404_v60 = vpop.permute.xlu0 %5403 }
0x2730   : > { %v11542_v2 = vpop.f32.mrb[84].mxu1 }
0x2731   : > { %v5316_v4 = vpop.f32.mrb[85].mxu1  ;;  %v5325_v35 = vadd.f32 %v11542_v2, %v5199_v30 }
0x2732   : > { %v11543_v5 = vpop.f32.mrb[86].mxu1  ;;  %v5317_v33 = vadd.f32 %v5316_v4, %v5189_v26 }
0x2733   : > { %v5319_v6 = vpop.f32.mrb[87].mxu1  ;;  %v5328_v27 = vadd.f32 %v11543_v5, %v5204_v31 }
0x2734   : > { %v5320_v50 = vadd.f32 %v5319_v6, %v5194_v47  ;;  %v5476_v6 = vld [vmem:[#allocation3] sm:$0xff] }
0x2735   : > { %v12300_v47 = vld [vmem:[%s15651_s2 + $0x1c0] sm:$0xff]  }
0x2736   : > { %11564 = vmatprep.mubr.msk.bf16.mxu1 %vm524_vm0, %v12300_v47 }
0x2738   : > { %v11546_v9 = vpop.f32.mrb[88].mxu1 }
0x2739   : > { %v5341_v10 = vadd.f32 %v11546_v9, %v5219_v7  ;;  %v5332_v11 = vpop.f32.mrb[89].mxu1 }
0x273a   : > { %v5333_v12 = vadd.f32 %v5332_v11, %v5209_v1  ;;  %v11547_v13 = vpop.f32.mrb[90].mxu1  ;;  %v5478_v1 = vld [vmem:[#allocation3 + $0x10] sm:$0xff]  ;;  %v5479_v11 = vld [vmem:[#allocation3 + $0x18] sm:$0xff] }
0x273b   : > { %v10394_v14 = vmul.f32 -1.442695, %v5341_v10  ;;  %v5344_v21 = vadd.f32 %v11547_v13, %v5224_v8  ;;  %v5335_v23 = vpop.f32.mrb[91].mxu1 }
0x273c   : > { %v10392_v22 = vmul.f32 -1.442695, %v5333_v12  ;;  %v5336_v18 = vadd.f32 %v5335_v23, %v5214_v3 }
0x273d   : > { %12674 = vpow2.f32 %v10394_v14  ;;  %v10395_v20 = vmul.f32 -1.442695, %v5344_v21  ;;  %v5477_v14 = vld [vmem:[#allocation3 + $0x8] sm:$0xff] }
0x273e   : > { %12676 = vpow2.f32 %v10392_v22  ;;  %v10393_v24 = vmul.f32 -1.442695, %v5336_v18 }
0x273f   : > { %12678 = vpow2.f32 %v10395_v20 }
0x2740   : > { %12680 = vpow2.f32 %v10393_v24 }
0x2741   : > { %12682 = vtanh.f32 %v5325_v35 }
0x2742   : > { %12684 = vtanh.f32 %v5317_v33 }
0x2743   : > { %12686 = vtanh.f32 %v5328_v27 }
0x2744   : > { %12688 = vtanh.f32 %v5320_v50 }
0x2747   : > { %v12675_v36 = vpop.eup %12674 }
0x2748   : > { %v12677_v42 = vpop.eup %12676  ;;  %v5365_v32 = vadd.f32 1.0, %v12675_v36 }
0x2749   : > { %v12679_v44 = vpop.eup %12678  ;;  %v5363_v40 = vadd.f32 1.0, %v12677_v42 }
0x274a   : > { %v12681_v39 = vpop.eup %12680  ;;  %12690 = vrcp.f32 %v5365_v32  ;;  %v5366_v51 = vadd.f32 1.0, %v12679_v44  ;;  %v10421_v32 = vld [vmem:[%s15652_s3 + $0x3a8] sm:$0xff]  ;;  %v10420_v44 = vld [vmem:[%s15652_s3 + $0x3a0] sm:$0xff] }
0x274b   : > { %12692 = vrcp.f32 %v5363_v40  ;;  %v5364_v16 = vadd.f32 1.0, %v12681_v39  ;;  %v12683_v38 = vpop.eup %12682  ;;  %v10423_v40 = vld [vmem:[%s15652_s3 + $0x3b8] sm:$0xff]  ;;  %v10422_v39 = vld [vmem:[%s15652_s3 + $0x3b0] sm:$0xff] }
0x274c   : > { %12694 = vrcp.f32 %v5366_v51  ;;  %v12685_v43 = vpop.eup %12684  ;;  %v10417_v51 = vld [vmem:[%s15652_s3 + $0x388] sm:$0xff] }
0x274d   : > { %12696 = vrcp.f32 %v5364_v16  ;;  %v12687_v45 = vpop.eup %12686  ;;  %v10416_v16 = vld [vmem:[%s15652_s3 + $0x380] sm:$0xff] }
0x274e   : > { %v12689_v25 = vpop.eup %12688 }
0x2754   : > { %v12691_v48 = vpop.eup %12690 }
0x2755   : > { %v12693_v15 = vpop.eup %12692  ;;  %v5377_v29 = vmul.f32 %v12691_v48, %v12683_v38  ;;  %v10419_v38 = vld [vmem:[%s15652_s3 + $0x398] sm:$0xff] }
0x2756   : > { %v12695_v46 = vpop.eup %12694  ;;  %v5375_v19 = vmul.f32 %v12693_v15, %v12685_v43  ;;  %v10418_v43 = vld [vmem:[%s15652_s3 + $0x390] sm:$0xff]  ;;  %v10443_v48 = vld [vmem:[%s15654_s5 + $0x1d8] sm:$0xff] }
0x2757   : > { %v12697_v49 = vpop.eup %12696  ;;  %v5378_v52 = vmul.f32 %v12695_v46, %v12687_v45  ;;  %v10441_v45 = vld [vmem:[%s15654_s5 + $0x1c8] sm:$0xff]  ;;  %v10442_v15 = vld [vmem:[%s15654_s5 + $0x1d0] sm:$0xff]  ;;  %v10460_v46 = vld [vmem:[%s15652_s3 + $0x3e0] sm:$0xff] }
0x2758   : > { %v5376_v54 = vmul.f32 %v12697_v49, %v12689_v25  ;;  %v10440_v25 = vld [vmem:[%s15654_s5 + $0x1c0] sm:$0xff]  ;;  %v10462_v49 = vld [vmem:[%s15652_s3 + $0x3f0] sm:$0xff] }
0x2759   : > { %v5385_v55 = vpack.c.bf16 %v5378_v52, %v5377_v29  ;;  %v10461_v29 = vld [vmem:[%s15652_s3 + $0x3e8] sm:$0xff] }
0x275a   : > { %v5384_v56 = vpack.c.bf16 %v5376_v54, %v5375_v19  ;;  %v10463_v19 = vld [vmem:[%s15652_s3 + $0x3f8] sm:$0xff]  ;;  %v10457_v52 = vld [vmem:[%s15652_s3 + $0x3c8] sm:$0xff]  ;;  %v10456_v54 = vld [vmem:[%s15652_s3 + $0x3c0] sm:$0xff] }
0x275c   : > { %11548 = vmatprep.subr.bf16.mxu0 %v5384_v56 }
0x275d   : > { %11549 = vmatpush3.bf16.msra.mxu0 %v5384_v56  ;;  %v10458_v56 = vld [vmem:[%s15652_s3 + $0x3d0] sm:$0xff] }
0x275e   : > { %11550 = vmatprep.subr.bf16.mxu0 %v5385_v55 }
0x2761   : > { %11551 = vmatpush3.bf16.msra.mxu0 %v5385_v55  ;;  %v10459_v55 = vld [vmem:[%s15652_s3 + $0x3d8] sm:$0xff] }
0x2764   : > { %11553 = vmatmul.mubr.msk.bf16.vlgmr.msra.gmra.mrb[72].mxu0 %vm813_vm2, %v12299_v57  ;;  %v10481_v57 = vld [vmem:[%s15654_s5 + $0x1e8] sm:$0xff] }
0x2837   : > { %v11554_v61 = vpop.f32.mrb[72].mxu0 }
0x2838   : > { %v5470_v62 = vadd.f32 %v11554_v61, %v5404_v60  ;;  %v5461_v63 = vpop.f32.mrb[73].mxu0  ;;  %v10482_v60 = vld [vmem:[%s15654_s5 + $0x1f0] sm:$0xff] }
0x2839   : > { %v5462_v2 = vadd.f32 %v5461_v63, %v5394_v58  ;;  %v11555_v3 = vpop.f32.mrb[74].mxu0  ;;  %v10480_v58 = vld [vmem:[%s15654_s5 + $0x1e0] sm:$0xff]  ;;  %v12301_v63 = vld [vmem:[%s15651_s2 + $0x1c8] sm:$0xff]  }
0x283a   : > { %v5482_v4 = vadd.f32 %v5478_v1, %v5470_v62  ;;  %v5490_v5 = vadd.f32 %v5470_v62, %v14385_v28  ;;  %v5473_v7 = vadd.f32 %v11555_v3, %v5409_v0  ;;  %v5464_v8 = vpop.f32.mrb[75].mxu0  ;;  %v12302_v0 = vld [vmem:[%s15651_s2 + $0x1d0] sm:$0xff]   ;;  %v12303_v1 = vld [vmem:[%s15651_s2 + $0x1d8] sm:$0xff]  }
0x283b   : > { %v5480_v9 = vadd.f32 %v5476_v6, %v5462_v2  ;;  %v5488_v10 = vadd.f32 %v5462_v2, %v14391_v41  ;;  %v5465_v12 = vadd.f32 %v5464_v8, %v5399_v59  ;;  %v10483_v59 = vld [vmem:[%s15654_s5 + $0x1f8] sm:$0xff]  ;;  %v12304_v2 = vld [vmem:[%s15653_s4 + $0xe0] sm:$0xff]  }
0x283c   : > { %5486 = vst.msk [vmem:[#allocation3 + $0x10] sm:$0xff] %vm524_vm0, %v5482_v4  ;;  %5494 = vst.msk [vmem:[#allocation2 + $0x28] sm:$0xff] %vm524_vm0, %v5490_v5  ;;  %v5483_v13 = vadd.f32 %v5479_v11, %v5473_v7  ;;  %v5491_v26 = vadd.f32 %v5473_v7, %v14387_v17  ;;  %11576 = vmatprep.mubr.msk.bf16.mxu0 %vm813_vm2, %v12304_v2 }
0x283d   : > { %5484 = vst.msk [vmem:[#allocation3] sm:$0xff] %vm524_vm0, %v5480_v9  ;;  %5492 = vst.msk [vmem:[#allocation2 + $0x8] sm:$0xff] %vm524_vm0, %v5488_v10  ;;  %v5481_v28 = vadd.f32 %v5477_v14, %v5465_v12  ;;  %v5489_v21 = vadd.f32 %v5465_v12, %v14393_v37 }
0x283e   : > { %5487 = vst.msk [vmem:[#allocation3 + $0x18] sm:$0xff] %vm524_vm0, %v5483_v13  ;;  %5495 = vst.msk [vmem:[#allocation2 + $0x38] sm:$0xff] %vm524_vm0, %v5491_v26 }
0x283f   : > { %5485 = vst.msk [vmem:[#allocation3 + $0x8] sm:$0xff] %vm524_vm0, %v5481_v28  ;;  %5493 = vst.msk [vmem:[#allocation2 + $0x18] sm:$0xff] %vm524_vm0, %v5489_v21 }
0x2843   : > { %v14485_v41 = vld [vmem:[#allocation2 + $0x28] sm:$0xff] }
0x2844   : > { %v14491_v22 = vld [vmem:[#allocation2 + $0x8] sm:$0xff] }
0x2845   : > { %v14487_v23 = vld [vmem:[#allocation2 + $0x38] sm:$0xff] }
0x2846   : > { %v12141_v17 = vpack.i.bf16 %v14487_v23, %v14485_v41  ;;  %v14493_v18 = vld [vmem:[#allocation2 + $0x18] sm:$0xff] }
0x2847   : > { %v12136_v37 = vpack.i.bf16 %v14493_v18, %v14491_v22 }
0x2848   : > { %12142 = vrot.lane.b32.xlu1 %v12141_v17, %s15696_s16 }
0x2849   : > { %12137 = vrot.lane.b32.xlu0 %v12136_v37, %s15696_s16 }
0x284c   : > { %5608 = vrot.lane.b32.xlu1 %v14297_v34, %s15696_s16 }
0x284d   : > { %5606 = vrot.lane.b32.xlu0 %v14297_v34, %s15696_s16 }
0x28ba   : > { %v12143_v20 = vpop.permute.xlu1 %12142 }
0x28bb   : > { %v12145_v24 = vunpack.i.h.bf16 %v12143_v20  ;;  %v12144_v30 = vunpack.i.l.bf16 %v12143_v20  ;;  %v12138_v35 = vpop.permute.xlu0 %12137 }
0x28bc   : > { %v12140_v31 = vunpack.i.h.bf16 %v12138_v35  ;;  %v12139_v33 = vunpack.i.l.bf16 %v12138_v35 }
0x28bd   : > { %v5523_v27 = vpack.c.bf16 %v12145_v24, %v12144_v30 }
0x28be   : > { %v5522_v50 = vpack.c.bf16 %v12140_v31, %v12139_v33  ;;  %v5609_v42 = vpop.permute.xlu1 %5608 }
0x28bf   : > { %5612 = vrot.lane.b32.xlu1 %v5523_v27, %s15696_s16  ;;  %v5607_v36 = vpop.permute.xlu0 %5606 }
0x28c0   : > { %5610 = vrot.lane.b32.xlu0 %v5522_v50, %s15696_s16  ;;  %11556 = vmatprep.subr.bf16.mxu1 %v5607_v36 }
0x28c1   : > { %11557 = vmatpush3.bf16.msra.mxu1 %v5607_v36 }
0x28c2   : > { %11558 = vmatprep.subr.bf16.mxu1 %v5609_v42 }
0x28c3   : > { %5569 = vperm.xlu1 %12005, %v10421_v32  }
0x28c4   : > { %5564 = vperm.xlu0 %12004, %v10420_v44  }
0x28c5   : > { %11559 = vmatpush3.bf16.msra.mxu1 %v5609_v42 }
0x28c7   : > { %5579 = vperm.xlu1 %12005, %v10423_v40  }
0x28c8   : > { %5574 = vperm.xlu0 %12004, %v10422_v39  }
0x28cb   : > { %5549 = vperm.xlu1 %12005, %v10417_v51  }
0x28cc   : > { %5544 = vperm.xlu0 %12004, %v10416_v16  }
0x28cf   : > { %5559 = vperm.xlu1 %12005, %v10419_v38  }
0x28d0   : > { %5554 = vperm.xlu0 %12004, %v10418_v43  }
0x28d3   : > { %5746 = vperm.xlu1 %12005, %v10441_v45  }
0x28d4   : > { %5741 = vperm.xlu0 %12004, %v10440_v25  }
0x28d7   : > { %5756 = vperm.xlu1 %12005, %v10443_v48  }
0x28d8   : > { %5751 = vperm.xlu0 %12004, %v10442_v15  }
0x28db   : > { %5901 = vperm.xlu1 %12005, %v10461_v29  }
0x28dc   : > { %5896 = vperm.xlu0 %12004, %v10460_v46  }
0x28df   : > { %5911 = vperm.xlu1 %12005, %v10463_v19  }
0x28e0   : > { %5906 = vperm.xlu0 %12004, %v10462_v49  }
0x28e3   : > { %5881 = vperm.xlu1 %12005, %v10457_v52  }
0x28e4   : > { %5876 = vperm.xlu0 %12004, %v10456_v54  }
0x28e7   : > { %5891 = vperm.xlu1 %12005, %v10459_v55  }
0x28e8   : > { %5886 = vperm.xlu0 %12004, %v10458_v56  }
0x28eb   : > { %6062 = vperm.xlu1 %12005, %v10481_v57  }
0x28ec   : > { %6057 = vperm.xlu0 %12004, %v10480_v58  }
0x28ef   : > { %6072 = vperm.xlu1 %12005, %v10483_v59   ;;  %v12305_v59 = vld [vmem:[%s15653_s4 + $0xe8] sm:$0xff]  }
0x28f0   : > { %6067 = vperm.xlu0 %12004, %v10482_v60   ;;  %v12306_v60 = vld [vmem:[%s15651_s2 + $0x1e0] sm:$0xff]  }
0x2931   : > { %v5613_v62 = vpop.permute.xlu1 %5612 }
0x2932   : > { %v5611_v61 = vpop.permute.xlu0 %5610 }
0x2933   : > { %11560 = vmatprep.subr.bf16.mxu1 %v5611_v61 }
0x2934   : > { %11561 = vmatpush3.bf16.msra.mxu1 %v5611_v61 }
0x2935   : > { %11562 = vmatprep.subr.bf16.mxu1 %v5613_v62 }
0x2938   : > { %11563 = vmatpush3.bf16.msra.mxu1 %v5613_v62 }
0x293b   : > { %11565 = vmatmul.mubr.msk.bf16.vlgmr.msra.gmra.mrb[92].mxu1 %vm524_vm0, %v12301_v63 }
0x293c   : > { %11568 = vmatprep.mubr.msk.bf16.mxu1 %vm524_vm0, %v12302_v0 }
0x2942   : > { %v5570_v5 = vpop.permute.xlu1 %5569 }
0x2943   : > { %11569 = vmatmul.mubr.msk.bf16.gmra.mrb[96].mxu1 %vm524_vm0, %v12303_v1  ;;  %v5565_v3 = vpop.permute.xlu0 %5564 }
0x2946   : > { %v5580_v10 = vpop.permute.xlu1 %5579 }
0x2947   : > { %v5575_v9 = vpop.permute.xlu0 %5574 }
0x294a   : > { %v5550_v24 = vpop.permute.xlu1 %5549 }
0x294b   : > { %v5545_v28 = vpop.permute.xlu0 %5544 }
0x294e   : > { %v5560_v27 = vpop.permute.xlu1 %5559 }
0x294f   : > { %v5555_v31 = vpop.permute.xlu0 %5554 }
0x2952   : > { %v5747_v62 = vpop.permute.xlu1 %5746 }
0x2953   : > { %v5742_v61 = vpop.permute.xlu0 %5741 }
0x2957   : > { %v5752_v63 = vpop.permute.xlu0 %5751 }
0x2a0e   : > { %v11566_v4 = vpop.f32.mrb[92].mxu1 }
0x2a0f   : > { %v5664_v6 = vpop.f32.mrb[93].mxu1  ;;  %v5673_v33 = vadd.f32 %v11566_v4, %v5555_v31  ;;  %v5826_v4 = vld [vmem:[#allocation3 + $0x10] sm:$0xff]  ;;  %v12309_v31 = vld [vmem:[%s15651_s2 + $0x1f8] sm:$0xff]  }
0x2a10   : > { %v11567_v7 = vpop.f32.mrb[94].mxu1  ;;  %v5665_v50 = vadd.f32 %v5664_v6, %v5545_v28 }
0x2a11   : > { %v5667_v8 = vpop.f32.mrb[95].mxu1  ;;  %v5676_v36 = vadd.f32 %v11567_v7, %v5560_v27  ;;  %v5897_v27 = vpop.permute.xlu0 %5896 }
0x2a12   : > { %v5668_v42 = vadd.f32 %v5667_v8, %v5550_v24 }
0x2a16   : > { %v11570_v11 = vpop.f32.mrb[96].mxu1 }
0x2a17   : > { %v5689_v12 = vadd.f32 %v11570_v11, %v5575_v9  ;;  %v5680_v13 = vpop.f32.mrb[97].mxu1  ;;  %v5824_v9 = vld [vmem:[#allocation3] sm:$0xff] }
0x2a18   : > { %v5681_v26 = vadd.f32 %v5680_v13, %v5565_v3  ;;  %v11571_v14 = vpop.f32.mrb[98].mxu1  ;;  %v5757_v3 = vpop.permute.xlu1 %5756 }
0x2a19   : > { %v10434_v21 = vmul.f32 -1.442695, %v5689_v12  ;;  %v5692_v17 = vadd.f32 %v11571_v14, %v5580_v10  ;;  %v5683_v37 = vpop.f32.mrb[99].mxu1 }
0x2a1a   : > { %v10432_v47 = vmul.f32 -1.442695, %v5681_v26  ;;  %v5684_v20 = vadd.f32 %v5683_v37, %v5570_v5  ;;  %v5827_v26 = vld [vmem:[#allocation3 + $0x18] sm:$0xff] }
0x2a1b   : > { %12698 = vpow2.f32 %v10434_v21  ;;  %v10435_v30 = vmul.f32 -1.442695, %v5692_v17  ;;  %v5825_v17 = vld [vmem:[#allocation3 + $0x8] sm:$0xff] }
0x2a1c   : > { %12700 = vpow2.f32 %v10432_v47  ;;  %v10433_v35 = vmul.f32 -1.442695, %v5684_v20 }
0x2a1d   : > { %12702 = vpow2.f32 %v10435_v30  ;;  %v12307_v30 = vld [vmem:[%s15651_s2 + $0x1e8] sm:$0xff]  }
0x2a1e   : > { %12704 = vpow2.f32 %v10433_v35  ;;  %v12308_v35 = vld [vmem:[%s15651_s2 + $0x1f0] sm:$0xff]  }
0x2a1f   : > { %12706 = vtanh.f32 %v5673_v33  ;;  %v12310_v33 = vld [vmem:[%s15653_s4 + $0xf0] sm:$0xff]  }
0x2a20   : > { %12708 = vtanh.f32 %v5665_v50  ;;  %11600 = vmatprep.mubr.msk.bf16.mxu1 %vm813_vm2, %v12310_v33 }
0x2a21   : > { %12710 = vtanh.f32 %v5676_v36  ;;  %v5902_v36 = vpop.permute.xlu1 %5901 }
0x2a22   : > { %12712 = vtanh.f32 %v5668_v42 }
0x2a25   : > { %v12699_v32 = vpop.eup %12698 }
0x2a26   : > { %v12701_v44 = vpop.eup %12700  ;;  %v5713_v40 = vadd.f32 1.0, %v12699_v32 }
0x2a27   : > { %v12703_v39 = vpop.eup %12702  ;;  %v5711_v51 = vadd.f32 1.0, %v12701_v44 }
0x2a28   : > { %v12705_v16 = vpop.eup %12704  ;;  %12714 = vrcp.f32 %v5713_v40  ;;  %v5714_v38 = vadd.f32 1.0, %v12703_v39  ;;  %v5907_v40 = vpop.permute.xlu0 %5906 }
0x2a29   : > { %12716 = vrcp.f32 %v5711_v51  ;;  %v5712_v43 = vadd.f32 1.0, %v12705_v16  ;;  %v12707_v45 = vpop.eup %12706  ;;  %v5912_v39 = vpop.permute.xlu1 %5911 }
0x2a2a   : > { %12718 = vrcp.f32 %v5714_v38  ;;  %v12709_v25 = vpop.eup %12708 }
0x2a2b   : > { %12720 = vrcp.f32 %v5712_v43  ;;  %v12711_v48 = vpop.eup %12710 }
0x2a2c   : > { %v12713_v15 = vpop.eup %12712 }
0x2a32   : > { %v12715_v29 = vpop.eup %12714 }
0x2a33   : > { %v12717_v46 = vpop.eup %12716  ;;  %v5725_v19 = vmul.f32 %v12715_v29, %v12707_v45 }
0x2a34   : > { %v12719_v49 = vpop.eup %12718  ;;  %v5723_v52 = vmul.f32 %v12717_v46, %v12709_v25  ;;  %v5877_v25 = vpop.permute.xlu0 %5876 }
0x2a35   : > { %v12721_v54 = vpop.eup %12720  ;;  %v5726_v55 = vmul.f32 %v12719_v49, %v12711_v48  ;;  %v5882_v49 = vpop.permute.xlu1 %5881 }
0x2a36   : > { %v5724_v56 = vmul.f32 %v12721_v54, %v12713_v15 }
0x2a37   : > { %v5733_v57 = vpack.c.bf16 %v5726_v55, %v5725_v19 }
0x2a38   : > { %v5732_v58 = vpack.c.bf16 %v5724_v56, %v5723_v52  ;;  %v5887_v55 = vpop.permute.xlu0 %5886 }
0x2a3a   : > { %11572 = vmatprep.subr.bf16.mxu0 %v5732_v58 }
0x2a3b   : > { %11573 = vmatpush3.bf16.msra.mxu0 %v5732_v58 }
0x2a3c   : > { %11574 = vmatprep.subr.bf16.mxu0 %v5733_v57 }
0x2a3f   : > { %11575 = vmatpush3.bf16.msra.mxu0 %v5733_v57  ;;  %v5892_v57 = vpop.permute.xlu1 %5891 }
0x2a40   : > { %11580 = vmatprep.subr.bf16.mxu0 %v14297_v34 }
0x2a42   : > { %11577 = vmatmul.mubr.msk.bf16.vlgmr.msra.gmra.mrb[76].mxu0 %vm813_vm2, %v12305_v59 }
0x2a43   : > { %11581 = vmatpush3.bf16.msra.mxu0 %v14297_v34  ;;  %11588 = vmatprep.mubr.msk.bf16.mxu0 %vm524_vm0, %v12306_v60 }
0x2a44   : > { %11582 = vmatprep.subr.bf16.mxu0 %v14297_v34 }
0x2a47   : > { %11583 = vmatpush3.bf16.msra.mxu0 %v14297_v34 }
0x2b15   : > { %v11578_v0 = vpop.f32.mrb[76].mxu0 }
0x2b16   : > { %v5818_v1 = vadd.f32 %v11578_v0, %v5752_v63  ;;  %v5809_v2 = vpop.f32.mrb[77].mxu0 }
0x2b17   : > { %v5810_v5 = vadd.f32 %v5809_v2, %v5742_v61  ;;  %v11579_v6 = vpop.f32.mrb[78].mxu0 }
0x2b18   : > { %v5830_v7 = vadd.f32 %v5826_v4, %v5818_v1  ;;  %v5838_v8 = vadd.f32 %v5818_v1, %v14485_v41  ;;  %v5821_v10 = vadd.f32 %v11579_v6, %v5757_v3  ;;  %v5812_v11 = vpop.f32.mrb[79].mxu0 }
0x2b19   : > { %v5828_v12 = vadd.f32 %v5824_v9, %v5810_v5  ;;  %v5836_v13 = vadd.f32 %v5810_v5, %v14491_v22  ;;  %v5813_v14 = vadd.f32 %v5812_v11, %v5747_v62 }
0x2b1a   : > { %5834 = vst.msk [vmem:[#allocation3 + $0x10] sm:$0xff] %vm524_vm0, %v5830_v7  ;;  %5842 = vst.msk [vmem:[#allocation2 + $0x28] sm:$0xff] %vm524_vm0, %v5838_v8  ;;  %v5831_v28 = vadd.f32 %v5827_v26, %v5821_v10  ;;  %v5839_v21 = vadd.f32 %v5821_v10, %v14487_v23 }
0x2b1b   : > { %5832 = vst.msk [vmem:[#allocation3] sm:$0xff] %vm524_vm0, %v5828_v12  ;;  %5840 = vst.msk [vmem:[#allocation2 + $0x8] sm:$0xff] %vm524_vm0, %v5836_v13  ;;  %v5829_v41 = vadd.f32 %v5825_v17, %v5813_v14  ;;  %v5837_v37 = vadd.f32 %v5813_v14, %v14493_v18 }
0x2b1c   : > { %5835 = vst.msk [vmem:[#allocation3 + $0x18] sm:$0xff] %vm524_vm0, %v5831_v28  ;;  %5843 = vst.msk [vmem:[#allocation2 + $0x38] sm:$0xff] %vm524_vm0, %v5839_v21 }
0x2b1d   : > { %5833 = vst.msk [vmem:[#allocation3 + $0x8] sm:$0xff] %vm524_vm0, %v5829_v41  ;;  %5841 = vst.msk [vmem:[#allocation2 + $0x18] sm:$0xff] %vm524_vm0, %v5837_v37  ;;  %v12311_v41 = vld [vmem:[%s15653_s4 + $0xf8] sm:$0xff]   ;;  %v6058_v37 = vpop.permute.xlu0 %6057 }
0x2b21   : > { %v14629_v24 = vld [vmem:[#allocation2 + $0x28] sm:$0xff] }
0x2b22   : > { %v14621_v22 = vld [vmem:[#allocation2 + $0x8] sm:$0xff] }
0x2b23   : > { %v14625_v23 = vld [vmem:[#allocation2 + $0x38] sm:$0xff] }
0x2b24   : > { %v14623_v47 = vld [vmem:[#allocation2 + $0x18] sm:$0xff]  ;;  %v5855_v18 = vpack.c.bf16 %v14625_v23, %v14629_v24 }
0x2b25   : > { %v5854_v20 = vpack.c.bf16 %v14623_v47, %v14621_v22 }
0x2b27   : > { %11584 = vmatprep.subr.bf16.mxu0 %v5854_v20 }
0x2b28   : > { %11585 = vmatpush3.bf16.msra.mxu0 %v5854_v20  ;;  %v6063_v20 = vpop.permute.xlu1 %6062 }
0x2b29   : > { %11586 = vmatprep.subr.bf16.mxu0 %v5855_v18 }
0x2b2c   : > { %11587 = vmatpush3.bf16.msra.mxu0 %v5855_v18  ;;  %v6068_v18 = vpop.permute.xlu0 %6067  ;;  %v6073_v33 = vpop.permute.xlu1 %6072 }
0x2b2f   : > { %11589 = vmatmul.mubr.msk.bf16.vlgmr.msra.gmra.mrb[80].mxu0 %vm524_vm0, %v12307_v30 }
0x2b30   : > { %11592 = vmatprep.mubr.msk.bf16.mxu0 %vm524_vm0, %v12308_v35 }
0x2b37   : > { %11593 = vmatmul.mubr.msk.bf16.gmra.mrb[84].mxu0 %vm524_vm0, %v12309_v31 }
0x2c02   : > { %v11590_v50 = vpop.f32.mrb[80].mxu0 }
0x2c03   : > { %v5980_v42 = vpop.f32.mrb[81].mxu0  ;;  %v5989_v56 = vadd.f32 %v11590_v50, %v5887_v55 }
0x2c04   : > { %v11591_v32 = vpop.f32.mrb[82].mxu0  ;;  %v5981_v58 = vadd.f32 %v5980_v42, %v5877_v25 }
0x2c05   : > { %v5983_v44 = vpop.f32.mrb[83].mxu0  ;;  %v5992_v59 = vadd.f32 %v11591_v32, %v5892_v57 }
0x2c06   : > { %v5984_v60 = vadd.f32 %v5983_v44, %v5882_v49  ;;  %v6140_v44 = vld [vmem:[#allocation3] sm:$0xff] }
0x2c0a   : > { %v11594_v51 = vpop.f32.mrb[84].mxu0 }
0x2c0b   : > { %v6005_v16 = vadd.f32 %v11594_v51, %v5907_v40  ;;  %v5996_v38 = vpop.f32.mrb[85].mxu0 }
0x2c0c   : > { %v5997_v43 = vadd.f32 %v5996_v38, %v5897_v27  ;;  %v11595_v45 = vpop.f32.mrb[86].mxu0  ;;  %v6142_v27 = vld [vmem:[#allocation3 + $0x10] sm:$0xff]  ;;  %v6143_v38 = vld [vmem:[#allocation3 + $0x18] sm:$0xff] }
0x2c0d   : > { %v10474_v48 = vmul.f32 -1.442695, %v6005_v16  ;;  %v6008_v15 = vadd.f32 %v11595_v45, %v5912_v39  ;;  %v5999_v29 = vpop.f32.mrb[87].mxu0 }
0x2c0e   : > { %v10472_v46 = vmul.f32 -1.442695, %v5997_v43  ;;  %v6000_v19 = vadd.f32 %v5999_v29, %v5902_v36 }
0x2c0f   : > { %12722 = vpow2.f32 %v10474_v48  ;;  %v10475_v52 = vmul.f32 -1.442695, %v6008_v15  ;;  %v6141_v48 = vld [vmem:[#allocation3 + $0x8] sm:$0xff] }
0x2c10   : > { %12724 = vpow2.f32 %v10472_v46  ;;  %v10473_v54 = vmul.f32 -1.442695, %v6000_v19 }
0x2c11   : > { %12726 = vpow2.f32 %v10475_v52 }
0x2c12   : > { %12728 = vpow2.f32 %v10473_v54  ;;  %v12312_v54 = vld [vmem:[%s15651_s2 + $0x200] sm:$0xff]  }
0x2c13   : > { %12730 = vtanh.f32 %v5989_v56  ;;  %11612 = vmatprep.mubr.msk.bf16.mxu0 %vm524_vm0, %v12312_v54 }
0x2c14   : > { %12732 = vtanh.f32 %v5981_v58 }
0x2c15   : > { %12734 = vtanh.f32 %v5992_v59 }
0x2c16   : > { %12736 = vtanh.f32 %v5984_v60 }
0x2c19   : > { %v12723_v61 = vpop.eup %12722 }
0x2c1a   : > { %v12725_v62 = vpop.eup %12724  ;;  %v6029_v63 = vadd.f32 1.0, %v12723_v61 }
0x2c1b   : > { %v12727_v0 = vpop.eup %12726  ;;  %v6027_v1 = vadd.f32 1.0, %v12725_v62 }
0x2c1c   : > { %v12729_v2 = vpop.eup %12728  ;;  %12738 = vrcp.f32 %v6029_v63  ;;  %v6030_v3 = vadd.f32 1.0, %v12727_v0 }
0x2c1d   : > { %12740 = vrcp.f32 %v6027_v1  ;;  %v6028_v4 = vadd.f32 1.0, %v12729_v2  ;;  %v12731_v5 = vpop.eup %12730  ;;  %v10501_v2 = vld [vmem:[%s15652_s3 + $0x428] sm:$0xff] }
0x2c1e   : > { %12742 = vrcp.f32 %v6030_v3  ;;  %v12733_v6 = vpop.eup %12732  ;;  %v10500_v3 = vld [vmem:[%s15652_s3 + $0x420] sm:$0xff] }
0x2c1f   : > { %12744 = vrcp.f32 %v6028_v4  ;;  %v12735_v7 = vpop.eup %12734 }
0x2c20   : > { %v12737_v8 = vpop.eup %12736 }
0x2c26   : > { %v12739_v9 = vpop.eup %12738 }
0x2c27   : > { %v12741_v10 = vpop.eup %12740  ;;  %v6041_v11 = vmul.f32 %v12739_v9, %v12731_v5  ;;  %v10497_v9 = vld [vmem:[%s15652_s3 + $0x408] sm:$0xff] }
0x2c28   : > { %v12743_v12 = vpop.eup %12742  ;;  %v6039_v13 = vmul.f32 %v12741_v10, %v12733_v6  ;;  %v10496_v10 = vld [vmem:[%s15652_s3 + $0x400] sm:$0xff] }
0x2c29   : > { %v12745_v26 = vpop.eup %12744  ;;  %v6042_v14 = vmul.f32 %v12743_v12, %v12735_v7  ;;  %v10503_v7 = vld [vmem:[%s15652_s3 + $0x438] sm:$0xff]  ;;  %v10498_v12 = vld [vmem:[%s15652_s3 + $0x410] sm:$0xff] }
0x2c2a   : > { %v6040_v28 = vmul.f32 %v12745_v26, %v12737_v8  ;;  %v10502_v8 = vld [vmem:[%s15652_s3 + $0x430] sm:$0xff]  ;;  %v10520_v26 = vld [vmem:[%s15654_s5 + $0x200] sm:$0xff] }
0x2c2b   : > { %v6049_v21 = vpack.c.bf16 %v6042_v14, %v6041_v11  ;;  %v10499_v11 = vld [vmem:[%s15652_s3 + $0x418] sm:$0xff] }
0x2c2c   : > { %v6048_v17 = vpack.c.bf16 %v6040_v28, %v6039_v13  ;;  %v10521_v13 = vld [vmem:[%s15654_s5 + $0x208] sm:$0xff]  ;;  %v10523_v14 = vld [vmem:[%s15654_s5 + $0x218] sm:$0xff]  ;;  %v10522_v28 = vld [vmem:[%s15654_s5 + $0x210] sm:$0xff] }
0x2c2e   : > { %11596 = vmatprep.subr.bf16.mxu1 %v6048_v17 }
0x2c2f   : > { %11597 = vmatpush3.bf16.msra.mxu1 %v6048_v17 }
0x2c30   : > { %11598 = vmatprep.subr.bf16.mxu1 %v6049_v21 }
0x2c33   : > { %11599 = vmatpush3.bf16.msra.mxu1 %v6049_v21 }
0x2c36   : > { %11601 = vmatmul.mubr.msk.bf16.vlgmr.msra.gmra.mrb[100].mxu1 %vm813_vm2, %v12311_v41  ;;  %v12313_v41 = vld [vmem:[%s15651_s2 + $0x208] sm:$0xff]  }
0x2d09   : > { %v11602_v30 = vpop.f32.mrb[100].mxu1 }
0x2d0a   : > { %v6134_v35 = vadd.f32 %v11602_v30, %v6068_v18  ;;  %v6125_v31 = vpop.f32.mrb[101].mxu1  ;;  %v12316_v18 = vld [vmem:[%s15653_s4 + $0x100] sm:$0xff]  }
0x2d0b   : > { %v6126_v50 = vadd.f32 %v6125_v31, %v6058_v37  ;;  %v11603_v36 = vpop.f32.mrb[102].mxu1  ;;  %v12314_v37 = vld [vmem:[%s15651_s2 + $0x210] sm:$0xff]   ;;  %11624 = vmatprep.mubr.msk.bf16.mxu1 %vm813_vm2, %v12316_v18 }
0x2d0c   : > { %v6146_v42 = vadd.f32 %v6142_v27, %v6134_v35  ;;  %v6154_v32 = vadd.f32 %v6134_v35, %v14629_v24  ;;  %v6137_v40 = vadd.f32 %v11603_v36, %v6073_v33  ;;  %v6128_v39 = vpop.f32.mrb[103].mxu1 }
0x2d0d   : > { %v6144_v51 = vadd.f32 %v6140_v44, %v6126_v50  ;;  %v6152_v16 = vadd.f32 %v6126_v50, %v14621_v22  ;;  %v6129_v43 = vadd.f32 %v6128_v39, %v6063_v20  ;;  %v12315_v20 = vld [vmem:[%s15651_s2 + $0x218] sm:$0xff]  }
0x2d0e   : > { %6150 = vst.msk [vmem:[#allocation3 + $0x10] sm:$0xff] %vm524_vm0, %v6146_v42  ;;  %6158 = vst.msk [vmem:[#allocation2 + $0x28] sm:$0xff] %vm524_vm0, %v6154_v32  ;;  %v6147_v45 = vadd.f32 %v6143_v38, %v6137_v40  ;;  %v6155_v25 = vadd.f32 %v6137_v40, %v14625_v23 }
0x2d0f   : > { %6148 = vst.msk [vmem:[#allocation3] sm:$0xff] %vm524_vm0, %v6144_v51  ;;  %6156 = vst.msk [vmem:[#allocation2 + $0x8] sm:$0xff] %vm524_vm0, %v6152_v16  ;;  %v6145_v24 = vadd.f32 %v6141_v48, %v6129_v43  ;;  %v6153_v15 = vadd.f32 %v6129_v43, %v14623_v47 }
0x2d10   : > { %6151 = vst.msk [vmem:[#allocation3 + $0x18] sm:$0xff] %vm524_vm0, %v6147_v45  ;;  %6159 = vst.msk [vmem:[#allocation2 + $0x38] sm:$0xff] %vm524_vm0, %v6155_v25 }
0x2d11   : > { %6149 = vst.msk [vmem:[#allocation3 + $0x8] sm:$0xff] %vm524_vm0, %v6145_v24  ;;  %6157 = vst.msk [vmem:[#allocation2 + $0x18] sm:$0xff] %vm524_vm0, %v6153_v15 }
0x2d15   : > { %v14665_v22 = vld [vmem:[#allocation2 + $0x28] sm:$0xff] }
0x2d16   : > { %v14671_v46 = vld [vmem:[#allocation2 + $0x8] sm:$0xff] }
0x2d17   : > { %v14667_v29 = vld [vmem:[#allocation2 + $0x38] sm:$0xff] }
0x2d18   : > { %v12151_v23 = vpack.i.bf16 %v14667_v29, %v14665_v22  ;;  %v14673_v19 = vld [vmem:[#allocation2 + $0x18] sm:$0xff]  ;;  %v6187_v52 = vpack.c.bf16 %v14667_v29, %v14665_v22 }
0x2d19   : > { %v12146_v47 = vpack.i.bf16 %v14673_v19, %v14671_v46  ;;  %v6185_v49 = vpack.c.bf16 %v14673_v19, %v14671_v46 }
0x2d1a   : > { %12152 = vrot.lane.b32.xlu1 %v12151_v23, %s15697_s18 }
0x2d1b   : > { %12147 = vrot.lane.b32.xlu0 %v12146_v47, %s15697_s18 }
0x2d1e   : > { %6276 = vrot.lane.b32.xlu1 %v6185_v49, %s15698_s19 }
0x2d1f   : > { %6274 = vrot.lane.b32.xlu0 %v14297_v34, %s15698_s19 }
0x2d22   : > { %6280 = vrot.lane.b32.xlu1 %v6187_v52, %s15698_s19 }
0x2d23   : > { %6278 = vrot.lane.b32.xlu0 %v14297_v34, %s15698_s19 }
0x2d8c   : > { %v12153_v55 = vpop.permute.xlu1 %12152 }
0x2d8d   : > { %v12155_v56 = vunpack.i.h.bf16 %v12153_v55  ;;  %v12154_v57 = vunpack.i.l.bf16 %v12153_v55  ;;  %v12148_v58 = vpop.permute.xlu0 %12147 }
0x2d8e   : > { %v12150_v59 = vunpack.i.h.bf16 %v12148_v58  ;;  %v12149_v60 = vunpack.i.l.bf16 %v12148_v58 }
0x2d8f   : > { %v6189_v61 = vpack.c.bf16 %v12155_v56, %v12154_v57 }
0x2d90   : > { %v6188_v62 = vpack.c.bf16 %v12150_v59, %v12149_v60  ;;  %v6277_v63 = vpop.permute.xlu1 %6276 }
0x2d91   : > { %v6275_v0 = vpop.permute.xlu0 %6274  ;;  %6284 = vrot.lane.b32.xlu1 %v6189_v61, %s15698_s19 }
0x2d92   : > { %6282 = vrot.lane.b32.xlu0 %v6188_v62, %s15698_s19  ;;  %v6286_v1 = vsel %vm657_vm1, %v6275_v0, %v6277_v63 }
0x2d93   : > { %11604 = vmatprep.subr.bf16.mxu0 %v6286_v1 }
0x2d94   : > { %11605 = vmatpush3.bf16.msra.mxu0 %v6286_v1  ;;  %v6281_v4 = vpop.permute.xlu1 %6280 }
0x2d95   : > { %v6279_v5 = vpop.permute.xlu0 %6278  ;;  %6235 = vperm.xlu1 %12005, %v10501_v2  }
0x2d96   : > { %6230 = vperm.xlu0 %12004, %v10500_v3   ;;  %v6287_v6 = vsel %vm657_vm1, %v6279_v5, %v6281_v4 }
0x2d97   : > { %11606 = vmatprep.subr.bf16.mxu0 %v6287_v6 }
0x2d98   : > { %11607 = vmatpush3.bf16.msra.mxu0 %v6287_v6 }
0x2d99   : > { %6245 = vperm.xlu1 %12005, %v10503_v7  }
0x2d9a   : > { %6240 = vperm.xlu0 %12004, %v10502_v8  }
0x2d9d   : > { %6215 = vperm.xlu1 %12005, %v10497_v9  }
0x2d9e   : > { %6210 = vperm.xlu0 %12004, %v10496_v10  }
0x2da1   : > { %6225 = vperm.xlu1 %12005, %v10499_v11  }
0x2da2   : > { %6220 = vperm.xlu0 %12004, %v10498_v12  }
0x2da5   : > { %6420 = vperm.xlu1 %12005, %v10521_v13  }
0x2da6   : > { %6415 = vperm.xlu0 %12004, %v10520_v26  }
0x2da9   : > { %6430 = vperm.xlu1 %12005, %v10523_v14   ;;  %v12317_v14 = vld [vmem:[%s15653_s4 + $0x108] sm:$0xff]  }
0x2daa   : > { %6425 = vperm.xlu0 %12004, %v10522_v28  }
0x2e03   : > { %v6285_v17 = vpop.permute.xlu1 %6284 }
0x2e04   : > { %v6283_v21 = vpop.permute.xlu0 %6282 }
0x2e05   : > { %11608 = vmatprep.subr.bf16.mxu0 %v6283_v21 }
0x2e06   : > { %11609 = vmatpush3.bf16.msra.mxu0 %v6283_v21 }
0x2e07   : > { %11610 = vmatprep.subr.bf16.mxu0 %v6285_v17 }
0x2e0a   : > { %11611 = vmatpush3.bf16.msra.mxu0 %v6285_v17 }
0x2e0d   : > { %11613 = vmatmul.mubr.msk.bf16.vlgmr.msra.gmra.mrb[88].mxu0 %vm524_vm0, %v12313_v41 }
0x2e0e   : > { %11616 = vmatprep.mubr.msk.bf16.mxu0 %vm524_vm0, %v12314_v37 }
0x2e14   : > { %v6236_v31 = vpop.permute.xlu1 %6235 }
0x2e15   : > { %11617 = vmatmul.mubr.msk.bf16.gmra.mrb[92].mxu0 %vm524_vm0, %v12315_v20  ;;  %v6231_v30 = vpop.permute.xlu0 %6230 }
0x2e18   : > { %v6246_v42 = vpop.permute.xlu1 %6245 }
0x2e19   : > { %v6241_v36 = vpop.permute.xlu0 %6240 }
0x2e1c   : > { %v6216_v24 = vpop.permute.xlu1 %6215 }
0x2e1d   : > { %v6211_v16 = vpop.permute.xlu0 %6210 }
0x2e20   : > { %v6226_v52 = vpop.permute.xlu1 %6225 }
0x2e21   : > { %v6221_v47 = vpop.permute.xlu0 %6220 }
0x2e24   : > { %v6421_v21 = vpop.permute.xlu1 %6420 }
0x2e25   : > { %v6416_v28 = vpop.permute.xlu0 %6415 }
0x2e28   : > { %v6431_v18 = vpop.permute.xlu1 %6430 }
0x2e29   : > { %v6426_v17 = vpop.permute.xlu0 %6425 }
0x2ee0   : > { %v11614_v35 = vpop.f32.mrb[88].mxu0 }
0x2ee1   : > { %v6338_v33 = vpop.f32.mrb[89].mxu0  ;;  %v6347_v49 = vadd.f32 %v11614_v35, %v6221_v47 }
0x2ee2   : > { %v11615_v27 = vpop.f32.mrb[90].mxu0  ;;  %v6339_v54 = vadd.f32 %v6338_v33, %v6211_v16 }
0x2ee3   : > { %v6341_v50 = vpop.f32.mrb[91].mxu0  ;;  %v6350_v55 = vadd.f32 %v11615_v27, %v6226_v52 }
0x2ee4   : > { %v6342_v56 = vadd.f32 %v6341_v50, %v6216_v24  ;;  %v6498_v50 = vld [vmem:[#allocation3] sm:$0xff] }
0x2ee8   : > { %v11618_v32 = vpop.f32.mrb[92].mxu0 }
0x2ee9   : > { %v6363_v44 = vadd.f32 %v11618_v32, %v6241_v36  ;;  %v6354_v40 = vpop.f32.mrb[93].mxu0 }
0x2eea   : > { %v6355_v39 = vadd.f32 %v6354_v40, %v6231_v30  ;;  %v11619_v51 = vpop.f32.mrb[94].mxu0  ;;  %v6500_v30 = vld [vmem:[#allocation3 + $0x10] sm:$0xff]  ;;  %v6501_v40 = vld [vmem:[#allocation3 + $0x18] sm:$0xff] }
0x2eeb   : > { %v10514_v38 = vmul.f32 -1.442695, %v6363_v44  ;;  %v6366_v43 = vadd.f32 %v11619_v51, %v6246_v42  ;;  %v6357_v45 = vpop.f32.mrb[95].mxu0 }
0x2eec   : > { %v10512_v25 = vmul.f32 -1.442695, %v6355_v39  ;;  %v6358_v48 = vadd.f32 %v6357_v45, %v6236_v31 }
0x2eed   : > { %12746 = vpow2.f32 %v10514_v38  ;;  %v10515_v15 = vmul.f32 -1.442695, %v6366_v43  ;;  %v6499_v38 = vld [vmem:[#allocation3 + $0x8] sm:$0xff] }
0x2eee   : > { %12748 = vpow2.f32 %v10512_v25  ;;  %v10513_v23 = vmul.f32 -1.442695, %v6358_v48 }
0x2eef   : > { %12750 = vpow2.f32 %v10515_v15 }
0x2ef0   : > { %12752 = vpow2.f32 %v10513_v23  ;;  %v12318_v23 = vld [vmem:[%s15651_s2 + $0x220] sm:$0xff]  }
0x2ef1   : > { %12754 = vtanh.f32 %v6347_v49 }
0x2ef2   : > { %12756 = vtanh.f32 %v6339_v54 }
0x2ef3   : > { %12758 = vtanh.f32 %v6350_v55 }
0x2ef4   : > { %12760 = vtanh.f32 %v6342_v56 }
0x2ef7   : > { %v12747_v57 = vpop.eup %12746 }
0x2ef8   : > { %v12749_v58 = vpop.eup %12748  ;;  %v6387_v59 = vadd.f32 1.0, %v12747_v57 }
0x2ef9   : > { %v12751_v60 = vpop.eup %12750  ;;  %v6385_v61 = vadd.f32 1.0, %v12749_v58 }
0x2efa   : > { %v12753_v62 = vpop.eup %12752  ;;  %12762 = vrcp.f32 %v6387_v59  ;;  %v6388_v63 = vadd.f32 1.0, %v12751_v60 }
0x2efb   : > { %12764 = vrcp.f32 %v6385_v61  ;;  %v6386_v0 = vadd.f32 1.0, %v12753_v62  ;;  %v12755_v1 = vpop.eup %12754  ;;  %v10541_v62 = vld [vmem:[%s15652_s3 + $0x468] sm:$0xff] }
0x2efc   : > { %12766 = vrcp.f32 %v6388_v63  ;;  %v12757_v2 = vpop.eup %12756  ;;  %v10540_v63 = vld [vmem:[%s15652_s3 + $0x460] sm:$0xff] }
0x2efd   : > { %12768 = vrcp.f32 %v6386_v0  ;;  %v12759_v3 = vpop.eup %12758 }
0x2efe   : > { %v12761_v4 = vpop.eup %12760 }
0x2f04   : > { %v12763_v5 = vpop.eup %12762 }
0x2f05   : > { %v12765_v6 = vpop.eup %12764  ;;  %v6399_v7 = vmul.f32 %v12763_v5, %v12755_v1  ;;  %v10537_v5 = vld [vmem:[%s15652_s3 + $0x448] sm:$0xff] }
0x2f06   : > { %v12767_v8 = vpop.eup %12766  ;;  %v6397_v9 = vmul.f32 %v12765_v6, %v12757_v2  ;;  %v10536_v6 = vld [vmem:[%s15652_s3 + $0x440] sm:$0xff] }
0x2f07   : > { %v12769_v10 = vpop.eup %12768  ;;  %v6400_v11 = vmul.f32 %v12767_v8, %v12759_v3  ;;  %v10543_v3 = vld [vmem:[%s15652_s3 + $0x478] sm:$0xff]  ;;  %v10538_v8 = vld [vmem:[%s15652_s3 + $0x450] sm:$0xff] }
0x2f08   : > { %v6398_v12 = vmul.f32 %v12769_v10, %v12761_v4  ;;  %v10542_v4 = vld [vmem:[%s15652_s3 + $0x470] sm:$0xff]  ;;  %v10560_v10 = vld [vmem:[%s15654_s5 + $0x220] sm:$0xff] }
0x2f09   : > { %v6407_v13 = vpack.c.bf16 %v6400_v11, %v6399_v7  ;;  %v10539_v7 = vld [vmem:[%s15652_s3 + $0x458] sm:$0xff] }
0x2f0a   : > { %v6406_v26 = vpack.c.bf16 %v6398_v12, %v6397_v9  ;;  %v10561_v9 = vld [vmem:[%s15654_s5 + $0x228] sm:$0xff]  ;;  %v10563_v11 = vld [vmem:[%s15654_s5 + $0x238] sm:$0xff]  ;;  %v10562_v12 = vld [vmem:[%s15654_s5 + $0x230] sm:$0xff] }
0x2f0c   : > { %11620 = vmatprep.subr.bf16.mxu1 %v6406_v26 }
0x2f0d   : > { %11621 = vmatpush3.bf16.msra.mxu1 %v6406_v26 }
0x2f0e   : > { %11622 = vmatprep.subr.bf16.mxu1 %v6407_v13 }
0x2f11   : > { %11623 = vmatpush3.bf16.msra.mxu1 %v6407_v13 }
0x2f14   : > { %11625 = vmatmul.mubr.msk.bf16.vlgmr.msra.gmra.mrb[104].mxu1 %vm813_vm2, %v12317_v14  ;;  %v12319_v14 = vld [vmem:[%s15651_s2 + $0x228] sm:$0xff]  }
0x2f15   : > { %11636 = vmatprep.mubr.msk.bf16.mxu1 %vm524_vm0, %v12318_v23 }
0x2fe7   : > { %v11626_v41 = vpop.f32.mrb[104].mxu1 }
0x2fe8   : > { %v6492_v37 = vadd.f32 %v11626_v41, %v6426_v17  ;;  %v6483_v20 = vpop.f32.mrb[105].mxu1  ;;  %v12322_v17 = vld [vmem:[%s15653_s4 + $0x110] sm:$0xff]  }
0x2fe9   : > { %v6484_v35 = vadd.f32 %v6483_v20, %v6416_v28  ;;  %v11627_v31 = vpop.f32.mrb[106].mxu1  ;;  %v12320_v28 = vld [vmem:[%s15651_s2 + $0x230] sm:$0xff]   ;;  %11648 = vmatprep.mubr.msk.bf16.mxu0 %vm813_vm2, %v12322_v17 }
0x2fea   : > { %v6504_v33 = vadd.f32 %v6500_v30, %v6492_v37  ;;  %v6512_v27 = vadd.f32 %v6492_v37, %v14665_v22  ;;  %v6495_v36 = vadd.f32 %v11627_v31, %v6431_v18  ;;  %v6486_v42 = vpop.f32.mrb[107].mxu1 }
0x2feb   : > { %v6502_v32 = vadd.f32 %v6498_v50, %v6484_v35  ;;  %v6510_v44 = vadd.f32 %v6484_v35, %v14671_v46  ;;  %v6487_v39 = vadd.f32 %v6486_v42, %v6421_v21  ;;  %v12321_v21 = vld [vmem:[%s15651_s2 + $0x238] sm:$0xff]  }
0x2fec   : > { %6508 = vst.msk [vmem:[#allocation3 + $0x10] sm:$0xff] %vm524_vm0, %v6504_v33  ;;  %6516 = vst.msk [vmem:[#allocation2 + $0x28] sm:$0xff] %vm524_vm0, %v6512_v27  ;;  %v6505_v51 = vadd.f32 %v6501_v40, %v6495_v36  ;;  %v6513_v16 = vadd.f32 %v6495_v36, %v14667_v29 }
0x2fed   : > { %6506 = vst.msk [vmem:[#allocation3] sm:$0xff] %vm524_vm0, %v6502_v32  ;;  %6514 = vst.msk [vmem:[#allocation2 + $0x8] sm:$0xff] %vm524_vm0, %v6510_v44  ;;  %v6503_v22 = vadd.f32 %v6499_v38, %v6487_v39  ;;  %v6511_v43 = vadd.f32 %v6487_v39, %v14673_v19 }
0x2fee   : > { %6509 = vst.msk [vmem:[#allocation3 + $0x18] sm:$0xff] %vm524_vm0, %v6505_v51  ;;  %6517 = vst.msk [vmem:[#allocation2 + $0x38] sm:$0xff] %vm524_vm0, %v6513_v16 }
0x2fef   : > { %6507 = vst.msk [vmem:[#allocation3 + $0x8] sm:$0xff] %vm524_vm0, %v6503_v22  ;;  %6515 = vst.msk [vmem:[#allocation2 + $0x18] sm:$0xff] %vm524_vm0, %v6511_v43 }
0x2ff3   : > { %v14765_v46 = vld [vmem:[#allocation2 + $0x28] sm:$0xff] }
0x2ff4   : > { %v14771_v25 = vld [vmem:[#allocation2 + $0x8] sm:$0xff] }
0x2ff5   : > { %v14767_v45 = vld [vmem:[#allocation2 + $0x38] sm:$0xff] }
0x2ff6   : > { %v12161_v29 = vpack.i.bf16 %v14767_v45, %v14765_v46  ;;  %v14773_v48 = vld [vmem:[#allocation2 + $0x18] sm:$0xff]  ;;  %v6545_v15 = vpack.c.bf16 %v14767_v45, %v14765_v46 }
0x2ff7   : > { %v12156_v19 = vpack.i.bf16 %v14773_v48, %v14771_v25  ;;  %v6543_v24 = vpack.c.bf16 %v14773_v48, %v14771_v25 }
0x2ff8   : > { %12162 = vrot.lane.b32.xlu1 %v12161_v29, %s15699_s14 }
0x2ff9   : > { %12157 = vrot.lane.b32.xlu0 %v12156_v19, %s15699_s14 }
0x2ffc   : > { %6634 = vrot.lane.b32.xlu1 %v6543_v24, %s15700_s15 }
0x2ffd   : > { %6632 = vrot.lane.b32.xlu0 %v14297_v34, %s15700_s15 }
0x3000   : > { %6638 = vrot.lane.b32.xlu1 %v6545_v15, %s15700_s15 }
0x3001   : > { %6636 = vrot.lane.b32.xlu0 %v14297_v34, %s15700_s15 }
0x306a   : > { %v12163_v47 = vpop.permute.xlu1 %12162 }
0x306b   : > { %v12165_v49 = vunpack.i.h.bf16 %v12163_v47  ;;  %v12164_v52 = vunpack.i.l.bf16 %v12163_v47  ;;  %v12158_v54 = vpop.permute.xlu0 %12157 }
0x306c   : > { %v12160_v55 = vunpack.i.h.bf16 %v12158_v54  ;;  %v12159_v56 = vunpack.i.l.bf16 %v12158_v54 }
0x306d   : > { %v6547_v57 = vpack.c.bf16 %v12165_v49, %v12164_v52 }
0x306e   : > { %v6546_v58 = vpack.c.bf16 %v12160_v55, %v12159_v56  ;;  %v6635_v59 = vpop.permute.xlu1 %6634 }
0x306f   : > { %v6633_v60 = vpop.permute.xlu0 %6632  ;;  %6642 = vrot.lane.b32.xlu1 %v6547_v57, %s15700_s15 }
0x3070   : > { %6640 = vrot.lane.b32.xlu0 %v6546_v58, %s15700_s15  ;;  %v6644_v61 = vsel %vm1015_vm3, %v6633_v60, %v6635_v59  ;;  %s9862_s15 = sshll.u32 %s15704_s22, 3 }
0x3071   : > { %11628 = vmatprep.subr.bf16.mxu1 %v6644_v61  ;;  %s405_s20 = scalar_lea.vmem %s15661_s12, %s9862_s15 }
0x3072   : > { %11629 = vmatpush3.bf16.msra.mxu1 %v6644_v61  ;;  %v6639_v0 = vpop.permute.xlu1 %6638 }
0x3073   : > { %v6637_v1 = vpop.permute.xlu0 %6636  ;;  %6593 = vperm.xlu1 %12005, %v10541_v62  }
0x3074   : > { %6588 = vperm.xlu0 %12004, %v10540_v63   ;;  %v6645_v2 = vsel %vm1015_vm3, %v6637_v1, %v6639_v0 }
0x3075   : > { %11630 = vmatprep.subr.bf16.mxu1 %v6645_v2 }
0x3076   : > { %11631 = vmatpush3.bf16.msra.mxu1 %v6645_v2 }
0x3077   : > { %6603 = vperm.xlu1 %12005, %v10543_v3  }
0x3078   : > { %6598 = vperm.xlu0 %12004, %v10542_v4  }
0x307b   : > { %6573 = vperm.xlu1 %12005, %v10537_v5  }
0x307c   : > { %6568 = vperm.xlu0 %12004, %v10536_v6  }
0x307f   : > { %6583 = vperm.xlu1 %12005, %v10539_v7  }
0x3080   : > { %6578 = vperm.xlu0 %12004, %v10538_v8  }
0x3083   : > { %6778 = vperm.xlu1 %12005, %v10561_v9  }
0x3084   : > { %6773 = vperm.xlu0 %12004, %v10560_v10  }
0x3087   : > { %6788 = vperm.xlu1 %12005, %v10563_v11   ;;  %v12323_v11 = vld [vmem:[%s15653_s4 + $0x118] sm:$0xff]  }
0x3088   : > { %6783 = vperm.xlu0 %12004, %v10562_v12  }
0x30e1   : > { %v6643_v26 = vpop.permute.xlu1 %6642 }
0x30e2   : > { %v6641_v13 = vpop.permute.xlu0 %6640 }
0x30e3   : > { %11632 = vmatprep.subr.bf16.mxu1 %v6641_v13 }
0x30e4   : > { %11633 = vmatpush3.bf16.msra.mxu1 %v6641_v13 }
0x30e5   : > { %11634 = vmatprep.subr.bf16.mxu1 %v6643_v26 }
0x30e8   : > { %11635 = vmatpush3.bf16.msra.mxu1 %v6643_v26 }
0x30eb   : > { %11637 = vmatmul.mubr.msk.bf16.vlgmr.msra.gmra.mrb[108].mxu1 %vm524_vm0, %v12319_v14 }
0x30ec   : > { %11640 = vmatprep.mubr.msk.bf16.mxu1 %vm524_vm0, %v12320_v28 }
0x30f2   : > { %v6594_v20 = vpop.permute.xlu1 %6593 }
0x30f3   : > { %11641 = vmatmul.mubr.msk.bf16.gmra.mrb[112].mxu1 %vm524_vm0, %v12321_v21  ;;  %v6589_v41 = vpop.permute.xlu0 %6588 }
0x30f6   : > { %v6604_v33 = vpop.permute.xlu1 %6603 }
0x30f7   : > { %v6599_v31 = vpop.permute.xlu0 %6598 }
0x30fa   : > { %v6574_v22 = vpop.permute.xlu1 %6573 }
0x30fb   : > { %v6569_v44 = vpop.permute.xlu0 %6568 }
0x30fe   : > { %v6584_v15 = vpop.permute.xlu1 %6583 }
0x30ff   : > { %v6579_v19 = vpop.permute.xlu0 %6578 }
0x3102   : > { %v6779_v13 = vpop.permute.xlu1 %6778 }
0x3103   : > { %v6774_v12 = vpop.permute.xlu0 %6773 }
0x3106   : > { %v6789_v17 = vpop.permute.xlu1 %6788 }
0x3107   : > { %v6784_v26 = vpop.permute.xlu0 %6783 }
0x31be   : > { %v11638_v37 = vpop.f32.mrb[108].mxu1 }
0x31bf   : > { %v6696_v18 = vpop.f32.mrb[109].mxu1  ;;  %v6705_v24 = vadd.f32 %v11638_v37, %v6579_v19 }
0x31c0   : > { %v11639_v30 = vpop.f32.mrb[110].mxu1  ;;  %v6697_v23 = vadd.f32 %v6696_v18, %v6569_v44 }
0x31c1   : > { %v6699_v35 = vpop.f32.mrb[111].mxu1  ;;  %v6708_v47 = vadd.f32 %v11639_v30, %v6584_v15 }
0x31c2   : > { %v6700_v49 = vadd.f32 %v6699_v35, %v6574_v22  ;;  %v6856_v35 = vld [vmem:[#allocation3] sm:$0xff] }
0x31c6   : > { %v11642_v27 = vpop.f32.mrb[112].mxu1 }
0x31c7   : > { %v6721_v50 = vadd.f32 %v11642_v27, %v6599_v31  ;;  %v6712_v36 = vpop.f32.mrb[113].mxu1 }
0x31c8   : > { %v6713_v42 = vadd.f32 %v6712_v36, %v6589_v41  ;;  %v11643_v32 = vpop.f32.mrb[114].mxu1  ;;  %v6858_v41 = vld [vmem:[#allocation3 + $0x10] sm:$0xff]  ;;  %v6859_v36 = vld [vmem:[#allocation3 + $0x18] sm:$0xff] }
0x31c9   : > { %v10554_v40 = vmul.f32 -1.442695, %v6721_v50  ;;  %v6724_v39 = vadd.f32 %v11643_v32, %v6604_v33  ;;  %v6715_v51 = vpop.f32.mrb[115].mxu1 }
0x31ca   : > { %v10552_v16 = vmul.f32 -1.442695, %v6713_v42  ;;  %v6716_v38 = vadd.f32 %v6715_v51, %v6594_v20 }
0x31cb   : > { %12770 = vpow2.f32 %v10554_v40  ;;  %v10555_v43 = vmul.f32 -1.442695, %v6724_v39  ;;  %v6857_v40 = vld [vmem:[#allocation3 + $0x8] sm:$0xff] }
0x31cc   : > { %12772 = vpow2.f32 %v10552_v16  ;;  %v10553_v29 = vmul.f32 -1.442695, %v6716_v38 }
0x31cd   : > { %12774 = vpow2.f32 %v10555_v43 }
0x31ce   : > { %12776 = vpow2.f32 %v10553_v29  ;;  %v12324_v29 = vld [vmem:[%s15651_s2 + $0x240] sm:$0xff]  }
0x31cf   : > { %12778 = vtanh.f32 %v6705_v24  ;;  %11660 = vmatprep.mubr.msk.bf16.mxu1 %vm524_vm0, %v12324_v29 }
0x31d0   : > { %12780 = vtanh.f32 %v6697_v23 }
0x31d1   : > { %12782 = vtanh.f32 %v6708_v47 }
0x31d2   : > { %12784 = vtanh.f32 %v6700_v49 }
0x31d5   : > { %v12771_v52 = vpop.eup %12770 }
0x31d6   : > { %v12773_v54 = vpop.eup %12772  ;;  %v6745_v55 = vadd.f32 1.0, %v12771_v52 }
0x31d7   : > { %v12775_v56 = vpop.eup %12774  ;;  %v6743_v57 = vadd.f32 1.0, %v12773_v54 }
0x31d8   : > { %v12777_v58 = vpop.eup %12776  ;;  %12786 = vrcp.f32 %v6745_v55  ;;  %v6746_v59 = vadd.f32 1.0, %v12775_v56 }
0x31d9   : > { %12788 = vrcp.f32 %v6743_v57  ;;  %v6744_v60 = vadd.f32 1.0, %v12777_v58  ;;  %v12779_v61 = vpop.eup %12778  ;;  %v10581_v57 = vld [vmem:[%s15652_s3 + $0x4a8] sm:$0xff]  ;;  %v10580_v58 = vld [vmem:[%s15652_s3 + $0x4a0] sm:$0xff] }
0x31da   : > { %12790 = vrcp.f32 %v6746_v59  ;;  %v12781_v62 = vpop.eup %12780 }
0x31db   : > { %12792 = vrcp.f32 %v6744_v60  ;;  %v12783_v63 = vpop.eup %12782 }
0x31dc   : > { %v12785_v0 = vpop.eup %12784 }
0x31e2   : > { %v12787_v1 = vpop.eup %12786 }
0x31e3   : > { %v12789_v2 = vpop.eup %12788  ;;  %v6757_v3 = vmul.f32 %v12787_v1, %v12779_v61  ;;  %v10576_v1 = vld [vmem:[%s15652_s3 + $0x480] sm:$0xff] }
0x31e4   : > { %v12791_v4 = vpop.eup %12790  ;;  %v6755_v5 = vmul.f32 %v12789_v2, %v12781_v62  ;;  %v10583_v62 = vld [vmem:[%s15652_s3 + $0x4b8] sm:$0xff] }
0x31e5   : > { %v12793_v6 = vpop.eup %12792  ;;  %v6758_v7 = vmul.f32 %v12791_v4, %v12783_v63  ;;  %v10582_v63 = vld [vmem:[%s15652_s3 + $0x4b0] sm:$0xff]  ;;  %v10579_v2 = vld [vmem:[%s15652_s3 + $0x498] sm:$0xff]  ;;  %v10601_v4 = vld [vmem:[%s15654_s5 + $0x248] sm:$0xff] }
0x31e6   : > { %v6756_v8 = vmul.f32 %v12793_v6, %v12785_v0  ;;  %v10577_v0 = vld [vmem:[%s15652_s3 + $0x488] sm:$0xff]  ;;  %v10603_v6 = vld [vmem:[%s15654_s5 + $0x258] sm:$0xff] }
0x31e7   : > { %v6765_v9 = vpack.c.bf16 %v6758_v7, %v6757_v3  ;;  %v10578_v3 = vld [vmem:[%s15652_s3 + $0x490] sm:$0xff] }
0x31e8   : > { %v6764_v10 = vpack.c.bf16 %v6756_v8, %v6755_v5  ;;  %v10600_v5 = vld [vmem:[%s15654_s5 + $0x240] sm:$0xff]  ;;  %v10602_v7 = vld [vmem:[%s15654_s5 + $0x250] sm:$0xff] }
0x31ea   : > { %11644 = vmatprep.subr.bf16.mxu0 %v6764_v10 }
0x31eb   : > { %11645 = vmatpush3.bf16.msra.mxu0 %v6764_v10  ;;  %v12325_v10 = vld [vmem:[%s15651_s2 + $0x248] sm:$0xff]  }
0x31ec   : > { %11646 = vmatprep.subr.bf16.mxu0 %v6765_v9 }
0x31ef   : > { %11647 = vmatpush3.bf16.msra.mxu0 %v6765_v9 }
0x31f2   : > { %11649 = vmatmul.mubr.msk.bf16.vlgmr.msra.gmra.mrb[96].mxu0 %vm813_vm2, %v12323_v11  ;;  %v12326_v11 = vld [vmem:[%s15651_s2 + $0x250] sm:$0xff]  }
0x32c5   : > { %v11650_v14 = vpop.f32.mrb[96].mxu0 }
0x32c6   : > { %v6850_v28 = vadd.f32 %v11650_v14, %v6784_v26  ;;  %v6841_v21 = vpop.f32.mrb[97].mxu0 }
0x32c7   : > { %v6842_v37 = vadd.f32 %v6841_v21, %v6774_v12  ;;  %v11651_v20 = vpop.f32.mrb[98].mxu0  ;;  %v12327_v12 = vld [vmem:[%s15651_s2 + $0x258] sm:$0xff]  }
0x32c8   : > { %v6862_v18 = vadd.f32 %v6858_v41, %v6850_v28  ;;  %v6870_v30 = vadd.f32 %v6850_v28, %v14765_v46  ;;  %v6853_v31 = vadd.f32 %v11651_v20, %v6789_v17  ;;  %v6844_v33 = vpop.f32.mrb[99].mxu0 }
0x32c9   : > { %v6860_v27 = vadd.f32 %v6856_v35, %v6842_v37  ;;  %v6868_v50 = vadd.f32 %v6842_v37, %v14771_v25  ;;  %v6845_v42 = vadd.f32 %v6844_v33, %v6779_v13  ;;  %v12328_v13 = vld [vmem:[%s15653_s4 + $0x120] sm:$0xff]  }
0x32ca   : > { %6866 = vst.msk [vmem:[#allocation3 + $0x10] sm:$0xff] %vm524_vm0, %v6862_v18  ;;  %6874 = vst.msk [vmem:[#allocation2 + $0x28] sm:$0xff] %vm524_vm0, %v6870_v30  ;;  %v6863_v32 = vadd.f32 %v6859_v36, %v6853_v31  ;;  %v6871_v44 = vadd.f32 %v6853_v31, %v14767_v45  ;;  %11672 = vmatprep.mubr.msk.bf16.mxu0 %vm813_vm2, %v12328_v13 }
0x32cb   : > { %6864 = vst.msk [vmem:[#allocation3] sm:$0xff] %vm524_vm0, %v6860_v27  ;;  %6872 = vst.msk [vmem:[#allocation2 + $0x8] sm:$0xff] %vm524_vm0, %v6868_v50  ;;  %v6861_v46 = vadd.f32 %v6857_v40, %v6845_v42  ;;  %v6869_v39 = vadd.f32 %v6845_v42, %v14773_v48 }
0x32cc   : > { %6867 = vst.msk [vmem:[#allocation3 + $0x18] sm:$0xff] %vm524_vm0, %v6863_v32  ;;  %6875 = vst.msk [vmem:[#allocation2 + $0x38] sm:$0xff] %vm524_vm0, %v6871_v44 }
0x32cd   : > { %6865 = vst.msk [vmem:[#allocation3 + $0x8] sm:$0xff] %vm524_vm0, %v6861_v46  ;;  %6873 = vst.msk [vmem:[#allocation2 + $0x18] sm:$0xff] %vm524_vm0, %v6869_v39 }
0x32d1   : > { %v14865_v25 = vld [vmem:[#allocation2 + $0x28] sm:$0xff]  ;;  %v7216_v13 = vld [vmem:[#allocation3 + $0x10] sm:$0xff] }
0x32d2   : > { %v14871_v16 = vld [vmem:[#allocation2 + $0x8] sm:$0xff] }
0x32d3   : > { %v14867_v51 = vld [vmem:[#allocation2 + $0x38] sm:$0xff] }
0x32d4   : > { %v12171_v45 = vpack.i.bf16 %v14867_v51, %v14865_v25  ;;  %v14873_v38 = vld [vmem:[#allocation2 + $0x18] sm:$0xff]  ;;  %v6903_v43 = vpack.c.bf16 %v14867_v51, %v14865_v25 }
0x32d5   : > { %v12166_v48 = vpack.i.bf16 %v14873_v38, %v14871_v16  ;;  %v6901_v22 = vpack.c.bf16 %v14873_v38, %v14871_v16 }
0x32d6   : > { %12172 = vrot.lane.b32.xlu1 %v12171_v45, %s15701_s0 }
0x32d7   : > { %12167 = vrot.lane.b32.xlu0 %v12166_v48, %s15701_s0 }
0x32da   : > { %6992 = vrot.lane.b32.xlu1 %v6901_v22, %s15702_s17 }
0x32db   : > { %6990 = vrot.lane.b32.xlu0 %v14297_v34, %s15702_s17 }
0x32de   : > { %6996 = vrot.lane.b32.xlu1 %v6903_v43, %s15702_s17 }
0x32df   : > { %6994 = vrot.lane.b32.xlu0 %v14297_v34, %s15702_s17 }
0x3348   : > { %v12173_v19 = vpop.permute.xlu1 %12172 }
0x3349   : > { %v12175_v24 = vunpack.i.h.bf16 %v12173_v19  ;;  %v12174_v15 = vunpack.i.l.bf16 %v12173_v19  ;;  %v12168_v23 = vpop.permute.xlu0 %12167 }
0x334a   : > { %v12170_v47 = vunpack.i.h.bf16 %v12168_v23  ;;  %v12169_v49 = vunpack.i.l.bf16 %v12168_v23 }
0x334b   : > { %v6905_v52 = vpack.c.bf16 %v12175_v24, %v12174_v15 }
0x334c   : > { %v6904_v54 = vpack.c.bf16 %v12170_v47, %v12169_v49  ;;  %v6993_v55 = vpop.permute.xlu1 %6992 }
0x334d   : > { %v6991_v56 = vpop.permute.xlu0 %6990  ;;  %7000 = vrot.lane.b32.xlu1 %v6905_v52, %s15702_s17 }
0x334e   : > { %6998 = vrot.lane.b32.xlu0 %v6904_v54, %s15702_s17  ;;  %v7002_v34 = vsel %vm1374_vm4, %v6991_v56, %v6993_v55 }
0x334f   : > { %11652 = vmatprep.subr.bf16.mxu1 %v7002_v34 }
0x3350   : > { %11653 = vmatpush3.bf16.msra.mxu1 %v7002_v34  ;;  %v6997_v59 = vpop.permute.xlu1 %6996 }
0x3351   : > { %v6995_v60 = vpop.permute.xlu0 %6994  ;;  %6951 = vperm.xlu1 %12005, %v10581_v57  }
0x3352   : > { %6946 = vperm.xlu0 %12004, %v10580_v58   ;;  %v7003_v61 = vsel %vm1374_vm4, %v6995_v60, %v6997_v59 }
0x3353   : > { %11654 = vmatprep.subr.bf16.mxu1 %v7003_v61 }
0x3354   : > { %11655 = vmatpush3.bf16.msra.mxu1 %v7003_v61 }
0x3355   : > { %6961 = vperm.xlu1 %12005, %v10583_v62  }
0x3356   : > { %6956 = vperm.xlu0 %12004, %v10582_v63  }
0x3359   : > { %6931 = vperm.xlu1 %12005, %v10577_v0  }
0x335a   : > { %6926 = vperm.xlu0 %12004, %v10576_v1  }
0x335d   : > { %6941 = vperm.xlu1 %12005, %v10579_v2  }
0x335e   : > { %6936 = vperm.xlu0 %12004, %v10578_v3  }
0x3361   : > { %7136 = vperm.xlu1 %12005, %v10601_v4  }
0x3362   : > { %7131 = vperm.xlu0 %12004, %v10600_v5   ;;  %v12329_v5 = vld [vmem:[%s15653_s4 + $0x128] sm:$0xff]  }
0x3365   : > { %7146 = vperm.xlu1 %12005, %v10603_v6  }
0x3366   : > { %7141 = vperm.xlu0 %12004, %v10602_v7  }
0x33bf   : > { %v7001_v9 = vpop.permute.xlu1 %7000 }
0x33c0   : > { %v6999_v8 = vpop.permute.xlu0 %6998 }
0x33c1   : > { %11656 = vmatprep.subr.bf16.mxu1 %v6999_v8 }
0x33c2   : > { %11657 = vmatpush3.bf16.msra.mxu1 %v6999_v8 }
0x33c3   : > { %11658 = vmatprep.subr.bf16.mxu1 %v7001_v9 }
0x33c6   : > { %11659 = vmatpush3.bf16.msra.mxu1 %v7001_v9 }
0x33c9   : > { %11661 = vmatmul.mubr.msk.bf16.vlgmr.msra.gmra.mrb[116].mxu1 %vm524_vm0, %v12325_v10 }
0x33ca   : > { %11664 = vmatprep.mubr.msk.bf16.mxu1 %vm524_vm0, %v12326_v11 }
0x33d0   : > { %v6952_v28 = vpop.permute.xlu1 %6951 }
0x33d1   : > { %11665 = vmatmul.mubr.msk.bf16.gmra.mrb[120].mxu1 %vm524_vm0, %v12327_v12  ;;  %v6947_v26 = vpop.permute.xlu0 %6946 }
0x33d4   : > { %v6962_v20 = vpop.permute.xlu1 %6961 }
0x33d5   : > { %v6957_v37 = vpop.permute.xlu0 %6956 }
0x33d8   : > { %v6932_v40 = vpop.permute.xlu1 %6931 }
0x33d9   : > { %v6927_v27 = vpop.permute.xlu0 %6926 }
0x33dc   : > { %v6942_v22 = vpop.permute.xlu1 %6941 }
0x33dd   : > { %v6937_v45 = vpop.permute.xlu0 %6936 }
0x33e0   : > { %v7137_v7 = vpop.permute.xlu1 %7136 }
0x33e1   : > { %v7132_v6 = vpop.permute.xlu0 %7131 }
0x33e4   : > { %v7147_v12 = vpop.permute.xlu1 %7146 }
0x33e5   : > { %v7142_v8 = vpop.permute.xlu0 %7141 }
0x349c   : > { %v11662_v14 = vpop.f32.mrb[116].mxu1 }
0x349d   : > { %v7054_v21 = vpop.f32.mrb[117].mxu1  ;;  %v7063_v48 = vadd.f32 %v11662_v14, %v6937_v45  ;;  %v12330_v45 = vld [vmem:[%s15651_s2 + $0x260] sm:$0xff]  }
0x349e   : > { %v11663_v17 = vpop.f32.mrb[118].mxu1  ;;  %v7055_v43 = vadd.f32 %v7054_v21, %v6927_v27  ;;  %v7215_v27 = vld [vmem:[#allocation3 + $0x8] sm:$0xff] }
0x349f   : > { %v7057_v41 = vpop.f32.mrb[119].mxu1  ;;  %v7066_v29 = vadd.f32 %v11663_v17, %v6942_v22  ;;  %v7214_v17 = vld [vmem:[#allocation3] sm:$0xff] }
0x34a0   : > { %v7058_v19 = vadd.f32 %v7057_v41, %v6932_v40 }
0x34a4   : > { %v11666_v18 = vpop.f32.mrb[120].mxu1 }
0x34a5   : > { %v7079_v30 = vadd.f32 %v11666_v18, %v6957_v37  ;;  %v7070_v35 = vpop.f32.mrb[121].mxu1 }
0x34a6   : > { %v7071_v31 = vadd.f32 %v7070_v35, %v6947_v26  ;;  %v11667_v33 = vpop.f32.mrb[122].mxu1 }
0x34a7   : > { %v10594_v50 = vmul.f32 -1.442695, %v7079_v30  ;;  %v7082_v36 = vadd.f32 %v11667_v33, %v6962_v20  ;;  %v7073_v42 = vpop.f32.mrb[123].mxu1  ;;  %v7217_v30 = vld [vmem:[#allocation3 + $0x18] sm:$0xff] }
0x34a8   : > { %v10592_v32 = vmul.f32 -1.442695, %v7071_v31  ;;  %v7074_v44 = vadd.f32 %v7073_v42, %v6952_v28 }
0x34a9   : > { %12794 = vpow2.f32 %v10594_v50  ;;  %v10595_v46 = vmul.f32 -1.442695, %v7082_v36 }
0x34aa   : > { %12796 = vpow2.f32 %v10592_v32  ;;  %v10593_v39 = vmul.f32 -1.442695, %v7074_v44  ;;  %v12941_v44 = vld [vmem:[#allocation2] sm:$0xff] }
0x34ab   : > { %12798 = vpow2.f32 %v10595_v46  ;;  %v14979_v40 = vpack.c.bf16 %v12941_v44, %v12941_v44 }
0x34ac   : > { %12800 = vpow2.f32 %v10593_v39 }
0x34ad   : > { %12802 = vtanh.f32 %v7063_v48 }
0x34ae   : > { %12804 = vtanh.f32 %v7055_v43 }
0x34af   : > { %12806 = vtanh.f32 %v7066_v29 }
0x34b0   : > { %12808 = vtanh.f32 %v7058_v19 }
0x34b3   : > { %v12795_v24 = vpop.eup %12794 }
0x34b4   : > { %v12797_v15 = vpop.eup %12796  ;;  %v7103_v23 = vadd.f32 1.0, %v12795_v24 }
0x34b5   : > { %v12799_v47 = vpop.eup %12798  ;;  %v7101_v49 = vadd.f32 1.0, %v12797_v15 }
0x34b6   : > { %v12801_v52 = vpop.eup %12800  ;;  %12810 = vrcp.f32 %v7103_v23  ;;  %v7104_v54 = vadd.f32 1.0, %v12799_v47 }
0x34b7   : > { %12812 = vrcp.f32 %v7101_v49  ;;  %v7102_v55 = vadd.f32 1.0, %v12801_v52  ;;  %v12803_v56 = vpop.eup %12802 }
0x34b8   : > { %12814 = vrcp.f32 %v7104_v54  ;;  %v12805_v34 = vpop.eup %12804  ;;  %v10621_v54 = vld [vmem:[%s15652_s3 + $0x4e8] sm:$0xff] }
0x34b9   : > { %12816 = vrcp.f32 %v7102_v55  ;;  %v12807_v57 = vpop.eup %12806  ;;  %v10620_v55 = vld [vmem:[%s15652_s3 + $0x4e0] sm:$0xff] }
0x34ba   : > { %v12809_v58 = vpop.eup %12808 }
0x34c0   : > { %v12811_v59 = vpop.eup %12810 }
0x34c1   : > { %v12813_v60 = vpop.eup %12812  ;;  %v7115_v61 = vmul.f32 %v12811_v59, %v12803_v56  ;;  %v10622_v59 = vld [vmem:[%s15652_s3 + $0x4f0] sm:$0xff] }
0x34c2   : > { %v12815_v62 = vpop.eup %12814  ;;  %v7113_v63 = vmul.f32 %v12813_v60, %v12805_v34  ;;  %v10617_v60 = vld [vmem:[%s15652_s3 + $0x4c8] sm:$0xff] }
0x34c3   : > { %v12817_v0 = vpop.eup %12816  ;;  %v7116_v1 = vmul.f32 %v12815_v62, %v12807_v57  ;;  %v10619_v62 = vld [vmem:[%s15652_s3 + $0x4d8] sm:$0xff] }
0x34c4   : > { %v7114_v2 = vmul.f32 %v12817_v0, %v12809_v58  ;;  %v10623_v58 = vld [vmem:[%s15652_s3 + $0x4f8] sm:$0xff]  ;;  %v10641_v0 = vld [vmem:[%s15654_s5 + $0x268] sm:$0xff] }
0x34c5   : > { %v7123_v3 = vpack.c.bf16 %v7116_v1, %v7115_v61  ;;  %v10616_v61 = vld [vmem:[%s15652_s3 + $0x4c0] sm:$0xff] }
0x34c6   : > { %v7122_v4 = vpack.c.bf16 %v7114_v2, %v7113_v63  ;;  %v10618_v63 = vld [vmem:[%s15652_s3 + $0x4d0] sm:$0xff]  ;;  %v10640_v1 = vld [vmem:[%s15654_s5 + $0x260] sm:$0xff]  ;;  %v10643_v2 = vld [vmem:[%s15654_s5 + $0x278] sm:$0xff] }
0x34c8   : > { %11668 = vmatprep.subr.bf16.mxu0 %v7122_v4 }
0x34c9   : > { %11669 = vmatpush3.bf16.msra.mxu0 %v7122_v4 }
0x34ca   : > { %11670 = vmatprep.subr.bf16.mxu0 %v7123_v3 }
0x34cd   : > { %11671 = vmatpush3.bf16.msra.mxu0 %v7123_v3  ;;  %v10642_v3 = vld [vmem:[%s15654_s5 + $0x270] sm:$0xff] }
0x34d0   : > { %11673 = vmatmul.mubr.msk.bf16.vlgmr.msra.gmra.mrb[100].mxu0 %vm813_vm2, %v12329_v5 }
0x34d1   : > { %11684 = vmatprep.mubr.msk.bf16.mxu0 %vm524_vm0, %v12330_v45 }
0x35a3   : > { %v11674_v9 = vpop.f32.mrb[100].mxu0 }
0x35a4   : > { %v7208_v10 = vadd.f32 %v11674_v9, %v7142_v8  ;;  %v7199_v11 = vpop.f32.mrb[101].mxu0  ;;  %v12333_v8 = vld [vmem:[%s15651_s2 + $0x278] sm:$0xff]   ;;  %v12334_v9 = vld [vmem:[%s15653_s4 + $0x130] sm:$0xff]  }
0x35a5   : > { %v7200_v26 = vadd.f32 %v7199_v11, %v7132_v6  ;;  %v11675_v14 = vpop.f32.mrb[102].mxu0  ;;  %v12331_v6 = vld [vmem:[%s15651_s2 + $0x268] sm:$0xff]   ;;  %11696 = vmatprep.mubr.msk.bf16.mxu1 %vm813_vm2, %v12334_v9 }
0x35a6   : > { %v7220_v28 = vadd.f32 %v7216_v13, %v7208_v10  ;;  %v7228_v21 = vadd.f32 %v7208_v10, %v14865_v25  ;;  %v7211_v41 = vadd.f32 %v11675_v14, %v7147_v12  ;;  %v7202_v37 = vpop.f32.mrb[103].mxu0 }
0x35a7   : > { %v7218_v20 = vadd.f32 %v7214_v17, %v7200_v26  ;;  %v7226_v18 = vadd.f32 %v7200_v26, %v14871_v16  ;;  %v7203_v35 = vadd.f32 %v7202_v37, %v7137_v7  ;;  %v12332_v7 = vld [vmem:[%s15651_s2 + $0x270] sm:$0xff]  }
0x35a8   : > { %7224 = vst.msk [vmem:[#allocation3 + $0x10] sm:$0xff] %vm524_vm0, %v7220_v28  ;;  %7232 = vst.msk [vmem:[#allocation2 + $0x28] sm:$0xff] %vm524_vm0, %v7228_v21  ;;  %v7221_v31 = vadd.f32 %v7217_v30, %v7211_v41  ;;  %v7229_v33 = vadd.f32 %v7211_v41, %v14867_v51 }
0x35a9   : > { %7222 = vst.msk [vmem:[#allocation3] sm:$0xff] %vm524_vm0, %v7218_v20  ;;  %7230 = vst.msk [vmem:[#allocation2 + $0x8] sm:$0xff] %vm524_vm0, %v7226_v18  ;;  %v7219_v25 = vadd.f32 %v7215_v27, %v7203_v35  ;;  %v7227_v50 = vadd.f32 %v7203_v35, %v14873_v38 }
0x35aa   : > { %7225 = vst.msk [vmem:[#allocation3 + $0x18] sm:$0xff] %vm524_vm0, %v7221_v31  ;;  %7233 = vst.msk [vmem:[#allocation2 + $0x38] sm:$0xff] %vm524_vm0, %v7229_v33 }
0x35ab   : > { %7223 = vst.msk [vmem:[#allocation3 + $0x8] sm:$0xff] %vm524_vm0, %v7219_v25  ;;  %7231 = vst.msk [vmem:[#allocation2 + $0x18] sm:$0xff] %vm524_vm0, %v7227_v50 }
0x35af   : > { %v14965_v16 = vld [vmem:[#allocation2 + $0x28] sm:$0xff] }
0x35b0   : > { %v14971_v42 = vld [vmem:[#allocation2 + $0x8] sm:$0xff] }
0x35b1   : > { %v14967_v36 = vld [vmem:[#allocation2 + $0x38] sm:$0xff] }
0x35b2   : > { %v12181_v51 = vpack.i.bf16 %v14967_v36, %v14965_v16  ;;  %v14973_v32 = vld [vmem:[#allocation2 + $0x18] sm:$0xff]  ;;  %v7261_v39 = vpack.c.bf16 %v14967_v36, %v14965_v16 }
0x35b3   : > { %v12176_v38 = vpack.i.bf16 %v14973_v32, %v14971_v42  ;;  %v7259_v46 = vpack.c.bf16 %v14973_v32, %v14971_v42 }
0x35b4   : > { %12182 = vrot.lane.b32.xlu1 %v12181_v51, %s15690_s26 }
0x35b5   : > { %12177 = vrot.lane.b32.xlu0 %v12176_v38, %s15690_s26 }
0x35b8   : > { %7350 = vrot.lane.b32.xlu1 %v7259_v46, %s15691_s27 }
0x35b9   : > { %7348 = vrot.lane.b32.xlu0 %v14979_v40, %s15691_s27 }
0x35bc   : > { %7354 = vrot.lane.b32.xlu1 %v7261_v39, %s15691_s27 }
0x35bd   : > { %7352 = vrot.lane.b32.xlu0 %v14979_v40, %s15691_s27 }
0x3626   : > { %v12183_v48 = vpop.permute.xlu1 %12182 }
0x3627   : > { %v12185_v22 = vunpack.i.h.bf16 %v12183_v48  ;;  %v12184_v43 = vunpack.i.l.bf16 %v12183_v48  ;;  %v12178_v29 = vpop.permute.xlu0 %12177 }
0x3628   : > { %v12180_v19 = vunpack.i.h.bf16 %v12178_v29  ;;  %v12179_v24 = vunpack.i.l.bf16 %v12178_v29 }
0x3629   : > { %v7263_v15 = vpack.c.bf16 %v12185_v22, %v12184_v43 }
0x362a   : > { %v7262_v23 = vpack.c.bf16 %v12180_v19, %v12179_v24  ;;  %v7351_v47 = vpop.permute.xlu1 %7350 }
0x362b   : > { %v7349_v49 = vpop.permute.xlu0 %7348  ;;  %7358 = vrot.lane.b32.xlu1 %v7263_v15, %s15691_s27 }
0x362c   : > { %7356 = vrot.lane.b32.xlu0 %v7262_v23, %s15691_s27  ;;  %v7360_v52 = vsel %vm1733_vm5, %v7349_v49, %v7351_v47 }
0x362d   : > { %11676 = vmatprep.subr.bf16.mxu0 %v7360_v52 }
0x362e   : > { %11677 = vmatpush3.bf16.msra.mxu0 %v7360_v52  ;;  %v7355_v56 = vpop.permute.xlu1 %7354 }
0x362f   : > { %v7353_v34 = vpop.permute.xlu0 %7352  ;;  %7309 = vperm.xlu1 %12005, %v10621_v54  }
0x3630   : > { %7304 = vperm.xlu0 %12004, %v10620_v55   ;;  %v7361_v57 = vsel %vm1733_vm5, %v7353_v34, %v7355_v56 }
0x3631   : > { %11678 = vmatprep.subr.bf16.mxu0 %v7361_v57 }
0x3632   : > { %11679 = vmatpush3.bf16.msra.mxu0 %v7361_v57 }
0x3633   : > { %7319 = vperm.xlu1 %12005, %v10623_v58  }
0x3634   : > { %7314 = vperm.xlu0 %12004, %v10622_v59  }
0x3637   : > { %7289 = vperm.xlu1 %12005, %v10617_v60  }
0x3638   : > { %7284 = vperm.xlu0 %12004, %v10616_v61  }
0x363b   : > { %7299 = vperm.xlu1 %12005, %v10619_v62  }
0x363c   : > { %7294 = vperm.xlu0 %12004, %v10618_v63  }
0x363f   : > { %7494 = vperm.xlu1 %12005, %v10641_v0  }
0x3640   : > { %7489 = vperm.xlu0 %12004, %v10640_v1  }
0x3643   : > { %7504 = vperm.xlu1 %12005, %v10643_v2   ;;  %v12335_v2 = vld [vmem:[%s15653_s4 + $0x138] sm:$0xff]  }
0x3644   : > { %7499 = vperm.xlu0 %12004, %v10642_v3  }
0x369d   : > { %v7359_v5 = vpop.permute.xlu1 %7358 }
0x369e   : > { %v7357_v4 = vpop.permute.xlu0 %7356 }
0x369f   : > { %11680 = vmatprep.subr.bf16.mxu0 %v7357_v4 }
0x36a0   : > { %11681 = vmatpush3.bf16.msra.mxu0 %v7357_v4 }
0x36a1   : > { %11682 = vmatprep.subr.bf16.mxu0 %v7359_v5 }
0x36a4   : > { %11683 = vmatpush3.bf16.msra.mxu0 %v7359_v5 }
0x36a7   : > { %11685 = vmatmul.mubr.msk.bf16.vlgmr.msra.gmra.mrb[104].mxu0 %vm524_vm0, %v12331_v6 }
0x36a8   : > { %11688 = vmatprep.mubr.msk.bf16.mxu0 %vm524_vm0, %v12332_v7 }
0x36ae   : > { %v7310_v12 = vpop.permute.xlu1 %7309 }
0x36af   : > { %11689 = vmatmul.mubr.msk.bf16.gmra.mrb[108].mxu0 %vm524_vm0, %v12333_v8  ;;  %v7305_v10 = vpop.permute.xlu0 %7304 }
0x36b2   : > { %v7320_v21 = vpop.permute.xlu1 %7319 }
0x36b3   : > { %v7315_v28 = vpop.permute.xlu0 %7314 }
0x36b6   : > { %v7290_v50 = vpop.permute.xlu1 %7289 }
0x36b7   : > { %v7285_v30 = vpop.permute.xlu0 %7284 }
0x36ba   : > { %v7300_v39 = vpop.permute.xlu1 %7299 }
0x36bb   : > { %v7295_v44 = vpop.permute.xlu0 %7294 }
0x36be   : > { %v7495_v4 = vpop.permute.xlu1 %7494 }
0x36bf   : > { %v7490_v3 = vpop.permute.xlu0 %7489 }
0x36c2   : > { %v7505_v9 = vpop.permute.xlu1 %7504 }
0x36c3   : > { %v7500_v5 = vpop.permute.xlu0 %7499 }
0x377a   : > { %v11686_v11 = vpop.f32.mrb[104].mxu0 }
0x377b   : > { %v7412_v13 = vpop.f32.mrb[105].mxu0  ;;  %v7421_v46 = vadd.f32 %v11686_v11, %v7295_v44 }
0x377c   : > { %v11687_v26 = vpop.f32.mrb[106].mxu0  ;;  %v7413_v45 = vadd.f32 %v7412_v13, %v7285_v30 }
0x377d   : > { %v7415_v14 = vpop.f32.mrb[107].mxu0  ;;  %v7424_v48 = vadd.f32 %v11687_v26, %v7300_v39 }
0x377e   : > { %v7416_v22 = vadd.f32 %v7415_v14, %v7290_v50  ;;  %v7572_v14 = vld [vmem:[#allocation3] sm:$0xff] }
0x3782   : > { %v11690_v17 = vpop.f32.mrb[108].mxu0 }
0x3783   : > { %v7437_v41 = vadd.f32 %v11690_v17, %v7315_v28  ;;  %v7428_v37 = vpop.f32.mrb[109].mxu0 }
0x3784   : > { %v7429_v20 = vadd.f32 %v7428_v37, %v7305_v10  ;;  %v11691_v18 = vpop.f32.mrb[110].mxu0  ;;  %v7574_v10 = vld [vmem:[#allocation3 + $0x10] sm:$0xff]  ;;  %v7575_v37 = vld [vmem:[#allocation3 + $0x18] sm:$0xff] }
0x3785   : > { %v10634_v35 = vmul.f32 -1.442695, %v7437_v41  ;;  %v7440_v31 = vadd.f32 %v11691_v18, %v7320_v21  ;;  %v7431_v33 = vpop.f32.mrb[111].mxu0 }
0x3786   : > { %v10632_v27 = vmul.f32 -1.442695, %v7429_v20  ;;  %v7432_v25 = vadd.f32 %v7431_v33, %v7310_v12 }
0x3787   : > { %12818 = vpow2.f32 %v10634_v35  ;;  %v10635_v51 = vmul.f32 -1.442695, %v7440_v31  ;;  %v7573_v35 = vld [vmem:[#allocation3 + $0x8] sm:$0xff] }
0x3788   : > { %12820 = vpow2.f32 %v10632_v27  ;;  %v10633_v38 = vmul.f32 -1.442695, %v7432_v25 }
0x3789   : > { %12822 = vpow2.f32 %v10635_v51 }
0x378a   : > { %12824 = vpow2.f32 %v10633_v38  ;;  %v12336_v38 = vld [vmem:[%s15651_s2 + $0x280] sm:$0xff]  }
0x378b   : > { %12826 = vtanh.f32 %v7421_v46  ;;  %11708 = vmatprep.mubr.msk.bf16.mxu0 %vm524_vm0, %v12336_v38 }
0x378c   : > { %12828 = vtanh.f32 %v7413_v45 }
0x378d   : > { %12830 = vtanh.f32 %v7424_v48 }
0x378e   : > { %12832 = vtanh.f32 %v7416_v22 }
0x3791   : > { %v12819_v43 = vpop.eup %12818 }
0x3792   : > { %v12821_v29 = vpop.eup %12820  ;;  %v7461_v19 = vadd.f32 1.0, %v12819_v43 }
0x3793   : > { %v12823_v24 = vpop.eup %12822  ;;  %v7459_v15 = vadd.f32 1.0, %v12821_v29 }
0x3794   : > { %v12825_v23 = vpop.eup %12824  ;;  %12834 = vrcp.f32 %v7461_v19  ;;  %v7462_v47 = vadd.f32 1.0, %v12823_v24 }
0x3795   : > { %12836 = vrcp.f32 %v7459_v15  ;;  %v7460_v49 = vadd.f32 1.0, %v12825_v23  ;;  %v12827_v52 = vpop.eup %12826  ;;  %v10661_v23 = vld [vmem:[%s15652_s3 + $0x528] sm:$0xff] }
0x3796   : > { %12838 = vrcp.f32 %v7462_v47  ;;  %v12829_v54 = vpop.eup %12828  ;;  %v10660_v47 = vld [vmem:[%s15652_s3 + $0x520] sm:$0xff] }
0x3797   : > { %12840 = vrcp.f32 %v7460_v49  ;;  %v12831_v55 = vpop.eup %12830 }
0x3798   : > { %v12833_v56 = vpop.eup %12832 }
0x379e   : > { %v12835_v34 = vpop.eup %12834 }
0x379f   : > { %v12837_v57 = vpop.eup %12836  ;;  %v7473_v58 = vmul.f32 %v12835_v34, %v12827_v52  ;;  %v10657_v34 = vld [vmem:[%s15652_s3 + $0x508] sm:$0xff] }
0x37a0   : > { %v12839_v59 = vpop.eup %12838  ;;  %v7471_v60 = vmul.f32 %v12837_v57, %v12829_v54  ;;  %v10656_v57 = vld [vmem:[%s15652_s3 + $0x500] sm:$0xff] }
0x37a1   : > { %v12841_v61 = vpop.eup %12840  ;;  %v7474_v62 = vmul.f32 %v12839_v59, %v12831_v55  ;;  %v10663_v55 = vld [vmem:[%s15652_s3 + $0x538] sm:$0xff]  ;;  %v10658_v59 = vld [vmem:[%s15652_s3 + $0x510] sm:$0xff] }
0x37a2   : > { %v7472_v63 = vmul.f32 %v12841_v61, %v12833_v56  ;;  %v10662_v56 = vld [vmem:[%s15652_s3 + $0x530] sm:$0xff]  ;;  %v10680_v61 = vld [vmem:[%s15654_s5 + $0x280] sm:$0xff] }
0x37a3   : > { %v7481_v0 = vpack.c.bf16 %v7474_v62, %v7473_v58  ;;  %v10659_v58 = vld [vmem:[%s15652_s3 + $0x518] sm:$0xff] }
0x37a4   : > { %v7480_v1 = vpack.c.bf16 %v7472_v63, %v7471_v60  ;;  %v10681_v60 = vld [vmem:[%s15654_s5 + $0x288] sm:$0xff]  ;;  %v10683_v62 = vld [vmem:[%s15654_s5 + $0x298] sm:$0xff]  ;;  %v10682_v63 = vld [vmem:[%s15654_s5 + $0x290] sm:$0xff] }
0x37a6   : > { %11692 = vmatprep.subr.bf16.mxu1 %v7480_v1 }
0x37a7   : > { %11693 = vmatpush3.bf16.msra.mxu1 %v7480_v1 }
0x37a8   : > { %11694 = vmatprep.subr.bf16.mxu1 %v7481_v0 }
0x37ab   : > { %11695 = vmatpush3.bf16.msra.mxu1 %v7481_v0 }
0x37ae   : > { %11697 = vmatmul.mubr.msk.bf16.vlgmr.msra.gmra.mrb[124].mxu1 %vm813_vm2, %v12335_v2  ;;  %v12337_v2 = vld [vmem:[%s15651_s2 + $0x288] sm:$0xff]  }
0x3881   : > { %v11698_v6 = vpop.f32.mrb[124].mxu1 }
0x3882   : > { %v7566_v7 = vadd.f32 %v11698_v6, %v7500_v5  ;;  %v7557_v8 = vpop.f32.mrb[125].mxu1  ;;  %v12340_v5 = vld [vmem:[%s15653_s4 + $0x140] sm:$0xff]  }
0x3883   : > { %v7558_v11 = vadd.f32 %v7557_v8, %v7490_v3  ;;  %v11699_v12 = vpop.f32.mrb[126].mxu1  ;;  %v12338_v3 = vld [vmem:[%s15651_s2 + $0x290] sm:$0xff]   ;;  %11720 = vmatprep.mubr.msk.bf16.mxu1 %vm813_vm2, %v12340_v5 }
0x3884   : > { %v7578_v13 = vadd.f32 %v7574_v10, %v7566_v7  ;;  %v7586_v26 = vadd.f32 %v7566_v7, %v14965_v16  ;;  %v7569_v28 = vadd.f32 %v11699_v12, %v7505_v9  ;;  %v7560_v21 = vpop.f32.mrb[127].mxu1 }
0x3885   : > { %v7576_v17 = vadd.f32 %v7572_v14, %v7558_v11  ;;  %v7584_v41 = vadd.f32 %v7558_v11, %v14971_v42  ;;  %v7561_v20 = vadd.f32 %v7560_v21, %v7495_v4  ;;  %v12339_v4 = vld [vmem:[%s15651_s2 + $0x298] sm:$0xff]  }
0x3886   : > { %7582 = vst.msk [vmem:[#allocation3 + $0x10] sm:$0xff] %vm524_vm0, %v7578_v13  ;;  %7590 = vst.msk [vmem:[#allocation2 + $0x28] sm:$0xff] %vm524_vm0, %v7586_v26  ;;  %v7579_v18 = vadd.f32 %v7575_v37, %v7569_v28  ;;  %v7587_v30 = vadd.f32 %v7569_v28, %v14967_v36 }
0x3887   : > { %7580 = vst.msk [vmem:[#allocation3] sm:$0xff] %vm524_vm0, %v7576_v17  ;;  %7588 = vst.msk [vmem:[#allocation2 + $0x8] sm:$0xff] %vm524_vm0, %v7584_v41  ;;  %v7577_v16 = vadd.f32 %v7573_v35, %v7561_v20  ;;  %v7585_v31 = vadd.f32 %v7561_v20, %v14973_v32 }
0x3888   : > { %7583 = vst.msk [vmem:[#allocation3 + $0x18] sm:$0xff] %vm524_vm0, %v7579_v18  ;;  %7591 = vst.msk [vmem:[#allocation2 + $0x38] sm:$0xff] %vm524_vm0, %v7587_v30 }
0x3889   : > { %7581 = vst.msk [vmem:[#allocation3 + $0x8] sm:$0xff] %vm524_vm0, %v7577_v16  ;;  %7589 = vst.msk [vmem:[#allocation2 + $0x18] sm:$0xff] %vm524_vm0, %v7585_v31 }
0x388d   : > { %v15067_v42 = vld [vmem:[#allocation2 + $0x28] sm:$0xff] }
0x388e   : > { %v15073_v27 = vld [vmem:[#allocation2 + $0x8] sm:$0xff] }
0x388f   : > { %v15069_v33 = vld [vmem:[#allocation2 + $0x38] sm:$0xff] }
0x3890   : > { %v12191_v36 = vpack.i.bf16 %v15069_v33, %v15067_v42  ;;  %v15075_v25 = vld [vmem:[#allocation2 + $0x18] sm:$0xff]  ;;  %v7619_v51 = vpack.c.bf16 %v15069_v33, %v15067_v42 }
0x3891   : > { %v12186_v32 = vpack.i.bf16 %v15075_v25, %v15073_v27  ;;  %v7617_v50 = vpack.c.bf16 %v15075_v25, %v15073_v27 }
0x3892   : > { %12192 = vrot.lane.b32.xlu1 %v12191_v36, %s15692_s30 }
0x3893   : > { %12187 = vrot.lane.b32.xlu0 %v12186_v32, %s15692_s30 }
0x3896   : > { %7708 = vrot.lane.b32.xlu1 %v7617_v50, %s15693_s13 }
0x3897   : > { %7706 = vrot.lane.b32.xlu0 %v14979_v40, %s15693_s13 }
0x389a   : > { %7712 = vrot.lane.b32.xlu1 %v7619_v51, %s15693_s13 }
0x389b   : > { %7710 = vrot.lane.b32.xlu0 %v14979_v40, %s15693_s13 }
0x3904   : > { %v12193_v44 = vpop.permute.xlu1 %12192 }
0x3905   : > { %v12195_v46 = vunpack.i.h.bf16 %v12193_v44  ;;  %v12194_v39 = vunpack.i.l.bf16 %v12193_v44  ;;  %v12188_v45 = vpop.permute.xlu0 %12187 }
0x3906   : > { %v12190_v48 = vunpack.i.h.bf16 %v12188_v45  ;;  %v12189_v22 = vunpack.i.l.bf16 %v12188_v45 }
0x3907   : > { %v7621_v43 = vpack.c.bf16 %v12195_v46, %v12194_v39 }
0x3908   : > { %v7620_v29 = vpack.c.bf16 %v12190_v48, %v12189_v22  ;;  %v7709_v19 = vpop.permute.xlu1 %7708 }
0x3909   : > { %v7707_v24 = vpop.permute.xlu0 %7706  ;;  %7716 = vrot.lane.b32.xlu1 %v7621_v43, %s15693_s13 }
0x390a   : > { %7714 = vrot.lane.b32.xlu0 %v7620_v29, %s15693_s13  ;;  %v7718_v15 = vsel %vm2092_vm6, %v7707_v24, %v7709_v19 }
0x390b   : > { %11700 = vmatprep.subr.bf16.mxu0 %v7718_v15 }
0x390c   : > { %11701 = vmatpush3.bf16.msra.mxu0 %v7718_v15  ;;  %v7713_v49 = vpop.permute.xlu1 %7712 }
0x390d   : > { %v7711_v52 = vpop.permute.xlu0 %7710  ;;  %7667 = vperm.xlu1 %12005, %v10661_v23  }
0x390e   : > { %7662 = vperm.xlu0 %12004, %v10660_v47   ;;  %v7719_v54 = vsel %vm2092_vm6, %v7711_v52, %v7713_v49 }
0x390f   : > { %11702 = vmatprep.subr.bf16.mxu0 %v7719_v54 }
0x3910   : > { %11703 = vmatpush3.bf16.msra.mxu0 %v7719_v54 }
0x3911   : > { %7677 = vperm.xlu1 %12005, %v10663_v55  }
0x3912   : > { %7672 = vperm.xlu0 %12004, %v10662_v56  }
0x3915   : > { %7647 = vperm.xlu1 %12005, %v10657_v34  }
0x3916   : > { %7642 = vperm.xlu0 %12004, %v10656_v57  }
0x3919   : > { %7657 = vperm.xlu1 %12005, %v10659_v58  }
0x391a   : > { %7652 = vperm.xlu0 %12004, %v10658_v59  }
0x391d   : > { %7852 = vperm.xlu1 %12005, %v10681_v60  }
0x391e   : > { %7847 = vperm.xlu0 %12004, %v10680_v61  }
0x3921   : > { %7862 = vperm.xlu1 %12005, %v10683_v62   ;;  %v12341_v62 = vld [vmem:[%s15653_s4 + $0x148] sm:$0xff]  }
0x3922   : > { %7857 = vperm.xlu0 %12004, %v10682_v63  }
0x397b   : > { %v7717_v1 = vpop.permute.xlu1 %7716 }
0x397c   : > { %v7715_v0 = vpop.permute.xlu0 %7714 }
0x397d   : > { %11704 = vmatprep.subr.bf16.mxu0 %v7715_v0 }
0x397e   : > { %11705 = vmatpush3.bf16.msra.mxu0 %v7715_v0 }
0x397f   : > { %11706 = vmatprep.subr.bf16.mxu0 %v7717_v1 }
0x3982   : > { %11707 = vmatpush3.bf16.msra.mxu0 %v7717_v1 }
0x3985   : > { %11709 = vmatmul.mubr.msk.bf16.vlgmr.msra.gmra.mrb[112].mxu0 %vm524_vm0, %v12337_v2 }
0x3986   : > { %11712 = vmatprep.mubr.msk.bf16.mxu0 %vm524_vm0, %v12338_v3 }
0x398c   : > { %v7668_v8 = vpop.permute.xlu1 %7667 }
0x398d   : > { %11713 = vmatmul.mubr.msk.bf16.gmra.mrb[116].mxu0 %vm524_vm0, %v12339_v4  ;;  %v7663_v6 = vpop.permute.xlu0 %7662 }
0x3990   : > { %v7678_v13 = vpop.permute.xlu1 %7677 }
0x3991   : > { %v7673_v12 = vpop.permute.xlu0 %7672 }
0x3994   : > { %v7648_v16 = vpop.permute.xlu1 %7647 }
0x3995   : > { %v7643_v41 = vpop.permute.xlu0 %7642 }
0x3998   : > { %v7658_v51 = vpop.permute.xlu1 %7657 }
0x3999   : > { %v7653_v32 = vpop.permute.xlu0 %7652 }
0x399c   : > { %v7853_v0 = vpop.permute.xlu1 %7852 }
0x399d   : > { %v7848_v63 = vpop.permute.xlu0 %7847 }
0x39a0   : > { %v7863_v5 = vpop.permute.xlu1 %7862 }
0x39a1   : > { %v7858_v1 = vpop.permute.xlu0 %7857 }
0x3a58   : > { %v11710_v7 = vpop.f32.mrb[112].mxu0 }
0x3a59   : > { %v7770_v9 = vpop.f32.mrb[113].mxu0  ;;  %v7779_v50 = vadd.f32 %v11710_v7, %v7653_v32 }
0x3a5a   : > { %v11711_v10 = vpop.f32.mrb[114].mxu0  ;;  %v7771_v38 = vadd.f32 %v7770_v9, %v7643_v41 }
0x3a5b   : > { %v7773_v11 = vpop.f32.mrb[115].mxu0  ;;  %v7782_v44 = vadd.f32 %v11711_v10, %v7658_v51 }
0x3a5c   : > { %v7774_v46 = vadd.f32 %v7773_v11, %v7648_v16  ;;  %v7930_v11 = vld [vmem:[#allocation3] sm:$0xff] }
0x3a60   : > { %v11714_v26 = vpop.f32.mrb[116].mxu0 }
0x3a61   : > { %v7795_v14 = vadd.f32 %v11714_v26, %v7673_v12  ;;  %v7786_v28 = vpop.f32.mrb[117].mxu0 }
0x3a62   : > { %v7787_v21 = vadd.f32 %v7786_v28, %v7663_v6  ;;  %v11715_v17 = vpop.f32.mrb[118].mxu0  ;;  %v7932_v6 = vld [vmem:[#allocation3 + $0x10] sm:$0xff]  ;;  %v7933_v28 = vld [vmem:[#allocation3 + $0x18] sm:$0xff] }
0x3a63   : > { %v10674_v37 = vmul.f32 -1.442695, %v7795_v14  ;;  %v7798_v20 = vadd.f32 %v11715_v17, %v7678_v13  ;;  %v7789_v18 = vpop.f32.mrb[119].mxu0 }
0x3a64   : > { %v10672_v30 = vmul.f32 -1.442695, %v7787_v21  ;;  %v7790_v35 = vadd.f32 %v7789_v18, %v7668_v8 }
0x3a65   : > { %12842 = vpow2.f32 %v10674_v37  ;;  %v10675_v31 = vmul.f32 -1.442695, %v7798_v20  ;;  %v7931_v37 = vld [vmem:[#allocation3 + $0x8] sm:$0xff] }
0x3a66   : > { %12844 = vpow2.f32 %v10672_v30  ;;  %v10673_v36 = vmul.f32 -1.442695, %v7790_v35 }
0x3a67   : > { %12846 = vpow2.f32 %v10675_v31 }
0x3a68   : > { %12848 = vpow2.f32 %v10673_v36  ;;  %v12342_v36 = vld [vmem:[%s15651_s2 + $0x2a0] sm:$0xff]  }
0x3a69   : > { %12850 = vtanh.f32 %v7779_v50 }
0x3a6a   : > { %12852 = vtanh.f32 %v7771_v38 }
0x3a6b   : > { %12854 = vtanh.f32 %v7782_v44 }
0x3a6c   : > { %12856 = vtanh.f32 %v7774_v46 }
0x3a6f   : > { %v12843_v39 = vpop.eup %12842 }
0x3a70   : > { %v12845_v45 = vpop.eup %12844  ;;  %v7819_v48 = vadd.f32 1.0, %v12843_v39 }
0x3a71   : > { %v12847_v22 = vpop.eup %12846  ;;  %v7817_v43 = vadd.f32 1.0, %v12845_v45 }
0x3a72   : > { %v12849_v29 = vpop.eup %12848  ;;  %12858 = vrcp.f32 %v7819_v48  ;;  %v7820_v19 = vadd.f32 1.0, %v12847_v22 }
0x3a73   : > { %12860 = vrcp.f32 %v7817_v43  ;;  %v7818_v24 = vadd.f32 1.0, %v12849_v29  ;;  %v12851_v15 = vpop.eup %12850  ;;  %v10701_v43 = vld [vmem:[%s15652_s3 + $0x568] sm:$0xff]  ;;  %v10700_v29 = vld [vmem:[%s15652_s3 + $0x560] sm:$0xff] }
0x3a74   : > { %12862 = vrcp.f32 %v7820_v19  ;;  %v12853_v23 = vpop.eup %12852 }
0x3a75   : > { %12864 = vrcp.f32 %v7818_v24  ;;  %v12855_v47 = vpop.eup %12854 }
0x3a76   : > { %v12857_v49 = vpop.eup %12856 }
0x3a7c   : > { %v12859_v52 = vpop.eup %12858 }
0x3a7d   : > { %v12861_v54 = vpop.eup %12860  ;;  %v7831_v55 = vmul.f32 %v12859_v52, %v12851_v15  ;;  %v10696_v52 = vld [vmem:[%s15652_s3 + $0x540] sm:$0xff] }
0x3a7e   : > { %v12863_v56 = vpop.eup %12862  ;;  %v7829_v34 = vmul.f32 %v12861_v54, %v12853_v23  ;;  %v10703_v23 = vld [vmem:[%s15652_s3 + $0x578] sm:$0xff] }
0x3a7f   : > { %v12865_v57 = vpop.eup %12864  ;;  %v7832_v58 = vmul.f32 %v12863_v56, %v12855_v47  ;;  %v10702_v47 = vld [vmem:[%s15652_s3 + $0x570] sm:$0xff]  ;;  %v10699_v54 = vld [vmem:[%s15652_s3 + $0x558] sm:$0xff]  ;;  %v10721_v56 = vld [vmem:[%s15654_s5 + $0x2a8] sm:$0xff] }
0x3a80   : > { %v7830_v59 = vmul.f32 %v12865_v57, %v12857_v49  ;;  %v10697_v49 = vld [vmem:[%s15652_s3 + $0x548] sm:$0xff]  ;;  %v10723_v57 = vld [vmem:[%s15654_s5 + $0x2b8] sm:$0xff] }
0x3a81   : > { %v7839_v60 = vpack.c.bf16 %v7832_v58, %v7831_v55  ;;  %v10698_v55 = vld [vmem:[%s15652_s3 + $0x550] sm:$0xff] }
0x3a82   : > { %v7838_v61 = vpack.c.bf16 %v7830_v59, %v7829_v34  ;;  %v10720_v34 = vld [vmem:[%s15654_s5 + $0x2a0] sm:$0xff]  ;;  %v10722_v58 = vld [vmem:[%s15654_s5 + $0x2b0] sm:$0xff] }
0x3a84   : > { %11716 = vmatprep.subr.bf16.mxu1 %v7838_v61 }
0x3a85   : > { %11717 = vmatpush3.bf16.msra.mxu1 %v7838_v61  ;;  %v12343_v61 = vld [vmem:[%s15651_s2 + $0x2a8] sm:$0xff]  }
0x3a86   : > { %11718 = vmatprep.subr.bf16.mxu1 %v7839_v60 }
0x3a89   : > { %11719 = vmatpush3.bf16.msra.mxu1 %v7839_v60 }
0x3a8c   : > { %11721 = vmatmul.mubr.msk.bf16.vlgmr.msra.gmra.mrb[128].mxu1 %vm813_vm2, %v12341_v62  ;;  %v12344_v62 = vld [vmem:[%s15651_s2 + $0x2b0] sm:$0xff]  }
0x3a8d   : > { %11732 = vmatprep.mubr.msk.bf16.mxu1 %vm524_vm0, %v12342_v36 }
0x3b5f   : > { %v11722_v2 = vpop.f32.mrb[128].mxu1 }
0x3b60   : > { %v7924_v3 = vadd.f32 %v11722_v2, %v7858_v1  ;;  %v7915_v4 = vpop.f32.mrb[129].mxu1 }
0x3b61   : > { %v7916_v7 = vadd.f32 %v7915_v4, %v7848_v63  ;;  %v11723_v8 = vpop.f32.mrb[130].mxu1  ;;  %v12345_v63 = vld [vmem:[%s15651_s2 + $0x2b8] sm:$0xff]  }
0x3b62   : > { %v7936_v9 = vadd.f32 %v7932_v6, %v7924_v3  ;;  %v7944_v10 = vadd.f32 %v7924_v3, %v15067_v42  ;;  %v7927_v12 = vadd.f32 %v11723_v8, %v7863_v5  ;;  %v7918_v13 = vpop.f32.mrb[131].mxu1 }
0x3b63   : > { %v7934_v26 = vadd.f32 %v7930_v11, %v7916_v7  ;;  %v7942_v14 = vadd.f32 %v7916_v7, %v15073_v27  ;;  %v7919_v21 = vadd.f32 %v7918_v13, %v7853_v0  ;;  %v12346_v0 = vld [vmem:[%s15653_s4 + $0x150] sm:$0xff]  }
0x3b64   : > { %7940 = vst.msk [vmem:[#allocation3 + $0x10] sm:$0xff] %vm524_vm0, %v7936_v9  ;;  %7948 = vst.msk [vmem:[#allocation2 + $0x28] sm:$0xff] %vm524_vm0, %v7944_v10  ;;  %v7937_v17 = vadd.f32 %v7933_v28, %v7927_v12  ;;  %v7945_v41 = vadd.f32 %v7927_v12, %v15069_v33  ;;  %11744 = vmatprep.mubr.msk.bf16.mxu0 %vm813_vm2, %v12346_v0 }
0x3b65   : > { %7938 = vst.msk [vmem:[#allocation3] sm:$0xff] %vm524_vm0, %v7934_v26  ;;  %7946 = vst.msk [vmem:[#allocation2 + $0x8] sm:$0xff] %vm524_vm0, %v7942_v14  ;;  %v7935_v42 = vadd.f32 %v7931_v37, %v7919_v21  ;;  %v7943_v20 = vadd.f32 %v7919_v21, %v15075_v25 }
0x3b66   : > { %7941 = vst.msk [vmem:[#allocation3 + $0x18] sm:$0xff] %vm524_vm0, %v7937_v17  ;;  %7949 = vst.msk [vmem:[#allocation2 + $0x38] sm:$0xff] %vm524_vm0, %v7945_v41 }
0x3b67   : > { %7939 = vst.msk [vmem:[#allocation3 + $0x8] sm:$0xff] %vm524_vm0, %v7935_v42  ;;  %7947 = vst.msk [vmem:[#allocation2 + $0x18] sm:$0xff] %vm524_vm0, %v7943_v20 }
0x3b6b   : > { %v15167_v27 = vld [vmem:[#allocation2 + $0x28] sm:$0xff]  ;;  %v8290_v0 = vld [vmem:[#allocation3 + $0x10] sm:$0xff] }
0x3b6c   : > { %v15173_v30 = vld [vmem:[#allocation2 + $0x8] sm:$0xff] }
0x3b6d   : > { %v15169_v18 = vld [vmem:[#allocation2 + $0x38] sm:$0xff] }
0x3b6e   : > { %v12201_v33 = vpack.i.bf16 %v15169_v18, %v15167_v27  ;;  %v15175_v35 = vld [vmem:[#allocation2 + $0x18] sm:$0xff]  ;;  %v7977_v31 = vpack.c.bf16 %v15169_v18, %v15167_v27 }
0x3b6f   : > { %v12196_v25 = vpack.i.bf16 %v15175_v35, %v15173_v30  ;;  %v7975_v16 = vpack.c.bf16 %v15175_v35, %v15173_v30 }
0x3b70   : > { %12202 = vrot.lane.b32.xlu1 %v12201_v33, %s15694_s28 }
0x3b71   : > { %12197 = vrot.lane.b32.xlu0 %v12196_v25, %s15694_s28 }
0x3b74   : > { %8066 = vrot.lane.b32.xlu1 %v7975_v16, %s15695_s29 }
0x3b75   : > { %8064 = vrot.lane.b32.xlu0 %v14979_v40, %s15695_s29 }
0x3b78   : > { %8070 = vrot.lane.b32.xlu1 %v7977_v31, %s15695_s29 }
0x3b79   : > { %8068 = vrot.lane.b32.xlu0 %v14979_v40, %s15695_s29 }
0x3be2   : > { %v12203_v32 = vpop.permute.xlu1 %12202 }
0x3be3   : > { %v12205_v50 = vunpack.i.h.bf16 %v12203_v32  ;;  %v12204_v51 = vunpack.i.l.bf16 %v12203_v32  ;;  %v12198_v38 = vpop.permute.xlu0 %12197 }
0x3be4   : > { %v12200_v44 = vunpack.i.h.bf16 %v12198_v38  ;;  %v12199_v46 = vunpack.i.l.bf16 %v12198_v38 }
0x3be5   : > { %v7979_v39 = vpack.c.bf16 %v12205_v50, %v12204_v51 }
0x3be6   : > { %v7978_v45 = vpack.c.bf16 %v12200_v44, %v12199_v46  ;;  %v8067_v48 = vpop.permute.xlu1 %8066 }
0x3be7   : > { %v8065_v22 = vpop.permute.xlu0 %8064  ;;  %8074 = vrot.lane.b32.xlu1 %v7979_v39, %s15695_s29 }
0x3be8   : > { %8072 = vrot.lane.b32.xlu0 %v7978_v45, %s15695_s29  ;;  %v8076_v40 = vsel %vm813_vm2, %v8065_v22, %v8067_v48 }
0x3be9   : > { %11724 = vmatprep.subr.bf16.mxu1 %v8076_v40 }
0x3bea   : > { %11725 = vmatpush3.bf16.msra.mxu1 %v8076_v40  ;;  %v8071_v19 = vpop.permute.xlu1 %8070 }
0x3beb   : > { %v8069_v24 = vpop.permute.xlu0 %8068  ;;  %8025 = vperm.xlu1 %12005, %v10701_v43  }
0x3bec   : > { %8020 = vperm.xlu0 %12004, %v10700_v29   ;;  %v8077_v15 = vsel %vm813_vm2, %v8069_v24, %v8071_v19 }
0x3bed   : > { %11726 = vmatprep.subr.bf16.mxu1 %v8077_v15 }
0x3bee   : > { %11727 = vmatpush3.bf16.msra.mxu1 %v8077_v15 }
0x3bef   : > { %8035 = vperm.xlu1 %12005, %v10703_v23  }
0x3bf0   : > { %8030 = vperm.xlu0 %12004, %v10702_v47  }
0x3bf3   : > { %8005 = vperm.xlu1 %12005, %v10697_v49  }
0x3bf4   : > { %8000 = vperm.xlu0 %12004, %v10696_v52  }
0x3bf7   : > { %8015 = vperm.xlu1 %12005, %v10699_v54  }
0x3bf8   : > { %8010 = vperm.xlu0 %12004, %v10698_v55  }
0x3bfb   : > { %8210 = vperm.xlu1 %12005, %v10721_v56  }
0x3bfc   : > { %8205 = vperm.xlu0 %12004, %v10720_v34   ;;  %v12347_v34 = vld [vmem:[%s15653_s4 + $0x158] sm:$0xff]  }
0x3bff   : > { %8220 = vperm.xlu1 %12005, %v10723_v57  }
0x3c00   : > { %8215 = vperm.xlu0 %12004, %v10722_v58  }
0x3c59   : > { %v8075_v60 = vpop.permute.xlu1 %8074 }
0x3c5a   : > { %v8073_v59 = vpop.permute.xlu0 %8072 }
0x3c5b   : > { %11728 = vmatprep.subr.bf16.mxu1 %v8073_v59 }
0x3c5c   : > { %11729 = vmatpush3.bf16.msra.mxu1 %v8073_v59 }
0x3c5d   : > { %11730 = vmatprep.subr.bf16.mxu1 %v8075_v60 }
0x3c60   : > { %11731 = vmatpush3.bf16.msra.mxu1 %v8075_v60 }
0x3c63   : > { %11733 = vmatmul.mubr.msk.bf16.vlgmr.msra.gmra.mrb[132].mxu1 %vm524_vm0, %v12343_v61 }
0x3c64   : > { %11736 = vmatprep.mubr.msk.bf16.mxu1 %vm524_vm0, %v12344_v62 }
0x3c6a   : > { %v8026_v3 = vpop.permute.xlu1 %8025 }
0x3c6b   : > { %11737 = vmatmul.mubr.msk.bf16.gmra.mrb[136].mxu1 %vm524_vm0, %v12345_v63  ;;  %v8021_v1 = vpop.permute.xlu0 %8020 }
0x3c6e   : > { %v8036_v8 = vpop.permute.xlu1 %8035 }
0x3c6f   : > { %v8031_v7 = vpop.permute.xlu0 %8030 }
0x3c72   : > { %v8006_v37 = vpop.permute.xlu1 %8005 }
0x3c73   : > { %v8001_v26 = vpop.permute.xlu0 %8000 }
0x3c76   : > { %v8016_v16 = vpop.permute.xlu1 %8015 }
0x3c77   : > { %v8011_v33 = vpop.permute.xlu0 %8010 }
0x3c7a   : > { %v8211_v58 = vpop.permute.xlu1 %8210 }
0x3c7b   : > { %v8206_v57 = vpop.permute.xlu0 %8205 }
0x3c7e   : > { %v8221_v63 = vpop.permute.xlu1 %8220 }
0x3c7f   : > { %v8216_v59 = vpop.permute.xlu0 %8215 }
0x3d36   : > { %v11734_v2 = vpop.f32.mrb[132].mxu1 }
0x3d37   : > { %v8128_v4 = vpop.f32.mrb[133].mxu1  ;;  %v8137_v25 = vadd.f32 %v11734_v2, %v8011_v33 }
0x3d38   : > { %v11735_v5 = vpop.f32.mrb[134].mxu1  ;;  %v8129_v31 = vadd.f32 %v8128_v4, %v8001_v26  ;;  %v8289_v26 = vld [vmem:[#allocation3 + $0x8] sm:$0xff] }
0x3d39   : > { %v8131_v6 = vpop.f32.mrb[135].mxu1  ;;  %v8140_v36 = vadd.f32 %v11735_v5, %v8016_v16  ;;  %v8288_v5 = vld [vmem:[#allocation3] sm:$0xff] }
0x3d3a   : > { %v8132_v32 = vadd.f32 %v8131_v6, %v8006_v37 }
0x3d3e   : > { %v11738_v9 = vpop.f32.mrb[136].mxu1 }
0x3d3f   : > { %v8153_v10 = vadd.f32 %v11738_v9, %v8031_v7  ;;  %v8144_v11 = vpop.f32.mrb[137].mxu1 }
0x3d40   : > { %v8145_v12 = vadd.f32 %v8144_v11, %v8021_v1  ;;  %v11739_v13 = vpop.f32.mrb[138].mxu1 }
0x3d41   : > { %v10714_v14 = vmul.f32 -1.442695, %v8153_v10  ;;  %v8156_v28 = vadd.f32 %v11739_v13, %v8036_v8  ;;  %v8147_v21 = vpop.f32.mrb[139].mxu1  ;;  %v8291_v10 = vld [vmem:[#allocation3 + $0x18] sm:$0xff] }
0x3d42   : > { %v10712_v17 = vmul.f32 -1.442695, %v8145_v12  ;;  %v8148_v41 = vadd.f32 %v8147_v21, %v8026_v3 }
0x3d43   : > { %12866 = vpow2.f32 %v10714_v14  ;;  %v10715_v42 = vmul.f32 -1.442695, %v8156_v28 }
0x3d44   : > { %12868 = vpow2.f32 %v10712_v17  ;;  %v10713_v20 = vmul.f32 -1.442695, %v8148_v41  ;;  %v15281_v41 = vld [vmem:[#allocation2] sm:$0xff] }
0x3d45   : > { %12870 = vpow2.f32 %v10715_v42  ;;  %v15285_v37 = vpack.c.bf16 %v15281_v41, %v15281_v41  ;;  %v12348_v42 = vld [vmem:[%s15651_s2 + $0x2c0] sm:$0xff]  }
0x3d46   : > { %12872 = vpow2.f32 %v10713_v20  ;;  %11756 = vmatprep.mubr.msk.bf16.mxu1 %vm524_vm0, %v12348_v42 }
0x3d47   : > { %12874 = vtanh.f32 %v8137_v25 }
0x3d48   : > { %12876 = vtanh.f32 %v8129_v31 }
0x3d49   : > { %12878 = vtanh.f32 %v8140_v36 }
0x3d4a   : > { %12880 = vtanh.f32 %v8132_v32 }
0x3d4d   : > { %v12867_v50 = vpop.eup %12866 }
0x3d4e   : > { %v12869_v51 = vpop.eup %12868  ;;  %v8177_v38 = vadd.f32 1.0, %v12867_v50 }
0x3d4f   : > { %v12871_v44 = vpop.eup %12870  ;;  %v8175_v46 = vadd.f32 1.0, %v12869_v51 }
0x3d50   : > { %v12873_v39 = vpop.eup %12872  ;;  %12882 = vrcp.f32 %v8177_v38  ;;  %v8178_v45 = vadd.f32 1.0, %v12871_v44  ;;  %v10741_v44 = vld [vmem:[%s15652_s3 + $0x5a8] sm:$0xff] }
0x3d51   : > { %12884 = vrcp.f32 %v8175_v46  ;;  %v8176_v48 = vadd.f32 1.0, %v12873_v39  ;;  %v12875_v22 = vpop.eup %12874  ;;  %v10740_v46 = vld [vmem:[%s15652_s3 + $0x5a0] sm:$0xff]  ;;  %v10743_v39 = vld [vmem:[%s15652_s3 + $0x5b8] sm:$0xff] }
0x3d52   : > { %12886 = vrcp.f32 %v8178_v45  ;;  %v12877_v40 = vpop.eup %12876  ;;  %v10742_v45 = vld [vmem:[%s15652_s3 + $0x5b0] sm:$0xff] }
0x3d53   : > { %12888 = vrcp.f32 %v8176_v48  ;;  %v12879_v43 = vpop.eup %12878  ;;  %v10737_v48 = vld [vmem:[%s15652_s3 + $0x588] sm:$0xff] }
0x3d54   : > { %v12881_v29 = vpop.eup %12880 }
0x3d5a   : > { %v12883_v19 = vpop.eup %12882 }
0x3d5b   : > { %v12885_v24 = vpop.eup %12884  ;;  %v8189_v15 = vmul.f32 %v12883_v19, %v12875_v22  ;;  %v10736_v22 = vld [vmem:[%s15652_s3 + $0x580] sm:$0xff] }
0x3d5c   : > { %v12887_v23 = vpop.eup %12886  ;;  %v8187_v47 = vmul.f32 %v12885_v24, %v12877_v40  ;;  %v10739_v40 = vld [vmem:[%s15652_s3 + $0x598] sm:$0xff]  ;;  %v10760_v19 = vld [vmem:[%s15654_s5 + $0x2c0] sm:$0xff] }
0x3d5d   : > { %v12889_v49 = vpop.eup %12888  ;;  %v8190_v52 = vmul.f32 %v12887_v23, %v12879_v43  ;;  %v10738_v43 = vld [vmem:[%s15652_s3 + $0x590] sm:$0xff]  ;;  %v10763_v24 = vld [vmem:[%s15654_s5 + $0x2d8] sm:$0xff]  ;;  %v10781_v23 = vld [vmem:[%s15652_s3 + $0x5e8] sm:$0xff] }
0x3d5e   : > { %v8188_v54 = vmul.f32 %v12889_v49, %v12881_v29  ;;  %v10761_v29 = vld [vmem:[%s15654_s5 + $0x2c8] sm:$0xff]  ;;  %v10783_v49 = vld [vmem:[%s15652_s3 + $0x5f8] sm:$0xff] }
0x3d5f   : > { %v8197_v55 = vpack.c.bf16 %v8190_v52, %v8189_v15  ;;  %v10762_v15 = vld [vmem:[%s15654_s5 + $0x2d0] sm:$0xff] }
0x3d60   : > { %v8196_v56 = vpack.c.bf16 %v8188_v54, %v8187_v47  ;;  %v10780_v47 = vld [vmem:[%s15652_s3 + $0x5e0] sm:$0xff]  ;;  %v10782_v52 = vld [vmem:[%s15652_s3 + $0x5f0] sm:$0xff]  ;;  %v10777_v54 = vld [vmem:[%s15652_s3 + $0x5c8] sm:$0xff] }
0x3d62   : > { %11740 = vmatprep.subr.bf16.mxu0 %v8196_v56 }
0x3d63   : > { %11741 = vmatpush3.bf16.msra.mxu0 %v8196_v56  ;;  %v10779_v56 = vld [vmem:[%s15652_s3 + $0x5d8] sm:$0xff] }
0x3d64   : > { %11742 = vmatprep.subr.bf16.mxu0 %v8197_v55 }
0x3d67   : > { %11743 = vmatpush3.bf16.msra.mxu0 %v8197_v55  ;;  %v10776_v55 = vld [vmem:[%s15652_s3 + $0x5c0] sm:$0xff] }
0x3d6a   : > { %11745 = vmatmul.mubr.msk.bf16.vlgmr.msra.gmra.mrb[120].mxu0 %vm813_vm2, %v12347_v34  ;;  %v10778_v34 = vld [vmem:[%s15652_s3 + $0x5d0] sm:$0xff] }
0x3e3d   : > { %v11746_v60 = vpop.f32.mrb[120].mxu0 }
0x3e3e   : > { %v8282_v61 = vadd.f32 %v11746_v60, %v8216_v59  ;;  %v8273_v62 = vpop.f32.mrb[121].mxu0  ;;  %v10803_v59 = vld [vmem:[%s15654_s5 + $0x2f8] sm:$0xff]  ;;  %v10802_v60 = vld [vmem:[%s15654_s5 + $0x2f0] sm:$0xff] }
0x3e3f   : > { %v8274_v1 = vadd.f32 %v8273_v62, %v8206_v57  ;;  %v11747_v2 = vpop.f32.mrb[122].mxu0  ;;  %v10801_v57 = vld [vmem:[%s15654_s5 + $0x2e8] sm:$0xff]  ;;  %v8986_v62 = vld [vmem:[%s15656_s7] sm:$0xff] }
0x3e40   : > { %v8294_v3 = vadd.f32 %v8290_v0, %v8282_v61  ;;  %v8302_v4 = vadd.f32 %v8282_v61, %v15167_v27  ;;  %v8285_v6 = vadd.f32 %v11747_v2, %v8221_v63  ;;  %v8276_v7 = vpop.f32.mrb[123].mxu0  ;;  %v8987_v61 = vld [vmem:[%s15656_s7 + $0x8] sm:$0xff]  ;;  %v8989_v63 = vld [vmem:[%s15656_s7 + $0x18] sm:$0xff]  ;;  %v8988_v0 = vld [vmem:[%s15656_s7 + $0x10] sm:$0xff] }
0x3e41   : > { %v8292_v8 = vadd.f32 %v8288_v5, %v8274_v1  ;;  %v8300_v9 = vadd.f32 %v8274_v1, %v15173_v30  ;;  %v8277_v11 = vadd.f32 %v8276_v7, %v8211_v58  ;;  %v10800_v58 = vld [vmem:[%s15654_s5 + $0x2e0] sm:$0xff]  ;;  %v12351_v5 = vld [vmem:[%s15651_s2 + $0x2d8] sm:$0xff]  }
0x3e42   : > { %8298 = vst.msk [vmem:[#allocation3 + $0x10] sm:$0xff] %vm524_vm0, %v8294_v3  ;;  %8306 = vst.msk [vmem:[#allocation2 + $0x28] sm:$0xff] %vm524_vm0, %v8302_v4  ;;  %v8295_v12 = vadd.f32 %v8291_v10, %v8285_v6  ;;  %v8303_v13 = vadd.f32 %v8285_v6, %v15169_v18  ;;  %v12349_v3 = vld [vmem:[%s15651_s2 + $0x2c8] sm:$0xff]   ;;  %v12350_v4 = vld [vmem:[%s15651_s2 + $0x2d0] sm:$0xff]  }
0x3e43   : > { %8296 = vst.msk [vmem:[#allocation3] sm:$0xff] %vm524_vm0, %v8292_v8  ;;  %8304 = vst.msk [vmem:[#allocation2 + $0x8] sm:$0xff] %vm524_vm0, %v8300_v9  ;;  %v8293_v27 = vadd.f32 %v8289_v26, %v8277_v11  ;;  %v8301_v14 = vadd.f32 %v8277_v11, %v15175_v35  ;;  %v12352_v6 = vld [vmem:[%s15653_s4 + $0x160] sm:$0xff]  }
0x3e44   : > { %8299 = vst.msk [vmem:[#allocation3 + $0x18] sm:$0xff] %vm524_vm0, %v8295_v12  ;;  %8307 = vst.msk [vmem:[#allocation2 + $0x38] sm:$0xff] %vm524_vm0, %v8303_v13  ;;  %11768 = vmatprep.mubr.msk.bf16.mxu0 %vm813_vm2, %v12352_v6 }
0x3e45   : > { %8297 = vst.msk [vmem:[#allocation3 + $0x8] sm:$0xff] %vm524_vm0, %v8293_v27  ;;  %8305 = vst.msk [vmem:[#allocation2 + $0x18] sm:$0xff] %vm524_vm0, %v8301_v14 }
0x3e49   : > { %v15267_v30 = vld [vmem:[#allocation2 + $0x28] sm:$0xff] }
0x3e4a   : > { %v15273_v21 = vld [vmem:[#allocation2 + $0x8] sm:$0xff] }
0x3e4b   : > { %v15269_v28 = vld [vmem:[#allocation2 + $0x38] sm:$0xff] }
0x3e4c   : > { %v12211_v18 = vpack.i.bf16 %v15269_v28, %v15267_v30  ;;  %v15275_v17 = vld [vmem:[#allocation2 + $0x18] sm:$0xff] }
0x3e4d   : > { %v12206_v35 = vpack.i.bf16 %v15275_v17, %v15273_v21 }
0x3e4e   : > { %12212 = vrot.lane.b32.xlu1 %v12211_v18, %s15696_s16 }
0x3e4f   : > { %12207 = vrot.lane.b32.xlu0 %v12206_v35, %s15696_s16 }
0x3e52   : > { %8420 = vrot.lane.b32.xlu1 %v15285_v37, %s15696_s16 }
0x3e53   : > { %8418 = vrot.lane.b32.xlu0 %v15285_v37, %s15696_s16 }
0x3ec0   : > { %v12213_v20 = vpop.permute.xlu1 %12212 }
0x3ec1   : > { %v12215_v33 = vunpack.i.h.bf16 %v12213_v20  ;;  %v12214_v25 = vunpack.i.l.bf16 %v12213_v20  ;;  %v12208_v16 = vpop.permute.xlu0 %12207 }
0x3ec2   : > { %v12210_v31 = vunpack.i.h.bf16 %v12208_v16  ;;  %v12209_v36 = vunpack.i.l.bf16 %v12208_v16 }
0x3ec3   : > { %v8335_v32 = vpack.c.bf16 %v12215_v33, %v12214_v25 }
0x3ec4   : > { %v8334_v50 = vpack.c.bf16 %v12210_v31, %v12209_v36  ;;  %v8421_v38 = vpop.permute.xlu1 %8420 }
0x3ec5   : > { %8424 = vrot.lane.b32.xlu1 %v8335_v32, %s15696_s16  ;;  %v8419_v51 = vpop.permute.xlu0 %8418 }
0x3ec6   : > { %8422 = vrot.lane.b32.xlu0 %v8334_v50, %s15696_s16  ;;  %11748 = vmatprep.subr.bf16.mxu1 %v8419_v51 }
0x3ec7   : > { %11749 = vmatpush3.bf16.msra.mxu1 %v8419_v51 }
0x3ec8   : > { %11750 = vmatprep.subr.bf16.mxu1 %v8421_v38 }
0x3ec9   : > { %8381 = vperm.xlu1 %12005, %v10741_v44  }
0x3eca   : > { %8376 = vperm.xlu0 %12004, %v10740_v46  }
0x3ecb   : > { %11751 = vmatpush3.bf16.msra.mxu1 %v8421_v38 }
0x3ecd   : > { %8391 = vperm.xlu1 %12005, %v10743_v39  }
0x3ece   : > { %8386 = vperm.xlu0 %12004, %v10742_v45  }
0x3ed1   : > { %8361 = vperm.xlu1 %12005, %v10737_v48  }
0x3ed2   : > { %8356 = vperm.xlu0 %12004, %v10736_v22  }
0x3ed5   : > { %8371 = vperm.xlu1 %12005, %v10739_v40  }
0x3ed6   : > { %8366 = vperm.xlu0 %12004, %v10738_v43  }
0x3ed9   : > { %8558 = vperm.xlu1 %12005, %v10761_v29  }
0x3eda   : > { %8553 = vperm.xlu0 %12004, %v10760_v19  }
0x3edd   : > { %8568 = vperm.xlu1 %12005, %v10763_v24  }
0x3ede   : > { %8563 = vperm.xlu0 %12004, %v10762_v15  }
0x3ee1   : > { %8713 = vperm.xlu1 %12005, %v10781_v23  }
0x3ee2   : > { %8708 = vperm.xlu0 %12004, %v10780_v47  }
0x3ee5   : > { %8723 = vperm.xlu1 %12005, %v10783_v49  }
0x3ee6   : > { %8718 = vperm.xlu0 %12004, %v10782_v52  }
0x3ee9   : > { %8693 = vperm.xlu1 %12005, %v10777_v54  }
0x3eea   : > { %8688 = vperm.xlu0 %12004, %v10776_v55  }
0x3eed   : > { %8703 = vperm.xlu1 %12005, %v10779_v56  }
0x3eee   : > { %8698 = vperm.xlu0 %12004, %v10778_v34  }
0x3ef1   : > { %8874 = vperm.xlu1 %12005, %v10801_v57  }
0x3ef2   : > { %8869 = vperm.xlu0 %12004, %v10800_v58  }
0x3ef5   : > { %8884 = vperm.xlu1 %12005, %v10803_v59  }
0x3ef6   : > { %8879 = vperm.xlu0 %12004, %v10802_v60  }
0x3ef9   : > { %8997 = vperm.xlu1 %12005, %v8987_v61  }
0x3efa   : > { %8992 = vperm.xlu0 %12004, %v8986_v62  }
0x3efd   : > { %9007 = vperm.xlu1 %12005, %v8989_v63  }
0x3efe   : > { %9002 = vperm.xlu0 %12004, %v8988_v0   ;;  %v12353_v0 = vld [vmem:[%s15653_s4 + $0x168] sm:$0xff]  }
0x3f37   : > { %v8425_v2 = vpop.permute.xlu1 %8424 }
0x3f38   : > { %v8423_v1 = vpop.permute.xlu0 %8422 }
0x3f39   : > { %11752 = vmatprep.subr.bf16.mxu1 %v8423_v1 }
0x3f3a   : > { %11753 = vmatpush3.bf16.msra.mxu1 %v8423_v1  ;;  %v12354_v1 = vld [vmem:[%s15651_s2 + $0x2e0] sm:$0xff]  }
0x3f3b   : > { %11754 = vmatprep.subr.bf16.mxu1 %v8425_v2 }
0x3f3e   : > { %11755 = vmatpush3.bf16.msra.mxu1 %v8425_v2 }
0x3f41   : > { %11757 = vmatmul.mubr.msk.bf16.vlgmr.msra.gmra.mrb[140].mxu1 %vm524_vm0, %v12349_v3 }
0x3f42   : > { %11760 = vmatprep.mubr.msk.bf16.mxu1 %vm524_vm0, %v12350_v4 }
0x3f48   : > { %v8382_v9 = vpop.permute.xlu1 %8381 }
0x3f49   : > { %11761 = vmatmul.mubr.msk.bf16.gmra.mrb[144].mxu1 %vm524_vm0, %v12351_v5  ;;  %v8377_v7 = vpop.permute.xlu0 %8376 }
0x3f4c   : > { %v8392_v26 = vpop.permute.xlu1 %8391 }
0x3f4d   : > { %v8387_v13 = vpop.permute.xlu0 %8386 }
0x3f50   : > { %v8362_v32 = vpop.permute.xlu1 %8361 }
0x3f51   : > { %v8357_v20 = vpop.permute.xlu0 %8356 }
0x3f54   : > { %v8372_v46 = vpop.permute.xlu1 %8371 }
0x3f55   : > { %v8367_v38 = vpop.permute.xlu0 %8366 }
0x3f58   : > { %v8559_v3 = vpop.permute.xlu1 %8558 }
0x3f59   : > { %v8554_v2 = vpop.permute.xlu0 %8553 }
0x3f5d   : > { %v8564_v4 = vpop.permute.xlu0 %8563 }
0x4014   : > { %v11758_v8 = vpop.f32.mrb[140].mxu1 }
0x4015   : > { %v8476_v10 = vpop.f32.mrb[141].mxu1  ;;  %v8485_v44 = vadd.f32 %v11758_v8, %v8367_v38  ;;  %v8569_v8 = vpop.permute.xlu1 %8568  ;;  %v12357_v38 = vld [vmem:[%s15651_s2 + $0x2f8] sm:$0xff]  }
0x4016   : > { %v11759_v11 = vpop.f32.mrb[142].mxu1  ;;  %v8477_v39 = vadd.f32 %v8476_v10, %v8357_v20 }
0x4017   : > { %v8479_v12 = vpop.f32.mrb[143].mxu1  ;;  %v8488_v45 = vadd.f32 %v11759_v11, %v8372_v46  ;;  %v8709_v46 = vpop.permute.xlu0 %8708 }
0x4018   : > { %v8480_v48 = vadd.f32 %v8479_v12, %v8362_v32 }
0x401c   : > { %v11762_v27 = vpop.f32.mrb[144].mxu1 }
0x401d   : > { %v8501_v14 = vadd.f32 %v11762_v27, %v8387_v13  ;;  %v8492_v18 = vpop.f32.mrb[145].mxu1 }
0x401e   : > { %v8493_v35 = vadd.f32 %v8492_v18, %v8377_v7  ;;  %v11763_v42 = vpop.f32.mrb[146].mxu1 }
0x401f   : > { %v10754_v33 = vmul.f32 -1.442695, %v8501_v14  ;;  %v8504_v25 = vadd.f32 %v11763_v42, %v8392_v26  ;;  %v8495_v16 = vpop.f32.mrb[147].mxu1 }
0x4020   : > { %v10752_v31 = vmul.f32 -1.442695, %v8493_v35  ;;  %v8496_v36 = vadd.f32 %v8495_v16, %v8382_v9  ;;  %v8638_v9 = vld [vmem:[#allocation3 + $0x10] sm:$0xff]  ;;  %v8639_v35 = vld [vmem:[#allocation3 + $0x18] sm:$0xff] }
0x4021   : > { %12890 = vpow2.f32 %v10754_v33  ;;  %v10755_v50 = vmul.f32 -1.442695, %v8504_v25  ;;  %v8637_v25 = vld [vmem:[#allocation3 + $0x8] sm:$0xff] }
0x4022   : > { %12892 = vpow2.f32 %v10752_v31  ;;  %v10753_v51 = vmul.f32 -1.442695, %v8496_v36 }
0x4023   : > { %12894 = vpow2.f32 %v10755_v50  ;;  %v12355_v50 = vld [vmem:[%s15651_s2 + $0x2e8] sm:$0xff]  }
0x4024   : > { %12896 = vpow2.f32 %v10753_v51  ;;  %v12356_v51 = vld [vmem:[%s15651_s2 + $0x2f0] sm:$0xff]  }
0x4025   : > { %12898 = vtanh.f32 %v8485_v44  ;;  %v12358_v44 = vld [vmem:[%s15653_s4 + $0x170] sm:$0xff]  }
0x4026   : > { %12900 = vtanh.f32 %v8477_v39  ;;  %11792 = vmatprep.mubr.msk.bf16.mxu1 %vm813_vm2, %v12358_v44 }
0x4027   : > { %12902 = vtanh.f32 %v8488_v45  ;;  %v8714_v45 = vpop.permute.xlu1 %8713 }
0x4028   : > { %12904 = vtanh.f32 %v8480_v48 }
0x402b   : > { %v12891_v22 = vpop.eup %12890 }
0x402c   : > { %v12893_v40 = vpop.eup %12892  ;;  %v8525_v43 = vadd.f32 1.0, %v12891_v22 }
0x402d   : > { %v12895_v29 = vpop.eup %12894  ;;  %v8523_v19 = vadd.f32 1.0, %v12893_v40 }
0x402e   : > { %v12897_v24 = vpop.eup %12896  ;;  %12906 = vrcp.f32 %v8525_v43  ;;  %v8526_v15 = vadd.f32 1.0, %v12895_v29  ;;  %v8719_v43 = vpop.permute.xlu0 %8718 }
0x402f   : > { %12908 = vrcp.f32 %v8523_v19  ;;  %v8524_v23 = vadd.f32 1.0, %v12897_v24  ;;  %v12899_v47 = vpop.eup %12898  ;;  %v8724_v29 = vpop.permute.xlu1 %8723 }
0x4030   : > { %12910 = vrcp.f32 %v8526_v15  ;;  %v12901_v49 = vpop.eup %12900 }
0x4031   : > { %12912 = vrcp.f32 %v8524_v23  ;;  %v12903_v52 = vpop.eup %12902 }
0x4032   : > { %v12905_v54 = vpop.eup %12904 }
0x4038   : > { %v12907_v55 = vpop.eup %12906 }
0x4039   : > { %v12909_v56 = vpop.eup %12908  ;;  %v8537_v34 = vmul.f32 %v12907_v55, %v12899_v47 }
0x403a   : > { %v12911_v57 = vpop.eup %12910  ;;  %v8535_v58 = vmul.f32 %v12909_v56, %v12901_v49  ;;  %v8689_v49 = vpop.permute.xlu0 %8688 }
0x403b   : > { %v12913_v59 = vpop.eup %12912  ;;  %v8538_v60 = vmul.f32 %v12911_v57, %v12903_v52  ;;  %v8694_v57 = vpop.permute.xlu1 %8693 }
0x403c   : > { %v8536_v61 = vmul.f32 %v12913_v59, %v12905_v54 }
0x403d   : > { %v8545_v62 = vpack.c.bf16 %v8538_v60, %v8537_v34 }
0x403e   : > { %v8544_v63 = vpack.c.bf16 %v8536_v61, %v8535_v58  ;;  %v8699_v60 = vpop.permute.xlu0 %8698 }
0x4040   : > { %11764 = vmatprep.subr.bf16.mxu0 %v8544_v63 }
0x4041   : > { %11765 = vmatpush3.bf16.msra.mxu0 %v8544_v63 }
0x4042   : > { %11766 = vmatprep.subr.bf16.mxu0 %v8545_v62 }
0x4045   : > { %11767 = vmatpush3.bf16.msra.mxu0 %v8545_v62  ;;  %v8704_v62 = vpop.permute.xlu1 %8703 }
0x4046   : > { %11772 = vmatprep.subr.bf16.mxu0 %v15285_v37 }
0x4048   : > { %11769 = vmatmul.mubr.msk.bf16.vlgmr.msra.gmra.mrb[124].mxu0 %vm813_vm2, %v12353_v0 }
0x4049   : > { %11773 = vmatpush3.bf16.msra.mxu0 %v15285_v37  ;;  %11780 = vmatprep.mubr.msk.bf16.mxu0 %vm524_vm0, %v12354_v1 }
0x404a   : > { %11774 = vmatprep.subr.bf16.mxu0 %v15285_v37 }
0x404d   : > { %11775 = vmatpush3.bf16.msra.mxu0 %v15285_v37  ;;  %v8636_v37 = vld [vmem:[#allocation3] sm:$0xff] }
0x411b   : > { %v11770_v5 = vpop.f32.mrb[124].mxu0 }
0x411c   : > { %v8630_v6 = vadd.f32 %v11770_v5, %v8564_v4  ;;  %v8621_v7 = vpop.f32.mrb[125].mxu0 }
0x411d   : > { %v8622_v10 = vadd.f32 %v8621_v7, %v8554_v2  ;;  %v11771_v11 = vpop.f32.mrb[126].mxu0 }
0x411e   : > { %v8642_v12 = vadd.f32 %v8638_v9, %v8630_v6  ;;  %v8650_v13 = vadd.f32 %v8630_v6, %v15267_v30  ;;  %v8633_v26 = vadd.f32 %v11771_v11, %v8569_v8  ;;  %v8624_v27 = vpop.f32.mrb[127].mxu0 }
0x411f   : > { %v8640_v14 = vadd.f32 %v8636_v37, %v8622_v10  ;;  %v8648_v18 = vadd.f32 %v8622_v10, %v15273_v21  ;;  %v8625_v42 = vadd.f32 %v8624_v27, %v8559_v3 }
0x4120   : > { %8646 = vst.msk [vmem:[#allocation3 + $0x10] sm:$0xff] %vm524_vm0, %v8642_v12  ;;  %8654 = vst.msk [vmem:[#allocation2 + $0x28] sm:$0xff] %vm524_vm0, %v8650_v13  ;;  %v8643_v20 = vadd.f32 %v8639_v35, %v8633_v26  ;;  %v8651_v33 = vadd.f32 %v8633_v26, %v15269_v28 }
0x4121   : > { %8644 = vst.msk [vmem:[#allocation3] sm:$0xff] %vm524_vm0, %v8640_v14  ;;  %8652 = vst.msk [vmem:[#allocation2 + $0x8] sm:$0xff] %vm524_vm0, %v8648_v18  ;;  %v8641_v30 = vadd.f32 %v8637_v25, %v8625_v42  ;;  %v8649_v16 = vadd.f32 %v8625_v42, %v15275_v17 }
0x4122   : > { %8647 = vst.msk [vmem:[#allocation3 + $0x18] sm:$0xff] %vm524_vm0, %v8643_v20  ;;  %8655 = vst.msk [vmem:[#allocation2 + $0x38] sm:$0xff] %vm524_vm0, %v8651_v33 }
0x4123   : > { %8645 = vst.msk [vmem:[#allocation3 + $0x8] sm:$0xff] %vm524_vm0, %v8641_v30  ;;  %8653 = vst.msk [vmem:[#allocation2 + $0x18] sm:$0xff] %vm524_vm0, %v8649_v16  ;;  %v12359_v30 = vld [vmem:[%s15653_s4 + $0x178] sm:$0xff]   ;;  %v12360_v16 = vld [vmem:[%s15655_s6] sm:$0xff]  }
0x4127   : > { %v15429_v32 = vld [vmem:[#allocation2 + $0x28] sm:$0xff] }
0x4128   : > { %v15421_v21 = vld [vmem:[#allocation2 + $0x8] sm:$0xff] }
0x4129   : > { %v15425_v28 = vld [vmem:[#allocation2 + $0x38] sm:$0xff] }
0x412a   : > { %v15423_v31 = vld [vmem:[#allocation2 + $0x18] sm:$0xff]  ;;  %v8667_v17 = vpack.c.bf16 %v15425_v28, %v15429_v32 }
0x412b   : > { %v8666_v36 = vpack.c.bf16 %v15423_v31, %v15421_v21 }
0x412d   : > { %11776 = vmatprep.subr.bf16.mxu0 %v8666_v36 }
0x412e   : > { %11777 = vmatpush3.bf16.msra.mxu0 %v8666_v36  ;;  %v8870_v36 = vpop.permute.xlu0 %8869 }
0x412f   : > { %11778 = vmatprep.subr.bf16.mxu0 %v8667_v17 }
0x4132   : > { %11779 = vmatpush3.bf16.msra.mxu0 %v8667_v17  ;;  %v8875_v17 = vpop.permute.xlu1 %8874 }
0x4135   : > { %11781 = vmatmul.mubr.msk.bf16.vlgmr.msra.gmra.mrb[128].mxu0 %vm524_vm0, %v12355_v50  ;;  %v8880_v50 = vpop.permute.xlu0 %8879 }
0x4136   : > { %11784 = vmatprep.mubr.msk.bf16.mxu0 %vm524_vm0, %v12356_v51 }
0x413d   : > { %11785 = vmatmul.mubr.msk.bf16.gmra.mrb[132].mxu0 %vm524_vm0, %v12357_v38 }
0x4208   : > { %v11782_v39 = vpop.f32.mrb[128].mxu0 }
0x4209   : > { %v8792_v48 = vpop.f32.mrb[129].mxu0  ;;  %v8801_v61 = vadd.f32 %v11782_v39, %v8699_v60  ;;  %v8954_v39 = vld [vmem:[#allocation3 + $0x10] sm:$0xff] }
0x420a   : > { %v11783_v22 = vpop.f32.mrb[130].mxu0  ;;  %v8793_v63 = vadd.f32 %v8792_v48, %v8689_v49 }
0x420b   : > { %v8795_v40 = vpop.f32.mrb[131].mxu0  ;;  %v8804_v0 = vadd.f32 %v11783_v22, %v8704_v62 }
0x420c   : > { %v8796_v1 = vadd.f32 %v8795_v40, %v8694_v57 }
0x4210   : > { %v11786_v19 = vpop.f32.mrb[132].mxu0 }
0x4211   : > { %v8817_v24 = vadd.f32 %v11786_v19, %v8719_v43  ;;  %v8808_v15 = vpop.f32.mrb[133].mxu0  ;;  %v8952_v43 = vld [vmem:[#allocation3] sm:$0xff] }
0x4212   : > { %v8809_v23 = vadd.f32 %v8808_v15, %v8709_v46  ;;  %v11787_v47 = vpop.f32.mrb[134].mxu0  ;;  %v8885_v46 = vpop.permute.xlu1 %8884 }
0x4213   : > { %v10794_v52 = vmul.f32 -1.442695, %v8817_v24  ;;  %v8820_v54 = vadd.f32 %v11787_v47, %v8724_v29  ;;  %v8811_v55 = vpop.f32.mrb[135].mxu0 }
0x4214   : > { %v10792_v56 = vmul.f32 -1.442695, %v8809_v23  ;;  %v8812_v34 = vadd.f32 %v8811_v55, %v8714_v45  ;;  %v8955_v23 = vld [vmem:[#allocation3 + $0x18] sm:$0xff] }
0x4215   : > { %12914 = vpow2.f32 %v10794_v52  ;;  %v10795_v58 = vmul.f32 -1.442695, %v8820_v54  ;;  %v8953_v54 = vld [vmem:[#allocation3 + $0x8] sm:$0xff] }
0x4216   : > { %12916 = vpow2.f32 %v10792_v56  ;;  %v10793_v59 = vmul.f32 -1.442695, %v8812_v34 }
0x4217   : > { %12918 = vpow2.f32 %v10795_v58 }
0x4218   : > { %12920 = vpow2.f32 %v10793_v59 }
0x4219   : > { %12922 = vtanh.f32 %v8801_v61 }
0x421a   : > { %12924 = vtanh.f32 %v8793_v63  ;;  %v8993_v63 = vpop.permute.xlu0 %8992 }
0x421b   : > { %12926 = vtanh.f32 %v8804_v0  ;;  %v8998_v0 = vpop.permute.xlu1 %8997 }
0x421c   : > { %12928 = vtanh.f32 %v8796_v1 }
0x421f   : > { %v12915_v2 = vpop.eup %12914 }
0x4220   : > { %v12917_v3 = vpop.eup %12916  ;;  %v8841_v4 = vadd.f32 1.0, %v12915_v2  ;;  %v9003_v2 = vpop.permute.xlu0 %9002 }
0x4221   : > { %v12919_v5 = vpop.eup %12918  ;;  %v8839_v6 = vadd.f32 1.0, %v12917_v3 }
0x4222   : > { %v12921_v7 = vpop.eup %12920  ;;  %12930 = vrcp.f32 %v8841_v4  ;;  %v8842_v8 = vadd.f32 1.0, %v12919_v5 }
0x4223   : > { %12932 = vrcp.f32 %v8839_v6  ;;  %v8840_v9 = vadd.f32 1.0, %v12921_v7  ;;  %v12923_v10 = vpop.eup %12922 }
0x4224   : > { %12934 = vrcp.f32 %v8842_v8  ;;  %v12925_v11 = vpop.eup %12924 }
0x4225   : > { %12936 = vrcp.f32 %v8840_v9  ;;  %v12927_v12 = vpop.eup %12926 }
0x4226   : > { %v12929_v13 = vpop.eup %12928 }
0x422c   : > { %v12931_v37 = vpop.eup %12930 }
0x422d   : > { %v12933_v26 = vpop.eup %12932  ;;  %v8853_v27 = vmul.f32 %v12931_v37, %v12923_v10  ;;  %v9008_v10 = vpop.permute.xlu1 %9007 }
0x422e   : > { %v12935_v14 = vpop.eup %12934  ;;  %v8851_v18 = vmul.f32 %v12933_v26, %v12925_v11 }
0x422f   : > { %v12937_v35 = vpop.eup %12936  ;;  %v8854_v42 = vmul.f32 %v12935_v14, %v12927_v12 }
0x4230   : > { %v8852_v20 = vmul.f32 %v12937_v35, %v12929_v13 }
0x4231   : > { %v8861_v33 = vpack.c.bf16 %v8854_v42, %v8853_v27 }
0x4232   : > { %v8860_v25 = vpack.c.bf16 %v8852_v20, %v8851_v18 }
0x4234   : > { %11788 = vmatprep.subr.bf16.mxu1 %v8860_v25 }
0x4235   : > { %11789 = vmatpush3.bf16.msra.mxu1 %v8860_v25 }
0x4236   : > { %11790 = vmatprep.subr.bf16.mxu1 %v8861_v33 }
0x4239   : > { %11791 = vmatpush3.bf16.msra.mxu1 %v8861_v33 }
0x423c   : > { %11793 = vmatmul.mubr.msk.bf16.vlgmr.msra.gmra.mrb[148].mxu1 %vm813_vm2, %v12359_v30 }
0x423d   : > { %11800 = vmatprep.mubr.msk.bf16.mxu1 %vm813_vm2, %v12360_v16 }
0x430f   : > { %v11794_v51 = vpop.f32.mrb[148].mxu1 }
0x4310   : > { %v8946_v38 = vadd.f32 %v11794_v51, %v8880_v50  ;;  %v8937_v44 = vpop.f32.mrb[149].mxu1  ;;  %v9100_v51 = vld [vmem:[%s15657_s8] sm:$0xff] }
0x4311   : > { %v8938_v45 = vadd.f32 %v8937_v44, %v8870_v36  ;;  %v11795_v48 = vpop.f32.mrb[150].mxu1  ;;  %11812 = vmatprep.mubr.msk.f32.mxu0 %vm813_vm2, %v9100_v51 }
0x4312   : > { %v8958_v22 = vadd.f32 %v8954_v39, %v8946_v38  ;;  %v8966_v40 = vadd.f32 %v8946_v38, %v15429_v32  ;;  %v8949_v29 = vadd.f32 %v11795_v48, %v8885_v46  ;;  %v8940_v19 = vpop.f32.mrb[151].mxu1 }
0x4313   : > { %v8956_v24 = vadd.f32 %v8952_v43, %v8938_v45  ;;  %v8964_v15 = vadd.f32 %v8938_v45, %v15421_v21  ;;  %v8941_v47 = vadd.f32 %v8940_v19, %v8875_v17  ;;  %v9101_v19 = vld [vmem:[%s15657_s8 + $0x8] sm:$0xff] }
0x4314   : > { %8962 = vst.msk [vmem:[#allocation3 + $0x10] sm:$0xff] %vm524_vm0, %v8958_v22  ;;  %8970 = vst.msk [vmem:[#allocation2 + $0x28] sm:$0xff] %vm524_vm0, %v8966_v40  ;;  %v8959_v49 = vadd.f32 %v8955_v23, %v8949_v29  ;;  %v8967_v52 = vadd.f32 %v8949_v29, %v15425_v28 }
0x4315   : > { %8960 = vst.msk [vmem:[#allocation3] sm:$0xff] %vm524_vm0, %v8956_v24  ;;  %8968 = vst.msk [vmem:[#allocation2 + $0x8] sm:$0xff] %vm524_vm0, %v8964_v15  ;;  %v8957_v32 = vadd.f32 %v8953_v54, %v8941_v47  ;;  %v8965_v55 = vadd.f32 %v8941_v47, %v15423_v31  ;;  %v12361_v31 = vld [vmem:[%s15655_s6 + $0x8] sm:$0xff]   ;;  %v9102_v15 = vld [vmem:[%s15657_s8 + $0x10] sm:$0xff] }
0x4316   : > { %8963 = vst.msk [vmem:[#allocation3 + $0x18] sm:$0xff] %vm524_vm0, %v8959_v49  ;;  %8971 = vst.msk [vmem:[#allocation2 + $0x38] sm:$0xff] %vm524_vm0, %v8967_v52  ;;  %v9103_v49 = vld [vmem:[%s15657_s8 + $0x18] sm:$0xff]  ;;  %v9104_v54 = vld [vmem:[%s15657_s8 + $0x20] sm:$0xff] }
0x4317   : > { %8961 = vst.msk [vmem:[#allocation3 + $0x8] sm:$0xff] %vm524_vm0, %v8957_v32  ;;  %8969 = vst.msk [vmem:[#allocation2 + $0x18] sm:$0xff] %vm524_vm0, %v8965_v55 }
0x431b   : > { %v8974_v28 = vld [vmem:[#allocation3 + $0x10] sm:$0xff] }
0x431c   : > { %v8972_v21 = vld [vmem:[#allocation3] sm:$0xff]  ;;  %v8978_v61 = vmax.f32 %v8974_v28, 0.0  ;;  %v9107_v28 = vld [vmem:[%s15657_s8 + $0x38] sm:$0xff] }
0x431d   : > { %v8975_v56 = vld [vmem:[#allocation3 + $0x18] sm:$0xff]  ;;  %v8976_v57 = vmax.f32 %v8972_v21, 0.0  ;;  %v9105_v21 = vld [vmem:[%s15657_s8 + $0x28] sm:$0xff] }
0x431e   : > { %v8973_v34 = vld [vmem:[#allocation3 + $0x8] sm:$0xff]  ;;  %v8979_v59 = vmax.f32 %v8975_v56, 0.0 }
0x431f   : > { %v8977_v58 = vmax.f32 %v8973_v34, 0.0  ;;  %v9106_v34 = vld [vmem:[%s15657_s8 + $0x30] sm:$0xff] }
0x4320   : > { %v8985_v62 = vpack.c.bf16 %v8979_v59, %v8978_v61  ;;  %v10822_v61 = vld [vmem:[%s15657_s8 + $0x50] sm:$0xff] }
0x4321   : > { %v8984_v60 = vpack.c.bf16 %v8977_v58, %v8976_v57  ;;  %v10820_v57 = vld [vmem:[%s15657_s8 + $0x40] sm:$0xff] }
0x4323   : > { %11796 = vmatprep.subr.bf16.mxu1 %v8984_v60 }
0x4324   : > { %11797 = vmatpush3.bf16.msra.mxu1 %v8984_v60  ;;  %v10821_v60 = vld [vmem:[%s15657_s8 + $0x48] sm:$0xff] }
0x4325   : > { %11798 = vmatprep.subr.bf16.mxu1 %v8985_v62 }
0x4328   : > { %11799 = vmatpush3.bf16.msra.mxu1 %v8985_v62 }
0x4329   : > { %11935 = vmatprep.subr.bf16.mxu1 %v12954_v53 }
0x432b   : > { %11801 = vmatmul.mubr.msk.bf16.vlgmr.msra.gmra.mrb[152].mxu1 %vm813_vm2, %v12361_v31 }
0x432c   : > { %11900 = vmatprep.mubr.msk.f32.mxu1 %vm12967_vm10, %v15281_v41  ;;  %v9081_v41 = vld [vmem:[%s15658_s9 + $0x10] sm:$0xff] }
0x43fe   : > { %v11802_v1 = vpop.f32.mrb[152].mxu1 }
0x43ff   : > { %v9060_v3 = vpop.f32.mrb[153].mxu1  ;;  %v9069_v4 = vadd.f32 %v11802_v1, %v9003_v2 }
0x4400   : > { %v9061_v5 = vadd.f32 %v9060_v3, %v8993_v63  ;;  %v11803_v6 = vpop.f32.mrb[154].mxu1  ;;  %v10823_v63 = vld [vmem:[%s15657_s8 + $0x58] sm:$0xff]  ;;  %v10825_v3 = vld [vmem:[%s15657_s8 + $0x68] sm:$0xff] }
0x4401   : > { %v9063_v7 = vpop.f32.mrb[155].mxu1  ;;  %v9077_v11 = vmax.f32 %v9069_v4, 0.0  ;;  %v9072_v12 = vadd.f32 %v11803_v6, %v9008_v10  ;;  %v10826_v4 = vld [vmem:[%s15657_s8 + $0x70] sm:$0xff]  ;;  %v10836_v6 = vld [vmem:[%s15657_s8 + $0x80] sm:$0xff] }
0x4402   : > { %v9075_v8 = vmax.f32 %v9061_v5, 0.0  ;;  %v9064_v9 = vadd.f32 %v9063_v7, %v8998_v0  ;;  %v10824_v0 = vld [vmem:[%s15657_s8 + $0x60] sm:$0xff]  ;;  %v10827_v5 = vld [vmem:[%s15657_s8 + $0x78] sm:$0xff] }
0x4403   : > { %v9078_v27 = vmax.f32 %v9072_v12, 0.0  ;;  %v9094_v14 = vsel %vm2092_vm6, %v9077_v11, -inf  ;;  %v9252_v42 = vsel %vm9245_vm7, %v9077_v11, -inf  ;;  %v9411_v30 = vsel %vm9404_vm8, %v9077_v11, -inf  ;;  %v10839_v12 = vld [vmem:[%s15657_s8 + $0x98] sm:$0xff] }
0x4404   : > { %v9076_v13 = vmax.f32 %v9064_v9, 0.0  ;;  %v9088_v37 = vsel %vm2092_vm6, %v9075_v8, -inf  ;;  %v9246_v18 = vsel %vm9245_vm7, %v9075_v8, -inf  ;;  %v9405_v33 = vsel %vm9404_vm8, %v9075_v8, -inf  ;;  %v10838_v9 = vld [vmem:[%s15657_s8 + $0x90] sm:$0xff] }
0x4405   : > { %9089 = vmax.xlane.f32.xlu0 %v9088_v37  ;;  %v9097_v35 = vsel %vm2092_vm6, %v9078_v27, -inf  ;;  %v9255_v25 = vsel %vm9245_vm7, %v9078_v27, -inf  ;;  %v9564_v36 = vsel %vm9563_vm9, %v9075_v8, -inf  ;;  %v9414_v17 = vsel %vm9404_vm8, %v9078_v27, -inf  ;;  %v10837_v8 = vld [vmem:[%s15657_s8 + $0x88] sm:$0xff] }
0x4406   : > { %v9091_v26 = vsel %vm2092_vm6, %v9076_v13, -inf  ;;  %v9249_v20 = vsel %vm9245_vm7, %v9076_v13, -inf  ;;  %v9408_v16 = vsel %vm9404_vm8, %v9076_v13, -inf  ;;  %v9570_v50 = vsel %vm9563_vm9, %v9077_v11, -inf  ;;  %v10841_v37 = vld [vmem:[%s15657_s8 + $0xa8] sm:$0xff] }
0x4407   : > { %9092 = vmax.xlane.f32.xlu1 %v9091_v26  ;;  %v9567_v38 = vsel %vm9563_vm9, %v9076_v13, -inf  ;;  %v9573_v44 = vsel %vm9563_vm9, %v9078_v27, -inf  ;;  %v10840_v13 = vld [vmem:[%s15657_s8 + $0xa0] sm:$0xff]  ;;  %v10842_v26 = vld [vmem:[%s15657_s8 + $0xb0] sm:$0xff]  ;;  %v10843_v27 = vld [vmem:[%s15657_s8 + $0xb8] sm:$0xff] }
0x4409   : > { %9095 = vmax.xlane.f32.xlu0 %v9094_v14  ;;  %v10852_v14 = vld [vmem:[%s15657_s8 + $0xc0] sm:$0xff] }
0x440b   : > { %9247 = vmax.xlane.f32.xlu1 %v9246_v18  ;;  %v10853_v18 = vld [vmem:[%s15657_s8 + $0xc8] sm:$0xff] }
0x440d   : > { %9098 = vmax.xlane.f32.xlu0 %v9097_v35  ;;  %v10854_v35 = vld [vmem:[%s15657_s8 + $0xd0] sm:$0xff] }
0x440f   : > { %9253 = vmax.xlane.f32.xlu1 %v9252_v42  ;;  %v10855_v42 = vld [vmem:[%s15657_s8 + $0xd8] sm:$0xff] }
0x4411   : > { %9250 = vmax.xlane.f32.xlu0 %v9249_v20  ;;  %v10856_v20 = vld [vmem:[%s15657_s8 + $0xe0] sm:$0xff] }
0x4413   : > { %9406 = vmax.xlane.f32.xlu1 %v9405_v33  ;;  %v10857_v33 = vld [vmem:[%s15657_s8 + $0xe8] sm:$0xff] }
0x4415   : > { %9256 = vmax.xlane.f32.xlu0 %v9255_v25  ;;  %v10858_v25 = vld [vmem:[%s15657_s8 + $0xf0] sm:$0xff] }
0x4417   : > { %9412 = vmax.xlane.f32.xlu1 %v9411_v30  ;;  %v10859_v30 = vld [vmem:[%s15657_s8 + $0xf8] sm:$0xff] }
0x4419   : > { %9409 = vmax.xlane.f32.xlu0 %v9408_v16  ;;  %v9080_v16 = vld [vmem:[%s15658_s9 + $0x8] sm:$0xff] }
0x441b   : > { %9565 = vmax.xlane.f32.xlu1 %v9564_v36  ;;  %v9079_v36 = vld [vmem:[%s15658_s9] sm:$0xff] }
0x441d   : > { %9415 = vmax.xlane.f32.xlu0 %v9414_v17 }
0x441f   : > { %9571 = vmax.xlane.f32.xlu1 %v9570_v50 }
0x4421   : > { %9568 = vmax.xlane.f32.xlu0 %v9567_v38 }
0x4425   : > { %9574 = vmax.xlane.f32.xlu0 %v9573_v44  ;;  %v9082_v44 = vld [vmem:[%s15658_s9 + $0x18] sm:$0xff] }
0x4492   : > { %v9090_v46 = vpop.xlane.xlu0 %9089 }
0x4494   : > { %v9093_v39 = vpop.xlane.xlu1 %9092 }
0x4495   : > { %v11903_v45 = vpack.c.bf16 %v9093_v39, %v9090_v46 }
0x4496   : > { %v9096_v48 = vpop.xlane.xlu0 %9095 }
0x4497   : > { %11904 = vmatprep.subr.bf16.mxu0 %v11903_v45 }
0x4498   : > { %11906 = vmatpush3.bf16.msra.mxu0 %v11903_v45  ;;  %v9248_v22 = vpop.xlane.xlu1 %9247 }
0x449a   : > { %v9099_v40 = vpop.xlane.xlu0 %9098 }
0x449b   : > { %v11907_v43 = vpack.c.bf16 %v9099_v40, %v9096_v48 }
0x449c   : > { %v9254_v23 = vpop.xlane.xlu1 %9253 }
0x449d   : > { %11908 = vmatprep.subr.bf16.mxu0 %v11907_v43 }
0x449e   : > { %11910 = vmatpush3.bf16.msra.mxu0 %v11907_v43  ;;  %v9251_v29 = vpop.xlane.xlu0 %9250 }
0x449f   : > { %v11911_v24 = vpack.c.bf16 %v9251_v29, %v9248_v22  ;;  %v9084_v29 = vld [vmem:[%s15658_s9 + $0x28] sm:$0xff] }
0x44a0   : > { %v9407_v32 = vpop.xlane.xlu1 %9406 }
0x44a1   : > { %11813 = vmatmul.mubr.msk.f32.vlgmr.msra.gmra.mrb[136].mxu0 %vm813_vm2, %v9101_v19  ;;  %11912 = vmatprep.subr.bf16.mxu0 %v11911_v24 }
0x44a2   : > { %11914 = vmatpush3.bf16.msra.mxu0 %v11911_v24  ;;  %v9257_v47 = vpop.xlane.xlu0 %9256  ;;  %11815 = vmatprep.mubr.msk.f32.mxu0 %vm813_vm2, %v9102_v15  ;;  %v9083_v24 = vld [vmem:[%s15658_s9 + $0x20] sm:$0xff] }
0x44a3   : > { %v11915_v52 = vpack.c.bf16 %v9257_v47, %v9254_v23 }
0x44a4   : > { %v9413_v59 = vpop.xlane.xlu1 %9412 }
0x44a5   : > { %11816 = vmatmul.mubr.msk.f32.gmra.mrb[138].mxu0 %vm813_vm2, %v9103_v49  ;;  %11916 = vmatprep.subr.bf16.mxu0 %v11915_v52 }
0x44a6   : > { %11918 = vmatpush3.bf16.msra.mxu0 %v11915_v52  ;;  %v9410_v55 = vpop.xlane.xlu0 %9409  ;;  %11818 = vmatprep.mubr.msk.f32.mxu0 %vm813_vm2, %v9104_v54 }
0x44a7   : > { %v11919_v56 = vpack.c.bf16 %v9410_v55, %v9407_v32  ;;  %v9086_v32 = vld [vmem:[%s15658_s9 + $0x38] sm:$0xff] }
0x44a8   : > { %v9566_v1 = vpop.xlane.xlu1 %9565 }
0x44a9   : > { %11819 = vmatmul.mubr.msk.f32.gmra.mrb[140].mxu0 %vm813_vm2, %v9105_v21  ;;  %11920 = vmatprep.subr.bf16.mxu0 %v11919_v56  ;;  %v9085_v21 = vld [vmem:[%s15658_s9 + $0x30] sm:$0xff] }
0x44aa   : > { %11821 = vmatprep.mubr.msk.f32.mxu0 %vm813_vm2, %v9106_v34  ;;  %v9416_v58 = vpop.xlane.xlu0 %9415 }
0x44ab   : > { %v11923_v62 = vpack.c.bf16 %v9416_v58, %v9413_v59 }
0x44ac   : > { %v9572_v10 = vpop.xlane.xlu1 %9571 }
0x44ad   : > { %11822 = vmatmul.mubr.msk.f32.gmra.mrb[142].mxu0 %vm813_vm2, %v9107_v28 }
0x44ae   : > { %11832 = vmatprep.mubr.msk.f32.mxu0 %vm813_vm2, %v10820_v57  ;;  %v9569_v31 = vpop.xlane.xlu0 %9568 }
0x44af   : > { %v11927_v2 = vpack.c.bf16 %v9569_v31, %v9566_v1  ;;  %v9730_v31 = vld [vmem:[%s15659_s10] sm:$0xff] }
0x44b1   : > { %11833 = vmatmul.mubr.msk.f32.vlgmr.msra.gmra.mrb[136].mxu0 %vm813_vm2, %v10821_v60 }
0x44b2   : > { %11922 = vmatpush3.bf16.msra.mxu0 %v11919_v56  ;;  %11835 = vmatprep.mubr.msk.f32.mxu0 %vm813_vm2, %v10822_v61  ;;  %v9575_v7 = vpop.xlane.xlu0 %9574 }
0x44b3   : > { %11924 = vmatprep.subr.bf16.mxu0 %v11923_v62  ;;  %v11931_v11 = vpack.c.bf16 %v9575_v7, %v9572_v10 }
0x44b5   : > { %11836 = vmatmul.mubr.msk.f32.gmra.mrb[138].mxu0 %vm813_vm2, %v10823_v63  ;;  %v9731_v63 = vld [vmem:[%s15660_s11] sm:$0xff] }
0x44b6   : > { %11926 = vmatpush3.bf16.msra.mxu0 %v11923_v62  ;;  %11838 = vmatprep.mubr.msk.f32.mxu0 %vm813_vm2, %v10824_v0 }
0x44b7   : > { %11928 = vmatprep.subr.bf16.mxu0 %v11927_v2 }
0x44b9   : > { %11839 = vmatmul.mubr.msk.f32.gmra.mrb[140].mxu0 %vm813_vm2, %v10825_v3 }
0x44ba   : > { %11841 = vmatprep.mubr.msk.f32.mxu0 %vm813_vm2, %v10826_v4 }
0x44bd   : > { %11842 = vmatmul.mubr.msk.f32.gmra.mrb[142].mxu0 %vm813_vm2, %v10827_v5 }
0x44be   : > { %11852 = vmatprep.mubr.msk.f32.mxu0 %vm813_vm2, %v10836_v6 }
0x44c1   : > { %11853 = vmatmul.mubr.msk.f32.vlgmr.msra.gmra.mrb[136].mxu0 %vm813_vm2, %v10837_v8 }
0x44c2   : > { %11930 = vmatpush3.bf16.msra.mxu0 %v11927_v2  ;;  %11855 = vmatprep.mubr.msk.f32.mxu0 %vm813_vm2, %v10838_v9 }
0x44c3   : > { %11932 = vmatprep.subr.bf16.mxu0 %v11931_v11 }
0x44c5   : > { %11856 = vmatmul.mubr.msk.f32.gmra.mrb[138].mxu0 %vm813_vm2, %v10839_v12 }
0x44c6   : > { %11934 = vmatpush3.bf16.msra.mxu0 %v11931_v11  ;;  %11858 = vmatprep.mubr.msk.f32.mxu0 %vm813_vm2, %v10840_v13 }
0x44c9   : > { %11859 = vmatmul.mubr.msk.f32.gmra.mrb[140].mxu0 %vm813_vm2, %v10841_v37 }
0x44ca   : > { %11861 = vmatprep.mubr.msk.f32.mxu0 %vm813_vm2, %v10842_v26 }
0x44cd   : > { %11862 = vmatmul.mubr.msk.f32.gmra.mrb[142].mxu0 %vm813_vm2, %v10843_v27 }
0x44ce   : > { %11872 = vmatprep.mubr.msk.f32.mxu0 %vm813_vm2, %v10852_v14 }
0x44d1   : > { %11873 = vmatmul.mubr.msk.f32.vlgmr.msra.gmra.mrb[136].mxu0 %vm813_vm2, %v10853_v18 }
0x44d2   : > { %11875 = vmatprep.mubr.msk.f32.mxu0 %vm813_vm2, %v10854_v35 }
0x44d5   : > { %11876 = vmatmul.mubr.msk.f32.gmra.mrb[138].mxu0 %vm813_vm2, %v10855_v42 }
0x44d6   : > { %11878 = vmatprep.mubr.msk.f32.mxu0 %vm813_vm2, %v10856_v20 }
0x44d9   : > { %11879 = vmatmul.mubr.msk.f32.gmra.mrb[140].mxu0 %vm813_vm2, %v10857_v33 }
0x44da   : > { %11881 = vmatprep.mubr.msk.f32.mxu0 %vm813_vm2, %v10858_v25 }
0x44dd   : > { %11882 = vmatmul.mubr.msk.f32.gmra.mrb[142].mxu0 %vm813_vm2, %v10859_v30 }
0x45a4   : > { %v11874_v17 = vpop.f32.mrb[136].mxu0 }
0x45a5   : > { %v11947_v50 = vadd.f32 %v11874_v17, %v9080_v16  ;;  %v9675_v51 = vpop.f32.mrb[137].mxu0 }
0x45a6   : > { %v11948_v38 = vadd.f32 %v9675_v51, %v9079_v36 }
0x45a7   : > { %v9723_v46 = vmax.f32 %v11947_v50, 0.0 }
0x45a8   : > { %v9722_v39 = vmax.f32 %v11948_v38, 0.0  ;;  %v11877_v45 = vpop.f32.mrb[138].mxu0 }
0x45a9   : > { %v11949_v48 = vadd.f32 %v11877_v45, %v9082_v44  ;;  %v9685_v22 = vpop.f32.mrb[139].mxu0 }
0x45aa   : > { %v11936_v40 = vpack.c.bf16 %v9723_v46, %v9722_v39  ;;  %v11950_v43 = vadd.f32 %v9685_v22, %v9081_v41 }
0x45ab   : > { %v9725_v19 = vmax.f32 %v11949_v48, 0.0 }
0x45ac   : > { %v9724_v15 = vmax.f32 %v11950_v43, 0.0  ;;  %v11880_v23 = vpop.f32.mrb[140].mxu0  ;;  %11937 = vmatpush3.bf16.msra.mxu1 %v11936_v40 }
0x45ad   : > { %v11951_v47 = vadd.f32 %v11880_v23, %v9084_v29  ;;  %v9695_v49 = vpop.f32.mrb[141].mxu0  ;;  %11938 = vmatprep.subr.bf16.mxu1 %v12954_v53 }
0x45ae   : > { %v11939_v52 = vpack.c.bf16 %v9725_v19, %v9724_v15  ;;  %v11952_v54 = vadd.f32 %v9695_v49, %v9083_v24 }
0x45af   : > { %v9727_v55 = vmax.f32 %v11951_v47, 0.0 }
0x45b0   : > { %v9726_v56 = vmax.f32 %v11952_v54, 0.0  ;;  %v11883_v34 = vpop.f32.mrb[142].mxu0  ;;  %11940 = vmatpush3.bf16.msra.mxu1 %v11939_v52 }
0x45b1   : > { %v11953_v28 = vadd.f32 %v11883_v34, %v9086_v32  ;;  %v9705_v57 = vpop.f32.mrb[143].mxu0  ;;  %11941 = vmatprep.subr.bf16.mxu1 %v12954_v53 }
0x45b2   : > { %v11942_v58 = vpack.c.bf16 %v9727_v55, %v9726_v56  ;;  %v11954_v59 = vadd.f32 %v9705_v57, %v9085_v21 }
0x45b3   : > { %v9729_v60 = vmax.f32 %v11953_v28, 0.0 }
0x45b4   : > { %v9728_v61 = vmax.f32 %v11954_v59, 0.0  ;;  %11943 = vmatpush3.bf16.msra.mxu1 %v11942_v58 }
0x45b5   : > { %11944 = vmatprep.subr.bf16.mxu1 %v12954_v53 }
0x45b6   : > { %v11945_v62 = vpack.c.bf16 %v9729_v60, %v9728_v61 }
0x45b8   : > { %11946 = vmatpush3.bf16.msra.mxu1 %v11945_v62 }
0x45bb   : > { %11901 = vmatmul.mubr.msk.f32.vlgmr.msra.gmra.mrb[156].mxu1 %vm524_vm0, %v9730_v31 }
0x468e   : > { %v9801_v0 = vpop.f32.mrb[156].mxu1 }
0x468f   : > { %v9802_v1 = vadd.f32 %v9801_v0, %v9731_v63  ;;  %v11902_v53 = vpop.f32.mrb[157].mxu1 }
0x4691   : > { %9806 = vst.msk [vmem:[%s405_s20] sm:$0xff] %vm657_vm1, %v9802_v1 }
0x4692 PF: > { %s22_s21 = sadd.s32 1, %s12949_s21  }
0x4693   : > { %p19_p4 = scmp.ge.s32.totalorder %s22_s21, 4  }
0x4695   :  { %21 = sbr.rel (!%p19_p4) target bundleno = 2 (0x2), region = 195 }

</bundles_post_ra>
